<compile_context>
chip_gen: v7x
topology: tpu7x:2x2x1
jax: 0.10.0
libtpu: 0.0.40
codegen_flags: <defaults>
</compile_context>

<pallas_src>
import functools

import jax
import jax.numpy as jnp
from jax import lax
from jax.experimental import pallas as pl
from jax.experimental.pallas import tpu as pltpu


# --------------------------------------------------------------------------
# Fused conv1 + ReLU + pool1 + conv2 + ReLU + pool2 kernel (B images / step)
# --------------------------------------------------------------------------
def _conv_stage_kernel(xt_ref, w1_ref, b1_ref, w2_ref, b2_ref, o_ref,
                       r1_ref, c2_ref, r2_ref, *, B):
    """xt_ref : (B*1024, 16) bf16  conv1 9-tap slab (32x32 frame/img, 7 pad taps)
       w1_ref : (16, 32)     bf16  conv1 taps (rows dy*3+dx, zero rows 9..15)
       b1_ref : (1, 32)      f32
       w2_ref : (288, 64)    bf16  conv2 taps, rows ordered (dy, dx, c_in)
       b2_ref : (1, 64)      f32
       o_ref  : (B*8, 8, 64) f32   pooled conv2 output; per image an (a,b,c)
                                   tile with garbage at a==7 / b==7 (the
                                   matching FC1 weight rows are zero)
       r1_ref : (B*1024, 32) f32   scratch: ReLU(conv1) on the 32x32 frame
       c2_ref : (B*256+64,32)f32   scratch: conv2 input (16x16 frame, 0 border)
       r2_ref : (B*256, 64)  f32   scratch: ReLU(conv2) on the 16x16 frame
    """
    M1 = B * 1024

    # ---- conv1: one MXU matmul over the tap slab, fused bias + ReLU -------
    a1 = jnp.dot(xt_ref[...], w1_ref[...], preferred_element_type=jnp.float32)
    r1_ref[...] = jnp.maximum(a1 + b1_ref[...], 0.0)

    # ---- pool1 (2x2, stride 2) ---------------------------------------------
    # width pairs: stride-2 reads of consecutive flat positions
    half1 = M1 // 2
    wp1 = jnp.maximum(r1_ref[pl.ds(0, half1, 2), :],
                      r1_ref[pl.ds(1, half1, 2), :])            # (B*512, 32)
    # height pairs: consecutive 16-wide pooled rows -> two contiguous slices
    wp1 = wp1.reshape(B * 16, 32, 32)
    hp1 = jnp.maximum(wp1[:, :16, :], wp1[:, 16:, :])           # (B*16, 16, 32)

    # Valid pooled pixels live at rows/cols 1..14 of each 16x16 tile; the
    # border is garbage and doubles as conv2's zero padding once masked.
    p = lax.broadcasted_iota(jnp.int32, (B * 16, 16, 32), 0) % 16
    q = lax.broadcasted_iota(jnp.int32, (B * 16, 16, 32), 1)
    inside = (p >= 1) & (p <= 14) & (q >= 1) & (q <= 14)
    c2_ref[pl.ds(0, B * 256), :] = jnp.where(inside, hp1, 0.0).reshape(B * 256, 32)
    c2_ref[pl.ds(B * 256, 64), :] = jnp.zeros((64, 32), jnp.float32)   # guard

    # ---- conv2: nine shifted-slab dots accumulated in a value --------------
    M2 = B * 256
    acc = None
    for t, off in enumerate((0, 1, 2, 16, 17, 18, 32, 33, 34)):
        patch = c2_ref[pl.ds(off, M2), :].astype(jnp.bfloat16)   # (M2, 32)
        wt = w2_ref[pl.ds(t * 32, 32), :]                        # (32, 64)
        term = jnp.dot(patch, wt, preferred_element_type=jnp.float32)
        acc = term if acc is None else acc + term
    r2_ref[...] = jnp.maximum(acc + b2_ref[...], 0.0)            # (B*256, 64)

    # ---- pool2 (2x2, stride 2) ---------------------------------------------
    half2 = M2 // 2
    wp2 = jnp.maximum(r2_ref[pl.ds(0, half2, 2), :],
                      r2_ref[pl.ds(1, half2, 2), :])             # (B*128, 64)
    wp2 = wp2.reshape(B * 8, 16, 64)
    o_ref[...] = jnp.maximum(wp2[:, :8, :], wp2[:, 8:, :]).astype(o_ref.dtype)


def conv_stage(x_nchw, w1, b1, w2, b2):
    """x: (N,1,28,28) f32 -> pooled/flattened features (N, 4096) f32."""
    N, C, H, W = x_nchw.shape
    assert (C, H, W) == (1, 28, 28)
    B = min(8, N)                       # images per grid step (all KB-scale)
    Npad = ((N + B - 1) // B) * B

    # Build the conv1 9-tap slab with cheap XLA ops (the raw image is tiny).
    # The frame has 3 pad rows/cols on top/left so pool1's output lands at
    # rows/cols 1..14 of conv2's 16x16 zero-padded frame.
    img = x_nchw.reshape(N, 28, 28)
    if Npad != N:
        img = jnp.pad(img, ((0, Npad - N), (0, 0), (0, 0)))
    pimg = jnp.pad(img, ((0, 0), (3, 3), (3, 3)))                # (Npad, 34, 34)
    taps = [pimg[:, dy:dy + 32, dx:dx + 32]
            for dy in range(3) for dx in range(3)]
    xt = jnp.stack(taps, axis=-1)                                # (Npad,32,32,9)
    xt = jnp.pad(xt, ((0, 0), (0, 0), (0, 0), (0, 7)))           # taps -> 16
    xt = xt.reshape(Npad * 1024, 16).astype(jnp.bfloat16)

    w1k = jnp.pad(w1, ((0, 7), (0, 0))).astype(jnp.bfloat16)     # (16, 32)
    w2k = w2.astype(jnp.bfloat16)                                # (288, 64)

    kern = functools.partial(_conv_stage_kernel, B=B)
    out = pl.pallas_call(
        kern,
        out_shape=jax.ShapeDtypeStruct((Npad * 8, 8, 64), jnp.float32),
        grid=(Npad // B,),
        in_specs=[
            pl.BlockSpec((B * 1024, 16), lambda i: (i, 0)),   # tap slab, tiled
            pl.BlockSpec((16, 32), lambda i: (0, 0)),          # conv1 weights
            pl.BlockSpec((1, 32), lambda i: (0, 0)),           # conv1 bias
            pl.BlockSpec((288, 64), lambda i: (0, 0)),         # conv2 weights
            pl.BlockSpec((1, 64), lambda i: (0, 0)),           # conv2 bias
        ],
        out_specs=pl.BlockSpec((B * 8, 8, 64), lambda i: (i, 0, 0)),
        scratch_shapes=[
            pltpu.VMEM((B * 1024, 32), jnp.float32),
            pltpu.VMEM((B * 256 + 64, 32), jnp.float32),
            pltpu.VMEM((B * 256, 64), jnp.float32),
        ],
        compiler_params=pltpu.CompilerParams(dimension_semantics=("parallel",)),
    )(xt, w1k, b1.reshape(1, 32), w2k, b2.reshape(1, 64))
    return out.reshape(Npad, 4096)[:N]


# --------------------------------------------------------------------------
# Fused Linear(4096->128)+ReLU+Linear(128->10 padded to 128) kernel
# --------------------------------------------------------------------------
def _fc_kernel(x_ref, w3_ref, b3_ref, w4_ref, b4_ref, o_ref):
    x = x_ref[...].astype(jnp.bfloat16)
    h = jnp.dot(x, w3_ref[...], preferred_element_type=jnp.float32)
    h = jnp.maximum(h + b3_ref[...], 0.0)
    y = jnp.dot(h.astype(jnp.bfloat16), w4_ref[...],
                preferred_element_type=jnp.float32)
    o_ref[...] = y + b4_ref[...]


def fc_stage(feats, w3p, b3, w4p, b4p):
    """feats: (N, 4096) f32 -> logits (N, 10) f32 (both FC layers fused)."""
    N, K = feats.shape
    No = w4p.shape[1]                                   # 128 (zero-padded)
    # No forced multi-step grid: one step for small batches, row-tiled beyond.
    bm = min(128, ((N + 7) // 8) * 8)
    Mp = ((N + bm - 1) // bm) * bm
    if Mp != N:
        feats = jnp.pad(feats, ((0, Mp - N), (0, 0)))

    out = pl.pallas_call(
        _fc_kernel,
        out_shape=jax.ShapeDtypeStruct((Mp, No), jnp.float32),
        grid=(Mp // bm,),
        in_specs=[
            pl.BlockSpec((bm, K), lambda i: (i, 0)),    # activation rows
            pl.BlockSpec((K, 128), lambda i: (0, 0)),   # w3 resident (bf16)
            pl.BlockSpec((1, 128), lambda i: (0, 0)),
            pl.BlockSpec((128, No), lambda i: (0, 0)),  # w4 resident (bf16)
            pl.BlockSpec((1, No), lambda i: (0, 0)),
        ],
        out_specs=pl.BlockSpec((bm, No), lambda i: (i, 0)),
        compiler_params=pltpu.CompilerParams(dimension_semantics=("parallel",)),
    )(feats, w3p.astype(jnp.bfloat16), b3.reshape(1, 128),
      w4p.astype(jnp.bfloat16), b4p.reshape(1, 128))
    return out[:N, :10]


# --------------------------------------------------------------------------
# Full forward pass
# --------------------------------------------------------------------------
def cnn_forward(x_nchw, params):
    feats = conv_stage(x_nchw, params["w1"], params["b1"],
                       params["w2"], params["b2"])
    return fc_stage(feats, params["w3p"], params["b3"],
                    params["w4p"], params["b4p"])


def init_params(key):
    ks = jax.random.split(key, 8)
    # Conv weights in (KH, KW, Cin, Cout) order flattened to (9*Cin, Cout),
    # matching the in-kernel tap order (dy, dx, c_in).
    w1 = (jax.random.normal(ks[0], (3, 3, 1, 32), jnp.float32) * 0.1).reshape(9, 32)
    b1 = jax.random.normal(ks[1], (32,), jnp.float32) * 0.1
    w2 = (jax.random.normal(ks[2], (3, 3, 32, 64), jnp.float32) * 0.05).reshape(288, 64)
    b2 = jax.random.normal(ks[3], (64,), jnp.float32) * 0.1
    # FC1 is conceptually defined in PyTorch's NCHW flatten order (c, h, w).
    # Imported PyTorch checkpoints must be permuted/padded exactly the same way.
    w3_chw = jax.random.normal(ks[4], (64 * 7 * 7, 128), jnp.float32) * 0.02
    # (c,h,w) rows -> (h,w,c) rows (used by the pure-jnp NHWC-flatten reference)
    w3_hwc = w3_chw.reshape(64, 7, 7, 128).transpose(1, 2, 0, 3).reshape(3136, 128)
    # kernel layout: per-image (8,8,64) tile flatten -> zero rows at h==7 / w==7
    w3p = jnp.pad(w3_hwc.reshape(7, 7, 64, 128),
                  ((0, 1), (0, 1), (0, 0), (0, 0))).reshape(4096, 128)
    b3 = jax.random.normal(ks[5], (128,), jnp.float32) * 0.1
    w4 = jax.random.normal(ks[6], (128, 10), jnp.float32) * 0.05
    b4 = jax.random.normal(ks[7], (10,), jnp.float32) * 0.1
    w4p = jnp.pad(w4, ((0, 0), (0, 118)))               # lane-dense FC2 output
    b4p = jnp.pad(b4, (0, 118))
    return dict(w1=w1, b1=b1, w2=w2, b2=b2, w3_hwc=w3_hwc, w3p=w3p, b3=b3,
                w4=w4, b4=b4, w4p=w4p, b4p=b4p)


def _reference_forward(x_nchw, params):
    """Pure-jnp reference (same parameter values) used only to verify kernels."""
    x = jnp.transpose(x_nchw, (0, 2, 3, 1)).astype(jnp.float32)

    def stage(h, w_flat, b, c_in, c_out):
        wk = w_flat.reshape(3, 3, c_in, c_out)
        y = lax.conv_general_dilated(
            h, wk, window_strides=(1, 1), padding="SAME",
            dimension_numbers=("NHWC", "HWIO", "NHWC"),
            precision=lax.Precision.HIGHEST)
        y = jnp.maximum(y + b, 0.0)
        n, hh, ww, c = y.shape
        return y.reshape(n, hh // 2, 2, ww // 2, 2, c).max(axis=(2, 4))

    h = stage(x, params["w1"], params["b1"], 1, 32)
    h = stage(h, params["w2"], params["b2"], 32, 64)
    h = h.reshape(x.shape[0], -1)                      # NHWC flatten (h, w, c)
    h = jnp.maximum(jnp.dot(h, params["w3_hwc"],
                            precision=lax.Precision.HIGHEST) + params["b3"], 0.0)
    return jnp.dot(h, params["w4"],
                   precision=lax.Precision.HIGHEST) + params["b4"]


if __name__ == "__main__":
    key = jax.random.PRNGKey(0)
    k_x, k_p = jax.random.split(key)
    # Spatial size must be 28x28 so Flatten yields 64*7*7 features.
    x = jax.random.normal(k_x, (2, 1, 28, 28), jnp.float32)   # NCHW, like PyTorch
    params = init_params(k_p)

    fwd = jax.jit(cnn_forward)
    out = fwd(x, params)
    jax.block_until_ready(out)
    assert out.shape == (2, 10) and out.dtype == jnp.float32

    ref = _reference_forward(x, params)
    err = float(jnp.max(jnp.abs(out - ref)))
    # bf16 matmul operands (f32 accumulation) against an all-f32 reference.
    assert err < 3e-2, f"max abs err = {err}"
    print("KERNEL_OK")
</pallas_src>

<mosaic_0001>
module attributes {stable_mosaic.version = 11 : i64} {
  func.func @_conv_stage_kernel(%arg0: i32, %arg1: memref<2048x16xbf16, #tpu.memory_space<vmem>>, %arg2: memref<16x32xbf16, #tpu.memory_space<vmem>>, %arg3: memref<1x32xf32, #tpu.memory_space<vmem>>, %arg4: memref<288x64xbf16, #tpu.memory_space<vmem>>, %arg5: memref<1x64xf32, #tpu.memory_space<vmem>>, %arg6: memref<16x8x64xf32, #tpu.memory_space<vmem>>, %arg7: memref<2048x32xf32, #tpu.memory_space<vmem>>, %arg8: memref<576x32xf32, #tpu.memory_space<vmem>>, %arg9: memref<512x64xf32, #tpu.memory_space<vmem>>) attributes {dimension_semantics = [#tpu.dimension_semantics<parallel>], iteration_bounds = array<i64: 1>, scalar_prefetch = 0 : i64, scratch_operands = 3 : i64, tpu.core_type = #tpu.core_type<tc>, window_params = [{transform_indices = @transform_0, window_bounds = array<i64: 2048, 16>}, {pipeline_mode = #tpu.pipeline_mode<synchronous>, transform_indices = @transform_1, window_bounds = array<i64: 16, 32>}, {pipeline_mode = #tpu.pipeline_mode<synchronous>, transform_indices = @transform_2, window_bounds = array<i64: 1, 32>}, {pipeline_mode = #tpu.pipeline_mode<synchronous>, transform_indices = @transform_3, window_bounds = array<i64: 288, 64>}, {pipeline_mode = #tpu.pipeline_mode<synchronous>, transform_indices = @transform_4, window_bounds = array<i64: 1, 64>}, {transform_indices = @transform_5, window_bounds = array<i64: 16, 8, 64>}]} {
    %c0 = arith.constant 0 : index
    %c0_0 = arith.constant 0 : index
    %0 = vector.load %arg1[%c0, %c0_0] : memref<2048x16xbf16, #tpu.memory_space<vmem>>, vector<2048x16xbf16>
    %c0_1 = arith.constant 0 : index
    %c0_2 = arith.constant 0 : index
    %1 = vector.load %arg2[%c0_1, %c0_2] : memref<16x32xbf16, #tpu.memory_space<vmem>>, vector<16x32xbf16>
    %cst = arith.constant dense<0.000000e+00> : vector<2048x32xf32>
    %2 = tpu.matmul %0, %1, %cst {dimension_numbers = #tpu.dot_dimension_numbers<[1], [0], [0], [1], [0, 0, 1, 1], [], []>} : vector<2048x16xbf16>, vector<16x32xbf16>, vector<2048x32xf32> -> vector<2048x32xf32>
    %c0_3 = arith.constant 0 : index
    %c0_4 = arith.constant 0 : index
    %3 = vector.load %arg3[%c0_3, %c0_4] : memref<1x32xf32, #tpu.memory_space<vmem>>, vector<1x32xf32>
    %4 = vector.broadcast %3 : vector<1x32xf32> to vector<2048x32xf32>
    %5 = arith.addf %2, %4 : vector<2048x32xf32>
    %cst_5 = arith.constant 0.000000e+00 : f32
    %6 = vector.broadcast %cst_5 : f32 to vector<2048x32xf32>
    %7 = arith.maximumf %5, %6 : vector<2048x32xf32>
    %c0_6 = arith.constant 0 : index
    %c0_7 = arith.constant 0 : index
    %8 = vector.load %arg7[%c0_6, %c0_7] : memref<2048x32xf32, #tpu.memory_space<vmem>>, vector<2048x32xf32>
    tpu.vector_store %arg7[%c0_6, %c0_7], %7 {strides = array<i32>} : memref<2048x32xf32, #tpu.memory_space<vmem>>, vector<2048x32xf32>,
    %c0_8 = arith.constant 0 : index
    %c0_9 = arith.constant 0 : index
    %9 = tpu.strided_load %arg7[%c0_8, %c0_9] {strides = array<i32: 2, 1>} : memref<2048x32xf32, #tpu.memory_space<vmem>>, vector<1024x32xf32>
    %c1 = arith.constant 1 : index
    %c0_10 = arith.constant 0 : index
    %10 = tpu.strided_load %arg7[%c1, %c0_10] {strides = array<i32: 2, 1>} : memref<2048x32xf32, #tpu.memory_space<vmem>>, vector<1024x32xf32>
    %11 = arith.maximumf %9, %10 : vector<1024x32xf32>
    %12 = vector.shape_cast %11 : vector<1024x32xf32> to vector<32x32x32xf32>
    %13 = vector.extract_strided_slice %12 {offsets = [0, 0, 0], sizes = [32, 16, 32], strides = [1, 1, 1]} : vector<32x32x32xf32> to vector<32x16x32xf32>
    %14 = vector.extract_strided_slice %12 {offsets = [0, 16, 0], sizes = [32, 16, 32], strides = [1, 1, 1]} : vector<32x32x32xf32> to vector<32x16x32xf32>
    %15 = arith.maximumf %13, %14 : vector<32x16x32xf32>
    %16 = tpu.iota {dimensions = array<i32: 0>} : vector<32x16x32xi32>
    %c16_i32 = arith.constant 16 : i32
    %c0_i32 = arith.constant 0 : i32
    %17 = arith.cmpi eq, %c16_i32, %c0_i32 : i32
    %c1_i32 = arith.constant 1 : i32
    %18 = arith.select %17, %c1_i32, %c16_i32 : i32
    %19 = vector.broadcast %18 : i32 to vector<32x16x32xi32>
    %20 = arith.remsi %16, %19 : vector<32x16x32xi32>
    %c0_i32_11 = arith.constant 0 : i32
    %21 = vector.broadcast %c0_i32_11 : i32 to vector<32x16x32xi32>
    %22 = arith.cmpi ne, %20, %21 : vector<32x16x32xi32>
    %c0_i32_12 = arith.constant 0 : i32
    %23 = vector.broadcast %c0_i32_12 : i32 to vector<32x16x32xi32>
    %24 = arith.cmpi slt, %20, %23 : vector<32x16x32xi32>
    %c0_i32_13 = arith.constant 0 : i32
    %25 = arith.cmpi slt, %18, %c0_i32_13 : i32
    %26 = vector.broadcast %25 : i1 to vector<32x16x32xi1>
    %27 = vector.broadcast %26 : vector<32x16x32xi1> to vector<32x16x32xi1>
    %28 = arith.xori %24, %27 : vector<32x16x32xi1>
    %29 = arith.andi %28, %22 : vector<32x16x32xi1>
    %30 = vector.broadcast %18 : i32 to vector<32x16x32xi32>
    %31 = arith.addi %20, %30 : vector<32x16x32xi32>
    %32 = arith.select %29, %31, %20 : vector<32x16x32xi1>, vector<32x16x32xi32>
    %33 = tpu.iota {dimensions = array<i32: 1>} : vector<32x16x32xi32>
    %c1_i32_14 = arith.constant 1 : i32
    %34 = vector.broadcast %c1_i32_14 : i32 to vector<32x16x32xi32>
    %35 = arith.cmpi sge, %32, %34 : vector<32x16x32xi32>
    %c14_i32 = arith.constant 14 : i32
    %36 = vector.broadcast %c14_i32 : i32 to vector<32x16x32xi32>
    %37 = arith.cmpi sle, %32, %36 : vector<32x16x32xi32>
    %38 = arith.andi %35, %37 : vector<32x16x32xi1>
    %c1_i32_15 = arith.constant 1 : i32
    %39 = vector.broadcast %c1_i32_15 : i32 to vector<32x16x32xi32>
    %40 = arith.cmpi sge, %33, %39 : vector<32x16x32xi32>
    %41 = arith.andi %38, %40 : vector<32x16x32xi1>
    %c14_i32_16 = arith.constant 14 : i32
    %42 = vector.broadcast %c14_i32_16 : i32 to vector<32x16x32xi32>
    %43 = arith.cmpi sle, %33, %42 : vector<32x16x32xi32>
    %44 = arith.andi %41, %43 : vector<32x16x32xi1>
    %cst_17 = arith.constant 0.000000e+00 : f32
    %45 = vector.broadcast %cst_17 : f32 to vector<32x16x32xf32>
    %46 = arith.select %44, %15, %45 : vector<32x16x32xi1>, vector<32x16x32xf32>
    %47 = vector.shape_cast %46 : vector<32x16x32xf32> to vector<512x32xf32>
    %c0_18 = arith.constant 0 : index
    %c0_19 = arith.constant 0 : index
    %48 = vector.load %arg8[%c0_18, %c0_19] : memref<576x32xf32, #tpu.memory_space<vmem>>, vector<512x32xf32>
    tpu.vector_store %arg8[%c0_18, %c0_19], %47 {strides = array<i32>} : memref<576x32xf32, #tpu.memory_space<vmem>>, vector<512x32xf32>,
    %cst_20 = arith.constant 0.000000e+00 : f32
    %49 = vector.broadcast %cst_20 : f32 to vector<64x32xf32>
    %c512 = arith.constant 512 : index
    %c0_21 = arith.constant 0 : index
    %50 = vector.load %arg8[%c512, %c0_21] : memref<576x32xf32, #tpu.memory_space<vmem>>, vector<64x32xf32>
    tpu.vector_store %arg8[%c512, %c0_21], %49 {strides = array<i32>} : memref<576x32xf32, #tpu.memory_space<vmem>>, vector<64x32xf32>,
    %c0_22 = arith.constant 0 : index
    %c0_23 = arith.constant 0 : index
    %51 = vector.load %arg8[%c0_22, %c0_23] : memref<576x32xf32, #tpu.memory_space<vmem>>, vector<512x32xf32>
    %52 = arith.truncf %51 : vector<512x32xf32> to vector<512x32xbf16>
    %c0_24 = arith.constant 0 : index
    %c0_25 = arith.constant 0 : index
    %53 = vector.load %arg4[%c0_24, %c0_25] : memref<288x64xbf16, #tpu.memory_space<vmem>>, vector<32x64xbf16>
    %cst_26 = arith.constant dense<0.000000e+00> : vector<512x64xf32>
    %54 = tpu.matmul %52, %53, %cst_26 {dimension_numbers = #tpu.dot_dimension_numbers<[1], [0], [0], [1], [0, 0, 1, 1], [], []>} : vector<512x32xbf16>, vector<32x64xbf16>, vector<512x64xf32> -> vector<512x64xf32>
    %c1_27 = arith.constant 1 : index
    %c0_28 = arith.constant 0 : index
    %55 = vector.load %arg8[%c1_27, %c0_28] : memref<576x32xf32, #tpu.memory_space<vmem>>, vector<512x32xf32>
    %56 = arith.truncf %55 : vector<512x32xf32> to vector<512x32xbf16>
    %c32 = arith.constant 32 : index
    %c0_29 = arith.constant 0 : index
    %57 = vector.load %arg4[%c32, %c0_29] : memref<288x64xbf16, #tpu.memory_space<vmem>>, vector<32x64xbf16>
    %cst_30 = arith.constant dense<0.000000e+00> : vector<512x64xf32>
    %58 = tpu.matmul %56, %57, %cst_30 {dimension_numbers = #tpu.dot_dimension_numbers<[1], [0], [0], [1], [0, 0, 1, 1], [], []>} : vector<512x32xbf16>, vector<32x64xbf16>, vector<512x64xf32> -> vector<512x64xf32>
    %59 = arith.addf %54, %58 : vector<512x64xf32>
    %c2 = arith.constant 2 : index
    %c0_31 = arith.constant 0 : index
    %60 = vector.load %arg8[%c2, %c0_31] : memref<576x32xf32, #tpu.memory_space<vmem>>, vector<512x32xf32>
    %61 = arith.truncf %60 : vector<512x32xf32> to vector<512x32xbf16>
    %c64 = arith.constant 64 : index
    %c0_32 = arith.constant 0 : index
    %62 = vector.load %arg4[%c64, %c0_32] : memref<288x64xbf16, #tpu.memory_space<vmem>>, vector<32x64xbf16>
    %cst_33 = arith.constant dense<0.000000e+00> : vector<512x64xf32>
    %63 = tpu.matmul %61, %62, %cst_33 {dimension_numbers = #tpu.dot_dimension_numbers<[1], [0], [0], [1], [0, 0, 1, 1], [], []>} : vector<512x32xbf16>, vector<32x64xbf16>, vector<512x64xf32> -> vector<512x64xf32>
    %64 = arith.addf %59, %63 : vector<512x64xf32>
    %c16 = arith.constant 16 : index
    %c0_34 = arith.constant 0 : index
    %65 = vector.load %arg8[%c16, %c0_34] : memref<576x32xf32, #tpu.memory_space<vmem>>, vector<512x32xf32>
    %66 = arith.truncf %65 : vector<512x32xf32> to vector<512x32xbf16>
    %c96 = arith.constant 96 : index
    %c0_35 = arith.constant 0 : index
    %67 = vector.load %arg4[%c96, %c0_35] : memref<288x64xbf16, #tpu.memory_space<vmem>>, vector<32x64xbf16>
    %cst_36 = arith.constant dense<0.000000e+00> : vector<512x64xf32>
    %68 = tpu.matmul %66, %67, %cst_36 {dimension_numbers = #tpu.dot_dimension_numbers<[1], [0], [0], [1], [0, 0, 1, 1], [], []>} : vector<512x32xbf16>, vector<32x64xbf16>, vector<512x64xf32> -> vector<512x64xf32>
    %69 = arith.addf %64, %68 : vector<512x64xf32>
    %c17 = arith.constant 17 : index
    %c0_37 = arith.constant 0 : index
    %70 = vector.load %arg8[%c17, %c0_37] : memref<576x32xf32, #tpu.memory_space<vmem>>, vector<512x32xf32>
    %71 = arith.truncf %70 : vector<512x32xf32> to vector<512x32xbf16>
    %c128 = arith.constant 128 : index
    %c0_38 = arith.constant 0 : index
    %72 = vector.load %arg4[%c128, %c0_38] : memref<288x64xbf16, #tpu.memory_space<vmem>>, vector<32x64xbf16>
    %cst_39 = arith.constant dense<0.000000e+00> : vector<512x64xf32>
    %73 = tpu.matmul %71, %72, %cst_39 {dimension_numbers = #tpu.dot_dimension_numbers<[1], [0], [0], [1], [0, 0, 1, 1], [], []>} : vector<512x32xbf16>, vector<32x64xbf16>, vector<512x64xf32> -> vector<512x64xf32>
    %74 = arith.addf %69, %73 : vector<512x64xf32>
    %c18 = arith.constant 18 : index
    %c0_40 = arith.constant 0 : index
    %75 = vector.load %arg8[%c18, %c0_40] : memref<576x32xf32, #tpu.memory_space<vmem>>, vector<512x32xf32>
    %76 = arith.truncf %75 : vector<512x32xf32> to vector<512x32xbf16>
    %c160 = arith.constant 160 : index
    %c0_41 = arith.constant 0 : index
    %77 = vector.load %arg4[%c160, %c0_41] : memref<288x64xbf16, #tpu.memory_space<vmem>>, vector<32x64xbf16>
    %cst_42 = arith.constant dense<0.000000e+00> : vector<512x64xf32>
    %78 = tpu.matmul %76, %77, %cst_42 {dimension_numbers = #tpu.dot_dimension_numbers<[1], [0], [0], [1], [0, 0, 1, 1], [], []>} : vector<512x32xbf16>, vector<32x64xbf16>, vector<512x64xf32> -> vector<512x64xf32>
    %79 = arith.addf %74, %78 : vector<512x64xf32>
    %c32_43 = arith.constant 32 : index
    %c0_44 = arith.constant 0 : index
    %80 = vector.load %arg8[%c32_43, %c0_44] : memref<576x32xf32, #tpu.memory_space<vmem>>, vector<512x32xf32>
    %81 = arith.truncf %80 : vector<512x32xf32> to vector<512x32xbf16>
    %c192 = arith.constant 192 : index
    %c0_45 = arith.constant 0 : index
    %82 = vector.load %arg4[%c192, %c0_45] : memref<288x64xbf16, #tpu.memory_space<vmem>>, vector<32x64xbf16>
    %cst_46 = arith.constant dense<0.000000e+00> : vector<512x64xf32>
    %83 = tpu.matmul %81, %82, %cst_46 {dimension_numbers = #tpu.dot_dimension_numbers<[1], [0], [0], [1], [0, 0, 1, 1], [], []>} : vector<512x32xbf16>, vector<32x64xbf16>, vector<512x64xf32> -> vector<512x64xf32>
    %84 = arith.addf %79, %83 : vector<512x64xf32>
    %c33 = arith.constant 33 : index
    %c0_47 = arith.constant 0 : index
    %85 = vector.load %arg8[%c33, %c0_47] : memref<576x32xf32, #tpu.memory_space<vmem>>, vector<512x32xf32>
    %86 = arith.truncf %85 : vector<512x32xf32> to vector<512x32xbf16>
    %c224 = arith.constant 224 : index
    %c0_48 = arith.constant 0 : index
    %87 = vector.load %arg4[%c224, %c0_48] : memref<288x64xbf16, #tpu.memory_space<vmem>>, vector<32x64xbf16>
    %cst_49 = arith.constant dense<0.000000e+00> : vector<512x64xf32>
    %88 = tpu.matmul %86, %87, %cst_49 {dimension_numbers = #tpu.dot_dimension_numbers<[1], [0], [0], [1], [0, 0, 1, 1], [], []>} : vector<512x32xbf16>, vector<32x64xbf16>, vector<512x64xf32> -> vector<512x64xf32>
    %89 = arith.addf %84, %88 : vector<512x64xf32>
    %c34 = arith.constant 34 : index
    %c0_50 = arith.constant 0 : index
    %90 = vector.load %arg8[%c34, %c0_50] : memref<576x32xf32, #tpu.memory_space<vmem>>, vector<512x32xf32>
    %91 = arith.truncf %90 : vector<512x32xf32> to vector<512x32xbf16>
    %c256 = arith.constant 256 : index
    %c0_51 = arith.constant 0 : index
    %92 = vector.load %arg4[%c256, %c0_51] : memref<288x64xbf16, #tpu.memory_space<vmem>>, vector<32x64xbf16>
    %cst_52 = arith.constant dense<0.000000e+00> : vector<512x64xf32>
    %93 = tpu.matmul %91, %92, %cst_52 {dimension_numbers = #tpu.dot_dimension_numbers<[1], [0], [0], [1], [0, 0, 1, 1], [], []>} : vector<512x32xbf16>, vector<32x64xbf16>, vector<512x64xf32> -> vector<512x64xf32>
    %94 = arith.addf %89, %93 : vector<512x64xf32>
    %c0_53 = arith.constant 0 : index
    %c0_54 = arith.constant 0 : index
    %95 = vector.load %arg5[%c0_53, %c0_54] : memref<1x64xf32, #tpu.memory_space<vmem>>, vector<1x64xf32>
    %96 = vector.broadcast %95 : vector<1x64xf32> to vector<512x64xf32>
    %97 = arith.addf %94, %96 : vector<512x64xf32>
    %cst_55 = arith.constant 0.000000e+00 : f32
    %98 = vector.broadcast %cst_55 : f32 to vector<512x64xf32>
    %99 = arith.maximumf %97, %98 : vector<512x64xf32>
    %c0_56 = arith.constant 0 : index
    %c0_57 = arith.constant 0 : index
    %100 = vector.load %arg9[%c0_56, %c0_57] : memref<512x64xf32, #tpu.memory_space<vmem>>, vector<512x64xf32>
    tpu.vector_store %arg9[%c0_56, %c0_57], %99 {strides = array<i32>} : memref<512x64xf32, #tpu.memory_space<vmem>>, vector<512x64xf32>,
    %c0_58 = arith.constant 0 : index
    %c0_59 = arith.constant 0 : index
    %101 = tpu.strided_load %arg9[%c0_58, %c0_59] {strides = array<i32: 2, 1>} : memref<512x64xf32, #tpu.memory_space<vmem>>, vector<256x64xf32>
    %c1_60 = arith.constant 1 : index
    %c0_61 = arith.constant 0 : index
    %102 = tpu.strided_load %arg9[%c1_60, %c0_61] {strides = array<i32: 2, 1>} : memref<512x64xf32, #tpu.memory_space<vmem>>, vector<256x64xf32>
    %103 = arith.maximumf %101, %102 : vector<256x64xf32>
    %104 = vector.shape_cast %103 : vector<256x64xf32> to vector<16x16x64xf32>
    %105 = vector.extract_strided_slice %104 {offsets = [0, 0, 0], sizes = [16, 8, 64], strides = [1, 1, 1]} : vector<16x16x64xf32> to vector<16x8x64xf32>
    %106 = vector.extract_strided_slice %104 {offsets = [0, 8, 0], sizes = [16, 8, 64], strides = [1, 1, 1]} : vector<16x16x64xf32> to vector<16x8x64xf32>
    %107 = arith.maximumf %105, %106 : vector<16x8x64xf32>
    %c0_62 = arith.constant 0 : index
    %c0_63 = arith.constant 0 : index
    %c0_64 = arith.constant 0 : index
    %108 = vector.load %arg6[%c0_62, %c0_63, %c0_64] : memref<16x8x64xf32, #tpu.memory_space<vmem>>, vector<16x8x64xf32>
    tpu.vector_store %arg6[%c0_62, %c0_63, %c0_64], %107 {strides = array<i32>} : memref<16x8x64xf32, #tpu.memory_space<vmem>>, vector<16x8x64xf32>,
    return
  }
  func.func @transform_0(%arg0: i32) -> (i32, i32) {
    %c0_i32 = arith.constant 0 : i32
    %c0_i32_0 = arith.constant 0 : i32
    return %arg0, %c0_i32 : i32, i32
  }
  func.func @transform_1(%arg0: i32) -> (i32, i32) {
    %c0_i32 = arith.constant 0 : i32
    %c0_i32_0 = arith.constant 0 : i32
    %c0_i32_1 = arith.constant 0 : i32
    return %c0_i32, %c0_i32_0 : i32, i32
  }
  func.func @transform_2(%arg0: i32) -> (i32, i32) {
    %c0_i32 = arith.constant 0 : i32
    %c0_i32_0 = arith.constant 0 : i32
    %c0_i32_1 = arith.constant 0 : i32
    return %c0_i32, %c0_i32_0 : i32, i32
  }
  func.func @transform_3(%arg0: i32) -> (i32, i32) {
    %c0_i32 = arith.constant 0 : i32
    %c0_i32_0 = arith.constant 0 : i32
    %c0_i32_1 = arith.constant 0 : i32
    return %c0_i32, %c0_i32_0 : i32, i32
  }
  func.func @transform_4(%arg0: i32) -> (i32, i32) {
    %c0_i32 = arith.constant 0 : i32
    %c0_i32_0 = arith.constant 0 : i32
    %c0_i32_1 = arith.constant 0 : i32
    return %c0_i32, %c0_i32_0 : i32, i32
  }
  func.func @transform_5(%arg0: i32) -> (i32, i32, i32) {
    %c0_i32 = arith.constant 0 : i32
    %c0_i32_0 = arith.constant 0 : i32
    %c0_i32_1 = arith.constant 0 : i32
    return %arg0, %c0_i32, %c0_i32_0 : i32, i32, i32
  }
}

module attributes {stable_mosaic.version = 11 : i64} {
  func.func @_fc_kernel(%arg0: i32, %arg1: memref<8x4096xf32, #tpu.memory_space<vmem>>, %arg2: memref<4096x128xbf16, #tpu.memory_space<vmem>>, %arg3: memref<1x128xf32, #tpu.memory_space<vmem>>, %arg4: memref<128x128xbf16, #tpu.memory_space<vmem>>, %arg5: memref<1x128xf32, #tpu.memory_space<vmem>>, %arg6: memref<8x128xf32, #tpu.memory_space<vmem>>) attributes {dimension_semantics = [#tpu.dimension_semantics<parallel>], iteration_bounds = array<i64: 1>, scalar_prefetch = 0 : i64, scratch_operands = 0 : i64, tpu.core_type = #tpu.core_type<tc>, window_params = [{transform_indices = @transform_0, window_bounds = array<i64: 8, 4096>}, {pipeline_mode = #tpu.pipeline_mode<synchronous>, transform_indices = @transform_1, window_bounds = array<i64: 4096, 128>}, {pipeline_mode = #tpu.pipeline_mode<synchronous>, transform_indices = @transform_2, window_bounds = array<i64: 1, 128>}, {pipeline_mode = #tpu.pipeline_mode<synchronous>, transform_indices = @transform_3, window_bounds = array<i64: 128, 128>}, {pipeline_mode = #tpu.pipeline_mode<synchronous>, transform_indices = @transform_4, window_bounds = array<i64: 1, 128>}, {transform_indices = @transform_5, window_bounds = array<i64: 8, 128>}]} {
    %c0 = arith.constant 0 : index
    %c0_0 = arith.constant 0 : index
    %0 = vector.load %arg1[%c0, %c0_0] : memref<8x4096xf32, #tpu.memory_space<vmem>>, vector<8x4096xf32>
    %1 = arith.truncf %0 : vector<8x4096xf32> to vector<8x4096xbf16>
    %c0_1 = arith.constant 0 : index
    %c0_2 = arith.constant 0 : index
    %2 = vector.load %arg2[%c0_1, %c0_2] : memref<4096x128xbf16, #tpu.memory_space<vmem>>, vector<4096x128xbf16>
    %cst = arith.constant dense<0.000000e+00> : vector<8x128xf32>
    %3 = tpu.matmul %1, %2, %cst {dimension_numbers = #tpu.dot_dimension_numbers<[1], [0], [0], [1], [0, 0, 1, 1], [], []>} : vector<8x4096xbf16>, vector<4096x128xbf16>, vector<8x128xf32> -> vector<8x128xf32>
    %c0_3 = arith.constant 0 : index
    %c0_4 = arith.constant 0 : index
    %4 = vector.load %arg3[%c0_3, %c0_4] : memref<1x128xf32, #tpu.memory_space<vmem>>, vector<1x128xf32>
    %5 = vector.broadcast %4 : vector<1x128xf32> to vector<8x128xf32>
    %6 = arith.addf %3, %5 : vector<8x128xf32>
    %cst_5 = arith.constant 0.000000e+00 : f32
    %7 = vector.broadcast %cst_5 : f32 to vector<8x128xf32>
    %8 = arith.maximumf %6, %7 : vector<8x128xf32>
    %9 = arith.truncf %8 : vector<8x128xf32> to vector<8x128xbf16>
    %c0_6 = arith.constant 0 : index
    %c0_7 = arith.constant 0 : index
    %10 = vector.load %arg4[%c0_6, %c0_7] : memref<128x128xbf16, #tpu.memory_space<vmem>>, vector<128x128xbf16>
    %cst_8 = arith.constant dense<0.000000e+00> : vector<8x128xf32>
    %11 = tpu.matmul %9, %10, %cst_8 {dimension_numbers = #tpu.dot_dimension_numbers<[1], [0], [0], [1], [0, 0, 1, 1], [], []>} : vector<8x128xbf16>, vector<128x128xbf16>, vector<8x128xf32> -> vector<8x128xf32>
    %c0_9 = arith.constant 0 : index
    %c0_10 = arith.constant 0 : index
    %12 = vector.load %arg5[%c0_9, %c0_10] : memref<1x128xf32, #tpu.memory_space<vmem>>, vector<1x128xf32>
    %13 = vector.broadcast %12 : vector<1x128xf32> to vector<8x128xf32>
    %14 = arith.addf %11, %13 : vector<8x128xf32>
    %c0_11 = arith.constant 0 : index
    %c0_12 = arith.constant 0 : index
    %15 = vector.load %arg6[%c0_11, %c0_12] : memref<8x128xf32, #tpu.memory_space<vmem>>, vector<8x128xf32>
    tpu.vector_store %arg6[%c0_11, %c0_12], %14 {strides = array<i32>} : memref<8x128xf32, #tpu.memory_space<vmem>>, vector<8x128xf32>,
    return
  }
  func.func @transform_0(%arg0: i32) -> (i32, i32) {
    %c0_i32 = arith.constant 0 : i32
    %c0_i32_0 = arith.constant 0 : i32
    return %arg0, %c0_i32 : i32, i32
  }
  func.func @transform_1(%arg0: i32) -> (i32, i32) {
    %c0_i32 = arith.constant 0 : i32
    %c0_i32_0 = arith.constant 0 : i32
    %c0_i32_1 = arith.constant 0 : i32
    return %c0_i32, %c0_i32_0 : i32, i32
  }
  func.func @transform_2(%arg0: i32) -> (i32, i32) {
    %c0_i32 = arith.constant 0 : i32
    %c0_i32_0 = arith.constant 0 : i32
    %c0_i32_1 = arith.constant 0 : i32
    return %c0_i32, %c0_i32_0 : i32, i32
  }
  func.func @transform_3(%arg0: i32) -> (i32, i32) {
    %c0_i32 = arith.constant 0 : i32
    %c0_i32_0 = arith.constant 0 : i32
    %c0_i32_1 = arith.constant 0 : i32
    return %c0_i32, %c0_i32_0 : i32, i32
  }
  func.func @transform_4(%arg0: i32) -> (i32, i32) {
    %c0_i32 = arith.constant 0 : i32
    %c0_i32_0 = arith.constant 0 : i32
    %c0_i32_1 = arith.constant 0 : i32
    return %c0_i32, %c0_i32_0 : i32, i32
  }
  func.func @transform_5(%arg0: i32) -> (i32, i32) {
    %c0_i32 = arith.constant 0 : i32
    %c0_i32_0 = arith.constant 0 : i32
    return %arg0, %c0_i32 : i32, i32
  }
}

</mosaic_0001>

<bundles_post_ra>
// kernel: cnn_forward.3
= control target key start
LH: loop header
LB: loop body
LE: loop exit
PB: predicated region body
PF: predicated region fallthrough
CT: control target
= control target key end

     0   :  { %vm3812_vm0 = vmmov 0   ;;  %s4740_s1 = inlined_call_operand.vmem [shape: bf16[4096,128], index: 1, kind: input, shape index: {}]   ;;  %s4741_s0 = inlined_call_operand.vmem [shape: f32[8,4096], index: 0, kind: input, shape index: {}]   ;;  %s4742_s2 = inlined_call_operand.vmem [shape: f32[1,128], index: 2, kind: input, shape index: {}]   ;;  %s4743_s3 = inlined_call_operand.vmem [shape: bf16[128,128], index: 3, kind: input, shape index: {}]   ;;  %s4744_s4 = inlined_call_operand.vmem [shape: f32[1,128], index: 4, kind: input, shape index: {}]   ;;  %s4745_s5 = inlined_call_operand.vmem [shape: f32[8,128], index: 5, kind: output, shape index: {}]  }
   0x1   :  { %v3547_v0 = vld [vmem:[%s4740_s1 + $0x40] sm:$0xff]   ;;  %v3551_v4 = vld [vmem:[%s4740_s1 + $0x48] sm:$0xff]   ;;  %v3555_v8 = vld [vmem:[%s4740_s1 + $0x50] sm:$0xff]  }
   0x2   :  { %v3548_v1 = vld [vmem:[%s4740_s1 + $0xc0] sm:$0xff]   ;;  %3164 = vmatprep.subr.bf16.mxu0 %v3547_v0  ;;  %v3552_v5 = vld [vmem:[%s4740_s1 + $0xc8] sm:$0xff]   ;;  %v3556_v9 = vld [vmem:[%s4740_s1 + $0xd0] sm:$0xff]  }
   0x3   :  { %v3549_v2 = vld [vmem:[%s4740_s1] sm:$0xff]   ;;  %3186 = vmatprep.subr.bf16.mxu1 %v3548_v1  ;;  %v3553_v6 = vld [vmem:[%s4740_s1 + $0x8] sm:$0xff]   ;;  %v3557_v10 = vld [vmem:[%s4740_s1 + $0x10] sm:$0xff]  }
   0x4   :  { %v3550_v3 = vld [vmem:[%s4740_s1 + $0x80] sm:$0xff]   ;;  %3165 = vmatpush3.bf16.msra.mxu0 %v3549_v2  ;;  %v3554_v7 = vld [vmem:[%s4740_s1 + $0x88] sm:$0xff]   ;;  %v3558_v11 = vld [vmem:[%s4740_s1 + $0x90] sm:$0xff]  }
   0x5   :  { %3187 = vmatpush3.bf16.msra.mxu1 %v3550_v3  ;;  %3166 = vmatprep.subr.bf16.mxu0 %v3551_v4  ;;  %v3559_v12 = vld [vmem:[%s4740_s1 + $0x58] sm:$0xff]   ;;  %v3563_v16 = vld [vmem:[%s4740_s1 + $0x60] sm:$0xff]   ;;  %v3567_v20 = vld [vmem:[%s4740_s1 + $0x68] sm:$0xff]  }
   0x6   :  { %3188 = vmatprep.subr.bf16.mxu1 %v3552_v5  ;;  %v3560_v13 = vld [vmem:[%s4740_s1 + $0xd8] sm:$0xff]   ;;  %v3564_v17 = vld [vmem:[%s4740_s1 + $0xe0] sm:$0xff]   ;;  %v3568_v21 = vld [vmem:[%s4740_s1 + $0xe8] sm:$0xff]  }
   0x7   :  { %v3561_v14 = vld [vmem:[%s4740_s1 + $0x18] sm:$0xff]   ;;  %v3565_v18 = vld [vmem:[%s4740_s1 + $0x20] sm:$0xff]   ;;  %v3569_v22 = vld [vmem:[%s4740_s1 + $0x28] sm:$0xff]  }
   0x8   :  { %3167 = vmatpush3.bf16.msra.mxu0 %v3553_v6  ;;  %v3562_v15 = vld [vmem:[%s4740_s1 + $0x98] sm:$0xff]   ;;  %v3566_v19 = vld [vmem:[%s4740_s1 + $0xa0] sm:$0xff]   ;;  %v3570_v23 = vld [vmem:[%s4740_s1 + $0xa8] sm:$0xff]  }
   0x9   :  { %3189 = vmatpush3.bf16.msra.mxu1 %v3554_v7  ;;  %3168 = vmatprep.subr.bf16.mxu0 %v3555_v8  ;;  %v3571_v24 = vld [vmem:[%s4740_s1 + $0x70] sm:$0xff]   ;;  %v3575_v28 = vld [vmem:[%s4740_s1 + $0x78] sm:$0xff]   ;;  %v22_v32 = vld [vmem:[%s4741_s0 + $0x8] sm:$0xff] }
   0xa   :  { %3190 = vmatprep.subr.bf16.mxu1 %v3556_v9  ;;  %v3572_v25 = vld [vmem:[%s4740_s1 + $0xf0] sm:$0xff]   ;;  %v3576_v29 = vld [vmem:[%s4740_s1 + $0xf8] sm:$0xff]   ;;  %v21_v34 = vld [vmem:[%s4741_s0] sm:$0xff]  ;;  %v54_v35 = vpack.c.bf16 %v22_v32, %v22_v32 }
   0xb   :  { %v3573_v26 = vld [vmem:[%s4740_s1 + $0x30] sm:$0xff]   ;;  %v3577_v30 = vld [vmem:[%s4740_s1 + $0x38] sm:$0xff]   ;;  %v53_v37 = vpack.c.bf16 %v21_v34, %v21_v34  ;;  %v3579_v40 = vld [vmem:[%s4740_s1 + $0x140] sm:$0xff]  }
   0xc   :  { %3169 = vmatpush3.bf16.msra.mxu0 %v3557_v10  ;;  %v3574_v27 = vld [vmem:[%s4740_s1 + $0xb0] sm:$0xff]   ;;  %v3578_v31 = vld [vmem:[%s4740_s1 + $0xb8] sm:$0xff]   ;;  %2172 = vmatprep.mubr.bf16.mxu0 %v54_v35  ;;  %v3580_v41 = vld [vmem:[%s4740_s1 + $0x1c0] sm:$0xff]  }
   0xd   :  { %3191 = vmatpush3.bf16.msra.mxu1 %v3558_v11  ;;  %3170 = vmatprep.subr.bf16.mxu0 %v3559_v12  ;;  %v24_v33 = vld [vmem:[%s4741_s0 + $0x18] sm:$0xff]  ;;  %v23_v38 = vld [vmem:[%s4741_s0 + $0x10] sm:$0xff]  ;;  %v3581_v42 = vld [vmem:[%s4740_s1 + $0x100] sm:$0xff]  }
   0xe   :  { %3192 = vmatprep.subr.bf16.mxu1 %v3560_v13  ;;  %v56_v36 = vpack.c.bf16 %v24_v33, %v24_v33  ;;  %v55_v39 = vpack.c.bf16 %v23_v38, %v23_v38  ;;  %v3582_v43 = vld [vmem:[%s4740_s1 + $0x180] sm:$0xff]   ;;  %v3583_v44 = vld [vmem:[%s4740_s1 + $0x148] sm:$0xff]   ;;  %v3587_v48 = vld [vmem:[%s4740_s1 + $0x150] sm:$0xff]  }
   0xf   :  { %v3584_v45 = vld [vmem:[%s4740_s1 + $0x1c8] sm:$0xff]   ;;  %v3588_v49 = vld [vmem:[%s4740_s1 + $0x1d0] sm:$0xff]   ;;  %v3591_v52 = vld [vmem:[%s4740_s1 + $0x158] sm:$0xff]  }
  0x10   :  { %3171 = vmatpush3.bf16.msra.mxu0 %v3561_v14  ;;  %2212 = vmatprep.mubr.bf16.mxu1 %v56_v36  ;;  %v3585_v46 = vld [vmem:[%s4740_s1 + $0x108] sm:$0xff]   ;;  %v3589_v50 = vld [vmem:[%s4740_s1 + $0x110] sm:$0xff]   ;;  %v3592_v53 = vld [vmem:[%s4740_s1 + $0x1d8] sm:$0xff]  }
  0x11   :  { %3193 = vmatpush3.bf16.msra.mxu1 %v3562_v15  ;;  %3172 = vmatprep.subr.bf16.mxu0 %v3563_v16  ;;  %v3586_v47 = vld [vmem:[%s4740_s1 + $0x188] sm:$0xff]   ;;  %v3590_v51 = vld [vmem:[%s4740_s1 + $0x190] sm:$0xff]   ;;  %v3593_v54 = vld [vmem:[%s4740_s1 + $0x118] sm:$0xff]  }
  0x12   :  { %3194 = vmatprep.subr.bf16.mxu1 %v3564_v17  ;;  %v3594_v55 = vld [vmem:[%s4740_s1 + $0x198] sm:$0xff]   ;;  %v3595_v56 = vld [vmem:[%s4740_s1 + $0x160] sm:$0xff]   ;;  %v3599_v60 = vld [vmem:[%s4740_s1 + $0x168] sm:$0xff]  }
  0x13   :  { %v3596_v57 = vld [vmem:[%s4740_s1 + $0x1e0] sm:$0xff]   ;;  %v3600_v61 = vld [vmem:[%s4740_s1 + $0x1e8] sm:$0xff]   ;;  %v3603_v0 = vld [vmem:[%s4740_s1 + $0x170] sm:$0xff]  }
  0x14   :  { %3173 = vmatpush3.bf16.msra.mxu0 %v3565_v18  ;;  %v3597_v58 = vld [vmem:[%s4740_s1 + $0x120] sm:$0xff]   ;;  %v3601_v62 = vld [vmem:[%s4740_s1 + $0x128] sm:$0xff]   ;;  %v3604_v1 = vld [vmem:[%s4740_s1 + $0x1f0] sm:$0xff]  }
  0x15   :  { %3195 = vmatpush3.bf16.msra.mxu1 %v3566_v19  ;;  %3174 = vmatprep.subr.bf16.mxu0 %v3567_v20  ;;  %v3598_v59 = vld [vmem:[%s4740_s1 + $0x1a0] sm:$0xff]   ;;  %v3602_v63 = vld [vmem:[%s4740_s1 + $0x1a8] sm:$0xff]   ;;  %v3605_v2 = vld [vmem:[%s4740_s1 + $0x130] sm:$0xff]  }
  0x16   :  { %3196 = vmatprep.subr.bf16.mxu1 %v3568_v21  ;;  %v3606_v3 = vld [vmem:[%s4740_s1 + $0x1b0] sm:$0xff]   ;;  %v3607_v4 = vld [vmem:[%s4740_s1 + $0x178] sm:$0xff]   ;;  %v26_v8 = vld [vmem:[%s4741_s0 + $0x28] sm:$0xff] }
  0x17   :  { %v3608_v5 = vld [vmem:[%s4740_s1 + $0x1f8] sm:$0xff]   ;;  %v58_v10 = vpack.c.bf16 %v26_v8, %v26_v8  ;;  %v25_v12 = vld [vmem:[%s4741_s0 + $0x20] sm:$0xff]  ;;  %v27_v13 = vld [vmem:[%s4741_s0 + $0x30] sm:$0xff] }
  0x18   :  { %3175 = vmatpush3.bf16.msra.mxu0 %v3569_v22  ;;  %v3609_v6 = vld [vmem:[%s4740_s1 + $0x138] sm:$0xff]   ;;  %v57_v14 = vpack.c.bf16 %v25_v12, %v25_v12  ;;  %v59_v15 = vpack.c.bf16 %v27_v13, %v27_v13  ;;  %v3611_v16 = vld [vmem:[%s4740_s1 + $0x240] sm:$0xff]   ;;  %v3615_v20 = vld [vmem:[%s4740_s1 + $0x248] sm:$0xff]  }
  0x19   :  { %3197 = vmatpush3.bf16.msra.mxu1 %v3570_v23  ;;  %3176 = vmatprep.subr.bf16.mxu0 %v3571_v24  ;;  %v3610_v7 = vld [vmem:[%s4740_s1 + $0x1b8] sm:$0xff]   ;;  %v3612_v17 = vld [vmem:[%s4740_s1 + $0x2c0] sm:$0xff]   ;;  %v3616_v21 = vld [vmem:[%s4740_s1 + $0x2c8] sm:$0xff]  }
  0x1a   :  { %3198 = vmatprep.subr.bf16.mxu1 %v3572_v25  ;;  %v28_v9 = vld [vmem:[%s4741_s0 + $0x38] sm:$0xff]  ;;  %v3613_v18 = vld [vmem:[%s4740_s1 + $0x200] sm:$0xff]   ;;  %v3617_v22 = vld [vmem:[%s4740_s1 + $0x208] sm:$0xff]  }
  0x1b   :  { %v60_v11 = vpack.c.bf16 %v28_v9, %v28_v9  ;;  %v3614_v19 = vld [vmem:[%s4740_s1 + $0x280] sm:$0xff]   ;;  %v3618_v23 = vld [vmem:[%s4740_s1 + $0x288] sm:$0xff]   ;;  %v3619_v24 = vld [vmem:[%s4740_s1 + $0x250] sm:$0xff]  }
  0x1c   :  { %3177 = vmatpush3.bf16.msra.mxu0 %v3573_v26  ;;  %v3620_v25 = vld [vmem:[%s4740_s1 + $0x2d0] sm:$0xff]   ;;  %v3627_v32 = vld [vmem:[%s4740_s1 + $0x260] sm:$0xff]   ;;  %v3631_v36 = vld [vmem:[%s4740_s1 + $0x268] sm:$0xff]  }
  0x1d   :  { %3199 = vmatpush3.bf16.msra.mxu1 %v3574_v27  ;;  %3178 = vmatprep.subr.bf16.mxu0 %v3575_v28  ;;  %v3621_v26 = vld [vmem:[%s4740_s1 + $0x210] sm:$0xff]   ;;  %v3623_v28 = vld [vmem:[%s4740_s1 + $0x258] sm:$0xff]   ;;  %v3628_v33 = vld [vmem:[%s4740_s1 + $0x2e0] sm:$0xff]  }
  0x1e   :  { %3200 = vmatprep.subr.bf16.mxu1 %v3576_v29  ;;  %v3622_v27 = vld [vmem:[%s4740_s1 + $0x290] sm:$0xff]   ;;  %v3624_v29 = vld [vmem:[%s4740_s1 + $0x2d8] sm:$0xff]   ;;  %v3629_v34 = vld [vmem:[%s4740_s1 + $0x220] sm:$0xff]  }
  0x1f   :  { %v3630_v35 = vld [vmem:[%s4740_s1 + $0x2a0] sm:$0xff]   ;;  %v3633_v38 = vld [vmem:[%s4740_s1 + $0x228] sm:$0xff]  }
  0x20   :  { %3179 = vmatpush3.bf16.msra.mxu0 %v3577_v30  ;;  %v3625_v30 = vld [vmem:[%s4740_s1 + $0x218] sm:$0xff]   ;;  %v3659_v8 = vld [vmem:[%s4740_s1 + $0x360] sm:$0xff]   ;;  %v3663_v12 = vld [vmem:[%s4740_s1 + $0x368] sm:$0xff]  }
  0x21   :  { %3201 = vmatpush3.bf16.msra.mxu1 %v3578_v31  ;;  %3208 = vmatprep.subr.bf16.mxu0 %v3579_v40  ;;  %v3626_v31 = vld [vmem:[%s4740_s1 + $0x298] sm:$0xff]   ;;  %v3635_v40 = vld [vmem:[%s4740_s1 + $0x270] sm:$0xff]   ;;  %v3660_v9 = vld [vmem:[%s4740_s1 + $0x3e0] sm:$0xff]  }
  0x22   :  { %3230 = vmatprep.subr.bf16.mxu1 %v3580_v41  ;;  %v3636_v41 = vld [vmem:[%s4740_s1 + $0x2f0] sm:$0xff]   ;;  %v3664_v13 = vld [vmem:[%s4740_s1 + $0x3e8] sm:$0xff]  }
  0x23   :  { %2173 = vmatmul.mubr.bf16.vlgmr.msra.gmra.mrb[0].mxu0 %v53_v37  ;;  %v3632_v37 = vld [vmem:[%s4740_s1 + $0x2e8] sm:$0xff]  }
  0x24   :  { %2213 = vmatmul.mubr.bf16.vlgmr.msra.gmra.mrb[0].mxu1 %v55_v39  ;;  %3209 = vmatpush3.bf16.msra.mxu0 %v3581_v42  ;;  %v3634_v39 = vld [vmem:[%s4740_s1 + $0x2a8] sm:$0xff]   ;;  %v3637_v42 = vld [vmem:[%s4740_s1 + $0x230] sm:$0xff]  }
  0x25   :  { %3231 = vmatpush3.bf16.msra.mxu1 %v3582_v43  ;;  %3210 = vmatprep.subr.bf16.mxu0 %v3583_v44  ;;  %v3638_v43 = vld [vmem:[%s4740_s1 + $0x2b0] sm:$0xff]   ;;  %v3639_v44 = vld [vmem:[%s4740_s1 + $0x278] sm:$0xff]  }
  0x26   :  { %3232 = vmatprep.subr.bf16.mxu1 %v3584_v45  ;;  %2252 = vmatprep.mubr.bf16.mxu0 %v58_v10  ;;  %v3640_v45 = vld [vmem:[%s4740_s1 + $0x2f8] sm:$0xff]   ;;  %v3661_v10 = vld [vmem:[%s4740_s1 + $0x320] sm:$0xff]  }
  0x27   :  { %2292 = vmatprep.mubr.bf16.mxu1 %v60_v11  ;;  %v3662_v11 = vld [vmem:[%s4740_s1 + $0x3a0] sm:$0xff]  }
  0x28   :  { %3211 = vmatpush3.bf16.msra.mxu0 %v3585_v46  ;;  %v3641_v46 = vld [vmem:[%s4740_s1 + $0x238] sm:$0xff]  }
  0x29   :  { %3233 = vmatpush3.bf16.msra.mxu1 %v3586_v47  ;;  %3212 = vmatprep.subr.bf16.mxu0 %v3587_v48  ;;  %v3642_v47 = vld [vmem:[%s4740_s1 + $0x2b8] sm:$0xff]   ;;  %v30_v48 = vld [vmem:[%s4741_s0 + $0x48] sm:$0xff] }
  0x2a   :  { %3234 = vmatprep.subr.bf16.mxu1 %v3588_v49  ;;  %v62_v49 = vpack.c.bf16 %v30_v48, %v30_v48  ;;  %v3691_v48 = vld [vmem:[%s4740_s1 + $0x460] sm:$0xff]  }
  0x2c   :  { %3213 = vmatpush3.bf16.msra.mxu0 %v3589_v50  ;;  %v32_v50 = vld [vmem:[%s4741_s0 + $0x58] sm:$0xff] }
  0x2d   :  { %3235 = vmatpush3.bf16.msra.mxu1 %v3590_v51  ;;  %3214 = vmatprep.subr.bf16.mxu0 %v3591_v52  ;;  %v29_v51 = vld [vmem:[%s4741_s0 + $0x40] sm:$0xff]  ;;  %v31_v52 = vld [vmem:[%s4741_s0 + $0x50] sm:$0xff] }
  0x2e   :  { %3236 = vmatprep.subr.bf16.mxu1 %v3592_v53  ;;  %v64_v53 = vpack.c.bf16 %v32_v50, %v32_v50  ;;  %v3693_v50 = vld [vmem:[%s4740_s1 + $0x420] sm:$0xff]  }
  0x30   :  { %3215 = vmatpush3.bf16.msra.mxu0 %v3593_v54  ;;  %v61_v54 = vpack.c.bf16 %v29_v51, %v29_v51  ;;  %v3694_v51 = vld [vmem:[%s4740_s1 + $0x4a0] sm:$0xff]  }
  0x31   :  { %3237 = vmatpush3.bf16.msra.mxu1 %v3594_v55  ;;  %3216 = vmatprep.subr.bf16.mxu0 %v3595_v56  ;;  %v63_v55 = vpack.c.bf16 %v31_v52, %v31_v52  ;;  %v3643_v56 = vld [vmem:[%s4740_s1 + $0x340] sm:$0xff]   ;;  %v3695_v52 = vld [vmem:[%s4740_s1 + $0x468] sm:$0xff]  }
  0x32   :  { %3238 = vmatprep.subr.bf16.mxu1 %v3596_v57  ;;  %v3644_v57 = vld [vmem:[%s4740_s1 + $0x3c0] sm:$0xff]  }
  0x34   :  { %3217 = vmatpush3.bf16.msra.mxu0 %v3597_v58  ;;  %v3645_v58 = vld [vmem:[%s4740_s1 + $0x300] sm:$0xff]  }
  0x35   :  { %3239 = vmatpush3.bf16.msra.mxu1 %v3598_v59  ;;  %3218 = vmatprep.subr.bf16.mxu0 %v3599_v60  ;;  %v3646_v59 = vld [vmem:[%s4740_s1 + $0x380] sm:$0xff]   ;;  %v3647_v60 = vld [vmem:[%s4740_s1 + $0x348] sm:$0xff]  }
  0x36   :  { %3240 = vmatprep.subr.bf16.mxu1 %v3600_v61  ;;  %v3648_v61 = vld [vmem:[%s4740_s1 + $0x3c8] sm:$0xff]  }
  0x38   :  { %3219 = vmatpush3.bf16.msra.mxu0 %v3601_v62  ;;  %v3649_v62 = vld [vmem:[%s4740_s1 + $0x308] sm:$0xff]  }
  0x39   :  { %3241 = vmatpush3.bf16.msra.mxu1 %v3602_v63  ;;  %3220 = vmatprep.subr.bf16.mxu0 %v3603_v0  ;;  %v3650_v63 = vld [vmem:[%s4740_s1 + $0x388] sm:$0xff]   ;;  %v3651_v0 = vld [vmem:[%s4740_s1 + $0x350] sm:$0xff]  }
  0x3a   :  { %3242 = vmatprep.subr.bf16.mxu1 %v3604_v1  ;;  %v3652_v1 = vld [vmem:[%s4740_s1 + $0x3d0] sm:$0xff]  }
  0x3c   :  { %3221 = vmatpush3.bf16.msra.mxu0 %v3605_v2  ;;  %v3653_v2 = vld [vmem:[%s4740_s1 + $0x310] sm:$0xff]  }
  0x3d   :  { %3243 = vmatpush3.bf16.msra.mxu1 %v3606_v3  ;;  %3222 = vmatprep.subr.bf16.mxu0 %v3607_v4  ;;  %v3654_v3 = vld [vmem:[%s4740_s1 + $0x390] sm:$0xff]   ;;  %v3655_v4 = vld [vmem:[%s4740_s1 + $0x358] sm:$0xff]  }
  0x3e   :  { %3244 = vmatprep.subr.bf16.mxu1 %v3608_v5  ;;  %v3656_v5 = vld [vmem:[%s4740_s1 + $0x3d8] sm:$0xff]  }
  0x40   :  { %3223 = vmatpush3.bf16.msra.mxu0 %v3609_v6  ;;  %v3657_v6 = vld [vmem:[%s4740_s1 + $0x318] sm:$0xff]  }
  0x41   :  { %3245 = vmatpush3.bf16.msra.mxu1 %v3610_v7  ;;  %3252 = vmatprep.subr.bf16.mxu0 %v3611_v16  ;;  %v3658_v7 = vld [vmem:[%s4740_s1 + $0x398] sm:$0xff]   ;;  %v3667_v16 = vld [vmem:[%s4740_s1 + $0x370] sm:$0xff]  }
  0x42   :  { %3274 = vmatprep.subr.bf16.mxu1 %v3612_v17  ;;  %v3668_v17 = vld [vmem:[%s4740_s1 + $0x3f0] sm:$0xff]  }
  0x43   :  { %2253 = vmatmul.mubr.bf16.vlgmr.msra.gmra.mrb[4].mxu0 %v57_v14  ;;  %v3665_v14 = vld [vmem:[%s4740_s1 + $0x328] sm:$0xff]  }
  0x44   :  { %2293 = vmatmul.mubr.bf16.vlgmr.msra.gmra.mrb[4].mxu1 %v59_v15  ;;  %3253 = vmatpush3.bf16.msra.mxu0 %v3613_v18  ;;  %v3666_v15 = vld [vmem:[%s4740_s1 + $0x3a8] sm:$0xff]   ;;  %v3669_v18 = vld [vmem:[%s4740_s1 + $0x330] sm:$0xff]  }
  0x45   :  { %3275 = vmatpush3.bf16.msra.mxu1 %v3614_v19  ;;  %3254 = vmatprep.subr.bf16.mxu0 %v3615_v20  ;;  %v3670_v19 = vld [vmem:[%s4740_s1 + $0x3b0] sm:$0xff]   ;;  %v3671_v20 = vld [vmem:[%s4740_s1 + $0x378] sm:$0xff]  }
  0x46   :  { %3276 = vmatprep.subr.bf16.mxu1 %v3616_v21  ;;  %2332 = vmatprep.mubr.bf16.mxu0 %v62_v49  ;;  %v3672_v21 = vld [vmem:[%s4740_s1 + $0x3f8] sm:$0xff]   ;;  %v3692_v49 = vld [vmem:[%s4740_s1 + $0x4e0] sm:$0xff]  }
  0x47   :  { %2372 = vmatprep.mubr.bf16.mxu1 %v64_v53  ;;  %v3696_v53 = vld [vmem:[%s4740_s1 + $0x4e8] sm:$0xff]  }
  0x48   :  { %3255 = vmatpush3.bf16.msra.mxu0 %v3617_v22  ;;  %v3673_v22 = vld [vmem:[%s4740_s1 + $0x338] sm:$0xff]  }
  0x49   :  { %3277 = vmatpush3.bf16.msra.mxu1 %v3618_v23  ;;  %3256 = vmatprep.subr.bf16.mxu0 %v3619_v24  ;;  %v3674_v23 = vld [vmem:[%s4740_s1 + $0x3b8] sm:$0xff]   ;;  %v34_v24 = vld [vmem:[%s4741_s0 + $0x68] sm:$0xff] }
  0x4a   :  { %3278 = vmatprep.subr.bf16.mxu1 %v3620_v25  ;;  %v36_v25 = vld [vmem:[%s4741_s0 + $0x78] sm:$0xff] }
  0x4c   :  { %3257 = vmatpush3.bf16.msra.mxu0 %v3621_v26  ;;  %v33_v26 = vld [vmem:[%s4741_s0 + $0x60] sm:$0xff] }
  0x4d   :  { %3279 = vmatpush3.bf16.msra.mxu1 %v3622_v27  ;;  %3258 = vmatprep.subr.bf16.mxu0 %v3623_v28  ;;  %v66_v27 = vpack.c.bf16 %v34_v24, %v34_v24  ;;  %v68_v28 = vpack.c.bf16 %v36_v25, %v36_v25  ;;  %v3723_v24 = vld [vmem:[%s4740_s1 + $0x560] sm:$0xff]  }
  0x4e   :  { %3280 = vmatprep.subr.bf16.mxu1 %v3624_v29  ;;  %v65_v29 = vpack.c.bf16 %v33_v26, %v33_v26  ;;  %v3724_v25 = vld [vmem:[%s4740_s1 + $0x5e0] sm:$0xff]  }
  0x4f   :  { %v3725_v26 = vld [vmem:[%s4740_s1 + $0x520] sm:$0xff]  }
  0x50   :  { %3259 = vmatpush3.bf16.msra.mxu0 %v3625_v30  ;;  %v35_v30 = vld [vmem:[%s4741_s0 + $0x70] sm:$0xff] }
  0x51   :  { %3281 = vmatpush3.bf16.msra.mxu1 %v3626_v31  ;;  %3260 = vmatprep.subr.bf16.mxu0 %v3627_v32  ;;  %v67_v31 = vpack.c.bf16 %v35_v30, %v35_v30  ;;  %v3675_v32 = vld [vmem:[%s4740_s1 + $0x440] sm:$0xff]   ;;  %v3729_v30 = vld [vmem:[%s4740_s1 + $0x528] sm:$0xff]  }
  0x52   :  { %3282 = vmatprep.subr.bf16.mxu1 %v3628_v33  ;;  %v3676_v33 = vld [vmem:[%s4740_s1 + $0x4c0] sm:$0xff]  }
  0x54   :  { %3261 = vmatpush3.bf16.msra.mxu0 %v3629_v34  ;;  %v3677_v34 = vld [vmem:[%s4740_s1 + $0x400] sm:$0xff]  }
  0x55   :  { %3283 = vmatpush3.bf16.msra.mxu1 %v3630_v35  ;;  %3262 = vmatprep.subr.bf16.mxu0 %v3631_v36  ;;  %v3678_v35 = vld [vmem:[%s4740_s1 + $0x480] sm:$0xff]   ;;  %v3679_v36 = vld [vmem:[%s4740_s1 + $0x448] sm:$0xff]  }
  0x56   :  { %3284 = vmatprep.subr.bf16.mxu1 %v3632_v37  ;;  %v3680_v37 = vld [vmem:[%s4740_s1 + $0x4c8] sm:$0xff]  }
  0x58   :  { %3263 = vmatpush3.bf16.msra.mxu0 %v3633_v38  ;;  %v3681_v38 = vld [vmem:[%s4740_s1 + $0x408] sm:$0xff]  }
  0x59   :  { %3285 = vmatpush3.bf16.msra.mxu1 %v3634_v39  ;;  %3264 = vmatprep.subr.bf16.mxu0 %v3635_v40  ;;  %v3682_v39 = vld [vmem:[%s4740_s1 + $0x488] sm:$0xff]   ;;  %v3683_v40 = vld [vmem:[%s4740_s1 + $0x450] sm:$0xff]  }
  0x5a   :  { %3286 = vmatprep.subr.bf16.mxu1 %v3636_v41  ;;  %v3684_v41 = vld [vmem:[%s4740_s1 + $0x4d0] sm:$0xff]  }
  0x5c   :  { %3265 = vmatpush3.bf16.msra.mxu0 %v3637_v42  ;;  %v3685_v42 = vld [vmem:[%s4740_s1 + $0x410] sm:$0xff]  }
  0x5d   :  { %3287 = vmatpush3.bf16.msra.mxu1 %v3638_v43  ;;  %3266 = vmatprep.subr.bf16.mxu0 %v3639_v44  ;;  %v3686_v43 = vld [vmem:[%s4740_s1 + $0x490] sm:$0xff]   ;;  %v3687_v44 = vld [vmem:[%s4740_s1 + $0x458] sm:$0xff]  }
  0x5e   :  { %3288 = vmatprep.subr.bf16.mxu1 %v3640_v45  ;;  %v3688_v45 = vld [vmem:[%s4740_s1 + $0x4d8] sm:$0xff]  }
  0x60   :  { %3267 = vmatpush3.bf16.msra.mxu0 %v3641_v46  ;;  %v3689_v46 = vld [vmem:[%s4740_s1 + $0x418] sm:$0xff]  }
  0x61   :  { %3289 = vmatpush3.bf16.msra.mxu1 %v3642_v47  ;;  %3296 = vmatprep.subr.bf16.mxu0 %v3643_v56  ;;  %v3690_v47 = vld [vmem:[%s4740_s1 + $0x498] sm:$0xff]   ;;  %v3699_v56 = vld [vmem:[%s4740_s1 + $0x470] sm:$0xff]  }
  0x62   :  { %3318 = vmatprep.subr.bf16.mxu1 %v3644_v57  ;;  %v3700_v57 = vld [vmem:[%s4740_s1 + $0x4f0] sm:$0xff]  }
  0x63   :  { %2333 = vmatmul.mubr.bf16.vlgmr.msra.gmra.mrb[8].mxu0 %v61_v54  ;;  %v3697_v54 = vld [vmem:[%s4740_s1 + $0x428] sm:$0xff]  }
  0x64   :  { %2373 = vmatmul.mubr.bf16.vlgmr.msra.gmra.mrb[8].mxu1 %v63_v55  ;;  %3297 = vmatpush3.bf16.msra.mxu0 %v3645_v58  ;;  %v3698_v55 = vld [vmem:[%s4740_s1 + $0x4a8] sm:$0xff]   ;;  %v3701_v58 = vld [vmem:[%s4740_s1 + $0x430] sm:$0xff]  }
  0x65   :  { %3319 = vmatpush3.bf16.msra.mxu1 %v3646_v59  ;;  %3298 = vmatprep.subr.bf16.mxu0 %v3647_v60  ;;  %v3702_v59 = vld [vmem:[%s4740_s1 + $0x4b0] sm:$0xff]   ;;  %v3703_v60 = vld [vmem:[%s4740_s1 + $0x478] sm:$0xff]  }
  0x66   :  { %3320 = vmatprep.subr.bf16.mxu1 %v3648_v61  ;;  %2412 = vmatprep.mubr.bf16.mxu0 %v66_v27  ;;  %v3704_v61 = vld [vmem:[%s4740_s1 + $0x4f8] sm:$0xff]   ;;  %v3726_v27 = vld [vmem:[%s4740_s1 + $0x5a0] sm:$0xff]  }
  0x67   :  { %2452 = vmatprep.mubr.bf16.mxu1 %v68_v28  ;;  %v3727_v28 = vld [vmem:[%s4740_s1 + $0x568] sm:$0xff]  }
  0x68   :  { %3299 = vmatpush3.bf16.msra.mxu0 %v3649_v62  ;;  %v3705_v62 = vld [vmem:[%s4740_s1 + $0x438] sm:$0xff]  }
  0x69   :  { %3321 = vmatpush3.bf16.msra.mxu1 %v3650_v63  ;;  %3300 = vmatprep.subr.bf16.mxu0 %v3651_v0  ;;  %v3706_v63 = vld [vmem:[%s4740_s1 + $0x4b8] sm:$0xff]   ;;  %v38_v0 = vld [vmem:[%s4741_s0 + $0x88] sm:$0xff] }
  0x6a   :  { %3322 = vmatprep.subr.bf16.mxu1 %v3652_v1  ;;  %v40_v1 = vld [vmem:[%s4741_s0 + $0x98] sm:$0xff] }
  0x6c   :  { %3301 = vmatpush3.bf16.msra.mxu0 %v3653_v2  ;;  %v70_v2 = vpack.c.bf16 %v38_v0, %v38_v0  ;;  %v3755_v0 = vld [vmem:[%s4740_s1 + $0x660] sm:$0xff]  }
  0x6d   :  { %3323 = vmatpush3.bf16.msra.mxu1 %v3654_v3  ;;  %3302 = vmatprep.subr.bf16.mxu0 %v3655_v4  ;;  %v72_v3 = vpack.c.bf16 %v40_v1, %v40_v1  ;;  %v37_v4 = vld [vmem:[%s4741_s0 + $0x80] sm:$0xff] }
  0x6e   :  { %3324 = vmatprep.subr.bf16.mxu1 %v3656_v5  ;;  %v39_v5 = vld [vmem:[%s4741_s0 + $0x90] sm:$0xff]  ;;  %v3756_v1 = vld [vmem:[%s4740_s1 + $0x6e0] sm:$0xff]  }
  0x70   :  { %3303 = vmatpush3.bf16.msra.mxu0 %v3657_v6  ;;  %v69_v6 = vpack.c.bf16 %v37_v4, %v37_v4  ;;  %v3759_v4 = vld [vmem:[%s4740_s1 + $0x668] sm:$0xff]  }
  0x71   :  { %3325 = vmatpush3.bf16.msra.mxu1 %v3658_v7  ;;  %3304 = vmatprep.subr.bf16.mxu0 %v3659_v8  ;;  %v71_v7 = vpack.c.bf16 %v39_v5, %v39_v5  ;;  %v3707_v8 = vld [vmem:[%s4740_s1 + $0x540] sm:$0xff]   ;;  %v3760_v5 = vld [vmem:[%s4740_s1 + $0x6e8] sm:$0xff]  }
  0x72   :  { %3326 = vmatprep.subr.bf16.mxu1 %v3660_v9  ;;  %v3708_v9 = vld [vmem:[%s4740_s1 + $0x5c0] sm:$0xff]  }
  0x74   :  { %3305 = vmatpush3.bf16.msra.mxu0 %v3661_v10  ;;  %v3709_v10 = vld [vmem:[%s4740_s1 + $0x500] sm:$0xff]  }
  0x75   :  { %3327 = vmatpush3.bf16.msra.mxu1 %v3662_v11  ;;  %3306 = vmatprep.subr.bf16.mxu0 %v3663_v12  ;;  %v3710_v11 = vld [vmem:[%s4740_s1 + $0x580] sm:$0xff]   ;;  %v3711_v12 = vld [vmem:[%s4740_s1 + $0x548] sm:$0xff]  }
  0x76   :  { %3328 = vmatprep.subr.bf16.mxu1 %v3664_v13  ;;  %v3712_v13 = vld [vmem:[%s4740_s1 + $0x5c8] sm:$0xff]  }
  0x78   :  { %3307 = vmatpush3.bf16.msra.mxu0 %v3665_v14  ;;  %v3713_v14 = vld [vmem:[%s4740_s1 + $0x508] sm:$0xff]  }
  0x79   :  { %3329 = vmatpush3.bf16.msra.mxu1 %v3666_v15  ;;  %3308 = vmatprep.subr.bf16.mxu0 %v3667_v16  ;;  %v3714_v15 = vld [vmem:[%s4740_s1 + $0x588] sm:$0xff]   ;;  %v3715_v16 = vld [vmem:[%s4740_s1 + $0x550] sm:$0xff]  }
  0x7a   :  { %3330 = vmatprep.subr.bf16.mxu1 %v3668_v17  ;;  %v3716_v17 = vld [vmem:[%s4740_s1 + $0x5d0] sm:$0xff]  }
  0x7c   :  { %3309 = vmatpush3.bf16.msra.mxu0 %v3669_v18  ;;  %v3717_v18 = vld [vmem:[%s4740_s1 + $0x510] sm:$0xff]  }
  0x7d   :  { %3331 = vmatpush3.bf16.msra.mxu1 %v3670_v19  ;;  %3310 = vmatprep.subr.bf16.mxu0 %v3671_v20  ;;  %v3718_v19 = vld [vmem:[%s4740_s1 + $0x590] sm:$0xff]   ;;  %v3719_v20 = vld [vmem:[%s4740_s1 + $0x558] sm:$0xff]  }
  0x7e   :  { %3332 = vmatprep.subr.bf16.mxu1 %v3672_v21  ;;  %v3720_v21 = vld [vmem:[%s4740_s1 + $0x5d8] sm:$0xff]  }
  0x80   :  { %3311 = vmatpush3.bf16.msra.mxu0 %v3673_v22  ;;  %v3721_v22 = vld [vmem:[%s4740_s1 + $0x518] sm:$0xff]  }
  0x81   :  { %3333 = vmatpush3.bf16.msra.mxu1 %v3674_v23  ;;  %3340 = vmatprep.subr.bf16.mxu0 %v3675_v32  ;;  %v3722_v23 = vld [vmem:[%s4740_s1 + $0x598] sm:$0xff]   ;;  %v3731_v32 = vld [vmem:[%s4740_s1 + $0x570] sm:$0xff]  }
  0x82   :  { %3362 = vmatprep.subr.bf16.mxu1 %v3676_v33  ;;  %v3732_v33 = vld [vmem:[%s4740_s1 + $0x5f0] sm:$0xff]  }
  0x83   :  { %2413 = vmatmul.mubr.bf16.vlgmr.msra.gmra.mrb[12].mxu0 %v65_v29  ;;  %v3728_v29 = vld [vmem:[%s4740_s1 + $0x5e8] sm:$0xff]  }
  0x84   :  { %2453 = vmatmul.mubr.bf16.vlgmr.msra.gmra.mrb[12].mxu1 %v67_v31  ;;  %3341 = vmatpush3.bf16.msra.mxu0 %v3677_v34  ;;  %v3730_v31 = vld [vmem:[%s4740_s1 + $0x5a8] sm:$0xff]   ;;  %v3733_v34 = vld [vmem:[%s4740_s1 + $0x530] sm:$0xff]  }
  0x85   :  { %3363 = vmatpush3.bf16.msra.mxu1 %v3678_v35  ;;  %3342 = vmatprep.subr.bf16.mxu0 %v3679_v36  ;;  %v3734_v35 = vld [vmem:[%s4740_s1 + $0x5b0] sm:$0xff]   ;;  %v3735_v36 = vld [vmem:[%s4740_s1 + $0x578] sm:$0xff]  }
  0x86   :  { %3364 = vmatprep.subr.bf16.mxu1 %v3680_v37  ;;  %2492 = vmatprep.mubr.bf16.mxu0 %v70_v2  ;;  %v3736_v37 = vld [vmem:[%s4740_s1 + $0x5f8] sm:$0xff]   ;;  %v3757_v2 = vld [vmem:[%s4740_s1 + $0x620] sm:$0xff]  }
  0x87   :  { %2532 = vmatprep.mubr.bf16.mxu1 %v72_v3  ;;  %v3758_v3 = vld [vmem:[%s4740_s1 + $0x6a0] sm:$0xff]  }
  0x88   :  { %3343 = vmatpush3.bf16.msra.mxu0 %v3681_v38  ;;  %v3737_v38 = vld [vmem:[%s4740_s1 + $0x538] sm:$0xff]  }
  0x89   :  { %3365 = vmatpush3.bf16.msra.mxu1 %v3682_v39  ;;  %3344 = vmatprep.subr.bf16.mxu0 %v3683_v40  ;;  %v3738_v39 = vld [vmem:[%s4740_s1 + $0x5b8] sm:$0xff]   ;;  %v42_v40 = vld [vmem:[%s4741_s0 + $0xa8] sm:$0xff] }
  0x8a   :  { %3366 = vmatprep.subr.bf16.mxu1 %v3684_v41  ;;  %v74_v41 = vpack.c.bf16 %v42_v40, %v42_v40 }
  0x8c   :  { %3345 = vmatpush3.bf16.msra.mxu0 %v3685_v42  ;;  %v44_v42 = vld [vmem:[%s4741_s0 + $0xb8] sm:$0xff] }
  0x8d   :  { %3367 = vmatpush3.bf16.msra.mxu1 %v3686_v43  ;;  %3346 = vmatprep.subr.bf16.mxu0 %v3687_v44  ;;  %v41_v43 = vld [vmem:[%s4741_s0 + $0xa0] sm:$0xff]  ;;  %v43_v44 = vld [vmem:[%s4741_s0 + $0xb0] sm:$0xff] }
  0x8e   :  { %3368 = vmatprep.subr.bf16.mxu1 %v3688_v45  ;;  %v76_v45 = vpack.c.bf16 %v44_v42, %v44_v42 }
  0x90   :  { %3347 = vmatpush3.bf16.msra.mxu0 %v3689_v46  ;;  %v73_v46 = vpack.c.bf16 %v41_v43, %v41_v43  ;;  %v3787_v43 = vld [vmem:[%s4740_s1 + $0x760] sm:$0xff]  }
  0x91   :  { %3369 = vmatpush3.bf16.msra.mxu1 %v3690_v47  ;;  %3348 = vmatprep.subr.bf16.mxu0 %v3691_v48  ;;  %v75_v47 = vpack.c.bf16 %v43_v44, %v43_v44  ;;  %v3739_v48 = vld [vmem:[%s4740_s1 + $0x640] sm:$0xff]  }
  0x92   :  { %3370 = vmatprep.subr.bf16.mxu1 %v3692_v49  ;;  %v3740_v49 = vld [vmem:[%s4740_s1 + $0x6c0] sm:$0xff]  }
  0x94   :  { %3349 = vmatpush3.bf16.msra.mxu0 %v3693_v50  ;;  %v3741_v50 = vld [vmem:[%s4740_s1 + $0x600] sm:$0xff]  }
  0x95   :  { %3371 = vmatpush3.bf16.msra.mxu1 %v3694_v51  ;;  %3350 = vmatprep.subr.bf16.mxu0 %v3695_v52  ;;  %v3742_v51 = vld [vmem:[%s4740_s1 + $0x680] sm:$0xff]   ;;  %v3743_v52 = vld [vmem:[%s4740_s1 + $0x648] sm:$0xff]  }
  0x96   :  { %3372 = vmatprep.subr.bf16.mxu1 %v3696_v53  ;;  %v3744_v53 = vld [vmem:[%s4740_s1 + $0x6c8] sm:$0xff]  }
  0x98   :  { %3351 = vmatpush3.bf16.msra.mxu0 %v3697_v54  ;;  %v3745_v54 = vld [vmem:[%s4740_s1 + $0x608] sm:$0xff]  }
  0x99   :  { %3373 = vmatpush3.bf16.msra.mxu1 %v3698_v55  ;;  %3352 = vmatprep.subr.bf16.mxu0 %v3699_v56  ;;  %v3746_v55 = vld [vmem:[%s4740_s1 + $0x688] sm:$0xff]   ;;  %v3747_v56 = vld [vmem:[%s4740_s1 + $0x650] sm:$0xff]  }
  0x9a   :  { %3374 = vmatprep.subr.bf16.mxu1 %v3700_v57  ;;  %v3748_v57 = vld [vmem:[%s4740_s1 + $0x6d0] sm:$0xff]  }
  0x9c   :  { %3353 = vmatpush3.bf16.msra.mxu0 %v3701_v58  ;;  %v3749_v58 = vld [vmem:[%s4740_s1 + $0x610] sm:$0xff]  }
  0x9d   :  { %3375 = vmatpush3.bf16.msra.mxu1 %v3702_v59  ;;  %3354 = vmatprep.subr.bf16.mxu0 %v3703_v60  ;;  %v3750_v59 = vld [vmem:[%s4740_s1 + $0x690] sm:$0xff]   ;;  %v3751_v60 = vld [vmem:[%s4740_s1 + $0x658] sm:$0xff]  }
  0x9e   :  { %3376 = vmatprep.subr.bf16.mxu1 %v3704_v61  ;;  %v3752_v61 = vld [vmem:[%s4740_s1 + $0x6d8] sm:$0xff]  }
  0xa0   :  { %3355 = vmatpush3.bf16.msra.mxu0 %v3705_v62  ;;  %v3753_v62 = vld [vmem:[%s4740_s1 + $0x618] sm:$0xff]  }
  0xa1   :  { %3377 = vmatpush3.bf16.msra.mxu1 %v3706_v63  ;;  %3384 = vmatprep.subr.bf16.mxu0 %v3707_v8  ;;  %v3754_v63 = vld [vmem:[%s4740_s1 + $0x698] sm:$0xff]   ;;  %v3763_v8 = vld [vmem:[%s4740_s1 + $0x670] sm:$0xff]  }
  0xa2   :  { %3406 = vmatprep.subr.bf16.mxu1 %v3708_v9  ;;  %v3764_v9 = vld [vmem:[%s4740_s1 + $0x6f0] sm:$0xff]  }
  0xa3   :  { %2493 = vmatmul.mubr.bf16.vlgmr.msra.gmra.mrb[16].mxu0 %v69_v6  ;;  %v3761_v6 = vld [vmem:[%s4740_s1 + $0x628] sm:$0xff]  }
  0xa4   :  { %2533 = vmatmul.mubr.bf16.vlgmr.msra.gmra.mrb[16].mxu1 %v71_v7  ;;  %3385 = vmatpush3.bf16.msra.mxu0 %v3709_v10  ;;  %v3762_v7 = vld [vmem:[%s4740_s1 + $0x6a8] sm:$0xff]   ;;  %v3765_v10 = vld [vmem:[%s4740_s1 + $0x630] sm:$0xff]  }
  0xa5   :  { %3407 = vmatpush3.bf16.msra.mxu1 %v3710_v11  ;;  %3386 = vmatprep.subr.bf16.mxu0 %v3711_v12  ;;  %v3766_v11 = vld [vmem:[%s4740_s1 + $0x6b0] sm:$0xff]   ;;  %v3767_v12 = vld [vmem:[%s4740_s1 + $0x678] sm:$0xff]  }
  0xa6   :  { %3408 = vmatprep.subr.bf16.mxu1 %v3712_v13  ;;  %2572 = vmatprep.mubr.bf16.mxu0 %v74_v41  ;;  %v3768_v13 = vld [vmem:[%s4740_s1 + $0x6f8] sm:$0xff]  }
  0xa7   :  { %2612 = vmatprep.mubr.bf16.mxu1 %v76_v45  ;;  %v3786_v41 = vld [vmem:[%s4740_s1 + $0x798] sm:$0xff]  }
  0xa8   :  { %3387 = vmatpush3.bf16.msra.mxu0 %v3713_v14  ;;  %v3769_v14 = vld [vmem:[%s4740_s1 + $0x638] sm:$0xff]  }
  0xa9   :  { %3409 = vmatpush3.bf16.msra.mxu1 %v3714_v15  ;;  %3388 = vmatprep.subr.bf16.mxu0 %v3715_v16  ;;  %v3770_v15 = vld [vmem:[%s4740_s1 + $0x6b8] sm:$0xff]   ;;  %v46_v16 = vld [vmem:[%s4741_s0 + $0xc8] sm:$0xff] }
  0xaa   :  { %3410 = vmatprep.subr.bf16.mxu1 %v3716_v17  ;;  %v48_v17 = vld [vmem:[%s4741_s0 + $0xd8] sm:$0xff] }
  0xac   :  { %3389 = vmatpush3.bf16.msra.mxu0 %v3717_v18  ;;  %v45_v18 = vld [vmem:[%s4741_s0 + $0xc0] sm:$0xff] }
  0xad   :  { %3411 = vmatpush3.bf16.msra.mxu1 %v3718_v19  ;;  %3390 = vmatprep.subr.bf16.mxu0 %v3719_v20  ;;  %v78_v19 = vpack.c.bf16 %v46_v16, %v46_v16  ;;  %v80_v20 = vpack.c.bf16 %v48_v17, %v48_v17 }
  0xae   :  { %3412 = vmatprep.subr.bf16.mxu1 %v3720_v21  ;;  %v77_v21 = vpack.c.bf16 %v45_v18, %v45_v18 }
  0xb0   :  { %3391 = vmatpush3.bf16.msra.mxu0 %v3721_v22  ;;  %v47_v22 = vld [vmem:[%s4741_s0 + $0xd0] sm:$0xff] }
  0xb1   :  { %3413 = vmatpush3.bf16.msra.mxu1 %v3722_v23  ;;  %3392 = vmatprep.subr.bf16.mxu0 %v3723_v24  ;;  %v79_v23 = vpack.c.bf16 %v47_v22, %v47_v22  ;;  %v3771_v24 = vld [vmem:[%s4740_s1 + $0x740] sm:$0xff]  }
  0xb2   :  { %3414 = vmatprep.subr.bf16.mxu1 %v3724_v25  ;;  %v3772_v25 = vld [vmem:[%s4740_s1 + $0x7c0] sm:$0xff]  }
  0xb4   :  { %3393 = vmatpush3.bf16.msra.mxu0 %v3725_v26  ;;  %v3773_v26 = vld [vmem:[%s4740_s1 + $0x700] sm:$0xff]  }
  0xb5   :  { %3415 = vmatpush3.bf16.msra.mxu1 %v3726_v27  ;;  %3394 = vmatprep.subr.bf16.mxu0 %v3727_v28  ;;  %v3774_v27 = vld [vmem:[%s4740_s1 + $0x780] sm:$0xff]   ;;  %v3775_v28 = vld [vmem:[%s4740_s1 + $0x748] sm:$0xff]  }
  0xb6   :  { %3416 = vmatprep.subr.bf16.mxu1 %v3728_v29  ;;  %v3776_v29 = vld [vmem:[%s4740_s1 + $0x7c8] sm:$0xff]  }
  0xb8   :  { %3395 = vmatpush3.bf16.msra.mxu0 %v3729_v30  ;;  %v3777_v30 = vld [vmem:[%s4740_s1 + $0x708] sm:$0xff]  }
  0xb9   :  { %3417 = vmatpush3.bf16.msra.mxu1 %v3730_v31  ;;  %3396 = vmatprep.subr.bf16.mxu0 %v3731_v32  ;;  %v3778_v31 = vld [vmem:[%s4740_s1 + $0x788] sm:$0xff]   ;;  %v3779_v32 = vld [vmem:[%s4740_s1 + $0x750] sm:$0xff]  }
  0xba   :  { %3418 = vmatprep.subr.bf16.mxu1 %v3732_v33  ;;  %v3780_v33 = vld [vmem:[%s4740_s1 + $0x7d0] sm:$0xff]  }
  0xbc   :  { %3397 = vmatpush3.bf16.msra.mxu0 %v3733_v34  ;;  %v3781_v34 = vld [vmem:[%s4740_s1 + $0x710] sm:$0xff]  }
  0xbd   :  { %3419 = vmatpush3.bf16.msra.mxu1 %v3734_v35  ;;  %3398 = vmatprep.subr.bf16.mxu0 %v3735_v36  ;;  %v3782_v35 = vld [vmem:[%s4740_s1 + $0x790] sm:$0xff]   ;;  %v3783_v36 = vld [vmem:[%s4740_s1 + $0x758] sm:$0xff]  }
  0xbe   :  { %3420 = vmatprep.subr.bf16.mxu1 %v3736_v37  ;;  %v3784_v37 = vld [vmem:[%s4740_s1 + $0x7d8] sm:$0xff]  }
  0xc0   :  { %3399 = vmatpush3.bf16.msra.mxu0 %v3737_v38 }
  0xc1   :  { %3421 = vmatpush3.bf16.msra.mxu1 %v3738_v39  ;;  %3428 = vmatprep.subr.bf16.mxu0 %v3739_v48  ;;  %v3785_v39 = vld [vmem:[%s4740_s1 + $0x718] sm:$0xff]  }
  0xc2   :  { %3450 = vmatprep.subr.bf16.mxu1 %v3740_v49  ;;  %v3789_v49 = vld [vmem:[%s4740_s1 + $0x720] sm:$0xff]  }
  0xc3   :  { %2573 = vmatmul.mubr.bf16.vlgmr.msra.gmra.mrb[20].mxu0 %v73_v46  ;;  %v3788_v46 = vld [vmem:[%s4740_s1 + $0x7e0] sm:$0xff]  }
  0xc4   :  { %2613 = vmatmul.mubr.bf16.vlgmr.msra.gmra.mrb[20].mxu1 %v75_v47  ;;  %3429 = vmatpush3.bf16.msra.mxu0 %v3741_v50 }
  0xc5   :  { %3451 = vmatpush3.bf16.msra.mxu1 %v3742_v51  ;;  %3430 = vmatprep.subr.bf16.mxu0 %v3743_v52  ;;  %v3790_v51 = vld [vmem:[%s4740_s1 + $0x7a0] sm:$0xff]  }
  0xc6   :  { %3452 = vmatprep.subr.bf16.mxu1 %v3744_v53  ;;  %2652 = vmatprep.mubr.bf16.mxu0 %v78_v19  ;;  %v2898_v52 = vld [vmem:[%s4742_s2] ss:$0 sm:$0xff] }
  0xc7   :  { %2692 = vmatprep.mubr.bf16.mxu1 %v80_v20 }
  0xc8   :  { %3431 = vmatpush3.bf16.msra.mxu0 %v3745_v54 }
  0xc9   :  { %3453 = vmatpush3.bf16.msra.mxu1 %v3746_v55  ;;  %3432 = vmatprep.subr.bf16.mxu0 %v3747_v56  ;;  %v3791_v55 = vld [vmem:[%s4740_s1 + $0x768] sm:$0xff]  }
  0xca   :  { %3454 = vmatprep.subr.bf16.mxu1 %v3748_v57  ;;  %v3792_v57 = vld [vmem:[%s4740_s1 + $0x7e8] sm:$0xff]  }
  0xcc   :  { %3433 = vmatpush3.bf16.msra.mxu0 %v3749_v58 }
  0xcd   :  { %3455 = vmatpush3.bf16.msra.mxu1 %v3750_v59  ;;  %3434 = vmatprep.subr.bf16.mxu0 %v3751_v60  ;;  %v3793_v59 = vld [vmem:[%s4740_s1 + $0x728] sm:$0xff]  }
  0xce   :  { %3456 = vmatprep.subr.bf16.mxu1 %v3752_v61  ;;  %v3794_v60 = vld [vmem:[%s4740_s1 + $0x7a8] sm:$0xff]   ;;  %v3795_v61 = vld [vmem:[%s4740_s1 + $0x770] sm:$0xff]  }
  0xd0   :  { %3435 = vmatpush3.bf16.msra.mxu0 %v3753_v62  ;;  %v3796_v62 = vld [vmem:[%s4740_s1 + $0x7f0] sm:$0xff]  }
  0xd1   :  { %3457 = vmatpush3.bf16.msra.mxu1 %v3754_v63  ;;  %3436 = vmatprep.subr.bf16.mxu0 %v3755_v0  ;;  %v3797_v63 = vld [vmem:[%s4740_s1 + $0x730] sm:$0xff]  }
  0xd2   :  { %3458 = vmatprep.subr.bf16.mxu1 %v3756_v1  ;;  %v3798_v0 = vld [vmem:[%s4740_s1 + $0x7b0] sm:$0xff]   ;;  %v3799_v1 = vld [vmem:[%s4740_s1 + $0x778] sm:$0xff]  }
  0xd4   :  { %3437 = vmatpush3.bf16.msra.mxu0 %v3757_v2  ;;  %v3800_v2 = vld [vmem:[%s4740_s1 + $0x7f8] sm:$0xff]  }
  0xd5   :  { %3459 = vmatpush3.bf16.msra.mxu1 %v3758_v3  ;;  %3438 = vmatprep.subr.bf16.mxu0 %v3759_v4  ;;  %v3801_v3 = vld [vmem:[%s4740_s1 + $0x738] sm:$0xff]  }
  0xd6   :  { %3460 = vmatprep.subr.bf16.mxu1 %v3760_v5  ;;  %v3802_v4 = vld [vmem:[%s4740_s1 + $0x7b8] sm:$0xff]   ;;  %v50_v5 = vld [vmem:[%s4741_s0 + $0xe8] sm:$0xff] }
  0xd8   :  { %3439 = vmatpush3.bf16.msra.mxu0 %v3761_v6  ;;  %v82_v6 = vpack.c.bf16 %v50_v5, %v50_v5 }
  0xd9   :  { %3461 = vmatpush3.bf16.msra.mxu1 %v3762_v7  ;;  %3440 = vmatprep.subr.bf16.mxu0 %v3763_v8  ;;  %v52_v7 = vld [vmem:[%s4741_s0 + $0xf8] sm:$0xff]  ;;  %v49_v8 = vld [vmem:[%s4741_s0 + $0xe0] sm:$0xff] }
  0xda   :  { %3462 = vmatprep.subr.bf16.mxu1 %v3764_v9  ;;  %v51_v9 = vld [vmem:[%s4741_s0 + $0xf0] sm:$0xff] }
  0xdc   :  { %3441 = vmatpush3.bf16.msra.mxu0 %v3765_v10  ;;  %v84_v10 = vpack.c.bf16 %v52_v7, %v52_v7 }
  0xdd   :  { %3463 = vmatpush3.bf16.msra.mxu1 %v3766_v11  ;;  %3442 = vmatprep.subr.bf16.mxu0 %v3767_v12  ;;  %v81_v11 = vpack.c.bf16 %v49_v8, %v49_v8  ;;  %v83_v12 = vpack.c.bf16 %v51_v9, %v51_v9 }
  0xde   :  { %3464 = vmatprep.subr.bf16.mxu1 %v3768_v13 }
  0xe0   :  { %3443 = vmatpush3.bf16.msra.mxu0 %v3769_v14 }
  0xe1   :  { %3465 = vmatpush3.bf16.msra.mxu1 %v3770_v15  ;;  %3472 = vmatprep.subr.bf16.mxu0 %v3771_v24 }
  0xe2   :  { %3494 = vmatprep.subr.bf16.mxu1 %v3772_v25 }
  0xe3   :  { %2653 = vmatmul.mubr.bf16.vlgmr.msra.gmra.mrb[24].mxu0 %v77_v21 }
  0xe4   :  { %2693 = vmatmul.mubr.bf16.vlgmr.msra.gmra.mrb[24].mxu1 %v79_v23  ;;  %3473 = vmatpush3.bf16.msra.mxu0 %v3773_v26 }
  0xe5   :  { %3495 = vmatpush3.bf16.msra.mxu1 %v3774_v27  ;;  %3474 = vmatprep.subr.bf16.mxu0 %v3775_v28 }
  0xe6   :  { %3496 = vmatprep.subr.bf16.mxu1 %v3776_v29  ;;  %2732 = vmatprep.mubr.bf16.mxu0 %v82_v6 }
  0xe7   :  { %2772 = vmatprep.mubr.bf16.mxu1 %v84_v10 }
  0xe8   :  { %3475 = vmatpush3.bf16.msra.mxu0 %v3777_v30 }
  0xe9   :  { %3497 = vmatpush3.bf16.msra.mxu1 %v3778_v31  ;;  %3476 = vmatprep.subr.bf16.mxu0 %v3779_v32 }
  0xea   :  { %3498 = vmatprep.subr.bf16.mxu1 %v3780_v33 }
  0xec   :  { %3477 = vmatpush3.bf16.msra.mxu0 %v3781_v34 }
  0xed   :  { %3499 = vmatpush3.bf16.msra.mxu1 %v3782_v35  ;;  %3478 = vmatprep.subr.bf16.mxu0 %v3783_v36 }
  0xee   :  { %3500 = vmatprep.subr.bf16.mxu1 %v3784_v37  ;;  %v3811_v37 = vmov 0.0  }
  0xf0   :  { %3479 = vmatpush3.bf16.msra.mxu0 %v3785_v39  ;;  %v3804_v39 = vld [vmem:[%s4743_s3 + $0x8] sm:$0xff]  }
  0xf1   :  { %3501 = vmatpush3.bf16.msra.mxu1 %v3786_v41  ;;  %3480 = vmatprep.subr.bf16.mxu0 %v3787_v43  ;;  %v3806_v41 = vld [vmem:[%s4743_s3 + $0x18] sm:$0xff]  }
  0xf2   :  { %3502 = vmatprep.subr.bf16.mxu1 %v3788_v46 }
  0xf4   :  { %3481 = vmatpush3.bf16.msra.mxu0 %v3789_v49 }
  0xf5   :  { %3503 = vmatpush3.bf16.msra.mxu1 %v3790_v51  ;;  %3482 = vmatprep.subr.bf16.mxu0 %v3791_v55 }
  0xf6   :  { %v3180_v38 = vpop.f32.mrb[0].mxu0  ;;  %3504 = vmatprep.subr.bf16.mxu1 %v3792_v57  ;;  %v3810_v57 = vld [vmem:[%s4743_s3 + $0x38] sm:$0xff]  }
  0xf7   :  { %v3202_v40 = vpop.f32.mrb[0].mxu1  ;;  %v3181_v42 = vpop.f32.mrb[1].mxu0 }
  0xf8   :  { %v3182_v44 = vadd.f32 %v3181_v42, %v3180_v38  ;;  %v3203_v45 = vpop.f32.mrb[1].mxu1  ;;  %v3183_v48 = vpop.f32.mrb[2].mxu0  ;;  %3483 = vmatpush3.bf16.msra.mxu0 %v3793_v59  ;;  %v3803_v38 = vld [vmem:[%s4743_s3] sm:$0xff]  }
  0xf9   :  { %v3204_v47 = vadd.f32 %v3203_v45, %v3202_v40  ;;  %v3205_v50 = vpop.f32.mrb[2].mxu1  ;;  %v3184_v53 = vpop.f32.mrb[3].mxu0  ;;  %3505 = vmatpush3.bf16.msra.mxu1 %v3794_v60  ;;  %3484 = vmatprep.subr.bf16.mxu0 %v3795_v61  ;;  %v3805_v40 = vld [vmem:[%s4743_s3 + $0x10] sm:$0xff]   ;;  %v3807_v42 = vld [vmem:[%s4743_s3 + $0x20] sm:$0xff]  }
  0xfa   :  { %v2175_v54 = vadd.f32 %v3182_v44, %v2898_v52  ;;  %v3206_v56 = vpop.f32.mrb[3].mxu1  ;;  %3506 = vmatprep.subr.bf16.mxu1 %v3796_v62 }
  0xfb   :  { %v3809_v56 = vld [vmem:[%s4743_s3 + $0x30] sm:$0xff]  }
  0xfc   :  { %v2215_v58 = vadd.f32 %v3204_v47, %v2175_v54  ;;  %3485 = vmatpush3.bf16.msra.mxu0 %v3797_v63  ;;  %v3808_v54 = vld [vmem:[%s4743_s3 + $0x28] sm:$0xff]  }
  0xfd   :  { %3507 = vmatpush3.bf16.msra.mxu1 %v3798_v0  ;;  %3486 = vmatprep.subr.bf16.mxu0 %v3799_v1 }
  0xfe   :  { %3508 = vmatprep.subr.bf16.mxu1 %v3800_v2 }
 0x100   :  { %3487 = vmatpush3.bf16.msra.mxu0 %v3801_v3 }
 0x101   :  { %3509 = vmatpush3.bf16.msra.mxu1 %v3802_v4  ;;  %3525 = vmatprep.subr.bf16.mxu0 %v3811_v37 }
 0x103   :  { %2733 = vmatmul.mubr.bf16.vlgmr.msra.gmra.mrb[28].mxu0 %v81_v11 }
 0x104   :  { %2773 = vmatmul.mubr.bf16.vlgmr.msra.gmra.mrb[28].mxu1 %v83_v12  ;;  %3526 = vmatpush3.bf16.msra.mxu0 %v3803_v38 }
 0x105   :  { %3527 = vmatprep.subr.bf16.mxu0 %v3811_v37  ;;  %3541 = vmatprep.mubr.msk.bf16.mxu0 %vm3812_vm0, %v3811_v37 }
 0x108   :  { %3528 = vmatpush3.bf16.msra.mxu0 %v3804_v39 }
 0x109   :  { %3529 = vmatprep.subr.bf16.mxu0 %v3811_v37 }
 0x10c   :  { %3530 = vmatpush3.bf16.msra.mxu0 %v3805_v40 }
 0x10d   :  { %3531 = vmatprep.subr.bf16.mxu0 %v3811_v37 }
 0x110   :  { %3532 = vmatpush3.bf16.msra.mxu0 %v3806_v41 }
 0x111   :  { %3533 = vmatprep.subr.bf16.mxu0 %v3811_v37 }
 0x114   :  { %3534 = vmatpush3.bf16.msra.mxu0 %v3807_v42 }
 0x115   :  { %3535 = vmatprep.subr.bf16.mxu0 %v3811_v37 }
 0x116   :  { %v3224_v13 = vpop.f32.mrb[4].mxu0 }
 0x117   :  { %v3246_v14 = vpop.f32.mrb[4].mxu1  ;;  %v3225_v15 = vpop.f32.mrb[5].mxu0 }
 0x118   :  { %v3226_v16 = vadd.f32 %v3225_v15, %v3224_v13  ;;  %v3247_v17 = vpop.f32.mrb[5].mxu1  ;;  %v3227_v18 = vpop.f32.mrb[6].mxu0  ;;  %3536 = vmatpush3.bf16.msra.mxu0 %v3808_v54 }
 0x119   :  { %v3248_v19 = vadd.f32 %v3247_v17, %v3246_v14  ;;  %v3249_v20 = vpop.f32.mrb[6].mxu1  ;;  %v3228_v21 = vpop.f32.mrb[7].mxu0  ;;  %3537 = vmatprep.subr.bf16.mxu0 %v3811_v37 }
 0x11a   :  { %v2255_v22 = vadd.f32 %v3226_v16, %v2215_v58  ;;  %v3250_v23 = vpop.f32.mrb[7].mxu1 }
 0x11c   :  { %v2295_v24 = vadd.f32 %v3248_v19, %v2255_v22  ;;  %3538 = vmatpush3.bf16.msra.mxu0 %v3809_v56 }
 0x11d   :  { %3539 = vmatprep.subr.bf16.mxu0 %v3811_v37 }
 0x120   :  { %3540 = vmatpush3.bf16.msra.mxu0 %v3810_v57 }
 0x136   :  { %v3268_v25 = vpop.f32.mrb[8].mxu0 }
 0x137   :  { %v3290_v26 = vpop.f32.mrb[8].mxu1  ;;  %v3269_v27 = vpop.f32.mrb[9].mxu0 }
 0x138   :  { %v3270_v28 = vadd.f32 %v3269_v27, %v3268_v25  ;;  %v3291_v29 = vpop.f32.mrb[9].mxu1  ;;  %v3271_v30 = vpop.f32.mrb[10].mxu0 }
 0x139   :  { %v3292_v31 = vadd.f32 %v3291_v29, %v3290_v26  ;;  %v3293_v32 = vpop.f32.mrb[10].mxu1  ;;  %v3272_v33 = vpop.f32.mrb[11].mxu0 }
 0x13a   :  { %v2335_v34 = vadd.f32 %v3270_v28, %v2295_v24  ;;  %v3294_v35 = vpop.f32.mrb[11].mxu1 }
 0x13c   :  { %v2375_v36 = vadd.f32 %v3292_v31, %v2335_v34 }
 0x156   :  { %v3312_v43 = vpop.f32.mrb[12].mxu0 }
 0x157   :  { %v3334_v44 = vpop.f32.mrb[12].mxu1  ;;  %v3313_v45 = vpop.f32.mrb[13].mxu0 }
 0x158   :  { %v3335_v46 = vpop.f32.mrb[13].mxu1  ;;  %v3314_v47 = vadd.f32 %v3313_v45, %v3312_v43  ;;  %v3315_v49 = vpop.f32.mrb[14].mxu0 }
 0x159   :  { %v3336_v48 = vadd.f32 %v3335_v46, %v3334_v44  ;;  %v3337_v50 = vpop.f32.mrb[14].mxu1  ;;  %v3316_v51 = vpop.f32.mrb[15].mxu0  ;;  %v3155_v44 = vld [vmem:[%s4744_s4] ss:$0 sm:$0xff] }
 0x15a   :  { %v3338_v52 = vpop.f32.mrb[15].mxu1  ;;  %v2415_v53 = vadd.f32 %v3314_v47, %v2375_v36 }
 0x15c   :  { %v2455_v55 = vadd.f32 %v3336_v48, %v2415_v53 }
 0x176   :  { %v3356_v58 = vpop.f32.mrb[16].mxu0 }
 0x177   :  { %v3378_v59 = vpop.f32.mrb[16].mxu1  ;;  %v3357_v60 = vpop.f32.mrb[17].mxu0 }
 0x178   :  { %v3358_v61 = vadd.f32 %v3357_v60, %v3356_v58  ;;  %v3379_v62 = vpop.f32.mrb[17].mxu1  ;;  %v3359_v63 = vpop.f32.mrb[18].mxu0 }
 0x179   :  { %v3380_v0 = vadd.f32 %v3379_v62, %v3378_v59  ;;  %v3381_v1 = vpop.f32.mrb[18].mxu1  ;;  %v3360_v2 = vpop.f32.mrb[19].mxu0 }
 0x17a   :  { %v2495_v3 = vadd.f32 %v3358_v61, %v2455_v55  ;;  %v3382_v4 = vpop.f32.mrb[19].mxu1 }
 0x17c   :  { %v2535_v5 = vadd.f32 %v3380_v0, %v2495_v3 }
 0x196   :  { %v3400_v6 = vpop.f32.mrb[20].mxu0 }
 0x197   :  { %v3422_v7 = vpop.f32.mrb[20].mxu1  ;;  %v3401_v8 = vpop.f32.mrb[21].mxu0 }
 0x198   :  { %v3402_v9 = vadd.f32 %v3401_v8, %v3400_v6  ;;  %v3423_v10 = vpop.f32.mrb[21].mxu1  ;;  %v3403_v11 = vpop.f32.mrb[22].mxu0 }
 0x199   :  { %v3424_v12 = vadd.f32 %v3423_v10, %v3422_v7  ;;  %v3425_v13 = vpop.f32.mrb[22].mxu1  ;;  %v3404_v14 = vpop.f32.mrb[23].mxu0 }
 0x19a   :  { %v2575_v15 = vadd.f32 %v3402_v9, %v2535_v5  ;;  %v3426_v16 = vpop.f32.mrb[23].mxu1 }
 0x19c   :  { %v2615_v17 = vadd.f32 %v3424_v12, %v2575_v15 }
 0x1b6   :  { %v3444_v18 = vpop.f32.mrb[24].mxu0 }
 0x1b7   :  { %v3466_v19 = vpop.f32.mrb[24].mxu1  ;;  %v3445_v20 = vpop.f32.mrb[25].mxu0 }
 0x1b8   :  { %v3467_v21 = vpop.f32.mrb[25].mxu1  ;;  %v3446_v22 = vadd.f32 %v3445_v20, %v3444_v18  ;;  %v3447_v24 = vpop.f32.mrb[26].mxu0 }
 0x1b9   :  { %v3468_v23 = vadd.f32 %v3467_v21, %v3466_v19  ;;  %v3469_v25 = vpop.f32.mrb[26].mxu1  ;;  %v3448_v26 = vpop.f32.mrb[27].mxu0 }
 0x1ba   :  { %v3470_v27 = vpop.f32.mrb[27].mxu1  ;;  %v2655_v28 = vadd.f32 %v3446_v22, %v2615_v17 }
 0x1bc   :  { %v2695_v29 = vadd.f32 %v3468_v23, %v2655_v28 }
 0x1d6   :  { %v3488_v30 = vpop.f32.mrb[28].mxu0 }
 0x1d7   :  { %v3510_v31 = vpop.f32.mrb[28].mxu1  ;;  %v3489_v32 = vpop.f32.mrb[29].mxu0 }
 0x1d8   :  { %v3490_v33 = vadd.f32 %v3489_v32, %v3488_v30  ;;  %v3511_v34 = vpop.f32.mrb[29].mxu1  ;;  %v3491_v35 = vpop.f32.mrb[30].mxu0 }
 0x1d9   :  { %v3512_v36 = vadd.f32 %v3511_v34, %v3510_v31  ;;  %v3513_v37 = vpop.f32.mrb[30].mxu1  ;;  %v3492_v38 = vpop.f32.mrb[31].mxu0 }
 0x1da   :  { %v2735_v39 = vadd.f32 %v3490_v33, %v2695_v29  ;;  %v3514_v40 = vpop.f32.mrb[31].mxu1 }
 0x1dc   :  { %v2775_v41 = vadd.f32 %v3512_v36, %v2735_v39 }
 0x1de   :  { %v2780_v42 = vmax.f32 %v2775_v41, 0.0 }
 0x1e0   :  { %v2781_v43 = vpack.c.bf16 %v2780_v42, %v2780_v42 }
 0x1e2   :  { %3542 = vmatmul.mubr.bf16.vlgmr.msra.gmra.mrb[32].mxu0 %v2781_v43 }
 0x2b5   :  { %v2887_v45 = vpop.f32.mrb[32].mxu0 }
 0x2b6   :  { %v2888_v46 = vadd.f32 %v3155_v44, %v2887_v45  ;;  %v3543_v47 = vpop.f32.mrb[33].mxu0 }
 0x2b7   :  { %v2890_v48 = vpop.f32.mrb[34].mxu0 }
 0x2b8   :  { %2893 = vst [vmem:[%s4745_s5] sm:$0xff] %v2888_v46  ;;  %v3544_v49 = vpop.f32.mrb[35].mxu0 }

// kernel: cnn_forward.2
= control target key start
LH: loop header
LB: loop body
LE: loop exit
PB: predicated region body
PF: predicated region fallthrough
CT: control target
= control target key end

     0   :  { %vm932_vm0 = vcmask 130048   ;;  %vm2630_vm1 = vcmask 261120   ;;  %v11597_v36 = vmov 0.0   ;;  %vm8797_vm4 = vcmask 523264   ;;  %s13765_s1 = inlined_call_operand.vmem [shape: bf16[16,32], index: 1, kind: input, shape index: {}]   ;;  %s13766_s0 = inlined_call_operand.vmem [shape: bf16[2048,16], index: 0, kind: input, shape index: {}]   ;;  %s13767_s2 = inlined_call_operand.vmem [shape: f32[1,32], index: 2, kind: input, shape index: {}]   ;;  %s13768_s3 = inlined_call_operand.vmem [shape: bf16[288,64], index: 3, kind: input, shape index: {}]   ;;  %s13769_s4 = inlined_call_operand.vmem [shape: f32[1,64], index: 4, kind: input, shape index: {}]   ;;  %s13770_s5 = inlined_call_operand.vmem [shape: f32[16,8,64], index: 5, kind: output, shape index: {}]  }
   0x1   :  { %v11444_v0 = vld [vmem:[%s13765_s1] sm:$0xff]   ;;  %v11446_v2 = vld [vmem:[%s13766_s0 + $0x8] sm:$0xff]   ;;  %v11447_v3 = vld [vmem:[%s13766_s0 + $0x10] sm:$0xff]   ;;  %3669 = vst.msk [vmem:[#allocation3] sm:$0xff] %vm2630_vm1, %v11597_v36 }
   0x2   :  { %v11445_v1 = vld [vmem:[%s13766_s0] sm:$0xff]   ;;  %10057 = vmatprep.subr.bf16.mxu0 %v11444_v0  ;;  %v11448_v4 = vld [vmem:[%s13766_s0 + $0x18] sm:$0xff]   ;;  %v11450_v6 = vld [vmem:[%s13766_s0 + $0x28] sm:$0xff]   ;;  %3670 = vst.msk [vmem:[#allocation3 + $0x8] sm:$0xff] %vm2630_vm1, %v11597_v36 }
   0x3   :  { %10058 = vmatpush3.bf16.msra.mxu0 %v11444_v0  ;;  %10059 = vmatprep.mubr.msk.bf16.mxu0 %vm932_vm0, %v11445_v1  ;;  %v11449_v5 = vld [vmem:[%s13766_s0 + $0x20] sm:$0xff]   ;;  %v11451_v7 = vld [vmem:[%s13766_s0 + $0x30] sm:$0xff]   ;;  %v11452_v8 = vld [vmem:[%s13766_s0 + $0x38] sm:$0xff]   ;;  %3699 = vst.msk [vmem:[#allocation3 + $0xf0] sm:$0xff] %vm2630_vm1, %v11597_v36 }
   0x4   :  { %v11453_v9 = vld [vmem:[%s13766_s0 + $0x40] sm:$0xff]   ;;  %v11454_v10 = vld [vmem:[%s13766_s0 + $0x48] sm:$0xff]   ;;  %v11455_v11 = vld [vmem:[%s13766_s0 + $0x50] sm:$0xff]   ;;  %3700 = vst.msk [vmem:[#allocation3 + $0xf8] sm:$0xff] %vm2630_vm1, %v11597_v36 }
   0x5   :  { %v11456_v12 = vld [vmem:[%s13766_s0 + $0x58] sm:$0xff]   ;;  %v11457_v13 = vld [vmem:[%s13766_s0 + $0x60] sm:$0xff]   ;;  %v11458_v14 = vld [vmem:[%s13766_s0 + $0x68] sm:$0xff]   ;;  %3701 = vst.msk [vmem:[#allocation3 + $0x100] sm:$0xff] %vm2630_vm1, %v11597_v36 }
   0x6   :  { %10060 = vmatmul.mubr.msk.bf16.vlgmr.msra.gmra.mrb[0].mxu0 %vm932_vm0, %v11446_v2  ;;  %v11459_v15 = vld [vmem:[%s13766_s0 + $0x70] sm:$0xff]   ;;  %v11460_v16 = vld [vmem:[%s13766_s0 + $0x78] sm:$0xff]   ;;  %v11461_v17 = vld [vmem:[%s13766_s0 + $0x80] sm:$0xff]   ;;  %3702 = vst.msk [vmem:[#allocation3 + $0x108] sm:$0xff] %vm2630_vm1, %v11597_v36 }
   0x7   :  { %10063 = vmatprep.mubr.msk.bf16.mxu0 %vm932_vm0, %v11447_v3  ;;  %v11462_v18 = vld [vmem:[%s13766_s0 + $0x88] sm:$0xff]   ;;  %v11463_v19 = vld [vmem:[%s13766_s0 + $0x90] sm:$0xff]   ;;  %v11464_v20 = vld [vmem:[%s13766_s0 + $0x98] sm:$0xff]   ;;  %3731 = vst.msk [vmem:[#allocation3 + $0x1f0] sm:$0xff] %vm2630_vm1, %v11597_v36 }
   0x8   :  { %v11465_v21 = vld [vmem:[%s13766_s0 + $0xa0] sm:$0xff]   ;;  %v11466_v22 = vld [vmem:[%s13766_s0 + $0xa8] sm:$0xff]   ;;  %v11467_v23 = vld [vmem:[%s13766_s0 + $0xb0] sm:$0xff]   ;;  %3732 = vst.msk [vmem:[#allocation3 + $0x1f8] sm:$0xff] %vm2630_vm1, %v11597_v36 }
   0x9   :  { %v11468_v24 = vld [vmem:[%s13766_s0 + $0xb8] sm:$0xff]   ;;  %v11469_v25 = vld [vmem:[%s13766_s0 + $0xc0] sm:$0xff]   ;;  %v11470_v26 = vld [vmem:[%s13766_s0 + $0xc8] sm:$0xff]   ;;  %3733 = vst.msk [vmem:[#allocation3 + $0x200] sm:$0xff] %vm2630_vm1, %v11597_v36 }
   0xa   :  { %v11471_v27 = vld [vmem:[%s13766_s0 + $0xd0] sm:$0xff]   ;;  %v11472_v28 = vld [vmem:[%s13766_s0 + $0xd8] sm:$0xff]   ;;  %v11473_v29 = vld [vmem:[%s13766_s0 + $0xe0] sm:$0xff]   ;;  %3734 = vst.msk [vmem:[#allocation3 + $0x208] sm:$0xff] %vm2630_vm1, %v11597_v36 }
   0xb   :  { %v11474_v30 = vld [vmem:[%s13766_s0 + $0xe8] sm:$0xff]   ;;  %v11475_v31 = vld [vmem:[%s13766_s0 + $0xf0] sm:$0xff]   ;;  %v11476_v32 = vld [vmem:[%s13766_s0 + $0xf8] sm:$0xff]   ;;  %3735 = vst.msk [vmem:[#allocation3 + $0x210] sm:$0xff] %vm2630_vm1, %v11597_v36 }
   0xc   :  { %v11477_v33 = vld [vmem:[%s13766_s0 + $0x100] sm:$0xff]   ;;  %v11478_v34 = vld [vmem:[%s13766_s0 + $0x108] sm:$0xff]   ;;  %v11479_v35 = vld [vmem:[%s13766_s0 + $0x110] sm:$0xff]   ;;  %3736 = vst.msk [vmem:[#allocation3 + $0x218] sm:$0xff] %vm2630_vm1, %v11597_v36 }
   0xd   :  { %3737 = vst.msk [vmem:[#allocation3 + $0x220] sm:$0xff] %vm2630_vm1, %v11597_v36  ;;  %v11480_v37 = vld [vmem:[%s13766_s0 + $0x118] sm:$0xff]   ;;  %v11481_v38 = vld [vmem:[%s13766_s0 + $0x120] sm:$0xff]   ;;  %v11482_v39 = vld [vmem:[%s13766_s0 + $0x128] sm:$0xff]  }
   0xe   :  { %10064 = vmatmul.mubr.msk.bf16.gmra.mrb[4].mxu0 %vm932_vm0, %v11448_v4  ;;  %v11483_v40 = vld [vmem:[%s13766_s0 + $0x130] sm:$0xff]   ;;  %v11484_v41 = vld [vmem:[%s13766_s0 + $0x138] sm:$0xff]   ;;  %v11485_v42 = vld [vmem:[%s13766_s0 + $0x140] sm:$0xff]  }
   0xf   :  { %10067 = vmatprep.mubr.msk.bf16.mxu0 %vm932_vm0, %v11449_v5  ;;  %v11486_v43 = vld [vmem:[%s13766_s0 + $0x148] sm:$0xff]   ;;  %v11487_v44 = vld [vmem:[%s13766_s0 + $0x150] sm:$0xff]   ;;  %v11488_v45 = vld [vmem:[%s13766_s0 + $0x158] sm:$0xff]  }
  0x10   :  { %v11489_v46 = vld [vmem:[%s13766_s0 + $0x160] sm:$0xff]   ;;  %v11490_v47 = vld [vmem:[%s13766_s0 + $0x168] sm:$0xff]   ;;  %v11491_v48 = vld [vmem:[%s13766_s0 + $0x170] sm:$0xff]  }
  0x11   :  { %v11492_v49 = vld [vmem:[%s13766_s0 + $0x178] sm:$0xff]   ;;  %v11493_v50 = vld [vmem:[%s13766_s0 + $0x180] sm:$0xff]   ;;  %v11494_v51 = vld [vmem:[%s13766_s0 + $0x188] sm:$0xff]  }
  0x12   :  { %v11495_v52 = vld [vmem:[%s13766_s0 + $0x190] sm:$0xff]   ;;  %v11496_v53 = vld [vmem:[%s13766_s0 + $0x198] sm:$0xff]   ;;  %v11497_v54 = vld [vmem:[%s13766_s0 + $0x1a0] sm:$0xff]  }
  0x13   :  { %v11498_v55 = vld [vmem:[%s13766_s0 + $0x1a8] sm:$0xff]   ;;  %v11499_v56 = vld [vmem:[%s13766_s0 + $0x1b0] sm:$0xff]   ;;  %v11866_v57 = vld [vmem:[%s13767_s2] ss:$0 sm:$0xff] }
  0x14   :  { %v11500_v60 = vld [vmem:[%s13766_s0 + $0x1b8] sm:$0xff]   ;;  %v11501_v62 = vld [vmem:[%s13766_s0 + $0x1c0] sm:$0xff]   ;;  %v11502_v2 = vld [vmem:[%s13766_s0 + $0x1c8] sm:$0xff]  }
  0x15   :  { %v11503_v4 = vld [vmem:[%s13766_s0 + $0x1d0] sm:$0xff]  }
  0x16   :  { %10068 = vmatmul.mubr.msk.bf16.gmra.mrb[8].mxu0 %vm932_vm0, %v11450_v6 }
  0x17   :  { %10071 = vmatprep.mubr.msk.bf16.mxu0 %vm932_vm0, %v11451_v7 }
  0x1e   :  { %10072 = vmatmul.mubr.msk.bf16.gmra.mrb[12].mxu0 %vm932_vm0, %v11452_v8 }
  0x1f   :  { %10075 = vmatprep.mubr.msk.bf16.mxu0 %vm932_vm0, %v11453_v9  ;;  %v11504_v9 = vld [vmem:[%s13766_s0 + $0x1d8] sm:$0xff]  }
  0x26   :  { %10076 = vmatmul.mubr.msk.bf16.gmra.mrb[16].mxu0 %vm932_vm0, %v11454_v10 }
  0x27   :  { %10079 = vmatprep.mubr.msk.bf16.mxu0 %vm932_vm0, %v11455_v11 }
  0x2e   :  { %10080 = vmatmul.mubr.msk.bf16.gmra.mrb[20].mxu0 %vm932_vm0, %v11456_v12  ;;  %v11505_v12 = vld [vmem:[%s13766_s0 + $0x1e0] sm:$0xff]  }
  0x2f   :  { %10083 = vmatprep.mubr.msk.bf16.mxu0 %vm932_vm0, %v11457_v13 }
  0x36   :  { %10084 = vmatmul.mubr.msk.bf16.gmra.mrb[24].mxu0 %vm932_vm0, %v11458_v14 }
  0x37   :  { %10087 = vmatprep.mubr.msk.bf16.mxu0 %vm932_vm0, %v11459_v15 }
  0x3e   :  { %10088 = vmatmul.mubr.msk.bf16.gmra.mrb[28].mxu0 %vm932_vm0, %v11460_v16 }
  0x3f   :  { %10091 = vmatprep.mubr.msk.bf16.mxu0 %vm932_vm0, %v11461_v17 }
  0x46   :  { %10092 = vmatmul.mubr.msk.bf16.gmra.mrb[32].mxu0 %vm932_vm0, %v11462_v18 }
  0x47   :  { %10095 = vmatprep.mubr.msk.bf16.mxu0 %vm932_vm0, %v11463_v19 }
  0x4e   :  { %10096 = vmatmul.mubr.msk.bf16.gmra.mrb[36].mxu0 %vm932_vm0, %v11464_v20 }
  0x4f   :  { %10099 = vmatprep.mubr.msk.bf16.mxu0 %vm932_vm0, %v11465_v21 }
  0x56   :  { %10100 = vmatmul.mubr.msk.bf16.gmra.mrb[40].mxu0 %vm932_vm0, %v11466_v22 }
  0x57   :  { %10103 = vmatprep.mubr.msk.bf16.mxu0 %vm932_vm0, %v11467_v23  ;;  %v11506_v23 = vld [vmem:[%s13766_s0 + $0x1e8] sm:$0xff]  }
  0x5e   :  { %10104 = vmatmul.mubr.msk.bf16.gmra.mrb[44].mxu0 %vm932_vm0, %v11468_v24 }
  0x5f   :  { %10107 = vmatprep.mubr.msk.bf16.mxu0 %vm932_vm0, %v11469_v25 }
  0x66   :  { %10108 = vmatmul.mubr.msk.bf16.gmra.mrb[48].mxu0 %vm932_vm0, %v11470_v26  ;;  %v11507_v26 = vld [vmem:[%s13766_s0 + $0x1f0] sm:$0xff]  }
  0x67   :  { %10111 = vmatprep.mubr.msk.bf16.mxu0 %vm932_vm0, %v11471_v27 }
  0x6e   :  { %10112 = vmatmul.mubr.msk.bf16.gmra.mrb[52].mxu0 %vm932_vm0, %v11472_v28 }
  0x6f   :  { %10115 = vmatprep.mubr.msk.bf16.mxu0 %vm932_vm0, %v11473_v29 }
  0x76   :  { %10116 = vmatmul.mubr.msk.bf16.gmra.mrb[56].mxu0 %vm932_vm0, %v11474_v30 }
  0x77   :  { %10119 = vmatprep.mubr.msk.bf16.mxu0 %vm932_vm0, %v11475_v31  ;;  %v3590_v31 = vlaneseq }
  0x7e   :  { %10120 = vmatmul.mubr.msk.bf16.gmra.mrb[60].mxu0 %vm932_vm0, %v11476_v32 }
  0x7f   :  { %10123 = vmatprep.mubr.msk.bf16.mxu0 %vm932_vm0, %v11477_v33 }
  0x86   :  { %10124 = vmatmul.mubr.msk.bf16.gmra.mrb[64].mxu0 %vm932_vm0, %v11478_v34 }
  0x87   :  { %10127 = vmatprep.mubr.msk.bf16.mxu0 %vm932_vm0, %v11479_v35  ;;  %v11916_v35 = vshrl.u32 %v3590_v31, 7 }
  0x89   :  { %vm3593_vm3 = vcmp.ge.s32.totalorder %v11916_v35, 1 }
  0x8e   :  { %10128 = vmatmul.mubr.msk.bf16.gmra.mrb[68].mxu0 %vm932_vm0, %v11480_v37 }
  0x8f   :  { %10131 = vmatprep.mubr.msk.bf16.mxu0 %vm932_vm0, %v11481_v38 }
  0x96   :  { %10132 = vmatmul.mubr.msk.bf16.gmra.mrb[72].mxu0 %vm932_vm0, %v11482_v39  ;;  %v11508_v39 = vld [vmem:[%s13766_s0 + $0x1f8] sm:$0xff]  }
  0x97   :  { %10135 = vmatprep.mubr.msk.bf16.mxu0 %vm932_vm0, %v11483_v40 }
  0x9e   :  { %10136 = vmatmul.mubr.msk.bf16.gmra.mrb[76].mxu0 %vm932_vm0, %v11484_v41 }
  0x9f   :  { %10139 = vmatprep.mubr.msk.bf16.mxu0 %vm932_vm0, %v11485_v42  ;;  %v11509_v42 = vld [vmem:[%s13766_s0 + $0x200] sm:$0xff]  }
  0xa6   :  { %10140 = vmatmul.mubr.msk.bf16.gmra.mrb[80].mxu0 %vm932_vm0, %v11486_v43 }
  0xa7   :  { %10143 = vmatprep.mubr.msk.bf16.mxu0 %vm932_vm0, %v11487_v44 }
  0xae   :  { %10144 = vmatmul.mubr.msk.bf16.gmra.mrb[84].mxu0 %vm932_vm0, %v11488_v45 }
  0xaf   :  { %10147 = vmatprep.mubr.msk.bf16.mxu0 %vm932_vm0, %v11489_v46 }
  0xb6   :  { %10148 = vmatmul.mubr.msk.bf16.gmra.mrb[88].mxu0 %vm932_vm0, %v11490_v47 }
  0xb7   :  { %10151 = vmatprep.mubr.msk.bf16.mxu0 %vm932_vm0, %v11491_v48  ;;  %v11929_v48 = vadd.s32 8, %v11916_v35  ;;  %v3903_v35 = vld [vmem:[#allocation3 + $0x1f1] sm:$0xff] }
  0xb9   :  { %vm3600_vm2 = vcmp.le.s32.totalorder %v11929_v48, 14 }
  0xbe   :  { %10152 = vmatmul.mubr.msk.bf16.gmra.mrb[92].mxu0 %vm932_vm0, %v11492_v49 }
  0xbf   :  { %10155 = vmatprep.mubr.msk.bf16.mxu0 %vm932_vm0, %v11493_v50 }
  0xc6   :  { %10156 = vmatmul.mubr.msk.bf16.gmra.mrb[96].mxu0 %vm932_vm0, %v11494_v51 }
  0xc7   :  { %10159 = vmatprep.mubr.msk.bf16.mxu0 %vm932_vm0, %v11495_v52 }
  0xce   :  { %10160 = vmatmul.mubr.msk.bf16.gmra.mrb[100].mxu0 %vm932_vm0, %v11496_v53 }
  0xcf   :  { %10163 = vmatprep.mubr.msk.bf16.mxu0 %vm932_vm0, %v11497_v54 }
  0xd6   :  { %10164 = vmatmul.mubr.msk.bf16.gmra.mrb[104].mxu0 %vm932_vm0, %v11498_v55 }
  0xd7   :  { %10167 = vmatprep.mubr.msk.bf16.mxu0 %vm932_vm0, %v11499_v56 }
  0xd9   :  { %v10061_v58 = vpop.f32.mrb[0].mxu0 }
  0xda   :  { %v1351_v59 = vpop.f32.mrb[1].mxu0 }
  0xdb   :  { %v10062_v61 = vpop.f32.mrb[2].mxu0 }
  0xdc   :  { %v1354_v63 = vpop.f32.mrb[3].mxu0 }
  0xde   :  { %10168 = vmatmul.mubr.msk.bf16.gmra.mrb[108].mxu0 %vm932_vm0, %v11500_v60 }
  0xdf   :  { %10171 = vmatprep.mubr.msk.bf16.mxu0 %vm932_vm0, %v11501_v62 }
  0xe1   :  { %v10065_v0 = vpop.f32.mrb[4].mxu0 }
  0xe2   :  { %v1367_v1 = vpop.f32.mrb[5].mxu0 }
  0xe3   :  { %v10066_v3 = vpop.f32.mrb[6].mxu0 }
  0xe4   :  { %v1370_v5 = vpop.f32.mrb[7].mxu0 }
  0xe6   :  { %10172 = vmatmul.mubr.msk.bf16.gmra.mrb[112].mxu0 %vm932_vm0, %v11502_v2 }
  0xe7   :  { %10175 = vmatprep.mubr.msk.bf16.mxu0 %vm932_vm0, %v11503_v4  ;;  %v11510_v4 = vld [vmem:[%s13766_s0 + $0x208] sm:$0xff]  }
  0xe9   :  { %v10069_v6 = vpop.f32.mrb[8].mxu0 }
  0xea   :  { %v1392_v7 = vadd.f32 %v10069_v6, %v11866_v57  ;;  %v1383_v8 = vpop.f32.mrb[9].mxu0 }
  0xeb   :  { %v1384_v10 = vadd.f32 %v11866_v57, %v1383_v8  ;;  %v10070_v11 = vpop.f32.mrb[10].mxu0 }
  0xec   :  { %v2384_v13 = vmax.f32 %v1392_v7, 0.0  ;;  %v1395_v14 = vadd.f32 %v10070_v11, %v11866_v57  ;;  %v1386_v15 = vpop.f32.mrb[11].mxu0  ;;  %v11511_v7 = vld [vmem:[%s13766_s0 + $0x210] sm:$0xff]  }
  0xed   :  { %v2382_v16 = vmax.f32 %v1384_v10, 0.0  ;;  %v1387_v17 = vadd.f32 %v11866_v57, %v1386_v15 }
  0xee   :  { %2641 = vst.msk [vmem:[#allocation2 + $0x50] sm:$0xff] %vm2630_vm1, %v2384_v13  ;;  %v2385_v18 = vmax.f32 %v1395_v14, 0.0  ;;  %10176 = vmatmul.mubr.msk.bf16.gmra.mrb[116].mxu0 %vm932_vm0, %v11504_v9 }
  0xef   :  { %2639 = vst.msk [vmem:[#allocation2 + $0x40] sm:$0xff] %vm2630_vm1, %v2382_v16  ;;  %v2383_v19 = vmax.f32 %v1387_v17, 0.0  ;;  %10179 = vmatprep.mubr.msk.bf16.mxu0 %vm932_vm0, %v11505_v12 }
  0xf0   :  { %2642 = vst.msk [vmem:[#allocation2 + $0x58] sm:$0xff] %vm2630_vm1, %v2385_v18 }
  0xf1   :  { %2640 = vst.msk [vmem:[#allocation2 + $0x48] sm:$0xff] %vm2630_vm1, %v2383_v19  ;;  %v10073_v20 = vpop.f32.mrb[12].mxu0 }
  0xf2   :  { %v1408_v21 = vadd.f32 %v10073_v20, %v11866_v57  ;;  %v1399_v22 = vpop.f32.mrb[13].mxu0 }
  0xf3   :  { %v1400_v24 = vadd.f32 %v11866_v57, %v1399_v22  ;;  %v10074_v25 = vpop.f32.mrb[14].mxu0 }
  0xf4   :  { %v2388_v27 = vmax.f32 %v1408_v21, 0.0  ;;  %v1411_v28 = vadd.f32 %v10074_v25, %v11866_v57  ;;  %v1402_v29 = vpop.f32.mrb[15].mxu0  ;;  %v11512_v21 = vld [vmem:[%s13766_s0 + $0x218] sm:$0xff]  }
  0xf5   :  { %v2386_v30 = vmax.f32 %v1400_v24, 0.0  ;;  %v1403_v32 = vadd.f32 %v11866_v57, %v1402_v29  ;;  %v11513_v24 = vld [vmem:[%s13766_s0 + $0x220] sm:$0xff]  }
  0xf6   :  { %2645 = vst.msk [vmem:[#allocation2 + $0x70] sm:$0xff] %vm2630_vm1, %v2388_v27  ;;  %v2389_v33 = vmax.f32 %v1411_v28, 0.0  ;;  %10180 = vmatmul.mubr.msk.bf16.gmra.mrb[120].mxu0 %vm932_vm0, %v11506_v23 }
  0xf7   :  { %2643 = vst.msk [vmem:[#allocation2 + $0x60] sm:$0xff] %vm2630_vm1, %v2386_v30  ;;  %v2387_v34 = vmax.f32 %v1403_v32, 0.0  ;;  %10183 = vmatprep.mubr.msk.bf16.mxu0 %vm932_vm0, %v11507_v26  ;;  %v2897_v46 = vld [vmem:[#allocation2 + $0x50] ss:$2 sm:$0xff]  ;;  %v3153_v47 = vld [vmem:[#allocation2 + $0x51] ss:$2 sm:$0xff] }
  0xf8   :  { %2646 = vst.msk [vmem:[#allocation2 + $0x78] sm:$0xff] %vm2630_vm1, %v2389_v33  ;;  %v2895_v51 = vld [vmem:[#allocation2 + $0x40] ss:$2 sm:$0xff]  ;;  %v3151_v52 = vld [vmem:[#allocation2 + $0x41] ss:$2 sm:$0xff]  ;;  %v3403_v58 = vmax.f32 %v2897_v46, %v3153_v47 }
  0xf9   :  { %2644 = vst.msk [vmem:[#allocation2 + $0x68] sm:$0xff] %vm2630_vm1, %v2387_v34  ;;  %v10077_v36 = vpop.f32.mrb[16].mxu0  ;;  %v3402_v62 = vmax.f32 %v2895_v51, %v3151_v52 }
  0xfa   :  { %v1424_v37 = vadd.f32 %v10077_v36, %v11866_v57  ;;  %v1415_v38 = vpop.f32.mrb[17].mxu0 }
  0xfb   :  { %v1416_v40 = vadd.f32 %v11866_v57, %v1415_v38  ;;  %v10078_v41 = vpop.f32.mrb[18].mxu0 }
  0xfc   :  { %v2392_v43 = vmax.f32 %v1424_v37, 0.0  ;;  %v1427_v44 = vadd.f32 %v10078_v41, %v11866_v57  ;;  %v1418_v45 = vpop.f32.mrb[19].mxu0 }
  0xfd   :  { %v2390_v49 = vmax.f32 %v1416_v40, 0.0  ;;  %v1419_v50 = vadd.f32 %v11866_v57, %v1418_v45 }
  0xfe   :  { %2649 = vst.msk [vmem:[#allocation2 + $0x90] sm:$0xff] %vm2630_vm1, %v2392_v43  ;;  %v2393_v53 = vmax.f32 %v1427_v44, 0.0  ;;  %10184 = vmatmul.mubr.msk.bf16.gmra.mrb[124].mxu0 %vm932_vm0, %v11508_v39 }
  0xff   :  { %v2901_v54 = vld [vmem:[#allocation2 + $0x70] ss:$2 sm:$0xff]  ;;  %v3157_v55 = vld [vmem:[#allocation2 + $0x71] ss:$2 sm:$0xff]  ;;  %2647 = vst.msk [vmem:[#allocation2 + $0x80] sm:$0xff] %vm2630_vm1, %v2390_v49  ;;  %v2391_v56 = vmax.f32 %v1419_v50, 0.0  ;;  %10187 = vmatprep.mubr.msk.bf16.mxu0 %vm932_vm0, %v11509_v42 }
 0x100   :  { %v3405_v59 = vmax.f32 %v2901_v54, %v3157_v55  ;;  %v2899_v60 = vld [vmem:[#allocation2 + $0x60] ss:$2 sm:$0xff]  ;;  %v3155_v61 = vld [vmem:[#allocation2 + $0x61] ss:$2 sm:$0xff]  ;;  %2650 = vst.msk [vmem:[#allocation2 + $0x98] sm:$0xff] %vm2630_vm1, %v2393_v53  ;;  %v11515_v54 = vld [vmem:[%s13766_s0 + $0x230] sm:$0xff]  }
 0x101   :  { %v3404_v63 = vmax.f32 %v2899_v60, %v3155_v61  ;;  %2648 = vst.msk [vmem:[#allocation2 + $0x88] sm:$0xff] %vm2630_vm1, %v2391_v56  ;;  %v10081_v0 = vpop.f32.mrb[20].mxu0  ;;  %v11514_v49 = vld [vmem:[%s13766_s0 + $0x228] sm:$0xff]  }
 0x102   :  { %v3529_v1 = vmax.f32 %v3403_v58, %v3405_v59  ;;  %v1440_v2 = vadd.f32 %v10081_v0, %v11866_v57  ;;  %v1431_v3 = vpop.f32.mrb[21].mxu0 }
 0x103   :  { %v1432_v5 = vadd.f32 %v11866_v57, %v1431_v3  ;;  %v10082_v6 = vpop.f32.mrb[22].mxu0  ;;  %v3528_v8 = vmax.f32 %v3402_v62, %v3404_v63 }
 0x104   :  { %v3608_v9 = vsel %vm3600_vm2, %v3529_v1, 0.0  ;;  %v2396_v10 = vmax.f32 %v1440_v2, 0.0  ;;  %v1443_v11 = vadd.f32 %v10082_v6, %v11866_v57  ;;  %v1434_v12 = vpop.f32.mrb[23].mxu0 }
 0x105   :  { %3672 = vst.msk [vmem:[#allocation3 + $0x18] sm:$0xff] %vm2630_vm1, %v3608_v9  ;;  %v2394_v13 = vmax.f32 %v1432_v5, 0.0  ;;  %v1435_v14 = vadd.f32 %v11866_v57, %v1434_v12  ;;  %v3607_v15 = vsel %vm3593_vm3, %v3528_v8, 0.0 }
 0x106   :  { %2653 = vst.msk [vmem:[#allocation2 + $0xb0] sm:$0xff] %vm2630_vm1, %v2396_v10  ;;  %v2397_v16 = vmax.f32 %v1443_v11, 0.0  ;;  %10188 = vmatmul.mubr.msk.bf16.gmra.mrb[128].mxu0 %vm932_vm0, %v11510_v4  ;;  %3671 = vst.msk [vmem:[#allocation3 + $0x10] sm:$0xff] %vm2630_vm1, %v3607_v15  ;;  %v11516_v4 = vld [vmem:[%s13766_s0 + $0x238] sm:$0xff]  }
 0x107   :  { %2651 = vst.msk [vmem:[#allocation2 + $0xa0] sm:$0xff] %vm2630_vm1, %v2394_v13  ;;  %v2395_v17 = vmax.f32 %v1435_v14, 0.0  ;;  %10191 = vmatprep.mubr.msk.bf16.mxu0 %vm932_vm0, %v11511_v7  ;;  %v2905_v28 = vld [vmem:[#allocation2 + $0x90] ss:$2 sm:$0xff]  ;;  %v3161_v29 = vld [vmem:[#allocation2 + $0x91] ss:$2 sm:$0xff] }
 0x108   :  { %2654 = vst.msk [vmem:[#allocation2 + $0xb8] sm:$0xff] %vm2630_vm1, %v2397_v16  ;;  %v2903_v32 = vld [vmem:[#allocation2 + $0x80] ss:$2 sm:$0xff]  ;;  %v3159_v33 = vld [vmem:[#allocation2 + $0x81] ss:$2 sm:$0xff]  ;;  %v3407_v39 = vmax.f32 %v2905_v28, %v3161_v29 }
 0x109   :  { %2652 = vst.msk [vmem:[#allocation2 + $0xa8] sm:$0xff] %vm2630_vm1, %v2395_v17  ;;  %v10085_v18 = vpop.f32.mrb[24].mxu0  ;;  %v3406_v43 = vmax.f32 %v2903_v32, %v3159_v33  ;;  %v11517_v7 = vld [vmem:[%s13766_s0 + $0x240] sm:$0xff]  }
 0x10a   :  { %v1456_v19 = vadd.f32 %v10085_v18, %v11866_v57  ;;  %v1447_v20 = vpop.f32.mrb[25].mxu0 }
 0x10b   :  { %v1448_v22 = vadd.f32 %v11866_v57, %v1447_v20  ;;  %v10086_v23 = vpop.f32.mrb[26].mxu0 }
 0x10c   :  { %v2400_v25 = vmax.f32 %v1456_v19, 0.0  ;;  %v1459_v26 = vadd.f32 %v10086_v23, %v11866_v57  ;;  %v1450_v27 = vpop.f32.mrb[27].mxu0 }
 0x10d   :  { %v2398_v30 = vmax.f32 %v1448_v22, 0.0  ;;  %v1451_v31 = vadd.f32 %v11866_v57, %v1450_v27 }
 0x10e   :  { %2657 = vst.msk [vmem:[#allocation2 + $0xd0] sm:$0xff] %vm2630_vm1, %v2400_v25  ;;  %v2401_v34 = vmax.f32 %v1459_v26, 0.0  ;;  %10192 = vmatmul.mubr.msk.bf16.gmra.mrb[132].mxu0 %vm932_vm0, %v11512_v21 }
 0x10f   :  { %v2909_v36 = vld [vmem:[#allocation2 + $0xb0] ss:$2 sm:$0xff]  ;;  %v3165_v37 = vld [vmem:[#allocation2 + $0xb1] ss:$2 sm:$0xff]  ;;  %2655 = vst.msk [vmem:[#allocation2 + $0xc0] sm:$0xff] %vm2630_vm1, %v2398_v30  ;;  %v2399_v38 = vmax.f32 %v1451_v31, 0.0  ;;  %10195 = vmatprep.mubr.msk.bf16.mxu0 %vm932_vm0, %v11513_v24 }
 0x110   :  { %v3409_v40 = vmax.f32 %v2909_v36, %v3165_v37  ;;  %v2907_v41 = vld [vmem:[#allocation2 + $0xa0] ss:$2 sm:$0xff]  ;;  %v3163_v42 = vld [vmem:[#allocation2 + $0xa1] ss:$2 sm:$0xff]  ;;  %2658 = vst.msk [vmem:[#allocation2 + $0xd8] sm:$0xff] %vm2630_vm1, %v2401_v34  ;;  %v11519_v34 = vld [vmem:[%s13766_s0 + $0x250] sm:$0xff]  }
 0x111   :  { %v3408_v44 = vmax.f32 %v2907_v41, %v3163_v42  ;;  %2656 = vst.msk [vmem:[#allocation2 + $0xc8] sm:$0xff] %vm2630_vm1, %v2399_v38  ;;  %v10089_v45 = vpop.f32.mrb[28].mxu0  ;;  %v11518_v31 = vld [vmem:[%s13766_s0 + $0x248] sm:$0xff]  }
 0x112   :  { %v1472_v46 = vadd.f32 %v10089_v45, %v11866_v57  ;;  %v1463_v47 = vpop.f32.mrb[29].mxu0  ;;  %v3531_v50 = vmax.f32 %v3407_v39, %v3409_v40 }
 0x113   :  { %v3530_v51 = vmax.f32 %v3406_v43, %v3408_v44  ;;  %v1464_v52 = vadd.f32 %v11866_v57, %v1463_v47  ;;  %v10090_v53 = vpop.f32.mrb[30].mxu0 }
 0x114   :  { %v2404_v55 = vmax.f32 %v1472_v46, 0.0  ;;  %v1475_v56 = vadd.f32 %v10090_v53, %v11866_v57  ;;  %v1466_v58 = vpop.f32.mrb[31].mxu0  ;;  %v3610_v59 = vsel %vm3600_vm2, %v3531_v50, 0.0  ;;  %v11520_v50 = vld [vmem:[%s13766_s0 + $0x258] sm:$0xff]   ;;  %v11521_v53 = vld [vmem:[%s13766_s0 + $0x260] sm:$0xff]  }
 0x115   :  { %v3609_v60 = vsel %vm3593_vm3, %v3530_v51, 0.0  ;;  %v2402_v61 = vmax.f32 %v1464_v52, 0.0  ;;  %v1467_v62 = vadd.f32 %v11866_v57, %v1466_v58  ;;  %3674 = vst.msk [vmem:[#allocation3 + $0x28] sm:$0xff] %vm2630_vm1, %v3610_v59 }
 0x116   :  { %3673 = vst.msk [vmem:[#allocation3 + $0x20] sm:$0xff] %vm2630_vm1, %v3609_v60  ;;  %2661 = vst.msk [vmem:[#allocation2 + $0xf0] sm:$0xff] %vm2630_vm1, %v2404_v55  ;;  %v2405_v63 = vmax.f32 %v1475_v56, 0.0  ;;  %10196 = vmatmul.mubr.msk.bf16.gmra.mrb[136].mxu0 %vm932_vm0, %v11514_v49 }
 0x117   :  { %2659 = vst.msk [vmem:[#allocation2 + $0xe0] sm:$0xff] %vm2630_vm1, %v2402_v61  ;;  %v2403_v0 = vmax.f32 %v1467_v62, 0.0  ;;  %10199 = vmatprep.mubr.msk.bf16.mxu0 %vm932_vm0, %v11515_v54  ;;  %v2913_v11 = vld [vmem:[#allocation2 + $0xd0] ss:$2 sm:$0xff]  ;;  %v3169_v12 = vld [vmem:[#allocation2 + $0xd1] ss:$2 sm:$0xff] }
 0x118   :  { %2662 = vst.msk [vmem:[#allocation2 + $0xf8] sm:$0xff] %vm2630_vm1, %v2405_v63  ;;  %v2911_v15 = vld [vmem:[#allocation2 + $0xc0] ss:$2 sm:$0xff]  ;;  %v3167_v16 = vld [vmem:[#allocation2 + $0xc1] ss:$2 sm:$0xff]  ;;  %v3411_v21 = vmax.f32 %v2913_v11, %v3169_v12 }
 0x119   :  { %2660 = vst.msk [vmem:[#allocation2 + $0xe8] sm:$0xff] %vm2630_vm1, %v2403_v0  ;;  %v10093_v1 = vpop.f32.mrb[32].mxu0  ;;  %v3410_v25 = vmax.f32 %v2911_v15, %v3167_v16 }
 0x11a   :  { %v1488_v2 = vadd.f32 %v10093_v1, %v11866_v57  ;;  %v1479_v3 = vpop.f32.mrb[33].mxu0 }
 0x11b   :  { %v1480_v5 = vadd.f32 %v11866_v57, %v1479_v3  ;;  %v10094_v6 = vpop.f32.mrb[34].mxu0 }
 0x11c   :  { %v2408_v8 = vmax.f32 %v1488_v2, 0.0  ;;  %v1491_v9 = vadd.f32 %v10094_v6, %v11866_v57  ;;  %v1482_v10 = vpop.f32.mrb[35].mxu0 }
 0x11d   :  { %v2406_v13 = vmax.f32 %v1480_v5, 0.0  ;;  %v1483_v14 = vadd.f32 %v11866_v57, %v1482_v10 }
 0x11e   :  { %2665 = vst.msk [vmem:[#allocation2 + $0x110] sm:$0xff] %vm2630_vm1, %v2408_v8  ;;  %v2409_v17 = vmax.f32 %v1491_v9, 0.0  ;;  %10200 = vmatmul.mubr.msk.bf16.gmra.mrb[140].mxu0 %vm932_vm0, %v11516_v4 }
 0x11f   :  { %v2917_v18 = vld [vmem:[#allocation2 + $0xf0] ss:$2 sm:$0xff]  ;;  %v3173_v19 = vld [vmem:[#allocation2 + $0xf1] ss:$2 sm:$0xff]  ;;  %2663 = vst.msk [vmem:[#allocation2 + $0x100] sm:$0xff] %vm2630_vm1, %v2406_v13  ;;  %v2407_v20 = vmax.f32 %v1483_v14, 0.0  ;;  %10203 = vmatprep.mubr.msk.bf16.mxu0 %vm932_vm0, %v11517_v7 }
 0x120   :  { %v3413_v22 = vmax.f32 %v2917_v18, %v3173_v19  ;;  %v2915_v23 = vld [vmem:[#allocation2 + $0xe0] ss:$2 sm:$0xff]  ;;  %v3171_v24 = vld [vmem:[#allocation2 + $0xe1] ss:$2 sm:$0xff]  ;;  %2666 = vst.msk [vmem:[#allocation2 + $0x118] sm:$0xff] %vm2630_vm1, %v2409_v17  ;;  %v11523_v18 = vld [vmem:[%s13766_s0 + $0x270] sm:$0xff]  }
 0x121   :  { %v3412_v26 = vmax.f32 %v2915_v23, %v3171_v24  ;;  %2664 = vst.msk [vmem:[#allocation2 + $0x108] sm:$0xff] %vm2630_vm1, %v2407_v20  ;;  %v10097_v27 = vpop.f32.mrb[36].mxu0  ;;  %v11522_v14 = vld [vmem:[%s13766_s0 + $0x268] sm:$0xff]  }
 0x122   :  { %v3533_v28 = vmax.f32 %v3411_v21, %v3413_v22  ;;  %v1504_v29 = vadd.f32 %v10097_v27, %v11866_v57  ;;  %v1495_v30 = vpop.f32.mrb[37].mxu0 }
 0x123   :  { %v1496_v32 = vadd.f32 %v11866_v57, %v1495_v30  ;;  %v10098_v33 = vpop.f32.mrb[38].mxu0  ;;  %v3532_v36 = vmax.f32 %v3410_v25, %v3412_v26 }
 0x124   :  { %v3612_v37 = vsel %vm3600_vm2, %v3533_v28, 0.0  ;;  %v2412_v38 = vmax.f32 %v1504_v29, 0.0  ;;  %v1507_v39 = vadd.f32 %v10098_v33, %v11866_v57  ;;  %v1498_v40 = vpop.f32.mrb[39].mxu0 }
 0x125   :  { %3676 = vst.msk [vmem:[#allocation3 + $0x38] sm:$0xff] %vm2630_vm1, %v3612_v37  ;;  %v2410_v41 = vmax.f32 %v1496_v32, 0.0  ;;  %v1499_v42 = vadd.f32 %v11866_v57, %v1498_v40  ;;  %v3611_v43 = vsel %vm3593_vm3, %v3532_v36, 0.0 }
 0x126   :  { %2669 = vst.msk [vmem:[#allocation2 + $0x130] sm:$0xff] %vm2630_vm1, %v2412_v38  ;;  %v2413_v44 = vmax.f32 %v1507_v39, 0.0  ;;  %10204 = vmatmul.mubr.msk.bf16.gmra.mrb[144].mxu0 %vm932_vm0, %v11518_v31  ;;  %3675 = vst.msk [vmem:[#allocation3 + $0x30] sm:$0xff] %vm2630_vm1, %v3611_v43  ;;  %v11524_v31 = vld [vmem:[%s13766_s0 + $0x278] sm:$0xff]  }
 0x127   :  { %2667 = vst.msk [vmem:[#allocation2 + $0x120] sm:$0xff] %vm2630_vm1, %v2410_v41  ;;  %v2411_v45 = vmax.f32 %v1499_v42, 0.0  ;;  %10207 = vmatprep.mubr.msk.bf16.mxu0 %vm932_vm0, %v11519_v34  ;;  %v2921_v58 = vld [vmem:[#allocation2 + $0x110] ss:$2 sm:$0xff]  ;;  %v3177_v59 = vld [vmem:[#allocation2 + $0x111] ss:$2 sm:$0xff] }
 0x128   :  { %2670 = vst.msk [vmem:[#allocation2 + $0x138] sm:$0xff] %vm2630_vm1, %v2413_v44  ;;  %v2919_v62 = vld [vmem:[#allocation2 + $0x100] ss:$2 sm:$0xff]  ;;  %v3175_v63 = vld [vmem:[#allocation2 + $0x101] ss:$2 sm:$0xff]  ;;  %v3415_v4 = vmax.f32 %v2921_v58, %v3177_v59 }
 0x129   :  { %2668 = vst.msk [vmem:[#allocation2 + $0x128] sm:$0xff] %vm2630_vm1, %v2411_v45  ;;  %v10101_v46 = vpop.f32.mrb[40].mxu0  ;;  %v3414_v8 = vmax.f32 %v2919_v62, %v3175_v63  ;;  %v11525_v34 = vld [vmem:[%s13766_s0 + $0x280] sm:$0xff]  }
 0x12a   :  { %v1520_v47 = vadd.f32 %v10101_v46, %v11866_v57  ;;  %v1511_v49 = vpop.f32.mrb[41].mxu0 }
 0x12b   :  { %v1512_v51 = vadd.f32 %v11866_v57, %v1511_v49  ;;  %v10102_v52 = vpop.f32.mrb[42].mxu0 }
 0x12c   :  { %v2416_v54 = vmax.f32 %v1520_v47, 0.0  ;;  %v1523_v55 = vadd.f32 %v10102_v52, %v11866_v57  ;;  %v1514_v56 = vpop.f32.mrb[43].mxu0 }
 0x12d   :  { %v2414_v60 = vmax.f32 %v1512_v51, 0.0  ;;  %v1515_v61 = vadd.f32 %v11866_v57, %v1514_v56 }
 0x12e   :  { %2673 = vst.msk [vmem:[#allocation2 + $0x150] sm:$0xff] %vm2630_vm1, %v2416_v54  ;;  %v2417_v0 = vmax.f32 %v1523_v55, 0.0  ;;  %10208 = vmatmul.mubr.msk.bf16.gmra.mrb[148].mxu0 %vm932_vm0, %v11520_v50 }
 0x12f   :  { %v2925_v1 = vld [vmem:[#allocation2 + $0x130] ss:$2 sm:$0xff]  ;;  %v3181_v2 = vld [vmem:[#allocation2 + $0x131] ss:$2 sm:$0xff]  ;;  %2671 = vst.msk [vmem:[#allocation2 + $0x140] sm:$0xff] %vm2630_vm1, %v2414_v60  ;;  %v2415_v3 = vmax.f32 %v1515_v61, 0.0  ;;  %10211 = vmatprep.mubr.msk.bf16.mxu0 %vm932_vm0, %v11521_v53 }
 0x130   :  { %v3417_v5 = vmax.f32 %v2925_v1, %v3181_v2  ;;  %v2923_v6 = vld [vmem:[#allocation2 + $0x120] ss:$2 sm:$0xff]  ;;  %v3179_v7 = vld [vmem:[#allocation2 + $0x121] ss:$2 sm:$0xff]  ;;  %2674 = vst.msk [vmem:[#allocation2 + $0x158] sm:$0xff] %vm2630_vm1, %v2417_v0  ;;  %v11527_v1 = vld [vmem:[%s13766_s0 + $0x290] sm:$0xff]  }
 0x131   :  { %v3416_v9 = vmax.f32 %v2923_v6, %v3179_v7  ;;  %2672 = vst.msk [vmem:[#allocation2 + $0x148] sm:$0xff] %vm2630_vm1, %v2415_v3  ;;  %v10105_v10 = vpop.f32.mrb[44].mxu0  ;;  %v11526_v61 = vld [vmem:[%s13766_s0 + $0x288] sm:$0xff]  }
 0x132   :  { %v3535_v11 = vmax.f32 %v3415_v4, %v3417_v5  ;;  %v1536_v12 = vadd.f32 %v10105_v10, %v11866_v57  ;;  %v1527_v13 = vpop.f32.mrb[45].mxu0 }
 0x133   :  { %v3534_v15 = vmax.f32 %v3414_v8, %v3416_v9  ;;  %v1528_v16 = vadd.f32 %v11866_v57, %v1527_v13  ;;  %v10106_v17 = vpop.f32.mrb[46].mxu0 }
 0x134   :  { %v2420_v19 = vmax.f32 %v1536_v12, 0.0  ;;  %v1539_v20 = vadd.f32 %v10106_v17, %v11866_v57  ;;  %v1530_v21 = vpop.f32.mrb[47].mxu0  ;;  %v3614_v22 = vsel %vm3600_vm2, %v3535_v11, 0.0  ;;  %v11529_v17 = vld [vmem:[%s13766_s0 + $0x2a0] sm:$0xff]  }
 0x135   :  { %v3613_v23 = vsel %vm3593_vm3, %v3534_v15, 0.0  ;;  %v2418_v24 = vmax.f32 %v1528_v16, 0.0  ;;  %v1531_v25 = vadd.f32 %v11866_v57, %v1530_v21  ;;  %3678 = vst.msk [vmem:[#allocation3 + $0x48] sm:$0xff] %vm2630_vm1, %v3614_v22 }
 0x136   :  { %3677 = vst.msk [vmem:[#allocation3 + $0x40] sm:$0xff] %vm2630_vm1, %v3613_v23  ;;  %2677 = vst.msk [vmem:[#allocation2 + $0x170] sm:$0xff] %vm2630_vm1, %v2420_v19  ;;  %v2421_v26 = vmax.f32 %v1539_v20, 0.0  ;;  %10212 = vmatmul.mubr.msk.bf16.gmra.mrb[152].mxu0 %vm932_vm0, %v11522_v14  ;;  %v11528_v14 = vld [vmem:[%s13766_s0 + $0x298] sm:$0xff]  }
 0x137   :  { %2675 = vst.msk [vmem:[#allocation2 + $0x160] sm:$0xff] %vm2630_vm1, %v2418_v24  ;;  %v2419_v27 = vmax.f32 %v1531_v25, 0.0  ;;  %10215 = vmatprep.mubr.msk.bf16.mxu0 %vm932_vm0, %v11523_v18  ;;  %v2929_v39 = vld [vmem:[#allocation2 + $0x150] ss:$2 sm:$0xff]  ;;  %v3185_v40 = vld [vmem:[#allocation2 + $0x151] ss:$2 sm:$0xff] }
 0x138   :  { %2678 = vst.msk [vmem:[#allocation2 + $0x178] sm:$0xff] %vm2630_vm1, %v2421_v26  ;;  %v2927_v43 = vld [vmem:[#allocation2 + $0x140] ss:$2 sm:$0xff]  ;;  %v3183_v44 = vld [vmem:[#allocation2 + $0x141] ss:$2 sm:$0xff]  ;;  %v3419_v50 = vmax.f32 %v2929_v39, %v3185_v40 }
 0x139   :  { %2676 = vst.msk [vmem:[#allocation2 + $0x168] sm:$0xff] %vm2630_vm1, %v2419_v27  ;;  %v10109_v28 = vpop.f32.mrb[48].mxu0  ;;  %v3418_v54 = vmax.f32 %v2927_v43, %v3183_v44 }
 0x13a   :  { %v1552_v29 = vadd.f32 %v10109_v28, %v11866_v57  ;;  %v1543_v30 = vpop.f32.mrb[49].mxu0 }
 0x13b   :  { %v1544_v32 = vadd.f32 %v11866_v57, %v1543_v30  ;;  %v10110_v33 = vpop.f32.mrb[50].mxu0 }
 0x13c   :  { %v2424_v36 = vmax.f32 %v1552_v29, 0.0  ;;  %v1555_v37 = vadd.f32 %v10110_v33, %v11866_v57  ;;  %v1546_v38 = vpop.f32.mrb[51].mxu0 }
 0x13d   :  { %v2422_v41 = vmax.f32 %v1544_v32, 0.0  ;;  %v1547_v42 = vadd.f32 %v11866_v57, %v1546_v38 }
 0x13e   :  { %2681 = vst.msk [vmem:[#allocation2 + $0x190] sm:$0xff] %vm2630_vm1, %v2424_v36  ;;  %v2425_v45 = vmax.f32 %v1555_v37, 0.0  ;;  %10216 = vmatmul.mubr.msk.bf16.gmra.mrb[156].mxu0 %vm932_vm0, %v11524_v31 }
 0x13f   :  { %v2933_v46 = vld [vmem:[#allocation2 + $0x170] ss:$2 sm:$0xff]  ;;  %v3189_v47 = vld [vmem:[#allocation2 + $0x171] ss:$2 sm:$0xff]  ;;  %2679 = vst.msk [vmem:[#allocation2 + $0x180] sm:$0xff] %vm2630_vm1, %v2422_v41  ;;  %v2423_v49 = vmax.f32 %v1547_v42, 0.0  ;;  %10219 = vmatprep.mubr.msk.bf16.mxu0 %vm932_vm0, %v11525_v34 }
 0x140   :  { %v3421_v51 = vmax.f32 %v2933_v46, %v3189_v47  ;;  %v2931_v52 = vld [vmem:[#allocation2 + $0x160] ss:$2 sm:$0xff]  ;;  %v3187_v53 = vld [vmem:[#allocation2 + $0x161] ss:$2 sm:$0xff]  ;;  %2682 = vst.msk [vmem:[#allocation2 + $0x198] sm:$0xff] %vm2630_vm1, %v2425_v45  ;;  %v11531_v46 = vld [vmem:[%s13766_s0 + $0x2b0] sm:$0xff]  }
 0x141   :  { %v3420_v55 = vmax.f32 %v2931_v52, %v3187_v53  ;;  %2680 = vst.msk [vmem:[#allocation2 + $0x188] sm:$0xff] %vm2630_vm1, %v2423_v49  ;;  %v10113_v56 = vpop.f32.mrb[52].mxu0  ;;  %v11530_v42 = vld [vmem:[%s13766_s0 + $0x2a8] sm:$0xff]  }
 0x142   :  { %v3537_v58 = vmax.f32 %v3419_v50, %v3421_v51  ;;  %v1568_v59 = vadd.f32 %v10113_v56, %v11866_v57  ;;  %v1559_v60 = vpop.f32.mrb[53].mxu0 }
 0x143   :  { %v3536_v62 = vmax.f32 %v3418_v54, %v3420_v55  ;;  %v1560_v63 = vadd.f32 %v11866_v57, %v1559_v60  ;;  %v10114_v0 = vpop.f32.mrb[54].mxu0 }
 0x144   :  { %v3616_v2 = vsel %vm3600_vm2, %v3537_v58, 0.0  ;;  %v2428_v3 = vmax.f32 %v1568_v59, 0.0  ;;  %v1571_v4 = vadd.f32 %v10114_v0, %v11866_v57  ;;  %v1562_v5 = vpop.f32.mrb[55].mxu0  ;;  %v11533_v0 = vld [vmem:[%s13766_s0 + $0x2c0] sm:$0xff]  }
 0x145   :  { %3680 = vst.msk [vmem:[#allocation3 + $0x58] sm:$0xff] %vm2630_vm1, %v3616_v2  ;;  %v2426_v6 = vmax.f32 %v1560_v63, 0.0  ;;  %v1563_v7 = vadd.f32 %v11866_v57, %v1562_v5  ;;  %v3615_v8 = vsel %vm3593_vm3, %v3536_v62, 0.0 }
 0x146   :  { %2685 = vst.msk [vmem:[#allocation2 + $0x1b0] sm:$0xff] %vm2630_vm1, %v2428_v3  ;;  %v2429_v9 = vmax.f32 %v1571_v4, 0.0  ;;  %10220 = vmatmul.mubr.msk.bf16.gmra.mrb[160].mxu0 %vm932_vm0, %v11526_v61  ;;  %3679 = vst.msk [vmem:[#allocation3 + $0x50] sm:$0xff] %vm2630_vm1, %v3615_v8  ;;  %v11532_v61 = vld [vmem:[%s13766_s0 + $0x2b8] sm:$0xff]  }
 0x147   :  { %2683 = vst.msk [vmem:[#allocation2 + $0x1a0] sm:$0xff] %vm2630_vm1, %v2426_v6  ;;  %v2427_v10 = vmax.f32 %v1563_v7, 0.0  ;;  %10223 = vmatprep.mubr.msk.bf16.mxu0 %vm932_vm0, %v11527_v1  ;;  %v2937_v21 = vld [vmem:[#allocation2 + $0x190] ss:$2 sm:$0xff]  ;;  %v3193_v22 = vld [vmem:[#allocation2 + $0x191] ss:$2 sm:$0xff] }
 0x148   :  { %2686 = vst.msk [vmem:[#allocation2 + $0x1b8] sm:$0xff] %vm2630_vm1, %v2429_v9  ;;  %v2935_v25 = vld [vmem:[#allocation2 + $0x180] ss:$2 sm:$0xff]  ;;  %v3191_v26 = vld [vmem:[#allocation2 + $0x181] ss:$2 sm:$0xff]  ;;  %v3423_v31 = vmax.f32 %v2937_v21, %v3193_v22 }
 0x149   :  { %2684 = vst.msk [vmem:[#allocation2 + $0x1a8] sm:$0xff] %vm2630_vm1, %v2427_v10  ;;  %v10117_v11 = vpop.f32.mrb[56].mxu0  ;;  %v3422_v36 = vmax.f32 %v2935_v25, %v3191_v26 }
 0x14a   :  { %v1584_v12 = vadd.f32 %v10117_v11, %v11866_v57  ;;  %v1575_v13 = vpop.f32.mrb[57].mxu0 }
 0x14b   :  { %v1576_v15 = vadd.f32 %v11866_v57, %v1575_v13  ;;  %v10118_v16 = vpop.f32.mrb[58].mxu0 }
 0x14c   :  { %v2432_v18 = vmax.f32 %v1584_v12, 0.0  ;;  %v1587_v19 = vadd.f32 %v10118_v16, %v11866_v57  ;;  %v1578_v20 = vpop.f32.mrb[59].mxu0 }
 0x14d   :  { %v2430_v23 = vmax.f32 %v1576_v15, 0.0  ;;  %v1579_v24 = vadd.f32 %v11866_v57, %v1578_v20 }
 0x14e   :  { %2689 = vst.msk [vmem:[#allocation2 + $0x1d0] sm:$0xff] %vm2630_vm1, %v2432_v18  ;;  %v2433_v27 = vmax.f32 %v1587_v19, 0.0  ;;  %10224 = vmatmul.mubr.msk.bf16.gmra.mrb[164].mxu0 %vm932_vm0, %v11528_v14 }
 0x14f   :  { %v2941_v28 = vld [vmem:[#allocation2 + $0x1b0] ss:$2 sm:$0xff]  ;;  %v3197_v29 = vld [vmem:[#allocation2 + $0x1b1] ss:$2 sm:$0xff]  ;;  %2687 = vst.msk [vmem:[#allocation2 + $0x1c0] sm:$0xff] %vm2630_vm1, %v2430_v23  ;;  %v2431_v30 = vmax.f32 %v1579_v24, 0.0  ;;  %10227 = vmatprep.mubr.msk.bf16.mxu0 %vm932_vm0, %v11529_v17 }
 0x150   :  { %v3425_v32 = vmax.f32 %v2941_v28, %v3197_v29  ;;  %v2939_v33 = vld [vmem:[#allocation2 + $0x1a0] ss:$2 sm:$0xff]  ;;  %v3195_v34 = vld [vmem:[#allocation2 + $0x1a1] ss:$2 sm:$0xff]  ;;  %2690 = vst.msk [vmem:[#allocation2 + $0x1d8] sm:$0xff] %vm2630_vm1, %v2433_v27  ;;  %v11535_v28 = vld [vmem:[%s13766_s0 + $0x2d0] sm:$0xff]  }
 0x151   :  { %v3424_v37 = vmax.f32 %v2939_v33, %v3195_v34  ;;  %2688 = vst.msk [vmem:[#allocation2 + $0x1c8] sm:$0xff] %vm2630_vm1, %v2431_v30  ;;  %v10121_v38 = vpop.f32.mrb[60].mxu0  ;;  %v11534_v24 = vld [vmem:[%s13766_s0 + $0x2c8] sm:$0xff]  }
 0x152   :  { %v3539_v39 = vmax.f32 %v3423_v31, %v3425_v32  ;;  %v1600_v40 = vadd.f32 %v10121_v38, %v11866_v57  ;;  %v1591_v41 = vpop.f32.mrb[61].mxu0 }
 0x153   :  { %v3538_v43 = vmax.f32 %v3422_v36, %v3424_v37  ;;  %v1592_v44 = vadd.f32 %v11866_v57, %v1591_v41  ;;  %v10122_v45 = vpop.f32.mrb[62].mxu0 }
 0x154   :  { %v2436_v47 = vmax.f32 %v1600_v40, 0.0  ;;  %v1603_v49 = vadd.f32 %v10122_v45, %v11866_v57  ;;  %v1594_v50 = vpop.f32.mrb[63].mxu0  ;;  %v3618_v51 = vsel %vm3600_vm2, %v3539_v39, 0.0  ;;  %v11537_v45 = vld [vmem:[%s13766_s0 + $0x2e0] sm:$0xff]  }
 0x155   :  { %v3617_v52 = vsel %vm3593_vm3, %v3538_v43, 0.0  ;;  %v2434_v53 = vmax.f32 %v1592_v44, 0.0  ;;  %v1595_v54 = vadd.f32 %v11866_v57, %v1594_v50  ;;  %3682 = vst.msk [vmem:[#allocation3 + $0x68] sm:$0xff] %vm2630_vm1, %v3618_v51 }
 0x156   :  { %3681 = vst.msk [vmem:[#allocation3 + $0x60] sm:$0xff] %vm2630_vm1, %v3617_v52  ;;  %2693 = vst.msk [vmem:[#allocation2 + $0x1f0] sm:$0xff] %vm2630_vm1, %v2436_v47  ;;  %v2437_v55 = vmax.f32 %v1603_v49, 0.0  ;;  %10228 = vmatmul.mubr.msk.bf16.gmra.mrb[168].mxu0 %vm932_vm0, %v11530_v42  ;;  %v11536_v42 = vld [vmem:[%s13766_s0 + $0x2d8] sm:$0xff]  }
 0x157   :  { %2691 = vst.msk [vmem:[#allocation2 + $0x1e0] sm:$0xff] %vm2630_vm1, %v2434_v53  ;;  %v2435_v56 = vmax.f32 %v1595_v54, 0.0  ;;  %10231 = vmatprep.mubr.msk.bf16.mxu0 %vm932_vm0, %v11531_v46  ;;  %v2945_v4 = vld [vmem:[#allocation2 + $0x1d0] ss:$2 sm:$0xff]  ;;  %v3201_v5 = vld [vmem:[#allocation2 + $0x1d1] ss:$2 sm:$0xff] }
 0x158   :  { %2694 = vst.msk [vmem:[#allocation2 + $0x1f8] sm:$0xff] %vm2630_vm1, %v2437_v55  ;;  %v2943_v8 = vld [vmem:[#allocation2 + $0x1c0] ss:$2 sm:$0xff]  ;;  %v3199_v9 = vld [vmem:[#allocation2 + $0x1c1] ss:$2 sm:$0xff]  ;;  %v3427_v14 = vmax.f32 %v2945_v4, %v3201_v5 }
 0x159   :  { %2692 = vst.msk [vmem:[#allocation2 + $0x1e8] sm:$0xff] %vm2630_vm1, %v2435_v56  ;;  %v10125_v58 = vpop.f32.mrb[64].mxu0  ;;  %v3426_v18 = vmax.f32 %v2943_v8, %v3199_v9  ;;  %v12209_v4 = vld [vmem:[%s13767_s2] ss:$0 sm:$0xff] }
 0x15a   :  { %v1616_v59 = vadd.f32 %v10125_v58, %v11866_v57  ;;  %v1607_v60 = vpop.f32.mrb[65].mxu0 }
 0x15b   :  { %v1608_v62 = vadd.f32 %v11866_v57, %v1607_v60  ;;  %v10126_v63 = vpop.f32.mrb[66].mxu0 }
 0x15c   :  { %v2440_v1 = vmax.f32 %v1616_v59, 0.0  ;;  %v1619_v2 = vadd.f32 %v10126_v63, %v11866_v57  ;;  %v1610_v3 = vpop.f32.mrb[67].mxu0 }
 0x15d   :  { %v2438_v6 = vmax.f32 %v1608_v62, 0.0  ;;  %v1611_v7 = vadd.f32 %v11866_v57, %v1610_v3 }
 0x15e   :  { %2697 = vst.msk [vmem:[#allocation2 + $0x210] sm:$0xff] %vm2630_vm1, %v2440_v1  ;;  %v2441_v10 = vmax.f32 %v1619_v2, 0.0  ;;  %10232 = vmatmul.mubr.msk.bf16.gmra.mrb[172].mxu0 %vm932_vm0, %v11532_v61 }
 0x15f   :  { %v2949_v11 = vld [vmem:[#allocation2 + $0x1f0] ss:$2 sm:$0xff]  ;;  %v3205_v12 = vld [vmem:[#allocation2 + $0x1f1] ss:$2 sm:$0xff]  ;;  %2695 = vst.msk [vmem:[#allocation2 + $0x200] sm:$0xff] %vm2630_vm1, %v2438_v6  ;;  %v2439_v13 = vmax.f32 %v1611_v7, 0.0  ;;  %10235 = vmatprep.mubr.msk.bf16.mxu0 %vm932_vm0, %v11533_v0 }
 0x160   :  { %v3429_v15 = vmax.f32 %v2949_v11, %v3205_v12  ;;  %v2947_v16 = vld [vmem:[#allocation2 + $0x1e0] ss:$2 sm:$0xff]  ;;  %v3203_v17 = vld [vmem:[#allocation2 + $0x1e1] ss:$2 sm:$0xff]  ;;  %2698 = vst.msk [vmem:[#allocation2 + $0x218] sm:$0xff] %vm2630_vm1, %v2441_v10  ;;  %v11539_v11 = vld [vmem:[%s13766_s0 + $0x2f0] sm:$0xff]  }
 0x161   :  { %v3428_v19 = vmax.f32 %v2947_v16, %v3203_v17  ;;  %2696 = vst.msk [vmem:[#allocation2 + $0x208] sm:$0xff] %vm2630_vm1, %v2439_v13  ;;  %v10129_v20 = vpop.f32.mrb[68].mxu0  ;;  %v11538_v7 = vld [vmem:[%s13766_s0 + $0x2e8] sm:$0xff]  }
 0x162   :  { %v3541_v21 = vmax.f32 %v3427_v14, %v3429_v15  ;;  %v1632_v22 = vadd.f32 %v10129_v20, %v11866_v57  ;;  %v1623_v23 = vpop.f32.mrb[69].mxu0 }
 0x163   :  { %v3540_v25 = vmax.f32 %v3426_v18, %v3428_v19  ;;  %v1624_v26 = vadd.f32 %v11866_v57, %v1623_v23  ;;  %v10130_v27 = vpop.f32.mrb[70].mxu0 }
 0x164   :  { %v3620_v29 = vsel %vm3600_vm2, %v3541_v21, 0.0  ;;  %v2444_v30 = vmax.f32 %v1632_v22, 0.0  ;;  %v1635_v31 = vadd.f32 %v10130_v27, %v11866_v57  ;;  %v1626_v32 = vpop.f32.mrb[71].mxu0 }
 0x165   :  { %3684 = vst.msk [vmem:[#allocation3 + $0x78] sm:$0xff] %vm2630_vm1, %v3620_v29  ;;  %v2442_v33 = vmax.f32 %v1624_v26, 0.0  ;;  %v1627_v34 = vadd.f32 %v11866_v57, %v1626_v32  ;;  %v3619_v36 = vsel %vm3593_vm3, %v3540_v25, 0.0  ;;  %v11541_v29 = vld [vmem:[%s13766_s0 + $0x300] sm:$0xff]  }
 0x166   :  { %2701 = vst.msk [vmem:[#allocation2 + $0x230] sm:$0xff] %vm2630_vm1, %v2444_v30  ;;  %v2445_v37 = vmax.f32 %v1635_v31, 0.0  ;;  %10236 = vmatmul.mubr.msk.bf16.gmra.mrb[176].mxu0 %vm932_vm0, %v11534_v24  ;;  %3683 = vst.msk [vmem:[#allocation3 + $0x70] sm:$0xff] %vm2630_vm1, %v3619_v36  ;;  %v11540_v24 = vld [vmem:[%s13766_s0 + $0x2f8] sm:$0xff]   ;;  %v11573_v36 = vld [vmem:[%s13768_s3 + $0x10] sm:$0xff]  }
 0x167   :  { %2699 = vst.msk [vmem:[#allocation2 + $0x220] sm:$0xff] %vm2630_vm1, %v2442_v33  ;;  %v2443_v38 = vmax.f32 %v1627_v34, 0.0  ;;  %10239 = vmatprep.mubr.msk.bf16.mxu0 %vm932_vm0, %v11535_v28  ;;  %v2953_v50 = vld [vmem:[#allocation2 + $0x210] ss:$2 sm:$0xff]  ;;  %v3209_v51 = vld [vmem:[#allocation2 + $0x211] ss:$2 sm:$0xff]  ;;  %10315 = vmatprep.subr.bf16.mxu0 %v11573_v36 }
 0x168   :  { %2702 = vst.msk [vmem:[#allocation2 + $0x238] sm:$0xff] %vm2630_vm1, %v2445_v37  ;;  %v2951_v54 = vld [vmem:[#allocation2 + $0x200] ss:$2 sm:$0xff]  ;;  %v3207_v55 = vld [vmem:[#allocation2 + $0x201] ss:$2 sm:$0xff]  ;;  %v3431_v61 = vmax.f32 %v2953_v50, %v3209_v51  ;;  %10316 = vmatpush3.bf16.msra.mxu0 %v11573_v36 }
 0x169   :  { %2700 = vst.msk [vmem:[#allocation2 + $0x228] sm:$0xff] %vm2630_vm1, %v2443_v38  ;;  %v10133_v39 = vpop.f32.mrb[72].mxu0 }
 0x16a   :  { %v1648_v40 = vadd.f32 %v10133_v39, %v11866_v57  ;;  %v1639_v41 = vpop.f32.mrb[73].mxu0 }
 0x16b   :  { %v1640_v43 = vadd.f32 %v11866_v57, %v1639_v41  ;;  %v10134_v44 = vpop.f32.mrb[74].mxu0 }
 0x16c   :  { %v2448_v46 = vmax.f32 %v1648_v40, 0.0  ;;  %v1651_v47 = vadd.f32 %v10134_v44, %v11866_v57  ;;  %v1642_v49 = vpop.f32.mrb[75].mxu0 }
 0x16d   :  { %v2446_v52 = vmax.f32 %v1640_v43, 0.0  ;;  %v1643_v53 = vadd.f32 %v11866_v57, %v1642_v49  ;;  %v3430_v57 = vmax.f32 %v2951_v54, %v3207_v55  ;;  %v11542_v55 = vld [vmem:[%s13766_s0 + $0x308] sm:$0xff]  }
 0x16e   :  { %2705 = vst.msk [vmem:[#allocation2 + $0x250] sm:$0xff] %vm2630_vm1, %v2448_v46  ;;  %v2449_v56 = vmax.f32 %v1651_v47, 0.0  ;;  %10240 = vmatmul.mubr.msk.bf16.gmra.mrb[180].mxu0 %vm932_vm0, %v11536_v42  ;;  %v11574_v47 = vld [vmem:[%s13768_s3 + $0x18] sm:$0xff]  }
 0x16f   :  { %v2957_v58 = vld [vmem:[#allocation2 + $0x230] ss:$2 sm:$0xff]  ;;  %v3213_v59 = vld [vmem:[#allocation2 + $0x231] ss:$2 sm:$0xff]  ;;  %2703 = vst.msk [vmem:[#allocation2 + $0x240] sm:$0xff] %vm2630_vm1, %v2446_v52  ;;  %v2447_v60 = vmax.f32 %v1643_v53, 0.0  ;;  %10243 = vmatprep.mubr.msk.bf16.mxu0 %vm932_vm0, %v11537_v45  ;;  %10317 = vmatprep.subr.bf16.mxu0 %v11574_v47 }
 0x170   :  { %v3433_v62 = vmax.f32 %v2957_v58, %v3213_v59  ;;  %v2955_v63 = vld [vmem:[#allocation2 + $0x220] ss:$2 sm:$0xff]  ;;  %v3211_v0 = vld [vmem:[#allocation2 + $0x221] ss:$2 sm:$0xff]  ;;  %2706 = vst.msk [vmem:[#allocation2 + $0x258] sm:$0xff] %vm2630_vm1, %v2449_v56  ;;  %10318 = vmatpush3.bf16.msra.mxu0 %v11574_v47 }
 0x171   :  { %v3432_v1 = vmax.f32 %v2955_v63, %v3211_v0  ;;  %2704 = vst.msk [vmem:[#allocation2 + $0x248] sm:$0xff] %vm2630_vm1, %v2447_v60  ;;  %v10137_v2 = vpop.f32.mrb[76].mxu0  ;;  %v11543_v60 = vld [vmem:[%s13766_s0 + $0x310] sm:$0xff]  }
 0x172   :  { %v3543_v3 = vmax.f32 %v3431_v61, %v3433_v62  ;;  %v1664_v5 = vadd.f32 %v12209_v4, %v10137_v2  ;;  %v1655_v6 = vpop.f32.mrb[77].mxu0 }
 0x173   :  { %v3542_v8 = vmax.f32 %v3430_v57, %v3432_v1  ;;  %v1656_v9 = vadd.f32 %v12209_v4, %v1655_v6  ;;  %v10138_v10 = vpop.f32.mrb[78].mxu0 }
 0x174   :  { %v3622_v12 = vsel %vm3600_vm2, %v3543_v3, 0.0  ;;  %v2452_v13 = vmax.f32 %v1664_v5, 0.0  ;;  %v1667_v14 = vadd.f32 %v12209_v4, %v10138_v10  ;;  %v1658_v15 = vpop.f32.mrb[79].mxu0 }
 0x175   :  { %3686 = vst.msk [vmem:[#allocation3 + $0x88] sm:$0xff] %vm2630_vm1, %v3622_v12  ;;  %v3621_v16 = vsel %vm3593_vm3, %v3542_v8, 0.0  ;;  %v2450_v17 = vmax.f32 %v1656_v9, 0.0  ;;  %v1659_v18 = vadd.f32 %v12209_v4, %v1658_v15  ;;  %v11544_v9 = vld [vmem:[%s13766_s0 + $0x318] sm:$0xff]   ;;  %v11545_v12 = vld [vmem:[%s13766_s0 + $0x320] sm:$0xff]  }
 0x176   :  { %3685 = vst.msk [vmem:[#allocation3 + $0x80] sm:$0xff] %vm2630_vm1, %v3621_v16  ;;  %2709 = vst.msk [vmem:[#allocation2 + $0x270] sm:$0xff] %vm2630_vm1, %v2452_v13  ;;  %v2453_v19 = vmax.f32 %v1667_v14, 0.0  ;;  %10244 = vmatmul.mubr.msk.bf16.gmra.mrb[184].mxu0 %vm932_vm0, %v11538_v7 }
 0x177   :  { %2707 = vst.msk [vmem:[#allocation2 + $0x260] sm:$0xff] %vm2630_vm1, %v2450_v17  ;;  %v2451_v20 = vmax.f32 %v1659_v18, 0.0  ;;  %10247 = vmatprep.mubr.msk.bf16.mxu0 %vm932_vm0, %v11539_v11  ;;  %v2961_v25 = vld [vmem:[#allocation2 + $0x250] ss:$2 sm:$0xff]  ;;  %v3217_v26 = vld [vmem:[#allocation2 + $0x251] ss:$2 sm:$0xff] }
 0x178   :  { %2710 = vst.msk [vmem:[#allocation2 + $0x278] sm:$0xff] %vm2630_vm1, %v2453_v19  ;;  %v2959_v30 = vld [vmem:[#allocation2 + $0x240] ss:$2 sm:$0xff]  ;;  %v3215_v31 = vld [vmem:[#allocation2 + $0x241] ss:$2 sm:$0xff]  ;;  %v3435_v43 = vmax.f32 %v2961_v25, %v3217_v26 }
 0x179   :  { %2708 = vst.msk [vmem:[#allocation2 + $0x268] sm:$0xff] %vm2630_vm1, %v2451_v20  ;;  %v10141_v21 = vpop.f32.mrb[80].mxu0  ;;  %v3434_v49 = vmax.f32 %v2959_v30, %v3215_v31 }
 0x17a   :  { %v1680_v22 = vadd.f32 %v12209_v4, %v10141_v21  ;;  %v1671_v23 = vpop.f32.mrb[81].mxu0 }
 0x17b   :  { %v1672_v27 = vadd.f32 %v12209_v4, %v1671_v23  ;;  %v10142_v28 = vpop.f32.mrb[82].mxu0 }
 0x17c   :  { %v2456_v32 = vmax.f32 %v1680_v22, 0.0  ;;  %v1683_v33 = vadd.f32 %v12209_v4, %v10142_v28  ;;  %v1674_v34 = vpop.f32.mrb[83].mxu0 }
 0x17d   :  { %v2454_v37 = vmax.f32 %v1672_v27, 0.0  ;;  %v1675_v38 = vadd.f32 %v12209_v4, %v1674_v34 }
 0x17e   :  { %2713 = vst.msk [vmem:[#allocation2 + $0x290] sm:$0xff] %vm2630_vm1, %v2456_v32  ;;  %v2457_v39 = vmax.f32 %v1683_v33, 0.0  ;;  %10248 = vmatmul.mubr.msk.bf16.gmra.mrb[188].mxu0 %vm932_vm0, %v11540_v24 }
 0x17f   :  { %v2965_v40 = vld [vmem:[#allocation2 + $0x270] ss:$2 sm:$0xff]  ;;  %v3221_v41 = vld [vmem:[#allocation2 + $0x271] ss:$2 sm:$0xff]  ;;  %2711 = vst.msk [vmem:[#allocation2 + $0x280] sm:$0xff] %vm2630_vm1, %v2454_v37  ;;  %v2455_v42 = vmax.f32 %v1675_v38, 0.0  ;;  %10251 = vmatprep.mubr.msk.bf16.mxu0 %vm932_vm0, %v11541_v29 }
 0x180   :  { %v3437_v44 = vmax.f32 %v2965_v40, %v3221_v41  ;;  %v2963_v45 = vld [vmem:[#allocation2 + $0x260] ss:$2 sm:$0xff]  ;;  %v3219_v46 = vld [vmem:[#allocation2 + $0x261] ss:$2 sm:$0xff]  ;;  %2714 = vst.msk [vmem:[#allocation2 + $0x298] sm:$0xff] %vm2630_vm1, %v2457_v39  ;;  %v11547_v41 = vld [vmem:[%s13766_s0 + $0x330] sm:$0xff]  }
 0x181   :  { %v3436_v50 = vmax.f32 %v2963_v45, %v3219_v46  ;;  %2712 = vst.msk [vmem:[#allocation2 + $0x288] sm:$0xff] %vm2630_vm1, %v2455_v42  ;;  %v10145_v51 = vpop.f32.mrb[84].mxu0  ;;  %v11546_v37 = vld [vmem:[%s13766_s0 + $0x328] sm:$0xff]  }
 0x182   :  { %v3545_v52 = vmax.f32 %v3435_v43, %v3437_v44  ;;  %v1696_v53 = vadd.f32 %v12209_v4, %v10145_v51  ;;  %v1687_v54 = vpop.f32.mrb[85].mxu0  ;;  %v11575_v51 = vld [vmem:[%s13768_s3 + $0x20] sm:$0xff]  }
 0x183   :  { %v3544_v56 = vmax.f32 %v3434_v49, %v3436_v50  ;;  %v1688_v58 = vadd.f32 %v12209_v4, %v1687_v54  ;;  %v10146_v59 = vpop.f32.mrb[86].mxu0  ;;  %10927 = vmatprep.subr.bf16.mxu1 %v11575_v51 }
 0x184   :  { %v3624_v61 = vsel %vm3600_vm2, %v3545_v52, 0.0  ;;  %v2460_v62 = vmax.f32 %v1696_v53, 0.0  ;;  %v1699_v63 = vadd.f32 %v12209_v4, %v10146_v59  ;;  %v1690_v0 = vpop.f32.mrb[87].mxu0  ;;  %10929 = vmatpush3.bf16.msra.mxu1 %v11575_v51 }
 0x185   :  { %3688 = vst.msk [vmem:[#allocation3 + $0x98] sm:$0xff] %vm2630_vm1, %v3624_v61  ;;  %v3623_v57 = vsel %vm3593_vm3, %v3544_v56, 0.0  ;;  %v2458_v1 = vmax.f32 %v1688_v58, 0.0  ;;  %v1691_v2 = vadd.f32 %v12209_v4, %v1690_v0  ;;  %v11548_v56 = vld [vmem:[%s13766_s0 + $0x338] sm:$0xff]   ;;  %v11576_v58 = vld [vmem:[%s13768_s3 + $0x28] sm:$0xff]   ;;  %v11549_v61 = vld [vmem:[%s13766_s0 + $0x340] sm:$0xff]  }
 0x186   :  { %3687 = vst.msk [vmem:[#allocation3 + $0x90] sm:$0xff] %vm2630_vm1, %v3623_v57  ;;  %2717 = vst.msk [vmem:[#allocation2 + $0x2b0] sm:$0xff] %vm2630_vm1, %v2460_v62  ;;  %v2461_v3 = vmax.f32 %v1699_v63, 0.0  ;;  %10252 = vmatmul.mubr.msk.bf16.gmra.mrb[192].mxu0 %vm932_vm0, %v11542_v55  ;;  %10928 = vmatprep.subr.bf16.mxu1 %v11576_v58 }
 0x187   :  { %2715 = vst.msk [vmem:[#allocation2 + $0x2a0] sm:$0xff] %vm2630_vm1, %v2458_v1  ;;  %v2459_v5 = vmax.f32 %v1691_v2, 0.0  ;;  %10255 = vmatprep.mubr.msk.bf16.mxu0 %vm932_vm0, %v11543_v60  ;;  %v2969_v16 = vld [vmem:[#allocation2 + $0x290] ss:$2 sm:$0xff]  ;;  %v3225_v17 = vld [vmem:[#allocation2 + $0x291] ss:$2 sm:$0xff] }
 0x188   :  { %2718 = vst.msk [vmem:[#allocation2 + $0x2b8] sm:$0xff] %vm2630_vm1, %v2461_v3  ;;  %v2967_v20 = vld [vmem:[#allocation2 + $0x280] ss:$2 sm:$0xff]  ;;  %v3223_v21 = vld [vmem:[#allocation2 + $0x281] ss:$2 sm:$0xff]  ;;  %v3439_v26 = vmax.f32 %v2969_v16, %v3225_v17  ;;  %10930 = vmatpush3.bf16.msra.mxu1 %v11576_v58 }
 0x189   :  { %2716 = vst.msk [vmem:[#allocation2 + $0x2a8] sm:$0xff] %vm2630_vm1, %v2459_v5  ;;  %v10149_v6 = vpop.f32.mrb[88].mxu0  ;;  %v3438_v30 = vmax.f32 %v2967_v20, %v3223_v21  ;;  %v11550_v21 = vld [vmem:[%s13766_s0 + $0x348] sm:$0xff]  }
 0x18a   :  { %v1712_v7 = vadd.f32 %v12209_v4, %v10149_v6  ;;  %v1703_v8 = vpop.f32.mrb[89].mxu0 }
 0x18b   :  { %v1704_v10 = vadd.f32 %v12209_v4, %v1703_v8  ;;  %v10150_v11 = vpop.f32.mrb[90].mxu0 }
 0x18c   :  { %v2464_v13 = vmax.f32 %v1712_v7, 0.0  ;;  %v1715_v14 = vadd.f32 %v12209_v4, %v10150_v11  ;;  %v1706_v15 = vpop.f32.mrb[91].mxu0 }
 0x18d   :  { %v2462_v18 = vmax.f32 %v1704_v10, 0.0  ;;  %v1707_v19 = vadd.f32 %v12209_v4, %v1706_v15 }
 0x18e   :  { %2721 = vst.msk [vmem:[#allocation2 + $0x2d0] sm:$0xff] %vm2630_vm1, %v2464_v13  ;;  %v2465_v22 = vmax.f32 %v1715_v14, 0.0  ;;  %10256 = vmatmul.mubr.msk.bf16.gmra.mrb[196].mxu0 %vm932_vm0, %v11544_v9 }
 0x18f   :  { %v2973_v23 = vld [vmem:[#allocation2 + $0x2b0] ss:$2 sm:$0xff]  ;;  %v3229_v24 = vld [vmem:[#allocation2 + $0x2b1] ss:$2 sm:$0xff]  ;;  %2719 = vst.msk [vmem:[#allocation2 + $0x2c0] sm:$0xff] %vm2630_vm1, %v2462_v18  ;;  %v2463_v25 = vmax.f32 %v1707_v19, 0.0  ;;  %10259 = vmatprep.mubr.msk.bf16.mxu0 %vm932_vm0, %v11545_v12 }
 0x190   :  { %v3441_v27 = vmax.f32 %v2973_v23, %v3229_v24  ;;  %v2971_v28 = vld [vmem:[#allocation2 + $0x2a0] ss:$2 sm:$0xff]  ;;  %v3227_v29 = vld [vmem:[#allocation2 + $0x2a1] ss:$2 sm:$0xff]  ;;  %2722 = vst.msk [vmem:[#allocation2 + $0x2d8] sm:$0xff] %vm2630_vm1, %v2465_v22 }
 0x191   :  { %v3440_v31 = vmax.f32 %v2971_v28, %v3227_v29  ;;  %2720 = vst.msk [vmem:[#allocation2 + $0x2c8] sm:$0xff] %vm2630_vm1, %v2463_v25  ;;  %v10153_v32 = vpop.f32.mrb[92].mxu0  ;;  %v11551_v25 = vld [vmem:[%s13766_s0 + $0x350] sm:$0xff]  }
 0x192   :  { %v3547_v33 = vmax.f32 %v3439_v26, %v3441_v27  ;;  %v1728_v34 = vadd.f32 %v12209_v4, %v10153_v32  ;;  %v1719_v36 = vpop.f32.mrb[93].mxu0 }
 0x193   :  { %v3546_v38 = vmax.f32 %v3438_v30, %v3440_v31  ;;  %v1720_v39 = vadd.f32 %v12209_v4, %v1719_v36  ;;  %v10154_v40 = vpop.f32.mrb[94].mxu0 }
 0x194   :  { %v3626_v42 = vsel %vm3600_vm2, %v3547_v33, 0.0  ;;  %v2468_v43 = vmax.f32 %v1728_v34, 0.0  ;;  %v1731_v44 = vadd.f32 %v12209_v4, %v10154_v40  ;;  %v1722_v45 = vpop.f32.mrb[95].mxu0 }
 0x195   :  { %3690 = vst.msk [vmem:[#allocation3 + $0xa8] sm:$0xff] %vm2630_vm1, %v3626_v42  ;;  %v3625_v46 = vsel %vm3593_vm3, %v3546_v38, 0.0  ;;  %v2466_v47 = vmax.f32 %v1720_v39, 0.0  ;;  %v1723_v49 = vadd.f32 %v12209_v4, %v1722_v45  ;;  %v11552_v39 = vld [vmem:[%s13766_s0 + $0x358] sm:$0xff]   ;;  %v11553_v42 = vld [vmem:[%s13766_s0 + $0x360] sm:$0xff]  }
 0x196   :  { %3689 = vst.msk [vmem:[#allocation3 + $0xa0] sm:$0xff] %vm2630_vm1, %v3625_v46  ;;  %2725 = vst.msk [vmem:[#allocation2 + $0x2f0] sm:$0xff] %vm2630_vm1, %v2468_v43  ;;  %v2469_v50 = vmax.f32 %v1731_v44, 0.0  ;;  %10260 = vmatmul.mubr.msk.bf16.gmra.mrb[200].mxu0 %vm932_vm0, %v11546_v37 }
 0x197   :  { %2723 = vst.msk [vmem:[#allocation2 + $0x2e0] sm:$0xff] %vm2630_vm1, %v2466_v47  ;;  %v2467_v52 = vmax.f32 %v1723_v49, 0.0  ;;  %10263 = vmatprep.mubr.msk.bf16.mxu0 %vm932_vm0, %v11547_v41  ;;  %v2977_v57 = vld [vmem:[#allocation2 + $0x2d0] ss:$2 sm:$0xff]  ;;  %v3233_v1 = vld [vmem:[#allocation2 + $0x2d1] ss:$2 sm:$0xff] }
 0x198   :  { %2726 = vst.msk [vmem:[#allocation2 + $0x2f8] sm:$0xff] %vm2630_vm1, %v2469_v50  ;;  %v2975_v5 = vld [vmem:[#allocation2 + $0x2c0] ss:$2 sm:$0xff]  ;;  %v3231_v6 = vld [vmem:[#allocation2 + $0x2c1] ss:$2 sm:$0xff]  ;;  %v3443_v11 = vmax.f32 %v2977_v57, %v3233_v1 }
 0x199   :  { %2724 = vst.msk [vmem:[#allocation2 + $0x2e8] sm:$0xff] %vm2630_vm1, %v2467_v52  ;;  %v10157_v53 = vpop.f32.mrb[96].mxu0  ;;  %v3442_v15 = vmax.f32 %v2975_v5, %v3231_v6 }
 0x19a   :  { %v1744_v54 = vadd.f32 %v12209_v4, %v10157_v53  ;;  %v1735_v55 = vpop.f32.mrb[97].mxu0 }
 0x19b   :  { %v1736_v59 = vadd.f32 %v12209_v4, %v1735_v55  ;;  %v10158_v60 = vpop.f32.mrb[98].mxu0 }
 0x19c   :  { %v2472_v62 = vmax.f32 %v1744_v54, 0.0  ;;  %v1747_v63 = vadd.f32 %v12209_v4, %v10158_v60  ;;  %v1738_v0 = vpop.f32.mrb[99].mxu0 }
 0x19d   :  { %v2470_v2 = vmax.f32 %v1736_v59, 0.0  ;;  %v1739_v3 = vadd.f32 %v12209_v4, %v1738_v0 }
 0x19e   :  { %2729 = vst.msk [vmem:[#allocation2 + $0x310] sm:$0xff] %vm2630_vm1, %v2472_v62  ;;  %v2473_v7 = vmax.f32 %v1747_v63, 0.0  ;;  %10264 = vmatmul.mubr.msk.bf16.gmra.mrb[204].mxu0 %vm932_vm0, %v11548_v56 }
 0x19f   :  { %v2981_v8 = vld [vmem:[#allocation2 + $0x2f0] ss:$2 sm:$0xff]  ;;  %v3237_v9 = vld [vmem:[#allocation2 + $0x2f1] ss:$2 sm:$0xff]  ;;  %2727 = vst.msk [vmem:[#allocation2 + $0x300] sm:$0xff] %vm2630_vm1, %v2470_v2  ;;  %v2471_v10 = vmax.f32 %v1739_v3, 0.0  ;;  %10267 = vmatprep.mubr.msk.bf16.mxu0 %vm932_vm0, %v11549_v61 }
 0x1a0   :  { %v3445_v12 = vmax.f32 %v2981_v8, %v3237_v9  ;;  %v2979_v13 = vld [vmem:[#allocation2 + $0x2e0] ss:$2 sm:$0xff]  ;;  %v3235_v14 = vld [vmem:[#allocation2 + $0x2e1] ss:$2 sm:$0xff]  ;;  %2730 = vst.msk [vmem:[#allocation2 + $0x318] sm:$0xff] %vm2630_vm1, %v2473_v7  ;;  %v11555_v8 = vld [vmem:[%s13766_s0 + $0x370] sm:$0xff]  }
 0x1a1   :  { %v3444_v16 = vmax.f32 %v2979_v13, %v3235_v14  ;;  %2728 = vst.msk [vmem:[#allocation2 + $0x308] sm:$0xff] %vm2630_vm1, %v2471_v10  ;;  %v10161_v17 = vpop.f32.mrb[100].mxu0  ;;  %v11554_v3 = vld [vmem:[%s13766_s0 + $0x368] sm:$0xff]  }
 0x1a2   :  { %v3549_v18 = vmax.f32 %v3443_v11, %v3445_v12  ;;  %v1760_v19 = vadd.f32 %v12209_v4, %v10161_v17  ;;  %v1751_v20 = vpop.f32.mrb[101].mxu0 }
 0x1a3   :  { %v3548_v22 = vmax.f32 %v3442_v15, %v3444_v16  ;;  %v1752_v23 = vadd.f32 %v12209_v4, %v1751_v20  ;;  %v10162_v24 = vpop.f32.mrb[102].mxu0 }
 0x1a4   :  { %v3628_v26 = vsel %vm3600_vm2, %v3549_v18, 0.0  ;;  %v2476_v27 = vmax.f32 %v1760_v19, 0.0  ;;  %v1763_v28 = vadd.f32 %v12209_v4, %v10162_v24  ;;  %v1754_v29 = vpop.f32.mrb[103].mxu0  ;;  %v11557_v24 = vld [vmem:[%s13766_s0 + $0x380] sm:$0xff]  }
 0x1a5   :  { %3692 = vst.msk [vmem:[#allocation3 + $0xb8] sm:$0xff] %vm2630_vm1, %v3628_v26  ;;  %v3627_v30 = vsel %vm3593_vm3, %v3548_v22, 0.0  ;;  %v2474_v31 = vmax.f32 %v1752_v23, 0.0  ;;  %v1755_v32 = vadd.f32 %v12209_v4, %v1754_v29 }
 0x1a6   :  { %3691 = vst.msk [vmem:[#allocation3 + $0xb0] sm:$0xff] %vm2630_vm1, %v3627_v30  ;;  %2733 = vst.msk [vmem:[#allocation2 + $0x330] sm:$0xff] %vm2630_vm1, %v2476_v27  ;;  %v2477_v33 = vmax.f32 %v1763_v28, 0.0  ;;  %10268 = vmatmul.mubr.msk.bf16.gmra.mrb[208].mxu0 %vm932_vm0, %v11550_v21  ;;  %v11556_v21 = vld [vmem:[%s13766_s0 + $0x378] sm:$0xff]  }
 0x1a7   :  { %2731 = vst.msk [vmem:[#allocation2 + $0x320] sm:$0xff] %vm2630_vm1, %v2474_v31  ;;  %v2475_v34 = vmax.f32 %v1755_v32, 0.0  ;;  %10271 = vmatprep.mubr.msk.bf16.mxu0 %vm932_vm0, %v11551_v25  ;;  %v2985_v46 = vld [vmem:[#allocation2 + $0x310] ss:$2 sm:$0xff]  ;;  %v3241_v47 = vld [vmem:[#allocation2 + $0x311] ss:$2 sm:$0xff] }
 0x1a8   :  { %2734 = vst.msk [vmem:[#allocation2 + $0x338] sm:$0xff] %vm2630_vm1, %v2477_v33  ;;  %v2983_v51 = vld [vmem:[#allocation2 + $0x300] ss:$2 sm:$0xff]  ;;  %v3239_v52 = vld [vmem:[#allocation2 + $0x301] ss:$2 sm:$0xff]  ;;  %v3447_v58 = vmax.f32 %v2985_v46, %v3241_v47 }
 0x1a9   :  { %2732 = vst.msk [vmem:[#allocation2 + $0x328] sm:$0xff] %vm2630_vm1, %v2475_v34  ;;  %v10165_v36 = vpop.f32.mrb[104].mxu0  ;;  %v3446_v62 = vmax.f32 %v2983_v51, %v3239_v52 }
 0x1aa   :  { %v1776_v37 = vadd.f32 %v12209_v4, %v10165_v36  ;;  %v1767_v38 = vpop.f32.mrb[105].mxu0 }
 0x1ab   :  { %v1768_v40 = vadd.f32 %v12209_v4, %v1767_v38  ;;  %v10166_v41 = vpop.f32.mrb[106].mxu0 }
 0x1ac   :  { %v2480_v43 = vmax.f32 %v1776_v37, 0.0  ;;  %v1779_v44 = vadd.f32 %v12209_v4, %v10166_v41  ;;  %v1770_v45 = vpop.f32.mrb[107].mxu0 }
 0x1ad   :  { %v2478_v49 = vmax.f32 %v1768_v40, 0.0  ;;  %v1771_v50 = vadd.f32 %v12209_v4, %v1770_v45 }
 0x1ae   :  { %2737 = vst.msk [vmem:[#allocation2 + $0x350] sm:$0xff] %vm2630_vm1, %v2480_v43  ;;  %v2481_v53 = vmax.f32 %v1779_v44, 0.0  ;;  %10272 = vmatmul.mubr.msk.bf16.gmra.mrb[212].mxu0 %vm932_vm0, %v11552_v39 }
 0x1af   :  { %v2989_v54 = vld [vmem:[#allocation2 + $0x330] ss:$2 sm:$0xff]  ;;  %v3245_v55 = vld [vmem:[#allocation2 + $0x331] ss:$2 sm:$0xff]  ;;  %2735 = vst.msk [vmem:[#allocation2 + $0x340] sm:$0xff] %vm2630_vm1, %v2478_v49  ;;  %v2479_v56 = vmax.f32 %v1771_v50, 0.0  ;;  %10275 = vmatprep.mubr.msk.bf16.mxu0 %vm932_vm0, %v11553_v42 }
 0x1b0   :  { %v3449_v59 = vmax.f32 %v2989_v54, %v3245_v55  ;;  %v2987_v60 = vld [vmem:[#allocation2 + $0x320] ss:$2 sm:$0xff]  ;;  %v3243_v61 = vld [vmem:[#allocation2 + $0x321] ss:$2 sm:$0xff]  ;;  %2738 = vst.msk [vmem:[#allocation2 + $0x358] sm:$0xff] %vm2630_vm1, %v2481_v53  ;;  %v11559_v54 = vld [vmem:[%s13766_s0 + $0x390] sm:$0xff]  }
 0x1b1   :  { %v3448_v63 = vmax.f32 %v2987_v60, %v3243_v61  ;;  %2736 = vst.msk [vmem:[#allocation2 + $0x348] sm:$0xff] %vm2630_vm1, %v2479_v56  ;;  %v10169_v0 = vpop.f32.mrb[108].mxu0  ;;  %v11558_v50 = vld [vmem:[%s13766_s0 + $0x388] sm:$0xff]  }
 0x1b2   :  { %v3551_v57 = vmax.f32 %v3447_v58, %v3449_v59  ;;  %v1792_v1 = vadd.f32 %v12209_v4, %v10169_v0  ;;  %v1783_v2 = vpop.f32.mrb[109].mxu0 }
 0x1b3   :  { %v3550_v5 = vmax.f32 %v3446_v62, %v3448_v63  ;;  %v1784_v6 = vadd.f32 %v12209_v4, %v1783_v2  ;;  %v10170_v7 = vpop.f32.mrb[110].mxu0  ;;  %v11560_v2 = vld [vmem:[%s13766_s0 + $0x398] sm:$0xff]  }
 0x1b4   :  { %v3630_v9 = vsel %vm3600_vm2, %v3551_v57, 0.0  ;;  %v2484_v10 = vmax.f32 %v1792_v1, 0.0  ;;  %v1795_v11 = vadd.f32 %v12209_v4, %v10170_v7  ;;  %v1786_v12 = vpop.f32.mrb[111].mxu0 }
 0x1b5   :  { %3694 = vst.msk [vmem:[#allocation3 + $0xc8] sm:$0xff] %vm2630_vm1, %v3630_v9  ;;  %v3629_v13 = vsel %vm3593_vm3, %v3550_v5, 0.0  ;;  %v2482_v14 = vmax.f32 %v1784_v6, 0.0  ;;  %v1787_v15 = vadd.f32 %v12209_v4, %v1786_v12  ;;  %v11561_v5 = vld [vmem:[%s13766_s0 + $0x3a0] sm:$0xff]  }
 0x1b6   :  { %3693 = vst.msk [vmem:[#allocation3 + $0xc0] sm:$0xff] %vm2630_vm1, %v3629_v13  ;;  %2741 = vst.msk [vmem:[#allocation2 + $0x370] sm:$0xff] %vm2630_vm1, %v2484_v10  ;;  %v2485_v16 = vmax.f32 %v1795_v11, 0.0  ;;  %10276 = vmatmul.mubr.msk.bf16.gmra.mrb[216].mxu0 %vm932_vm0, %v11554_v3 }
 0x1b7   :  { %2739 = vst.msk [vmem:[#allocation2 + $0x360] sm:$0xff] %vm2630_vm1, %v2482_v14  ;;  %v2483_v17 = vmax.f32 %v1787_v15, 0.0  ;;  %10279 = vmatprep.mubr.msk.bf16.mxu0 %vm932_vm0, %v11555_v8  ;;  %v2993_v28 = vld [vmem:[#allocation2 + $0x350] ss:$2 sm:$0xff]  ;;  %v3249_v29 = vld [vmem:[#allocation2 + $0x351] ss:$2 sm:$0xff] }
 0x1b8   :  { %2742 = vst.msk [vmem:[#allocation2 + $0x378] sm:$0xff] %vm2630_vm1, %v2485_v16  ;;  %v2991_v32 = vld [vmem:[#allocation2 + $0x340] ss:$2 sm:$0xff]  ;;  %v3247_v33 = vld [vmem:[#allocation2 + $0x341] ss:$2 sm:$0xff]  ;;  %v3451_v39 = vmax.f32 %v2993_v28, %v3249_v29 }
 0x1b9   :  { %2740 = vst.msk [vmem:[#allocation2 + $0x368] sm:$0xff] %vm2630_vm1, %v2483_v17  ;;  %v10173_v18 = vpop.f32.mrb[112].mxu0  ;;  %v3450_v43 = vmax.f32 %v2991_v32, %v3247_v33  ;;  %v11565_v33 = vld [vmem:[%s13766_s0 + $0x3c0] sm:$0xff]  }
 0x1ba   :  { %v1808_v19 = vadd.f32 %v12209_v4, %v10173_v18  ;;  %v1799_v20 = vpop.f32.mrb[113].mxu0 }
 0x1bb   :  { %v1800_v22 = vadd.f32 %v12209_v4, %v1799_v20  ;;  %v10174_v23 = vpop.f32.mrb[114].mxu0 }
 0x1bc   :  { %v2488_v25 = vmax.f32 %v1808_v19, 0.0  ;;  %v1811_v26 = vadd.f32 %v12209_v4, %v10174_v23  ;;  %v1802_v27 = vpop.f32.mrb[115].mxu0 }
 0x1bd   :  { %v2486_v30 = vmax.f32 %v1800_v22, 0.0  ;;  %v1803_v31 = vadd.f32 %v12209_v4, %v1802_v27  ;;  %v11562_v22 = vld [vmem:[%s13766_s0 + $0x3a8] sm:$0xff]  }
 0x1be   :  { %2745 = vst.msk [vmem:[#allocation2 + $0x390] sm:$0xff] %vm2630_vm1, %v2488_v25  ;;  %v2489_v34 = vmax.f32 %v1811_v26, 0.0  ;;  %10280 = vmatmul.mubr.msk.bf16.gmra.mrb[220].mxu0 %vm932_vm0, %v11556_v21  ;;  %v11563_v25 = vld [vmem:[%s13766_s0 + $0x3b0] sm:$0xff]  }
 0x1bf   :  { %v2997_v36 = vld [vmem:[#allocation2 + $0x370] ss:$2 sm:$0xff]  ;;  %v3253_v37 = vld [vmem:[#allocation2 + $0x371] ss:$2 sm:$0xff]  ;;  %2743 = vst.msk [vmem:[#allocation2 + $0x380] sm:$0xff] %vm2630_vm1, %v2486_v30  ;;  %v2487_v38 = vmax.f32 %v1803_v31, 0.0  ;;  %10283 = vmatprep.mubr.msk.bf16.mxu0 %vm932_vm0, %v11557_v24 }
 0x1c0   :  { %v3453_v40 = vmax.f32 %v2997_v36, %v3253_v37  ;;  %v2995_v41 = vld [vmem:[#allocation2 + $0x360] ss:$2 sm:$0xff]  ;;  %v3251_v42 = vld [vmem:[#allocation2 + $0x361] ss:$2 sm:$0xff]  ;;  %2746 = vst.msk [vmem:[#allocation2 + $0x398] sm:$0xff] %vm2630_vm1, %v2489_v34  ;;  %v11564_v31 = vld [vmem:[%s13766_s0 + $0x3b8] sm:$0xff]  }
 0x1c1   :  { %v3452_v44 = vmax.f32 %v2995_v41, %v3251_v42  ;;  %2744 = vst.msk [vmem:[#allocation2 + $0x388] sm:$0xff] %vm2630_vm1, %v2487_v38  ;;  %v10177_v45 = vpop.f32.mrb[116].mxu0  ;;  %v11566_v38 = vld [vmem:[%s13766_s0 + $0x3c8] sm:$0xff]  }
 0x1c2   :  { %v3553_v46 = vmax.f32 %v3451_v39, %v3453_v40  ;;  %v1824_v47 = vadd.f32 %v12209_v4, %v10177_v45  ;;  %v1815_v49 = vpop.f32.mrb[117].mxu0  ;;  %v11567_v40 = vld [vmem:[%s13766_s0 + $0x3d0] sm:$0xff]   ;;  %v11568_v45 = vld [vmem:[%s13766_s0 + $0x3d8] sm:$0xff]  }
 0x1c3   :  { %v3552_v51 = vmax.f32 %v3450_v43, %v3452_v44  ;;  %v1816_v52 = vadd.f32 %v12209_v4, %v1815_v49  ;;  %v10178_v53 = vpop.f32.mrb[118].mxu0  ;;  %v11569_v49 = vld [vmem:[%s13766_s0 + $0x3e0] sm:$0xff]  }
 0x1c4   :  { %v3632_v55 = vsel %vm3600_vm2, %v3553_v46, 0.0  ;;  %v2492_v56 = vmax.f32 %v1824_v47, 0.0  ;;  %v1827_v58 = vadd.f32 %v12209_v4, %v10178_v53  ;;  %v1818_v59 = vpop.f32.mrb[119].mxu0 }
 0x1c5   :  { %3696 = vst.msk [vmem:[#allocation3 + $0xd8] sm:$0xff] %vm2630_vm1, %v3632_v55  ;;  %v3631_v60 = vsel %vm3593_vm3, %v3552_v51, 0.0  ;;  %v2490_v61 = vmax.f32 %v1816_v52, 0.0  ;;  %v1819_v62 = vadd.f32 %v12209_v4, %v1818_v59 }
 0x1c6   :  { %3695 = vst.msk [vmem:[#allocation3 + $0xd0] sm:$0xff] %vm2630_vm1, %v3631_v60  ;;  %2749 = vst.msk [vmem:[#allocation2 + $0x3b0] sm:$0xff] %vm2630_vm1, %v2492_v56  ;;  %v2493_v63 = vmax.f32 %v1827_v58, 0.0  ;;  %10284 = vmatmul.mubr.msk.bf16.gmra.mrb[224].mxu0 %vm932_vm0, %v11558_v50 }
 0x1c7   :  { %2747 = vst.msk [vmem:[#allocation2 + $0x3a0] sm:$0xff] %vm2630_vm1, %v2490_v61  ;;  %v2491_v0 = vmax.f32 %v1819_v62, 0.0  ;;  %10287 = vmatprep.mubr.msk.bf16.mxu0 %vm932_vm0, %v11559_v54  ;;  %v3001_v7 = vld [vmem:[#allocation2 + $0x390] ss:$2 sm:$0xff]  ;;  %v3257_v8 = vld [vmem:[#allocation2 + $0x391] ss:$2 sm:$0xff] }
 0x1c8   :  { %2750 = vst.msk [vmem:[#allocation2 + $0x3b8] sm:$0xff] %vm2630_vm1, %v2493_v63  ;;  %v2999_v9 = vld [vmem:[#allocation2 + $0x380] ss:$2 sm:$0xff]  ;;  %v3255_v10 = vld [vmem:[#allocation2 + $0x381] ss:$2 sm:$0xff]  ;;  %v3455_v13 = vmax.f32 %v3001_v7, %v3257_v8 }
 0x1c9   :  { %2748 = vst.msk [vmem:[#allocation2 + $0x3a8] sm:$0xff] %vm2630_vm1, %v2491_v0  ;;  %v10181_v57 = vpop.f32.mrb[120].mxu0  ;;  %v3454_v17 = vmax.f32 %v2999_v9, %v3255_v10  ;;  %v11570_v61 = vld [vmem:[%s13766_s0 + $0x3e8] sm:$0xff]   ;;  %v11571_v0 = vld [vmem:[%s13766_s0 + $0x3f0] sm:$0xff]  }
 0x1ca   :  { %v1831_v1 = vpop.f32.mrb[121].mxu0 }
 0x1cb   :  { %v10182_v3 = vpop.f32.mrb[122].mxu0 }
 0x1cc   :  { %v1834_v6 = vpop.f32.mrb[123].mxu0 }
 0x1ce   :  { %10288 = vmatmul.mubr.msk.bf16.gmra.mrb[228].mxu0 %vm932_vm0, %v11560_v2 }
 0x1cf   :  { %v3005_v11 = vld [vmem:[#allocation2 + $0x3b0] ss:$2 sm:$0xff]  ;;  %v3261_v12 = vld [vmem:[#allocation2 + $0x3b1] ss:$2 sm:$0xff]  ;;  %10291 = vmatprep.mubr.msk.bf16.mxu0 %vm932_vm0, %v11561_v5 }
 0x1d0   :  { %v3457_v14 = vmax.f32 %v3005_v11, %v3261_v12  ;;  %v3003_v15 = vld [vmem:[#allocation2 + $0x3a0] ss:$2 sm:$0xff]  ;;  %v3259_v16 = vld [vmem:[#allocation2 + $0x3a1] ss:$2 sm:$0xff]  ;;  %v11572_v11 = vld [vmem:[%s13766_s0 + $0x3f8] sm:$0xff]  }
 0x1d1   :  { %v3456_v18 = vmax.f32 %v3003_v15, %v3259_v16  ;;  %v10185_v19 = vpop.f32.mrb[124].mxu0  ;;  %v3841_v12 = vld [vmem:[#allocation3 + $0x1] sm:$0xff] }
 0x1d2   :  { %v3555_v20 = vmax.f32 %v3455_v13, %v3457_v14  ;;  %v1847_v21 = vpop.f32.mrb[125].mxu0  ;;  %v3842_v13 = vld [vmem:[#allocation3 + $0x9] sm:$0xff] }
 0x1d3   :  { %v3554_v23 = vmax.f32 %v3454_v17, %v3456_v18  ;;  %v10186_v24 = vpop.f32.mrb[126].mxu0 }
 0x1d4   :  { %v3634_v26 = vsel %vm3600_vm2, %v3555_v20, 0.0  ;;  %v1850_v27 = vpop.f32.mrb[127].mxu0  ;;  %v3905_v24 = vpack.c.bf16 %v3842_v13, %v3841_v12 }
 0x1d5   :  { %3698 = vst.msk [vmem:[#allocation3 + $0xe8] sm:$0xff] %vm2630_vm1, %v3634_v26  ;;  %v3633_v28 = vsel %vm3593_vm3, %v3554_v23, 0.0 }
 0x1d6   :  { %3697 = vst.msk [vmem:[#allocation3 + $0xe0] sm:$0xff] %vm2630_vm1, %v3633_v28  ;;  %10292 = vmatmul.mubr.msk.bf16.gmra.mrb[232].mxu0 %vm932_vm0, %v11562_v22  ;;  %v12514_v22 = vld [vmem:[%s13767_s2] ss:$0 sm:$0xff] }
 0x1d7   :  { %10295 = vmatprep.mubr.msk.bf16.mxu0 %vm932_vm0, %v11563_v25 }
 0x1d9   :  { %v10189_v29 = vpop.f32.mrb[128].mxu0 }
 0x1da   :  { %v1863_v30 = vpop.f32.mrb[129].mxu0 }
 0x1db   :  { %v10190_v32 = vpop.f32.mrb[130].mxu0 }
 0x1dc   :  { %v1866_v34 = vpop.f32.mrb[131].mxu0 }
 0x1de   :  { %10296 = vmatmul.mubr.msk.bf16.gmra.mrb[236].mxu0 %vm932_vm0, %v11564_v31 }
 0x1df   :  { %10299 = vmatprep.mubr.msk.bf16.mxu0 %vm932_vm0, %v11565_v33 }
 0x1e1   :  { %v10193_v36 = vpop.f32.mrb[132].mxu0 }
 0x1e2   :  { %v1879_v37 = vpop.f32.mrb[133].mxu0 }
 0x1e3   :  { %v10194_v39 = vpop.f32.mrb[134].mxu0 }
 0x1e4   :  { %v1882_v41 = vpop.f32.mrb[135].mxu0 }
 0x1e6   :  { %10300 = vmatmul.mubr.msk.bf16.gmra.mrb[240].mxu0 %vm932_vm0, %v11566_v38  ;;  %v3844_v38 = vld [vmem:[#allocation3 + $0x19] sm:$0xff] }
 0x1e7   :  { %10303 = vmatprep.mubr.msk.bf16.mxu0 %vm932_vm0, %v11567_v40 }
 0x1e9   :  { %v10197_v42 = vpop.f32.mrb[136].mxu0 }
 0x1ea   :  { %v1904_v43 = vadd.f32 %v12209_v4, %v10197_v42  ;;  %v1895_v44 = vpop.f32.mrb[137].mxu0  ;;  %v3846_v42 = vld [vmem:[#allocation3 + $0x29] sm:$0xff] }
 0x1eb   :  { %v1896_v46 = vadd.f32 %v12209_v4, %v1895_v44  ;;  %v10198_v47 = vpop.f32.mrb[138].mxu0 }
 0x1ec   :  { %v2512_v50 = vmax.f32 %v1904_v43, 0.0  ;;  %v1907_v51 = vadd.f32 %v12209_v4, %v10198_v47  ;;  %v1898_v52 = vpop.f32.mrb[139].mxu0 }
 0x1ed   :  { %v2510_v53 = vmax.f32 %v1896_v46, 0.0  ;;  %v1899_v54 = vadd.f32 %v12209_v4, %v1898_v52 }
 0x1ee   :  { %2769 = vst.msk [vmem:[#allocation2 + $0x450] sm:$0xff] %vm2630_vm1, %v2512_v50  ;;  %v2513_v55 = vmax.f32 %v1907_v51, 0.0  ;;  %10304 = vmatmul.mubr.msk.bf16.gmra.mrb[244].mxu0 %vm932_vm0, %v11568_v45  ;;  %v3843_v45 = vld [vmem:[#allocation3 + $0x11] sm:$0xff] }
 0x1ef   :  { %2767 = vst.msk [vmem:[#allocation2 + $0x440] sm:$0xff] %vm2630_vm1, %v2510_v53  ;;  %v2511_v56 = vmax.f32 %v1899_v54, 0.0  ;;  %10307 = vmatprep.mubr.msk.bf16.mxu0 %vm932_vm0, %v11569_v49  ;;  %v3906_v52 = vpack.c.bf16 %v3844_v38, %v3843_v45  ;;  %v3845_v53 = vld [vmem:[#allocation3 + $0x21] sm:$0xff] }
 0x1f0   :  { %2770 = vst.msk [vmem:[#allocation2 + $0x458] sm:$0xff] %vm2630_vm1, %v2513_v55 }
 0x1f1   :  { %2768 = vst.msk [vmem:[#allocation2 + $0x448] sm:$0xff] %vm2630_vm1, %v2511_v56  ;;  %v10201_v58 = vpop.f32.mrb[140].mxu0  ;;  %v3907_v56 = vpack.c.bf16 %v3846_v42, %v3845_v53 }
 0x1f2   :  { %v1920_v59 = vadd.f32 %v12209_v4, %v10201_v58  ;;  %v1911_v60 = vpop.f32.mrb[141].mxu0 }
 0x1f3   :  { %v1912_v62 = vadd.f32 %v12209_v4, %v1911_v60  ;;  %v10202_v63 = vpop.f32.mrb[142].mxu0 }
 0x1f4   :  { %v2516_v57 = vmax.f32 %v1920_v59, 0.0  ;;  %v1923_v1 = vadd.f32 %v12209_v4, %v10202_v63  ;;  %v1914_v2 = vpop.f32.mrb[143].mxu0 }
 0x1f5   :  { %v2514_v3 = vmax.f32 %v1912_v62, 0.0  ;;  %v1915_v5 = vadd.f32 %v12209_v4, %v1914_v2  ;;  %v3848_v62 = vld [vmem:[#allocation3 + $0x39] sm:$0xff] }
 0x1f6   :  { %2773 = vst.msk [vmem:[#allocation2 + $0x470] sm:$0xff] %vm2630_vm1, %v2516_v57  ;;  %v2517_v6 = vmax.f32 %v1923_v1, 0.0  ;;  %10308 = vmatmul.mubr.msk.bf16.gmra.mrb[248].mxu0 %vm932_vm0, %v11570_v61  ;;  %v3850_v57 = vld [vmem:[#allocation3 + $0x49] sm:$0xff] }
 0x1f7   :  { %2771 = vst.msk [vmem:[#allocation2 + $0x460] sm:$0xff] %vm2630_vm1, %v2514_v3  ;;  %v2515_v7 = vmax.f32 %v1915_v5, 0.0  ;;  %10311 = vmatprep.mubr.msk.bf16.mxu0 %vm932_vm0, %v11571_v0  ;;  %v3025_v19 = vld [vmem:[#allocation2 + $0x450] ss:$2 sm:$0xff]  ;;  %v3281_v20 = vld [vmem:[#allocation2 + $0x451] ss:$2 sm:$0xff] }
 0x1f8   :  { %2774 = vst.msk [vmem:[#allocation2 + $0x478] sm:$0xff] %vm2630_vm1, %v2517_v6  ;;  %v3023_v25 = vld [vmem:[#allocation2 + $0x440] ss:$2 sm:$0xff]  ;;  %v3279_v26 = vld [vmem:[#allocation2 + $0x441] ss:$2 sm:$0xff]  ;;  %v3467_v30 = vmax.f32 %v3025_v19, %v3281_v20  ;;  %v3847_v3 = vld [vmem:[#allocation3 + $0x31] sm:$0xff] }
 0x1f9   :  { %2772 = vst.msk [vmem:[#allocation2 + $0x468] sm:$0xff] %vm2630_vm1, %v2515_v7  ;;  %v10205_v8 = vpop.f32.mrb[144].mxu0  ;;  %v3466_v34 = vmax.f32 %v3023_v25, %v3279_v26  ;;  %v4767_v5 = vld [vmem:[#allocation3 + $0x102] sm:$0xff] }
 0x1fa   :  { %v1936_v9 = vadd.f32 %v12209_v4, %v10205_v8  ;;  %v1927_v10 = vpop.f32.mrb[145].mxu0 }
 0x1fb   :  { %v1928_v14 = vadd.f32 %v12209_v4, %v1927_v10  ;;  %v10206_v15 = vpop.f32.mrb[146].mxu0  ;;  %v3849_v10 = vld [vmem:[#allocation3 + $0x41] sm:$0xff] }
 0x1fc   :  { %v2520_v16 = vmax.f32 %v1936_v9, 0.0  ;;  %v1939_v17 = vadd.f32 %v12209_v4, %v10206_v15  ;;  %v1930_v18 = vpop.f32.mrb[147].mxu0  ;;  %v3908_v9 = vpack.c.bf16 %v3848_v62, %v3847_v3  ;;  %v3909_v15 = vpack.c.bf16 %v3850_v57, %v3849_v10  ;;  %v3855_v62 = vld [vmem:[#allocation3 + $0x71] sm:$0xff] }
 0x1fd   :  { %v2518_v21 = vmax.f32 %v1928_v14, 0.0  ;;  %v1931_v23 = vadd.f32 %v12514_v22, %v1930_v18 }
 0x1fe   :  { %2777 = vst.msk [vmem:[#allocation2 + $0x490] sm:$0xff] %vm2630_vm1, %v2520_v16  ;;  %v2521_v27 = vmax.f32 %v1939_v17, 0.0  ;;  %10312 = vmatmul.mubr.msk.bf16.gmra.mrb[252].mxu0 %vm932_vm0, %v11572_v11 }
 0x1ff   :  { %v3029_v4 = vld [vmem:[#allocation2 + $0x470] ss:$2 sm:$0xff]  ;;  %v3285_v28 = vld [vmem:[#allocation2 + $0x471] ss:$2 sm:$0xff]  ;;  %2775 = vst.msk [vmem:[#allocation2 + $0x480] sm:$0xff] %vm2630_vm1, %v2518_v21  ;;  %v2519_v29 = vmax.f32 %v1931_v23, 0.0  ;;  %10319 = vmatprep.mubr.msk.bf16.mxu0 %vm2630_vm1, %v3905_v24 }
 0x200   :  { %v3469_v31 = vmax.f32 %v3029_v4, %v3285_v28  ;;  %v3027_v32 = vld [vmem:[#allocation2 + $0x460] ss:$2 sm:$0xff]  ;;  %v3283_v33 = vld [vmem:[#allocation2 + $0x461] ss:$2 sm:$0xff]  ;;  %2778 = vst.msk [vmem:[#allocation2 + $0x498] sm:$0xff] %vm2630_vm1, %v2521_v27 }
 0x201   :  { %v3468_v36 = vmax.f32 %v3027_v32, %v3283_v33  ;;  %2776 = vst.msk [vmem:[#allocation2 + $0x488] sm:$0xff] %vm2630_vm1, %v2519_v29  ;;  %v10209_v37 = vpop.f32.mrb[148].mxu0 }
 0x202   :  { %v3561_v39 = vmax.f32 %v3467_v30, %v3469_v31  ;;  %v1952_v40 = vadd.f32 %v12514_v22, %v10209_v37  ;;  %v1943_v41 = vpop.f32.mrb[149].mxu0  ;;  %v3852_v31 = vld [vmem:[#allocation3 + $0x59] sm:$0xff] }
 0x203   :  { %v1944_v43 = vadd.f32 %v12514_v22, %v1943_v41  ;;  %v10210_v44 = vpop.f32.mrb[150].mxu0  ;;  %v3560_v46 = vmax.f32 %v3466_v34, %v3468_v36  ;;  %v3854_v36 = vld [vmem:[#allocation3 + $0x69] sm:$0xff] }
 0x204   :  { %v3640_v47 = vsel %vm3600_vm2, %v3561_v39, 0.0  ;;  %v2524_v49 = vmax.f32 %v1952_v40, 0.0  ;;  %v1955_v50 = vadd.f32 %v12514_v22, %v10210_v44  ;;  %v1946_v51 = vpop.f32.mrb[151].mxu0  ;;  %v3851_v40 = vld [vmem:[#allocation3 + $0x51] sm:$0xff] }
 0x205   :  { %3704 = vst.msk [vmem:[#allocation3 + $0x118] sm:$0xff] %vm2630_vm1, %v3640_v47  ;;  %v2522_v54 = vmax.f32 %v1944_v43, 0.0  ;;  %v1947_v55 = vadd.f32 %v12514_v22, %v1946_v51  ;;  %v3639_v58 = vsel %vm3593_vm3, %v3560_v46, 0.0  ;;  %v3910_v45 = vpack.c.bf16 %v3852_v31, %v3851_v40  ;;  %v3853_v46 = vld [vmem:[#allocation3 + $0x61] sm:$0xff] }
 0x206   :  { %2781 = vst.msk [vmem:[#allocation2 + $0x4b0] sm:$0xff] %vm2630_vm1, %v2524_v49  ;;  %v2525_v59 = vmax.f32 %v1955_v50, 0.0  ;;  %10320 = vmatmul.mubr.msk.bf16.vlgmr.msra.gmra.mrb[0].mxu0 %vm2630_vm1, %v3906_v52  ;;  %3703 = vst.msk [vmem:[#allocation3 + $0x110] sm:$0xff] %vm2630_vm1, %v3639_v58  ;;  %v3911_v51 = vpack.c.bf16 %v3854_v36, %v3853_v46  ;;  %v3861_v40 = vld [vmem:[#allocation3 + $0xa1] sm:$0xff] }
 0x207   :  { %2779 = vst.msk [vmem:[#allocation2 + $0x4a0] sm:$0xff] %vm2630_vm1, %v2522_v54  ;;  %v2523_v60 = vmax.f32 %v1947_v55, 0.0  ;;  %10323 = vmatprep.mubr.msk.bf16.mxu0 %vm2630_vm1, %v3907_v56  ;;  %v3033_v11 = vld [vmem:[#allocation2 + $0x490] ss:$2 sm:$0xff]  ;;  %v3289_v12 = vld [vmem:[#allocation2 + $0x491] ss:$2 sm:$0xff] }
 0x208   :  { %2782 = vst.msk [vmem:[#allocation2 + $0x4b8] sm:$0xff] %vm2630_vm1, %v2525_v59  ;;  %v3031_v17 = vld [vmem:[#allocation2 + $0x480] ss:$2 sm:$0xff]  ;;  %v3287_v18 = vld [vmem:[#allocation2 + $0x481] ss:$2 sm:$0xff]  ;;  %v3471_v25 = vmax.f32 %v3033_v11, %v3289_v12 }
 0x209   :  { %2780 = vst.msk [vmem:[#allocation2 + $0x4a8] sm:$0xff] %vm2630_vm1, %v2523_v60  ;;  %v10213_v61 = vpop.f32.mrb[152].mxu0  ;;  %v3470_v28 = vmax.f32 %v3031_v17, %v3287_v18  ;;  %v3856_v55 = vld [vmem:[#allocation3 + $0x79] sm:$0xff]  ;;  %v3858_v59 = vld [vmem:[#allocation3 + $0x89] sm:$0xff] }
 0x20a   :  { %v1968_v63 = vadd.f32 %v12514_v22, %v10213_v61  ;;  %v1959_v0 = vpop.f32.mrb[153].mxu0 }
 0x20b   :  { %v1960_v1 = vadd.f32 %v12514_v22, %v1959_v0  ;;  %v10214_v2 = vpop.f32.mrb[154].mxu0 }
 0x20c   :  { %v2528_v6 = vmax.f32 %v1968_v63, 0.0  ;;  %v1971_v7 = vadd.f32 %v12514_v22, %v10214_v2  ;;  %v1962_v8 = vpop.f32.mrb[155].mxu0  ;;  %v3857_v2 = vld [vmem:[#allocation3 + $0x81] sm:$0xff] }
 0x20d   :  { %v2526_v13 = vmax.f32 %v1960_v1, 0.0  ;;  %v1963_v14 = vadd.f32 %v12514_v22, %v1962_v8  ;;  %v4768_v16 = vld [vmem:[#allocation3 + $0x10a] sm:$0xff]  ;;  %v3912_v1 = vpack.c.bf16 %v3856_v55, %v3855_v62  ;;  %v4769_v3 = vld [vmem:[#allocation3 + $0x112] sm:$0xff] }
 0x20e   :  { %2785 = vst.msk [vmem:[#allocation2 + $0x4d0] sm:$0xff] %vm2630_vm1, %v2528_v6  ;;  %v2529_v19 = vmax.f32 %v1971_v7, 0.0  ;;  %10324 = vmatmul.mubr.msk.bf16.gmra.mrb[4].mxu0 %vm2630_vm1, %v3908_v9  ;;  %v4815_v20 = vpack.c.bf16 %v4768_v16, %v4767_v5  ;;  %v3913_v9 = vpack.c.bf16 %v3858_v59, %v3857_v2  ;;  %v3863_v55 = vld [vmem:[#allocation3 + $0xb1] sm:$0xff] }
 0x20f   :  { %v3037_v21 = vld [vmem:[#allocation2 + $0x4b0] ss:$2 sm:$0xff]  ;;  %v3293_v23 = vld [vmem:[#allocation2 + $0x4b1] ss:$2 sm:$0xff]  ;;  %2783 = vst.msk [vmem:[#allocation2 + $0x4c0] sm:$0xff] %vm2630_vm1, %v2526_v13  ;;  %v2527_v24 = vmax.f32 %v1963_v14, 0.0  ;;  %10327 = vmatprep.mubr.msk.bf16.mxu0 %vm2630_vm1, %v3909_v15 }
 0x210   :  { %v3473_v26 = vmax.f32 %v3037_v21, %v3293_v23  ;;  %v3035_v27 = vld [vmem:[#allocation2 + $0x4a0] ss:$2 sm:$0xff]  ;;  %v3291_v4 = vld [vmem:[#allocation2 + $0x4a1] ss:$2 sm:$0xff]  ;;  %2786 = vst.msk [vmem:[#allocation2 + $0x4d8] sm:$0xff] %vm2630_vm1, %v2529_v19  ;;  %10487 = vmatprep.mubr.msk.bf16.mxu1 %vm2630_vm1, %v4815_v20 }
 0x211   :  { %v3472_v29 = vmax.f32 %v3035_v27, %v3291_v4  ;;  %2784 = vst.msk [vmem:[#allocation2 + $0x4c8] sm:$0xff] %vm2630_vm1, %v2527_v24  ;;  %v10217_v30 = vpop.f32.mrb[156].mxu0 }
 0x212   :  { %v3563_v32 = vmax.f32 %v3471_v25, %v3473_v26  ;;  %v1984_v33 = vadd.f32 %v12514_v22, %v10217_v30  ;;  %v1975_v34 = vpop.f32.mrb[157].mxu0  ;;  %v3860_v26 = vld [vmem:[#allocation3 + $0x99] sm:$0xff] }
 0x213   :  { %v3562_v37 = vmax.f32 %v3470_v28, %v3472_v29  ;;  %v1976_v38 = vadd.f32 %v12514_v22, %v1975_v34  ;;  %v10218_v39 = vpop.f32.mrb[158].mxu0  ;;  %v3862_v29 = vld [vmem:[#allocation3 + $0xa9] sm:$0xff] }
 0x214   :  { %v3642_v41 = vsel %vm3600_vm2, %v3563_v32, 0.0  ;;  %v2532_v42 = vmax.f32 %v1984_v33, 0.0  ;;  %v1987_v43 = vadd.f32 %v12514_v22, %v10218_v39  ;;  %v1978_v44 = vpop.f32.mrb[159].mxu0  ;;  %v3859_v33 = vld [vmem:[#allocation3 + $0x91] sm:$0xff] }
 0x215   :  { %3706 = vst.msk [vmem:[#allocation3 + $0x128] sm:$0xff] %vm2630_vm1, %v3642_v41  ;;  %v3641_v47 = vsel %vm3593_vm3, %v3562_v37, 0.0  ;;  %v2530_v49 = vmax.f32 %v1976_v38, 0.0  ;;  %v1979_v50 = vadd.f32 %v12514_v22, %v1978_v44  ;;  %v3914_v39 = vpack.c.bf16 %v3860_v26, %v3859_v33 }
 0x216   :  { %3705 = vst.msk [vmem:[#allocation3 + $0x120] sm:$0xff] %vm2630_vm1, %v3641_v47  ;;  %2789 = vst.msk [vmem:[#allocation2 + $0x4f0] sm:$0xff] %vm2630_vm1, %v2532_v42  ;;  %v2533_v52 = vmax.f32 %v1987_v43, 0.0  ;;  %10328 = vmatmul.mubr.msk.bf16.gmra.mrb[8].mxu0 %vm2630_vm1, %v3910_v45  ;;  %v3915_v44 = vpack.c.bf16 %v3862_v29, %v3861_v40 }
 0x217   :  { %2787 = vst.msk [vmem:[#allocation2 + $0x4e0] sm:$0xff] %vm2630_vm1, %v2530_v49  ;;  %v2531_v53 = vmax.f32 %v1979_v50, 0.0  ;;  %10331 = vmatprep.mubr.msk.bf16.mxu0 %vm2630_vm1, %v3911_v51  ;;  %v3041_v5 = vld [vmem:[#allocation2 + $0x4d0] ss:$2 sm:$0xff]  ;;  %v3297_v6 = vld [vmem:[#allocation2 + $0x4d1] ss:$2 sm:$0xff] }
 0x218   :  { %2790 = vst.msk [vmem:[#allocation2 + $0x4f8] sm:$0xff] %vm2630_vm1, %v2533_v52  ;;  %v3039_v11 = vld [vmem:[#allocation2 + $0x4c0] ss:$2 sm:$0xff]  ;;  %v3295_v12 = vld [vmem:[#allocation2 + $0x4c1] ss:$2 sm:$0xff]  ;;  %v3475_v18 = vmax.f32 %v3041_v5, %v3297_v6 }
 0x219   :  { %2788 = vst.msk [vmem:[#allocation2 + $0x4e8] sm:$0xff] %vm2630_vm1, %v2531_v53  ;;  %v10221_v54 = vpop.f32.mrb[160].mxu0  ;;  %v3474_v23 = vmax.f32 %v3039_v11, %v3295_v12  ;;  %v3864_v49 = vld [vmem:[#allocation3 + $0xb9] sm:$0xff]  ;;  %v3866_v52 = vld [vmem:[#allocation3 + $0xc9] sm:$0xff] }
 0x21a   :  { %v2000_v56 = vadd.f32 %v12514_v22, %v10221_v54  ;;  %v1991_v58 = vpop.f32.mrb[161].mxu0 }
 0x21b   :  { %v1992_v60 = vadd.f32 %v12514_v22, %v1991_v58  ;;  %v10222_v61 = vpop.f32.mrb[162].mxu0 }
 0x21c   :  { %v2536_v63 = vmax.f32 %v2000_v56, 0.0  ;;  %v2003_v0 = vadd.f32 %v12514_v22, %v10222_v61  ;;  %v1994_v57 = vpop.f32.mrb[163].mxu0  ;;  %v3865_v61 = vld [vmem:[#allocation3 + $0xc1] sm:$0xff] }
 0x21d   :  { %v2534_v7 = vmax.f32 %v1992_v60, 0.0  ;;  %v1995_v8 = vadd.f32 %v12514_v22, %v1994_v57  ;;  %v4770_v10 = vld [vmem:[#allocation3 + $0x11a] sm:$0xff]  ;;  %v3916_v60 = vpack.c.bf16 %v3864_v49, %v3863_v55  ;;  %v4771_v62 = vld [vmem:[#allocation3 + $0x122] sm:$0xff]  ;;  %v3917_v2 = vpack.c.bf16 %v3866_v52, %v3865_v61 }
 0x21e   :  { %2793 = vst.msk [vmem:[#allocation2 + $0x510] sm:$0xff] %vm2630_vm1, %v2536_v63  ;;  %v2537_v13 = vmax.f32 %v2003_v0, 0.0  ;;  %10332 = vmatmul.mubr.msk.bf16.gmra.mrb[12].mxu0 %vm2630_vm1, %v3912_v1  ;;  %v4816_v14 = vpack.c.bf16 %v4770_v10, %v4769_v3  ;;  %v3873_v49 = vld [vmem:[#allocation3 + $0x101] sm:$0xff] }
 0x21f   :  { %v3045_v15 = vld [vmem:[#allocation2 + $0x4f0] ss:$2 sm:$0xff]  ;;  %v3301_v16 = vld [vmem:[#allocation2 + $0x4f1] ss:$2 sm:$0xff]  ;;  %2791 = vst.msk [vmem:[#allocation2 + $0x500] sm:$0xff] %vm2630_vm1, %v2534_v7  ;;  %v2535_v17 = vmax.f32 %v1995_v8, 0.0  ;;  %10335 = vmatprep.mubr.msk.bf16.mxu0 %vm2630_vm1, %v3913_v9 }
 0x220   :  { %v3477_v19 = vmax.f32 %v3045_v15, %v3301_v16  ;;  %v3043_v20 = vld [vmem:[#allocation2 + $0x4e0] ss:$2 sm:$0xff]  ;;  %v3299_v21 = vld [vmem:[#allocation2 + $0x4e1] ss:$2 sm:$0xff]  ;;  %2794 = vst.msk [vmem:[#allocation2 + $0x518] sm:$0xff] %vm2630_vm1, %v2537_v13  ;;  %10488 = vmatmul.mubr.msk.bf16.vlgmr.msra.gmra.mrb[0].mxu1 %vm2630_vm1, %v4816_v14 }
 0x221   :  { %v3476_v24 = vmax.f32 %v3043_v20, %v3299_v21  ;;  %2792 = vst.msk [vmem:[#allocation2 + $0x508] sm:$0xff] %vm2630_vm1, %v2535_v17  ;;  %v10225_v25 = vpop.f32.mrb[164].mxu0 }
 0x222   :  { %v3565_v27 = vmax.f32 %v3475_v18, %v3477_v19  ;;  %v2016_v4 = vadd.f32 %v12514_v22, %v10225_v25  ;;  %v2007_v28 = vpop.f32.mrb[165].mxu0  ;;  %v3868_v19 = vld [vmem:[#allocation3 + $0xd9] sm:$0xff]  ;;  %v3870_v25 = vld [vmem:[#allocation3 + $0xe9] sm:$0xff] }
 0x223   :  { %v3564_v30 = vmax.f32 %v3474_v23, %v3476_v24  ;;  %v2008_v31 = vadd.f32 %v12514_v22, %v2007_v28  ;;  %v10226_v32 = vpop.f32.mrb[166].mxu0  ;;  %v3869_v24 = vld [vmem:[#allocation3 + $0xe1] sm:$0xff]  ;;  %v3867_v28 = vld [vmem:[#allocation3 + $0xd1] sm:$0xff] }
 0x224   :  { %v3644_v34 = vsel %vm3600_vm2, %v3565_v27, 0.0  ;;  %v2540_v36 = vmax.f32 %v2016_v4, 0.0  ;;  %v2019_v37 = vadd.f32 %v12514_v22, %v10226_v32  ;;  %v2010_v38 = vpop.f32.mrb[167].mxu0  ;;  %v3918_v33 = vpack.c.bf16 %v3868_v19, %v3867_v28  ;;  %v3877_v28 = vld [vmem:[#allocation3 + $0x121] sm:$0xff] }
 0x225   :  { %3708 = vst.msk [vmem:[#allocation3 + $0x138] sm:$0xff] %vm2630_vm1, %v3644_v34  ;;  %v3643_v41 = vsel %vm3593_vm3, %v3564_v30, 0.0  ;;  %v2538_v42 = vmax.f32 %v2008_v31, 0.0  ;;  %v2011_v43 = vadd.f32 %v12514_v22, %v2010_v38  ;;  %v3919_v38 = vpack.c.bf16 %v3870_v25, %v3869_v24 }
 0x226   :  { %3707 = vst.msk [vmem:[#allocation3 + $0x130] sm:$0xff] %vm2630_vm1, %v3643_v41  ;;  %2797 = vst.msk [vmem:[#allocation2 + $0x530] sm:$0xff] %vm2630_vm1, %v2540_v36  ;;  %v2541_v45 = vmax.f32 %v2019_v37, 0.0  ;;  %10336 = vmatmul.mubr.msk.bf16.gmra.mrb[16].mxu0 %vm2630_vm1, %v3914_v39  ;;  %v3871_v41 = vld [vmem:[#allocation3 + $0xf1] sm:$0xff] }
 0x227   :  { %2795 = vst.msk [vmem:[#allocation2 + $0x520] sm:$0xff] %vm2630_vm1, %v2538_v42  ;;  %v2539_v46 = vmax.f32 %v2011_v43, 0.0  ;;  %10339 = vmatprep.mubr.msk.bf16.mxu0 %vm2630_vm1, %v3915_v44  ;;  %v3049_v63 = vld [vmem:[#allocation2 + $0x510] ss:$2 sm:$0xff]  ;;  %v3305_v0 = vld [vmem:[#allocation2 + $0x511] ss:$2 sm:$0xff] }
 0x228   :  { %2798 = vst.msk [vmem:[#allocation2 + $0x538] sm:$0xff] %vm2630_vm1, %v2541_v45  ;;  %v3047_v5 = vld [vmem:[#allocation2 + $0x500] ss:$2 sm:$0xff]  ;;  %v3303_v6 = vld [vmem:[#allocation2 + $0x501] ss:$2 sm:$0xff]  ;;  %v3479_v12 = vmax.f32 %v3049_v63, %v3305_v0  ;;  %v11577_v44 = vld [vmem:[%s13768_s3 + $0x30] sm:$0xff]  }
 0x229   :  { %2796 = vst.msk [vmem:[#allocation2 + $0x528] sm:$0xff] %vm2630_vm1, %v2539_v46  ;;  %v10229_v47 = vpop.f32.mrb[168].mxu0  ;;  %v3478_v16 = vmax.f32 %v3047_v5, %v3303_v6  ;;  %v3872_v42 = vld [vmem:[#allocation3 + $0xf9] sm:$0xff]  ;;  %10519 = vmatprep.subr.bf16.mxu1 %v11577_v44 }
 0x22a   :  { %v2032_v50 = vadd.f32 %v12514_v22, %v10229_v47  ;;  %v2023_v51 = vpop.f32.mrb[169].mxu0  ;;  %v3920_v47 = vpack.c.bf16 %v3872_v42, %v3871_v41  ;;  %10520 = vmatpush3.bf16.msra.mxu1 %v11577_v44 }
 0x22b   :  { %v2024_v53 = vadd.f32 %v12514_v22, %v2023_v51  ;;  %v10230_v54 = vpop.f32.mrb[170].mxu0 }
 0x22c   :  { %v2544_v56 = vmax.f32 %v2032_v50, 0.0  ;;  %v2035_v58 = vadd.f32 %v12514_v22, %v10230_v54  ;;  %v2026_v59 = vpop.f32.mrb[171].mxu0  ;;  %v3874_v50 = vld [vmem:[#allocation3 + $0x109] sm:$0xff] }
 0x22d   :  { %v2542_v57 = vmax.f32 %v2024_v53, 0.0  ;;  %v2027_v1 = vadd.f32 %v12514_v22, %v2026_v59  ;;  %v4772_v3 = vld [vmem:[#allocation3 + $0x12a] sm:$0xff] }
 0x22e   :  { %2801 = vst.msk [vmem:[#allocation2 + $0x550] sm:$0xff] %vm2630_vm1, %v2544_v56  ;;  %v2545_v7 = vmax.f32 %v2035_v58, 0.0  ;;  %10340 = vmatmul.mubr.msk.bf16.gmra.mrb[20].mxu0 %vm2630_vm1, %v3916_v60  ;;  %v4817_v8 = vpack.c.bf16 %v4772_v3, %v4771_v62  ;;  %v4773_v56 = vld [vmem:[#allocation3 + $0x132] sm:$0xff]  ;;  %v3921_v62 = vpack.c.bf16 %v3874_v50, %v3873_v49 }
 0x22f   :  { %v3053_v9 = vld [vmem:[#allocation2 + $0x530] ss:$2 sm:$0xff]  ;;  %v3309_v10 = vld [vmem:[#allocation2 + $0x531] ss:$2 sm:$0xff]  ;;  %2799 = vst.msk [vmem:[#allocation2 + $0x540] sm:$0xff] %vm2630_vm1, %v2542_v57  ;;  %v2543_v11 = vmax.f32 %v2027_v1, 0.0  ;;  %10343 = vmatprep.mubr.msk.bf16.mxu0 %vm2630_vm1, %v3917_v2 }
 0x230   :  { %v3481_v13 = vmax.f32 %v3053_v9, %v3309_v10  ;;  %v3051_v14 = vld [vmem:[#allocation2 + $0x520] ss:$2 sm:$0xff]  ;;  %v3307_v15 = vld [vmem:[#allocation2 + $0x521] ss:$2 sm:$0xff]  ;;  %2802 = vst.msk [vmem:[#allocation2 + $0x558] sm:$0xff] %vm2630_vm1, %v2545_v7  ;;  %10491 = vmatprep.mubr.msk.bf16.mxu1 %vm2630_vm1, %v4817_v8  ;;  %v3879_v42 = vld [vmem:[#allocation3 + $0x131] sm:$0xff] }
 0x231   :  { %v3480_v17 = vmax.f32 %v3051_v14, %v3307_v15  ;;  %2800 = vst.msk [vmem:[#allocation2 + $0x548] sm:$0xff] %vm2630_vm1, %v2543_v11  ;;  %v10233_v18 = vpop.f32.mrb[172].mxu0  ;;  %v3876_v14 = vld [vmem:[#allocation3 + $0x119] sm:$0xff] }
 0x232   :  { %v3567_v20 = vmax.f32 %v3479_v12, %v3481_v13  ;;  %v2048_v21 = vadd.f32 %v12514_v22, %v10233_v18  ;;  %v2039_v23 = vpop.f32.mrb[173].mxu0  ;;  %v3878_v18 = vld [vmem:[#allocation3 + $0x129] sm:$0xff] }
 0x233   :  { %v3566_v26 = vmax.f32 %v3478_v16, %v3480_v17  ;;  %v2040_v27 = vadd.f32 %v12514_v22, %v2039_v23  ;;  %v10234_v4 = vpop.f32.mrb[174].mxu0  ;;  %v3875_v23 = vld [vmem:[#allocation3 + $0x111] sm:$0xff] }
 0x234   :  { %v3646_v29 = vsel %vm3600_vm2, %v3567_v20, 0.0  ;;  %v2548_v30 = vmax.f32 %v2048_v21, 0.0  ;;  %v2051_v31 = vadd.f32 %v12514_v22, %v10234_v4  ;;  %v2042_v32 = vpop.f32.mrb[175].mxu0  ;;  %v3922_v4 = vpack.c.bf16 %v3876_v14, %v3875_v23  ;;  %v11578_v23 = vld [vmem:[%s13768_s3 + $0x38] sm:$0xff]  }
 0x235   :  { %3710 = vst.msk [vmem:[#allocation3 + $0x148] sm:$0xff] %vm2630_vm1, %v3646_v29  ;;  %v3645_v34 = vsel %vm3593_vm3, %v3566_v26, 0.0  ;;  %v2546_v36 = vmax.f32 %v2040_v27, 0.0  ;;  %v2043_v37 = vadd.f32 %v12514_v22, %v2042_v32  ;;  %v3923_v32 = vpack.c.bf16 %v3878_v18, %v3877_v28  ;;  %10521 = vmatprep.subr.bf16.mxu1 %v11578_v23 }
 0x236   :  { %3709 = vst.msk [vmem:[#allocation3 + $0x140] sm:$0xff] %vm2630_vm1, %v3645_v34  ;;  %2805 = vst.msk [vmem:[#allocation2 + $0x570] sm:$0xff] %vm2630_vm1, %v2548_v30  ;;  %v2549_v39 = vmax.f32 %v2051_v31, 0.0  ;;  %10344 = vmatmul.mubr.msk.bf16.gmra.mrb[24].mxu0 %vm2630_vm1, %v3918_v33  ;;  %10522 = vmatpush3.bf16.msra.mxu1 %v11578_v23 }
 0x237   :  { %2803 = vst.msk [vmem:[#allocation2 + $0x560] sm:$0xff] %vm2630_vm1, %v2546_v36  ;;  %v2547_v40 = vmax.f32 %v2043_v37, 0.0  ;;  %10347 = vmatprep.mubr.msk.bf16.mxu0 %vm2630_vm1, %v3919_v38  ;;  %v3057_v58 = vld [vmem:[#allocation2 + $0x550] ss:$2 sm:$0xff]  ;;  %v3313_v59 = vld [vmem:[#allocation2 + $0x551] ss:$2 sm:$0xff] }
 0x238   :  { %2806 = vst.msk [vmem:[#allocation2 + $0x578] sm:$0xff] %vm2630_vm1, %v2549_v39  ;;  %v3055_v0 = vld [vmem:[#allocation2 + $0x540] ss:$2 sm:$0xff]  ;;  %v3311_v57 = vld [vmem:[#allocation2 + $0x541] ss:$2 sm:$0xff]  ;;  %v3483_v7 = vmax.f32 %v3057_v58, %v3313_v59 }
 0x239   :  { %2804 = vst.msk [vmem:[#allocation2 + $0x568] sm:$0xff] %vm2630_vm1, %v2547_v40  ;;  %v10237_v43 = vpop.f32.mrb[176].mxu0  ;;  %v3482_v11 = vmax.f32 %v3055_v0, %v3311_v57 }
 0x23a   :  { %v2064_v45 = vadd.f32 %v12514_v22, %v10237_v43  ;;  %v2055_v46 = vpop.f32.mrb[177].mxu0 }
 0x23b   :  { %v2056_v51 = vadd.f32 %v12514_v22, %v2055_v46  ;;  %v10238_v52 = vpop.f32.mrb[178].mxu0 }
 0x23c   :  { %v2552_v53 = vmax.f32 %v2064_v45, 0.0  ;;  %v2067_v54 = vadd.f32 %v12514_v22, %v10238_v52  ;;  %v2058_v55 = vpop.f32.mrb[179].mxu0 }
 0x23d   :  { %v2550_v60 = vmax.f32 %v2056_v51, 0.0  ;;  %v2059_v61 = vadd.f32 %v12514_v22, %v2058_v55  ;;  %v4774_v63 = vld [vmem:[#allocation3 + $0x13a] sm:$0xff]  ;;  %v4775_v50 = vld [vmem:[#allocation3 + $0x142] sm:$0xff] }
 0x23e   :  { %2809 = vst.msk [vmem:[#allocation2 + $0x590] sm:$0xff] %vm2630_vm1, %v2552_v53  ;;  %v2553_v1 = vmax.f32 %v2067_v54, 0.0  ;;  %10348 = vmatmul.mubr.msk.bf16.gmra.mrb[28].mxu0 %vm2630_vm1, %v3920_v47  ;;  %v4818_v2 = vpack.c.bf16 %v4774_v63, %v4773_v56  ;;  %v3880_v37 = vld [vmem:[#allocation3 + $0x139] sm:$0xff]  ;;  %v3881_v49 = vld [vmem:[#allocation3 + $0x141] sm:$0xff] }
 0x23f   :  { %v3061_v3 = vld [vmem:[#allocation2 + $0x570] ss:$2 sm:$0xff]  ;;  %v3317_v5 = vld [vmem:[#allocation2 + $0x571] ss:$2 sm:$0xff]  ;;  %2807 = vst.msk [vmem:[#allocation2 + $0x580] sm:$0xff] %vm2630_vm1, %v2550_v60  ;;  %v2551_v6 = vmax.f32 %v2059_v61, 0.0  ;;  %10351 = vmatprep.mubr.msk.bf16.mxu0 %vm2630_vm1, %v3921_v62  ;;  %v3924_v47 = vpack.c.bf16 %v3880_v37, %v3879_v42 }
 0x240   :  { %v3485_v8 = vmax.f32 %v3061_v3, %v3317_v5  ;;  %v3059_v9 = vld [vmem:[#allocation2 + $0x560] ss:$2 sm:$0xff]  ;;  %v3315_v10 = vld [vmem:[#allocation2 + $0x561] ss:$2 sm:$0xff]  ;;  %2810 = vst.msk [vmem:[#allocation2 + $0x598] sm:$0xff] %vm2630_vm1, %v2553_v1  ;;  %10492 = vmatmul.mubr.msk.bf16.gmra.mrb[4].mxu1 %vm2630_vm1, %v4818_v2 }
 0x241   :  { %v3484_v12 = vmax.f32 %v3059_v9, %v3315_v10  ;;  %2808 = vst.msk [vmem:[#allocation2 + $0x588] sm:$0xff] %vm2630_vm1, %v2551_v6  ;;  %v10241_v13 = vpop.f32.mrb[180].mxu0 }
 0x242   :  { %v3569_v15 = vmax.f32 %v3483_v7, %v3485_v8  ;;  %v2080_v16 = vadd.f32 %v12514_v22, %v10241_v13  ;;  %v2071_v17 = vpop.f32.mrb[181].mxu0 }
 0x243   :  { %v3568_v19 = vmax.f32 %v3482_v11, %v3484_v12  ;;  %v2072_v20 = vadd.f32 %v12514_v22, %v2071_v17  ;;  %v10242_v21 = vpop.f32.mrb[182].mxu0 }
 0x244   :  { %v3648_v24 = vsel %vm3600_vm2, %v3569_v15, 0.0  ;;  %v2556_v25 = vmax.f32 %v2080_v16, 0.0  ;;  %v2083_v26 = vadd.f32 %v12514_v22, %v10242_v21  ;;  %v2074_v27 = vpop.f32.mrb[183].mxu0 }
 0x245   :  { %3712 = vst.msk [vmem:[#allocation3 + $0x158] sm:$0xff] %vm2630_vm1, %v3648_v24  ;;  %v3647_v29 = vsel %vm3593_vm3, %v3568_v19, 0.0  ;;  %v2554_v30 = vmax.f32 %v2072_v20, 0.0  ;;  %v2075_v31 = vadd.f32 %v12514_v22, %v2074_v27 }
 0x246   :  { %3711 = vst.msk [vmem:[#allocation3 + $0x150] sm:$0xff] %vm2630_vm1, %v3647_v29  ;;  %2813 = vst.msk [vmem:[#allocation2 + $0x5b0] sm:$0xff] %vm2630_vm1, %v2556_v25  ;;  %v2557_v33 = vmax.f32 %v2083_v26, 0.0  ;;  %10352 = vmatmul.mubr.msk.bf16.gmra.mrb[32].mxu0 %vm2630_vm1, %v3922_v4 }
 0x247   :  { %2811 = vst.msk [vmem:[#allocation2 + $0x5a0] sm:$0xff] %vm2630_vm1, %v2554_v30  ;;  %v2555_v34 = vmax.f32 %v2075_v31, 0.0  ;;  %10355 = vmatprep.mubr.msk.bf16.mxu0 %vm2630_vm1, %v3923_v32  ;;  %v3065_v43 = vld [vmem:[#allocation2 + $0x590] ss:$2 sm:$0xff]  ;;  %v3321_v51 = vld [vmem:[#allocation2 + $0x591] ss:$2 sm:$0xff] }
 0x248   :  { %2814 = vst.msk [vmem:[#allocation2 + $0x5b8] sm:$0xff] %vm2630_vm1, %v2557_v33  ;;  %v3063_v56 = vld [vmem:[#allocation2 + $0x580] ss:$2 sm:$0xff]  ;;  %v3319_v58 = vld [vmem:[#allocation2 + $0x581] ss:$2 sm:$0xff]  ;;  %v3487_v57 = vmax.f32 %v3065_v43, %v3321_v51 }
 0x249   :  { %2812 = vst.msk [vmem:[#allocation2 + $0x5a8] sm:$0xff] %vm2630_vm1, %v2555_v34  ;;  %v10245_v36 = vpop.f32.mrb[184].mxu0  ;;  %v3486_v5 = vmax.f32 %v3063_v56, %v3319_v58 }
 0x24a   :  { %v2096_v38 = vadd.f32 %v12514_v22, %v10245_v36  ;;  %v2087_v39 = vpop.f32.mrb[185].mxu0 }
 0x24b   :  { %v2088_v40 = vadd.f32 %v12514_v22, %v2087_v39  ;;  %v10246_v41 = vpop.f32.mrb[186].mxu0 }
 0x24c   :  { %v2560_v44 = vmax.f32 %v2096_v38, 0.0  ;;  %v2099_v45 = vadd.f32 %v12514_v22, %v10246_v41  ;;  %v2090_v46 = vpop.f32.mrb[187].mxu0 }
 0x24d   :  { %v2558_v52 = vmax.f32 %v2088_v40, 0.0  ;;  %v2091_v53 = vadd.f32 %v12514_v22, %v2090_v46  ;;  %v3882_v54 = vld [vmem:[#allocation3 + $0x149] sm:$0xff]  ;;  %v3883_v33 = vld [vmem:[#allocation3 + $0x151] sm:$0xff] }
 0x24e   :  { %v4776_v55 = vld [vmem:[#allocation3 + $0x14a] sm:$0xff]  ;;  %2817 = vst.msk [vmem:[#allocation2 + $0x5d0] sm:$0xff] %vm2630_vm1, %v2560_v44  ;;  %v2561_v59 = vmax.f32 %v2099_v45, 0.0  ;;  %10356 = vmatmul.mubr.msk.bf16.gmra.mrb[36].mxu0 %vm2630_vm1, %v3924_v47  ;;  %v3925_v60 = vpack.c.bf16 %v3882_v54, %v3881_v49  ;;  %v4777_v34 = vld [vmem:[#allocation3 + $0x152] sm:$0xff] }
 0x24f   :  { %v4819_v61 = vpack.c.bf16 %v4776_v55, %v4775_v50  ;;  %v3069_v62 = vld [vmem:[#allocation2 + $0x5b0] ss:$2 sm:$0xff]  ;;  %v3325_v63 = vld [vmem:[#allocation2 + $0x5b1] ss:$2 sm:$0xff]  ;;  %2815 = vst.msk [vmem:[#allocation2 + $0x5c0] sm:$0xff] %vm2630_vm1, %v2558_v52  ;;  %v2559_v0 = vmax.f32 %v2091_v53, 0.0 }
 0x250   :  { %v3489_v1 = vmax.f32 %v3069_v62, %v3325_v63  ;;  %v3067_v2 = vld [vmem:[#allocation2 + $0x5a0] ss:$2 sm:$0xff]  ;;  %v3323_v3 = vld [vmem:[#allocation2 + $0x5a1] ss:$2 sm:$0xff]  ;;  %2818 = vst.msk [vmem:[#allocation2 + $0x5d8] sm:$0xff] %vm2630_vm1, %v2561_v59  ;;  %10359 = vmatprep.mubr.msk.bf16.mxu0 %vm2630_vm1, %v3925_v60 }
 0x251   :  { %10495 = vmatprep.mubr.msk.bf16.mxu1 %vm2630_vm1, %v4819_v61  ;;  %v3488_v6 = vmax.f32 %v3067_v2, %v3323_v3  ;;  %2816 = vst.msk [vmem:[#allocation2 + $0x5c8] sm:$0xff] %vm2630_vm1, %v2559_v0  ;;  %v10249_v7 = vpop.f32.mrb[188].mxu0 }
 0x252   :  { %v3571_v8 = vmax.f32 %v3487_v57, %v3489_v1  ;;  %v2112_v9 = vadd.f32 %v12514_v22, %v10249_v7  ;;  %v2103_v10 = vpop.f32.mrb[189].mxu0 }
 0x253   :  { %v3570_v11 = vmax.f32 %v3486_v5, %v3488_v6  ;;  %v2104_v12 = vadd.f32 %v12514_v22, %v2103_v10  ;;  %v10250_v13 = vpop.f32.mrb[190].mxu0 }
 0x254   :  { %v3650_v14 = vsel %vm3600_vm2, %v3571_v8, 0.0  ;;  %v2564_v15 = vmax.f32 %v2112_v9, 0.0  ;;  %v2115_v16 = vadd.f32 %v12514_v22, %v10250_v13  ;;  %v2106_v17 = vpop.f32.mrb[191].mxu0  ;;  %v11579_v9 = vld [vmem:[%s13768_s3] sm:$0xff]  }
 0x255   :  { %3714 = vst.msk [vmem:[#allocation3 + $0x168] sm:$0xff] %vm2630_vm1, %v3650_v14  ;;  %v3649_v18 = vsel %vm3593_vm3, %v3570_v11, 0.0  ;;  %v2562_v19 = vmax.f32 %v2104_v12, 0.0  ;;  %v2107_v20 = vadd.f32 %v12514_v22, %v2106_v17  ;;  %10383 = vmatprep.subr.bf16.mxu0 %v11579_v9  ;;  %v11580_v11 = vld [vmem:[%s13768_s3 + $0x8] sm:$0xff]   ;;  %v12712_v14 = vld [vmem:[%s13768_s3 + $0x40] sm:$0xff]  }
 0x256   :  { %3713 = vst.msk [vmem:[#allocation3 + $0x160] sm:$0xff] %vm2630_vm1, %v3649_v18  ;;  %2821 = vst.msk [vmem:[#allocation2 + $0x5f0] sm:$0xff] %vm2630_vm1, %v2564_v15  ;;  %v2565_v21 = vmax.f32 %v2115_v16, 0.0  ;;  %10384 = vmatpush3.bf16.msra.mxu0 %v11579_v9  ;;  %10587 = vmatprep.subr.bf16.mxu1 %v12712_v14 }
 0x257   :  { %2819 = vst.msk [vmem:[#allocation2 + $0x5e0] sm:$0xff] %vm2630_vm1, %v2562_v19  ;;  %v2563_v24 = vmax.f32 %v2107_v20, 0.0  ;;  %v3073_v29 = vld [vmem:[#allocation2 + $0x5d0] ss:$2 sm:$0xff]  ;;  %v3329_v36 = vld [vmem:[#allocation2 + $0x5d1] ss:$2 sm:$0xff]  ;;  %10385 = vmatprep.subr.bf16.mxu0 %v11580_v11 }
 0x258   :  { %2822 = vst.msk [vmem:[#allocation2 + $0x5f8] sm:$0xff] %vm2630_vm1, %v2565_v21  ;;  %v3071_v41 = vld [vmem:[#allocation2 + $0x5c0] ss:$2 sm:$0xff]  ;;  %v3327_v42 = vld [vmem:[#allocation2 + $0x5c1] ss:$2 sm:$0xff]  ;;  %v3491_v50 = vmax.f32 %v3073_v29, %v3329_v36 }
 0x259   :  { %2820 = vst.msk [vmem:[#allocation2 + $0x5e8] sm:$0xff] %vm2630_vm1, %v2563_v24  ;;  %v10253_v25 = vpop.f32.mrb[192].mxu0  ;;  %v3490_v54 = vmax.f32 %v3071_v41, %v3327_v42 }
 0x25a   :  { %v2128_v26 = vadd.f32 %v12514_v22, %v10253_v25  ;;  %v2119_v27 = vpop.f32.mrb[193].mxu0  ;;  %10386 = vmatpush3.bf16.msra.mxu0 %v11580_v11 }
 0x25b   :  { %v2120_v4 = vadd.f32 %v12514_v22, %v2119_v27  ;;  %v10254_v28 = vpop.f32.mrb[194].mxu0 }
 0x25c   :  { %v2568_v30 = vmax.f32 %v2128_v26, 0.0  ;;  %v2131_v31 = vadd.f32 %v12514_v22, %v10254_v28  ;;  %v2122_v32 = vpop.f32.mrb[195].mxu0 }
 0x25d   :  { %v2566_v37 = vmax.f32 %v2120_v4, 0.0  ;;  %v2123_v38 = vadd.f32 %v12514_v22, %v2122_v32  ;;  %v3884_v39 = vld [vmem:[#allocation3 + $0x159] sm:$0xff]  ;;  %v3885_v21 = vld [vmem:[#allocation3 + $0x161] sm:$0xff] }
 0x25e   :  { %v4778_v40 = vld [vmem:[#allocation3 + $0x15a] sm:$0xff]  ;;  %2825 = vst.msk [vmem:[#allocation2 + $0x610] sm:$0xff] %vm2630_vm1, %v2568_v30  ;;  %v2569_v43 = vmax.f32 %v2131_v31, 0.0  ;;  %v3926_v44 = vpack.c.bf16 %v3884_v39, %v3883_v33  ;;  %v4779_v23 = vld [vmem:[#allocation3 + $0x162] sm:$0xff] }
 0x25f   :  { %v4820_v45 = vpack.c.bf16 %v4778_v40, %v4777_v34  ;;  %v3077_v46 = vld [vmem:[#allocation2 + $0x5f0] ss:$2 sm:$0xff]  ;;  %v3333_v47 = vld [vmem:[#allocation2 + $0x5f1] ss:$2 sm:$0xff]  ;;  %2823 = vst.msk [vmem:[#allocation2 + $0x600] sm:$0xff] %vm2630_vm1, %v2566_v37  ;;  %v2567_v49 = vmax.f32 %v2123_v38, 0.0 }
 0x260   :  { %v3493_v51 = vmax.f32 %v3077_v46, %v3333_v47  ;;  %v3075_v52 = vld [vmem:[#allocation2 + $0x5e0] ss:$2 sm:$0xff]  ;;  %v3331_v53 = vld [vmem:[#allocation2 + $0x5e1] ss:$2 sm:$0xff]  ;;  %2826 = vst.msk [vmem:[#allocation2 + $0x618] sm:$0xff] %vm2630_vm1, %v2569_v43  ;;  %10360 = vmatmul.mubr.msk.bf16.gmra.mrb[40].mxu0 %vm2630_vm1, %v3926_v44 }
 0x261   :  { %10496 = vmatmul.mubr.msk.bf16.gmra.mrb[8].mxu1 %vm2630_vm1, %v4820_v45  ;;  %v3492_v55 = vmax.f32 %v3075_v52, %v3331_v53  ;;  %2824 = vst.msk [vmem:[#allocation2 + $0x608] sm:$0xff] %vm2630_vm1, %v2567_v49  ;;  %v10257_v56 = vpop.f32.mrb[196].mxu0  ;;  %v12723_v37 = vld [vmem:[%s13768_s3 + $0x20] sm:$0xff]  }
 0x262   :  { %v3573_v58 = vmax.f32 %v3491_v50, %v3493_v51  ;;  %v2144_v59 = vadd.f32 %v12514_v22, %v10257_v56  ;;  %v2135_v60 = vpop.f32.mrb[197].mxu0  ;;  %10451 = vmatprep.subr.bf16.mxu0 %v12723_v37 }
 0x263   :  { %v3572_v61 = vmax.f32 %v3490_v54, %v3492_v55  ;;  %v2136_v62 = vadd.f32 %v12514_v22, %v2135_v60  ;;  %v10258_v63 = vpop.f32.mrb[198].mxu0 }
 0x264   :  { %v3652_v0 = vsel %vm3600_vm2, %v3573_v58, 0.0  ;;  %v2572_v57 = vmax.f32 %v2144_v59, 0.0  ;;  %v2147_v1 = vadd.f32 %v12514_v22, %v10258_v63  ;;  %v2138_v2 = vpop.f32.mrb[199].mxu0  ;;  %v12741_v59 = vld [vmem:[%s13767_s2] ss:$0 sm:$0xff] }
 0x265   :  { %3716 = vst.msk [vmem:[#allocation3 + $0x178] sm:$0xff] %vm2630_vm1, %v3652_v0  ;;  %v3651_v3 = vsel %vm3593_vm3, %v3572_v61, 0.0  ;;  %v2570_v5 = vmax.f32 %v2136_v62, 0.0  ;;  %v2139_v6 = vadd.f32 %v12514_v22, %v2138_v2 }
 0x266   :  { %3715 = vst.msk [vmem:[#allocation3 + $0x170] sm:$0xff] %vm2630_vm1, %v3651_v3  ;;  %2829 = vst.msk [vmem:[#allocation2 + $0x630] sm:$0xff] %vm2630_vm1, %v2572_v57  ;;  %v2573_v7 = vmax.f32 %v2147_v1, 0.0 }
 0x267   :  { %2827 = vst.msk [vmem:[#allocation2 + $0x620] sm:$0xff] %vm2630_vm1, %v2570_v5  ;;  %v2571_v8 = vmax.f32 %v2139_v6, 0.0  ;;  %v3081_v17 = vld [vmem:[#allocation2 + $0x610] ss:$2 sm:$0xff]  ;;  %v3337_v24 = vld [vmem:[#allocation2 + $0x611] ss:$2 sm:$0xff] }
 0x268   :  { %2830 = vst.msk [vmem:[#allocation2 + $0x638] sm:$0xff] %vm2630_vm1, %v2573_v7  ;;  %v3079_v28 = vld [vmem:[#allocation2 + $0x600] ss:$2 sm:$0xff]  ;;  %v3335_v29 = vld [vmem:[#allocation2 + $0x601] ss:$2 sm:$0xff]  ;;  %v3495_v38 = vmax.f32 %v3081_v17, %v3337_v24 }
 0x269   :  { %2828 = vst.msk [vmem:[#allocation2 + $0x628] sm:$0xff] %vm2630_vm1, %v2571_v8  ;;  %v10261_v10 = vpop.f32.mrb[200].mxu0  ;;  %v3494_v42 = vmax.f32 %v3079_v28, %v3335_v29 }
 0x26a   :  { %v2160_v12 = vadd.f32 %v12514_v22, %v10261_v10  ;;  %v2151_v13 = vpop.f32.mrb[201].mxu0 }
 0x26b   :  { %v2152_v15 = vadd.f32 %v12514_v22, %v2151_v13  ;;  %v10262_v16 = vpop.f32.mrb[202].mxu0 }
 0x26c   :  { %v2576_v18 = vmax.f32 %v2160_v12, 0.0  ;;  %v2163_v19 = vadd.f32 %v12514_v22, %v10262_v16  ;;  %v2154_v20 = vpop.f32.mrb[203].mxu0 }
 0x26d   :  { %v2574_v25 = vmax.f32 %v2152_v15, 0.0  ;;  %v2155_v26 = vadd.f32 %v12514_v22, %v2154_v20  ;;  %v3886_v27 = vld [vmem:[#allocation3 + $0x169] sm:$0xff]  ;;  %v3887_v7 = vld [vmem:[#allocation3 + $0x171] sm:$0xff] }
 0x26e   :  { %v4780_v4 = vld [vmem:[#allocation3 + $0x16a] sm:$0xff]  ;;  %2833 = vst.msk [vmem:[#allocation2 + $0x650] sm:$0xff] %vm2630_vm1, %v2576_v18  ;;  %v2577_v30 = vmax.f32 %v2163_v19, 0.0  ;;  %v3927_v31 = vpack.c.bf16 %v3886_v27, %v3885_v21  ;;  %v4781_v8 = vld [vmem:[#allocation3 + $0x172] sm:$0xff] }
 0x26f   :  { %v4821_v32 = vpack.c.bf16 %v4780_v4, %v4779_v23  ;;  %v3085_v33 = vld [vmem:[#allocation2 + $0x630] ss:$2 sm:$0xff]  ;;  %v3341_v34 = vld [vmem:[#allocation2 + $0x631] ss:$2 sm:$0xff]  ;;  %2831 = vst.msk [vmem:[#allocation2 + $0x640] sm:$0xff] %vm2630_vm1, %v2574_v25  ;;  %v2575_v36 = vmax.f32 %v2155_v26, 0.0 }
 0x270   :  { %v3497_v39 = vmax.f32 %v3085_v33, %v3341_v34  ;;  %v3083_v40 = vld [vmem:[#allocation2 + $0x620] ss:$2 sm:$0xff]  ;;  %v3339_v41 = vld [vmem:[#allocation2 + $0x621] ss:$2 sm:$0xff]  ;;  %2834 = vst.msk [vmem:[#allocation2 + $0x658] sm:$0xff] %vm2630_vm1, %v2577_v30  ;;  %10363 = vmatprep.mubr.msk.bf16.mxu0 %vm2630_vm1, %v3927_v31 }
 0x271   :  { %10499 = vmatprep.mubr.msk.bf16.mxu1 %vm2630_vm1, %v4821_v32  ;;  %v3496_v43 = vmax.f32 %v3083_v40, %v3339_v41  ;;  %2832 = vst.msk [vmem:[#allocation2 + $0x648] sm:$0xff] %vm2630_vm1, %v2575_v36  ;;  %v10265_v44 = vpop.f32.mrb[204].mxu0 }
 0x272   :  { %v3575_v45 = vmax.f32 %v3495_v38, %v3497_v39  ;;  %v2176_v46 = vadd.f32 %v12514_v22, %v10265_v44  ;;  %v2167_v47 = vpop.f32.mrb[205].mxu0 }
 0x273   :  { %v3574_v49 = vmax.f32 %v3494_v42, %v3496_v43  ;;  %v2168_v50 = vadd.f32 %v12514_v22, %v2167_v47  ;;  %v10266_v51 = vpop.f32.mrb[206].mxu0 }
 0x274   :  { %v3654_v52 = vsel %vm3600_vm2, %v3575_v45, 0.0  ;;  %v2580_v53 = vmax.f32 %v2176_v46, 0.0  ;;  %v2179_v54 = vadd.f32 %v12514_v22, %v10266_v51  ;;  %v2170_v55 = vpop.f32.mrb[207].mxu0 }
 0x275   :  { %3718 = vst.msk [vmem:[#allocation3 + $0x188] sm:$0xff] %vm2630_vm1, %v3654_v52  ;;  %v3653_v56 = vsel %vm3593_vm3, %v3574_v49, 0.0  ;;  %v2578_v58 = vmax.f32 %v2168_v50, 0.0  ;;  %v2171_v60 = vadd.f32 %v12741_v59, %v2170_v55 }
 0x276   :  { %3717 = vst.msk [vmem:[#allocation3 + $0x180] sm:$0xff] %vm2630_vm1, %v3653_v56  ;;  %2837 = vst.msk [vmem:[#allocation2 + $0x670] sm:$0xff] %vm2630_vm1, %v2580_v53  ;;  %v2581_v61 = vmax.f32 %v2179_v54, 0.0 }
 0x277   :  { %2835 = vst.msk [vmem:[#allocation2 + $0x660] sm:$0xff] %vm2630_vm1, %v2578_v58  ;;  %v2579_v22 = vmax.f32 %v2171_v60, 0.0  ;;  %v3089_v2 = vld [vmem:[#allocation2 + $0x650] ss:$2 sm:$0xff]  ;;  %v3345_v9 = vld [vmem:[#allocation2 + $0x651] ss:$2 sm:$0xff] }
 0x278   :  { %2838 = vst.msk [vmem:[#allocation2 + $0x678] sm:$0xff] %vm2630_vm1, %v2581_v61  ;;  %v3087_v15 = vld [vmem:[#allocation2 + $0x640] ss:$2 sm:$0xff]  ;;  %v3343_v16 = vld [vmem:[#allocation2 + $0x641] ss:$2 sm:$0xff]  ;;  %v3499_v24 = vmax.f32 %v3089_v2, %v3345_v9 }
 0x279   :  { %2836 = vst.msk [vmem:[#allocation2 + $0x668] sm:$0xff] %vm2630_vm1, %v2579_v22  ;;  %v10269_v62 = vpop.f32.mrb[208].mxu0  ;;  %v3498_v4 = vmax.f32 %v3087_v15, %v3343_v16 }
 0x27a   :  { %v2192_v63 = vadd.f32 %v12741_v59, %v10269_v62  ;;  %v2183_v0 = vpop.f32.mrb[209].mxu0 }
 0x27b   :  { %v2184_v57 = vadd.f32 %v12741_v59, %v2183_v0  ;;  %v10270_v1 = vpop.f32.mrb[210].mxu0 }
 0x27c   :  { %v2584_v3 = vmax.f32 %v2192_v63, 0.0  ;;  %v2195_v5 = vadd.f32 %v12741_v59, %v10270_v1  ;;  %v2186_v6 = vpop.f32.mrb[211].mxu0 }
 0x27d   :  { %v2582_v10 = vmax.f32 %v2184_v57, 0.0  ;;  %v2187_v11 = vadd.f32 %v12741_v59, %v2186_v6  ;;  %v3888_v12 = vld [vmem:[#allocation3 + $0x179] sm:$0xff]  ;;  %v3889_v58 = vld [vmem:[#allocation3 + $0x181] sm:$0xff] }
 0x27e   :  { %v4782_v13 = vld [vmem:[#allocation3 + $0x17a] sm:$0xff]  ;;  %2841 = vst.msk [vmem:[#allocation2 + $0x690] sm:$0xff] %vm2630_vm1, %v2584_v3  ;;  %v2585_v17 = vmax.f32 %v2195_v5, 0.0  ;;  %v3928_v18 = vpack.c.bf16 %v3888_v12, %v3887_v7  ;;  %v4783_v60 = vld [vmem:[#allocation3 + $0x182] sm:$0xff] }
 0x27f   :  { %v4822_v19 = vpack.c.bf16 %v4782_v13, %v4781_v8  ;;  %v3093_v20 = vld [vmem:[#allocation2 + $0x670] ss:$2 sm:$0xff]  ;;  %v3349_v21 = vld [vmem:[#allocation2 + $0x671] ss:$2 sm:$0xff]  ;;  %2839 = vst.msk [vmem:[#allocation2 + $0x680] sm:$0xff] %vm2630_vm1, %v2582_v10  ;;  %v2583_v23 = vmax.f32 %v2187_v11, 0.0 }
 0x280   :  { %v3501_v25 = vmax.f32 %v3093_v20, %v3349_v21  ;;  %v3091_v26 = vld [vmem:[#allocation2 + $0x660] ss:$2 sm:$0xff]  ;;  %v3347_v27 = vld [vmem:[#allocation2 + $0x661] ss:$2 sm:$0xff]  ;;  %2842 = vst.msk [vmem:[#allocation2 + $0x698] sm:$0xff] %vm2630_vm1, %v2585_v17  ;;  %10364 = vmatmul.mubr.msk.bf16.gmra.mrb[44].mxu0 %vm2630_vm1, %v3928_v18 }
 0x281   :  { %10500 = vmatmul.mubr.msk.bf16.gmra.mrb[12].mxu1 %vm2630_vm1, %v4822_v19  ;;  %v3500_v28 = vmax.f32 %v3091_v26, %v3347_v27  ;;  %2840 = vst.msk [vmem:[#allocation2 + $0x688] sm:$0xff] %vm2630_vm1, %v2583_v23  ;;  %v10273_v29 = vpop.f32.mrb[212].mxu0 }
 0x282   :  { %v3577_v30 = vmax.f32 %v3499_v24, %v3501_v25  ;;  %v2208_v31 = vadd.f32 %v12741_v59, %v10273_v29  ;;  %v2199_v32 = vpop.f32.mrb[213].mxu0 }
 0x283   :  { %v3576_v33 = vmax.f32 %v3498_v4, %v3500_v28  ;;  %v2200_v34 = vadd.f32 %v12741_v59, %v2199_v32  ;;  %v10274_v36 = vpop.f32.mrb[214].mxu0 }
 0x284   :  { %v3656_v38 = vsel %vm3600_vm2, %v3577_v30, 0.0  ;;  %v2588_v39 = vmax.f32 %v2208_v31, 0.0  ;;  %v2211_v40 = vadd.f32 %v12741_v59, %v10274_v36  ;;  %v2202_v41 = vpop.f32.mrb[215].mxu0 }
 0x285   :  { %3720 = vst.msk [vmem:[#allocation3 + $0x198] sm:$0xff] %vm2630_vm1, %v3656_v38  ;;  %v3655_v42 = vsel %vm3593_vm3, %v3576_v33, 0.0  ;;  %v2586_v43 = vmax.f32 %v2200_v34, 0.0  ;;  %v2203_v44 = vadd.f32 %v12741_v59, %v2202_v41 }
 0x286   :  { %3719 = vst.msk [vmem:[#allocation3 + $0x190] sm:$0xff] %vm2630_vm1, %v3655_v42  ;;  %2845 = vst.msk [vmem:[#allocation2 + $0x6b0] sm:$0xff] %vm2630_vm1, %v2588_v39  ;;  %v2589_v45 = vmax.f32 %v2211_v40, 0.0 }
 0x287   :  { %2843 = vst.msk [vmem:[#allocation2 + $0x6a0] sm:$0xff] %vm2630_vm1, %v2586_v43  ;;  %v2587_v46 = vmax.f32 %v2203_v44, 0.0  ;;  %v3097_v53 = vld [vmem:[#allocation2 + $0x690] ss:$2 sm:$0xff]  ;;  %v3353_v61 = vld [vmem:[#allocation2 + $0x691] ss:$2 sm:$0xff] }
 0x288   :  { %2846 = vst.msk [vmem:[#allocation2 + $0x6b8] sm:$0xff] %vm2630_vm1, %v2589_v45  ;;  %v3095_v57 = vld [vmem:[#allocation2 + $0x680] ss:$2 sm:$0xff]  ;;  %v3351_v1 = vld [vmem:[#allocation2 + $0x681] ss:$2 sm:$0xff]  ;;  %v3503_v9 = vmax.f32 %v3097_v53, %v3353_v61 }
 0x289   :  { %2844 = vst.msk [vmem:[#allocation2 + $0x6a8] sm:$0xff] %vm2630_vm1, %v2587_v46  ;;  %v10277_v47 = vpop.f32.mrb[216].mxu0  ;;  %v3502_v13 = vmax.f32 %v3095_v57, %v3351_v1 }
 0x28a   :  { %v2224_v49 = vadd.f32 %v12741_v59, %v10277_v47  ;;  %v2215_v50 = vpop.f32.mrb[217].mxu0 }
 0x28b   :  { %v2216_v51 = vadd.f32 %v12741_v59, %v2215_v50  ;;  %v10278_v52 = vpop.f32.mrb[218].mxu0 }
 0x28c   :  { %v2592_v54 = vmax.f32 %v2224_v49, 0.0  ;;  %v2227_v55 = vadd.f32 %v12741_v59, %v10278_v52  ;;  %v2218_v56 = vpop.f32.mrb[219].mxu0 }
 0x28d   :  { %v2590_v22 = vmax.f32 %v2216_v51, 0.0  ;;  %v2219_v62 = vadd.f32 %v12741_v59, %v2218_v56  ;;  %v3890_v63 = vld [vmem:[#allocation3 + $0x189] sm:$0xff]  ;;  %v3891_v43 = vld [vmem:[#allocation3 + $0x191] sm:$0xff] }
 0x28e   :  { %v4784_v0 = vld [vmem:[#allocation3 + $0x18a] sm:$0xff]  ;;  %2849 = vst.msk [vmem:[#allocation2 + $0x6d0] sm:$0xff] %vm2630_vm1, %v2592_v54  ;;  %v2593_v2 = vmax.f32 %v2227_v55, 0.0  ;;  %v3929_v3 = vpack.c.bf16 %v3890_v63, %v3889_v58  ;;  %v4785_v44 = vld [vmem:[#allocation3 + $0x192] sm:$0xff] }
 0x28f   :  { %v4823_v5 = vpack.c.bf16 %v4784_v0, %v4783_v60  ;;  %v3101_v6 = vld [vmem:[#allocation2 + $0x6b0] ss:$2 sm:$0xff]  ;;  %v3357_v7 = vld [vmem:[#allocation2 + $0x6b1] ss:$2 sm:$0xff]  ;;  %2847 = vst.msk [vmem:[#allocation2 + $0x6c0] sm:$0xff] %vm2630_vm1, %v2590_v22  ;;  %v2591_v8 = vmax.f32 %v2219_v62, 0.0 }
 0x290   :  { %v3505_v10 = vmax.f32 %v3101_v6, %v3357_v7  ;;  %v3099_v11 = vld [vmem:[#allocation2 + $0x6a0] ss:$2 sm:$0xff]  ;;  %v3355_v12 = vld [vmem:[#allocation2 + $0x6a1] ss:$2 sm:$0xff]  ;;  %2850 = vst.msk [vmem:[#allocation2 + $0x6d8] sm:$0xff] %vm2630_vm1, %v2593_v2  ;;  %10367 = vmatprep.mubr.msk.bf16.mxu0 %vm2630_vm1, %v3929_v3 }
 0x291   :  { %10503 = vmatprep.mubr.msk.bf16.mxu1 %vm2630_vm1, %v4823_v5  ;;  %v3504_v15 = vmax.f32 %v3099_v11, %v3355_v12  ;;  %2848 = vst.msk [vmem:[#allocation2 + $0x6c8] sm:$0xff] %vm2630_vm1, %v2591_v8  ;;  %v10281_v16 = vpop.f32.mrb[220].mxu0 }
 0x292   :  { %v3579_v17 = vmax.f32 %v3503_v9, %v3505_v10  ;;  %v2240_v18 = vadd.f32 %v12741_v59, %v10281_v16  ;;  %v2231_v19 = vpop.f32.mrb[221].mxu0 }
 0x293   :  { %v3578_v20 = vmax.f32 %v3502_v13, %v3504_v15  ;;  %v2232_v21 = vadd.f32 %v12741_v59, %v2231_v19  ;;  %v10282_v23 = vpop.f32.mrb[222].mxu0 }
 0x294   :  { %v3658_v24 = vsel %vm3600_vm2, %v3579_v17, 0.0  ;;  %v2596_v25 = vmax.f32 %v2240_v18, 0.0  ;;  %v2243_v26 = vadd.f32 %v12741_v59, %v10282_v23  ;;  %v2234_v27 = vpop.f32.mrb[223].mxu0 }
 0x295   :  { %3722 = vst.msk [vmem:[#allocation3 + $0x1a8] sm:$0xff] %vm2630_vm1, %v3658_v24  ;;  %v3657_v4 = vsel %vm3593_vm3, %v3578_v20, 0.0  ;;  %v2594_v28 = vmax.f32 %v2232_v21, 0.0  ;;  %v2235_v29 = vadd.f32 %v12741_v59, %v2234_v27 }
 0x296   :  { %3721 = vst.msk [vmem:[#allocation3 + $0x1a0] sm:$0xff] %vm2630_vm1, %v3657_v4  ;;  %2853 = vst.msk [vmem:[#allocation2 + $0x6f0] sm:$0xff] %vm2630_vm1, %v2596_v25  ;;  %v2597_v30 = vmax.f32 %v2243_v26, 0.0 }
 0x297   :  { %2851 = vst.msk [vmem:[#allocation2 + $0x6e0] sm:$0xff] %vm2630_vm1, %v2594_v28  ;;  %v2595_v31 = vmax.f32 %v2235_v29, 0.0  ;;  %v3105_v39 = vld [vmem:[#allocation2 + $0x6d0] ss:$2 sm:$0xff]  ;;  %v3361_v45 = vld [vmem:[#allocation2 + $0x6d1] ss:$2 sm:$0xff] }
 0x298   :  { %2854 = vst.msk [vmem:[#allocation2 + $0x6f8] sm:$0xff] %vm2630_vm1, %v2597_v30  ;;  %v3103_v51 = vld [vmem:[#allocation2 + $0x6c0] ss:$2 sm:$0xff]  ;;  %v3359_v52 = vld [vmem:[#allocation2 + $0x6c1] ss:$2 sm:$0xff]  ;;  %v3507_v61 = vmax.f32 %v3105_v39, %v3361_v45 }
 0x299   :  { %2852 = vst.msk [vmem:[#allocation2 + $0x6e8] sm:$0xff] %vm2630_vm1, %v2595_v31  ;;  %v10285_v32 = vpop.f32.mrb[224].mxu0  ;;  %v3506_v0 = vmax.f32 %v3103_v51, %v3359_v52 }
 0x29a   :  { %v2256_v33 = vadd.f32 %v12741_v59, %v10285_v32  ;;  %v2247_v34 = vpop.f32.mrb[225].mxu0 }
 0x29b   :  { %v2248_v36 = vadd.f32 %v12741_v59, %v2247_v34  ;;  %v10286_v38 = vpop.f32.mrb[226].mxu0 }
 0x29c   :  { %v2600_v40 = vmax.f32 %v2256_v33, 0.0  ;;  %v2259_v41 = vadd.f32 %v12741_v59, %v10286_v38  ;;  %v2250_v42 = vpop.f32.mrb[227].mxu0 }
 0x29d   :  { %v2598_v46 = vmax.f32 %v2248_v36, 0.0  ;;  %v2251_v47 = vadd.f32 %v12741_v59, %v2250_v42  ;;  %v3892_v49 = vld [vmem:[#allocation3 + $0x199] sm:$0xff]  ;;  %v3893_v28 = vld [vmem:[#allocation3 + $0x1a1] sm:$0xff] }
 0x29e   :  { %v4786_v50 = vld [vmem:[#allocation3 + $0x19a] sm:$0xff]  ;;  %2857 = vst.msk [vmem:[#allocation2 + $0x710] sm:$0xff] %vm2630_vm1, %v2600_v40  ;;  %v2601_v53 = vmax.f32 %v2259_v41, 0.0  ;;  %v3930_v54 = vpack.c.bf16 %v3892_v49, %v3891_v43  ;;  %v4787_v29 = vld [vmem:[#allocation3 + $0x1a2] sm:$0xff] }
 0x29f   :  { %v4824_v55 = vpack.c.bf16 %v4786_v50, %v4785_v44  ;;  %v3109_v56 = vld [vmem:[#allocation2 + $0x6f0] ss:$2 sm:$0xff]  ;;  %v3365_v58 = vld [vmem:[#allocation2 + $0x6f1] ss:$2 sm:$0xff]  ;;  %2855 = vst.msk [vmem:[#allocation2 + $0x700] sm:$0xff] %vm2630_vm1, %v2598_v46  ;;  %v2599_v60 = vmax.f32 %v2251_v47, 0.0 }
 0x2a0   :  { %v3509_v22 = vmax.f32 %v3109_v56, %v3365_v58  ;;  %v3107_v62 = vld [vmem:[#allocation2 + $0x6e0] ss:$2 sm:$0xff]  ;;  %v3363_v63 = vld [vmem:[#allocation2 + $0x6e1] ss:$2 sm:$0xff]  ;;  %2858 = vst.msk [vmem:[#allocation2 + $0x718] sm:$0xff] %vm2630_vm1, %v2601_v53  ;;  %10368 = vmatmul.mubr.msk.bf16.gmra.mrb[48].mxu0 %vm2630_vm1, %v3930_v54 }
 0x2a1   :  { %10504 = vmatmul.mubr.msk.bf16.gmra.mrb[16].mxu1 %vm2630_vm1, %v4824_v55  ;;  %v3508_v57 = vmax.f32 %v3107_v62, %v3363_v63  ;;  %2856 = vst.msk [vmem:[#allocation2 + $0x708] sm:$0xff] %vm2630_vm1, %v2599_v60  ;;  %v10289_v1 = vpop.f32.mrb[228].mxu0 }
 0x2a2   :  { %v3581_v2 = vmax.f32 %v3507_v61, %v3509_v22  ;;  %v2272_v3 = vadd.f32 %v12741_v59, %v10289_v1  ;;  %v2263_v5 = vpop.f32.mrb[229].mxu0 }
 0x2a3   :  { %v3580_v6 = vmax.f32 %v3506_v0, %v3508_v57  ;;  %v2264_v7 = vadd.f32 %v12741_v59, %v2263_v5  ;;  %v10290_v8 = vpop.f32.mrb[230].mxu0 }
 0x2a4   :  { %v3660_v9 = vsel %vm3600_vm2, %v3581_v2, 0.0  ;;  %v2604_v10 = vmax.f32 %v2272_v3, 0.0  ;;  %v2275_v11 = vadd.f32 %v12741_v59, %v10290_v8  ;;  %v2266_v12 = vpop.f32.mrb[231].mxu0 }
 0x2a5   :  { %3724 = vst.msk [vmem:[#allocation3 + $0x1b8] sm:$0xff] %vm2630_vm1, %v3660_v9  ;;  %v3659_v13 = vsel %vm3593_vm3, %v3580_v6, 0.0  ;;  %v2602_v15 = vmax.f32 %v2264_v7, 0.0  ;;  %v2267_v16 = vadd.f32 %v12741_v59, %v2266_v12 }
 0x2a6   :  { %3723 = vst.msk [vmem:[#allocation3 + $0x1b0] sm:$0xff] %vm2630_vm1, %v3659_v13  ;;  %2861 = vst.msk [vmem:[#allocation2 + $0x730] sm:$0xff] %vm2630_vm1, %v2604_v10  ;;  %v2605_v17 = vmax.f32 %v2275_v11, 0.0 }
 0x2a7   :  { %2859 = vst.msk [vmem:[#allocation2 + $0x720] sm:$0xff] %vm2630_vm1, %v2602_v15  ;;  %v2603_v18 = vmax.f32 %v2267_v16, 0.0  ;;  %v3113_v25 = vld [vmem:[#allocation2 + $0x710] ss:$2 sm:$0xff]  ;;  %v3369_v30 = vld [vmem:[#allocation2 + $0x711] ss:$2 sm:$0xff] }
 0x2a8   :  { %2862 = vst.msk [vmem:[#allocation2 + $0x738] sm:$0xff] %vm2630_vm1, %v2605_v17  ;;  %v3111_v36 = vld [vmem:[#allocation2 + $0x700] ss:$2 sm:$0xff]  ;;  %v3367_v38 = vld [vmem:[#allocation2 + $0x701] ss:$2 sm:$0xff]  ;;  %v3511_v45 = vmax.f32 %v3113_v25, %v3369_v30 }
 0x2a9   :  { %2860 = vst.msk [vmem:[#allocation2 + $0x728] sm:$0xff] %vm2630_vm1, %v2603_v18  ;;  %v10293_v19 = vpop.f32.mrb[232].mxu0  ;;  %v3510_v50 = vmax.f32 %v3111_v36, %v3367_v38 }
 0x2aa   :  { %v2288_v20 = vadd.f32 %v12741_v59, %v10293_v19  ;;  %v2279_v21 = vpop.f32.mrb[233].mxu0 }
 0x2ab   :  { %v2280_v23 = vadd.f32 %v12741_v59, %v2279_v21  ;;  %v10294_v24 = vpop.f32.mrb[234].mxu0 }
 0x2ac   :  { %v2608_v26 = vmax.f32 %v2288_v20, 0.0  ;;  %v2291_v27 = vadd.f32 %v12741_v59, %v10294_v24  ;;  %v2282_v4 = vpop.f32.mrb[235].mxu0 }
 0x2ad   :  { %v2606_v31 = vmax.f32 %v2280_v23, 0.0  ;;  %v2283_v32 = vadd.f32 %v12741_v59, %v2282_v4  ;;  %v3894_v33 = vld [vmem:[#allocation3 + $0x1a9] sm:$0xff]  ;;  %v3895_v15 = vld [vmem:[#allocation3 + $0x1b1] sm:$0xff] }
 0x2ae   :  { %v4788_v34 = vld [vmem:[#allocation3 + $0x1aa] sm:$0xff]  ;;  %2865 = vst.msk [vmem:[#allocation2 + $0x750] sm:$0xff] %vm2630_vm1, %v2608_v26  ;;  %v2609_v39 = vmax.f32 %v2291_v27, 0.0  ;;  %v3931_v40 = vpack.c.bf16 %v3894_v33, %v3893_v28  ;;  %v4789_v16 = vld [vmem:[#allocation3 + $0x1b2] sm:$0xff] }
 0x2af   :  { %v4825_v41 = vpack.c.bf16 %v4788_v34, %v4787_v29  ;;  %v3117_v42 = vld [vmem:[#allocation2 + $0x730] ss:$2 sm:$0xff]  ;;  %v3373_v43 = vld [vmem:[#allocation2 + $0x731] ss:$2 sm:$0xff]  ;;  %2863 = vst.msk [vmem:[#allocation2 + $0x740] sm:$0xff] %vm2630_vm1, %v2606_v31  ;;  %v2607_v44 = vmax.f32 %v2283_v32, 0.0 }
 0x2b0   :  { %v3513_v46 = vmax.f32 %v3117_v42, %v3373_v43  ;;  %v3115_v47 = vld [vmem:[#allocation2 + $0x720] ss:$2 sm:$0xff]  ;;  %v3371_v49 = vld [vmem:[#allocation2 + $0x721] ss:$2 sm:$0xff]  ;;  %2866 = vst.msk [vmem:[#allocation2 + $0x758] sm:$0xff] %vm2630_vm1, %v2609_v39  ;;  %10371 = vmatprep.mubr.msk.bf16.mxu0 %vm2630_vm1, %v3931_v40 }
 0x2b1   :  { %10507 = vmatprep.mubr.msk.bf16.mxu1 %vm2630_vm1, %v4825_v41  ;;  %v3512_v51 = vmax.f32 %v3115_v47, %v3371_v49  ;;  %2864 = vst.msk [vmem:[#allocation2 + $0x748] sm:$0xff] %vm2630_vm1, %v2607_v44  ;;  %v10297_v52 = vpop.f32.mrb[236].mxu0 }
 0x2b2   :  { %v3583_v53 = vmax.f32 %v3511_v45, %v3513_v46  ;;  %v2304_v54 = vadd.f32 %v12741_v59, %v10297_v52  ;;  %v2295_v55 = vpop.f32.mrb[237].mxu0 }
 0x2b3   :  { %v3582_v56 = vmax.f32 %v3510_v50, %v3512_v51  ;;  %v2296_v58 = vadd.f32 %v12741_v59, %v2295_v55  ;;  %v10298_v60 = vpop.f32.mrb[238].mxu0 }
 0x2b4   :  { %v3662_v61 = vsel %vm3600_vm2, %v3583_v53, 0.0  ;;  %v2612_v22 = vmax.f32 %v2304_v54, 0.0  ;;  %v2307_v62 = vadd.f32 %v12741_v59, %v10298_v60  ;;  %v2298_v63 = vpop.f32.mrb[239].mxu0 }
 0x2b5   :  { %3726 = vst.msk [vmem:[#allocation3 + $0x1c8] sm:$0xff] %vm2630_vm1, %v3662_v61  ;;  %v3661_v0 = vsel %vm3593_vm3, %v3582_v56, 0.0  ;;  %v2610_v57 = vmax.f32 %v2296_v58, 0.0  ;;  %v2299_v1 = vadd.f32 %v12741_v59, %v2298_v63 }
 0x2b6   :  { %3725 = vst.msk [vmem:[#allocation3 + $0x1c0] sm:$0xff] %vm2630_vm1, %v3661_v0  ;;  %2869 = vst.msk [vmem:[#allocation2 + $0x770] sm:$0xff] %vm2630_vm1, %v2612_v22  ;;  %v2613_v2 = vmax.f32 %v2307_v62, 0.0 }
 0x2b7   :  { %2867 = vst.msk [vmem:[#allocation2 + $0x760] sm:$0xff] %vm2630_vm1, %v2610_v57  ;;  %v2611_v3 = vmax.f32 %v2299_v1, 0.0  ;;  %v3121_v10 = vld [vmem:[#allocation2 + $0x750] ss:$2 sm:$0xff]  ;;  %v3377_v17 = vld [vmem:[#allocation2 + $0x751] ss:$2 sm:$0xff] }
 0x2b8   :  { %2870 = vst.msk [vmem:[#allocation2 + $0x778] sm:$0xff] %vm2630_vm1, %v2613_v2  ;;  %v3119_v23 = vld [vmem:[#allocation2 + $0x740] ss:$2 sm:$0xff]  ;;  %v3375_v24 = vld [vmem:[#allocation2 + $0x741] ss:$2 sm:$0xff]  ;;  %v3515_v30 = vmax.f32 %v3121_v10, %v3377_v17 }
 0x2b9   :  { %2868 = vst.msk [vmem:[#allocation2 + $0x768] sm:$0xff] %vm2630_vm1, %v2611_v3  ;;  %v10301_v5 = vpop.f32.mrb[240].mxu0  ;;  %v3514_v34 = vmax.f32 %v3119_v23, %v3375_v24 }
 0x2ba   :  { %v2320_v6 = vadd.f32 %v12741_v59, %v10301_v5  ;;  %v2311_v7 = vpop.f32.mrb[241].mxu0 }
 0x2bb   :  { %v2312_v8 = vadd.f32 %v12741_v59, %v2311_v7  ;;  %v10302_v9 = vpop.f32.mrb[242].mxu0 }
 0x2bc   :  { %v2616_v11 = vmax.f32 %v2320_v6, 0.0  ;;  %v2323_v12 = vadd.f32 %v12741_v59, %v10302_v9  ;;  %v2314_v13 = vpop.f32.mrb[243].mxu0 }
 0x2bd   :  { %v2614_v18 = vmax.f32 %v2312_v8, 0.0  ;;  %v2315_v19 = vadd.f32 %v12741_v59, %v2314_v13  ;;  %v3896_v20 = vld [vmem:[#allocation3 + $0x1b9] sm:$0xff]  ;;  %v3897_v56 = vld [vmem:[#allocation3 + $0x1c1] sm:$0xff] }
 0x2be   :  { %v4790_v21 = vld [vmem:[#allocation3 + $0x1ba] sm:$0xff]  ;;  %2873 = vst.msk [vmem:[#allocation2 + $0x790] sm:$0xff] %vm2630_vm1, %v2616_v11  ;;  %v2617_v25 = vmax.f32 %v2323_v12, 0.0  ;;  %v3932_v26 = vpack.c.bf16 %v3896_v20, %v3895_v15  ;;  %v4791_v58 = vld [vmem:[#allocation3 + $0x1c2] sm:$0xff] }
 0x2bf   :  { %v4826_v27 = vpack.c.bf16 %v4790_v21, %v4789_v16  ;;  %v3125_v4 = vld [vmem:[#allocation2 + $0x770] ss:$2 sm:$0xff]  ;;  %v3381_v28 = vld [vmem:[#allocation2 + $0x771] ss:$2 sm:$0xff]  ;;  %2871 = vst.msk [vmem:[#allocation2 + $0x780] sm:$0xff] %vm2630_vm1, %v2614_v18  ;;  %v2615_v29 = vmax.f32 %v2315_v19, 0.0 }
 0x2c0   :  { %v3517_v31 = vmax.f32 %v3125_v4, %v3381_v28  ;;  %v3123_v32 = vld [vmem:[#allocation2 + $0x760] ss:$2 sm:$0xff]  ;;  %v3379_v33 = vld [vmem:[#allocation2 + $0x761] ss:$2 sm:$0xff]  ;;  %2874 = vst.msk [vmem:[#allocation2 + $0x798] sm:$0xff] %vm2630_vm1, %v2617_v25  ;;  %10372 = vmatmul.mubr.msk.bf16.gmra.mrb[52].mxu0 %vm2630_vm1, %v3932_v26 }
 0x2c1   :  { %10508 = vmatmul.mubr.msk.bf16.gmra.mrb[20].mxu1 %vm2630_vm1, %v4826_v27  ;;  %v3516_v36 = vmax.f32 %v3123_v32, %v3379_v33  ;;  %2872 = vst.msk [vmem:[#allocation2 + $0x788] sm:$0xff] %vm2630_vm1, %v2615_v29  ;;  %v10305_v38 = vpop.f32.mrb[244].mxu0  ;;  %v3904_v26 = vld [vmem:[#allocation3 + $0x1f9] sm:$0xff]  ;;  %v3742_v29 = vld [vmem:[#allocation3 + $0x8] sm:$0xff]  ;;  %v5296_v32 = vld [vmem:[#allocation3 + $0x10] sm:$0xff] }
 0x2c2   :  { %v3585_v39 = vmax.f32 %v3515_v30, %v3517_v31  ;;  %v2336_v40 = vadd.f32 %v12741_v59, %v10305_v38  ;;  %v2327_v41 = vpop.f32.mrb[245].mxu0  ;;  %v4797_v27 = vld [vmem:[#allocation3 + $0x1f2] sm:$0xff]  ;;  %v4798_v4 = vld [vmem:[#allocation3 + $0x1fa] sm:$0xff]  ;;  %v12890_v30 = vpack.c.bf16 %v3904_v26, %v3903_v35 }
 0x2c3   :  { %v3584_v42 = vmax.f32 %v3514_v34, %v3516_v36  ;;  %v2328_v43 = vadd.f32 %v12741_v59, %v2327_v41  ;;  %v10306_v44 = vpop.f32.mrb[246].mxu0  ;;  %v3741_v28 = vld [vmem:[#allocation3] sm:$0xff]  ;;  %v4830_v31 = vpack.c.bf16 %v4798_v4, %v4797_v27  ;;  %v5297_v33 = vld [vmem:[#allocation3 + $0x18] sm:$0xff]  ;;  %v5331_v4 = vld [vmem:[#allocation3 + $0x128] sm:$0xff] }
 0x2c4   :  { %v3664_v45 = vsel %vm3600_vm2, %v3585_v39, 0.0  ;;  %v2620_v46 = vmax.f32 %v2336_v40, 0.0  ;;  %v2339_v47 = vadd.f32 %v12741_v59, %v10306_v44  ;;  %v2330_v49 = vpop.f32.mrb[247].mxu0  ;;  %v3805_v34 = vpack.c.bf16 %v3742_v29, %v3741_v28  ;;  %v5298_v38 = vld [vmem:[#allocation3 + $0x20] sm:$0xff]  ;;  %v5299_v39 = vld [vmem:[#allocation3 + $0x28] sm:$0xff]  ;;  %v5300_v40 = vld [vmem:[#allocation3 + $0x30] sm:$0xff] }
 0x2c5   :  { %3728 = vst.msk [vmem:[#allocation3 + $0x1d8] sm:$0xff] %vm2630_vm1, %v3664_v45  ;;  %v3663_v50 = vsel %vm3593_vm3, %v3584_v42, 0.0  ;;  %v2618_v51 = vmax.f32 %v2328_v43, 0.0  ;;  %v2331_v52 = vadd.f32 %v12741_v59, %v2330_v49  ;;  %v5360_v36 = vpack.c.bf16 %v5297_v33, %v5296_v32  ;;  %v5301_v41 = vld [vmem:[#allocation3 + $0x38] sm:$0xff]  ;;  %v11582_v43 = vld [vmem:[%s13768_s3 + $0x48] sm:$0xff]   ;;  %v12908_v45 = vld [vmem:[%s13768_s3 + $0x50] sm:$0xff]  }
 0x2c6   :  { %3727 = vst.msk [vmem:[#allocation3 + $0x1d0] sm:$0xff] %vm2630_vm1, %v3663_v50  ;;  %2877 = vst.msk [vmem:[#allocation2 + $0x7b0] sm:$0xff] %vm2630_vm1, %v2620_v46  ;;  %v2621_v53 = vmax.f32 %v2339_v47, 0.0  ;;  %v5361_v42 = vpack.c.bf16 %v5299_v39, %v5298_v38  ;;  %v5362_v44 = vpack.c.bf16 %v5301_v41, %v5300_v40  ;;  %v5302_v46 = vld [vmem:[#allocation3 + $0x40] sm:$0xff]  ;;  %v5303_v47 = vld [vmem:[#allocation3 + $0x48] sm:$0xff] }
 0x2c7   :  { %2875 = vst.msk [vmem:[#allocation2 + $0x7a0] sm:$0xff] %vm2630_vm1, %v2618_v51  ;;  %v2619_v54 = vmax.f32 %v2331_v52, 0.0  ;;  %v3129_v55 = vld [vmem:[#allocation2 + $0x790] ss:$2 sm:$0xff]  ;;  %v3385_v60 = vld [vmem:[#allocation2 + $0x791] ss:$2 sm:$0xff]  ;;  %v5363_v51 = vpack.c.bf16 %v5303_v47, %v5302_v46 }
 0x2c8   :  { %2878 = vst.msk [vmem:[#allocation2 + $0x7b8] sm:$0xff] %vm2630_vm1, %v2621_v53  ;;  %v3127_v62 = vld [vmem:[#allocation2 + $0x780] ss:$2 sm:$0xff]  ;;  %v3383_v59 = vld [vmem:[#allocation2 + $0x781] ss:$2 sm:$0xff]  ;;  %v3519_v2 = vmax.f32 %v3129_v55, %v3385_v60  ;;  %v5304_v49 = vld [vmem:[#allocation3 + $0x50] sm:$0xff] }
 0x2c9   :  { %2876 = vst.msk [vmem:[#allocation2 + $0x7a8] sm:$0xff] %vm2630_vm1, %v2619_v54  ;;  %v3518_v7 = vmax.f32 %v3127_v62, %v3383_v59  ;;  %v5305_v50 = vld [vmem:[#allocation3 + $0x58] sm:$0xff]  ;;  %v5307_v53 = vld [vmem:[#allocation3 + $0x68] sm:$0xff]  ;;  %v5308_v54 = vld [vmem:[#allocation3 + $0x70] sm:$0xff] }
 0x2ca   :  { %v5364_v52 = vpack.c.bf16 %v5305_v50, %v5304_v49  ;;  %v5309_v55 = vld [vmem:[#allocation3 + $0x78] sm:$0xff]  ;;  %v5310_v60 = vld [vmem:[#allocation3 + $0x80] sm:$0xff]  ;;  %v5332_v28 = vld [vmem:[#allocation3 + $0x130] sm:$0xff] }
 0x2cb   :  { %v5313_v62 = vld [vmem:[#allocation3 + $0x98] sm:$0xff]  ;;  %v5330_v27 = vld [vmem:[#allocation3 + $0x120] sm:$0xff]  ;;  %v5343_v50 = vld [vmem:[#allocation3 + $0x188] sm:$0xff] }
 0x2cc   :  { %v5329_v35 = vld [vmem:[#allocation3 + $0x118] sm:$0xff]  ;;  %v5334_v33 = vld [vmem:[#allocation3 + $0x140] sm:$0xff] }
 0x2cd   :  { %v3898_v61 = vld [vmem:[#allocation3 + $0x1c9] sm:$0xff]  ;;  %v3899_v13 = vld [vmem:[#allocation3 + $0x1d1] sm:$0xff]  ;;  %v5338_v41 = vld [vmem:[#allocation3 + $0x160] sm:$0xff] }
 0x2ce   :  { %v4792_v22 = vld [vmem:[#allocation3 + $0x1ca] sm:$0xff]  ;;  %v12869_v63 = vpack.c.bf16 %v3898_v61, %v3897_v56  ;;  %v4793_v15 = vld [vmem:[#allocation3 + $0x1d2] sm:$0xff]  ;;  %v5342_v49 = vld [vmem:[#allocation3 + $0x180] sm:$0xff] }
 0x2cf   :  { %v4827_v0 = vpack.c.bf16 %v4792_v22, %v4791_v58  ;;  %v3133_v57 = vld [vmem:[#allocation2 + $0x7b0] ss:$2 sm:$0xff]  ;;  %v3389_v1 = vld [vmem:[#allocation2 + $0x7b1] ss:$2 sm:$0xff]  ;;  %v5366_v58 = vpack.c.bf16 %v5309_v55, %v5308_v54  ;;  %v5311_v61 = vld [vmem:[#allocation3 + $0x88] sm:$0xff] }
 0x2d0   :  { %v3521_v3 = vmax.f32 %v3133_v57, %v3389_v1  ;;  %v3131_v5 = vld [vmem:[#allocation2 + $0x7a0] ss:$2 sm:$0xff]  ;;  %v3387_v6 = vld [vmem:[#allocation2 + $0x7a1] ss:$2 sm:$0xff]  ;;  %10375 = vmatprep.mubr.msk.bf16.mxu0 %vm2630_vm1, %v12869_v63  ;;  %v5312_v22 = vld [vmem:[#allocation3 + $0x90] sm:$0xff]  ;;  %v5367_v59 = vpack.c.bf16 %v5311_v61, %v5310_v60 }
 0x2d1   :  { %10511 = vmatprep.mubr.msk.bf16.mxu1 %vm2630_vm1, %v4827_v0  ;;  %v3520_v8 = vmax.f32 %v3131_v5, %v3387_v6  ;;  %v5368_v0 = vpack.c.bf16 %v5313_v62, %v5312_v22  ;;  %v5314_v57 = vld [vmem:[#allocation3 + $0xa0] sm:$0xff]  ;;  %v5315_v1 = vld [vmem:[#allocation3 + $0xa8] sm:$0xff]  ;;  %v5333_v29 = vld [vmem:[#allocation3 + $0x138] sm:$0xff] }
 0x2d2   :  { %v3587_v9 = vmax.f32 %v3519_v2, %v3521_v3  ;;  %v5316_v2 = vld [vmem:[#allocation3 + $0xb0] sm:$0xff]  ;;  %v5317_v3 = vld [vmem:[#allocation3 + $0xb8] sm:$0xff]  ;;  %v5369_v5 = vpack.c.bf16 %v5315_v1, %v5314_v57  ;;  %v5378_v32 = vpack.c.bf16 %v5333_v29, %v5332_v28  ;;  %v5347_v54 = vld [vmem:[#allocation3 + $0x1a8] sm:$0xff] }
 0x2d3   :  { %v3586_v10 = vmax.f32 %v3518_v7, %v3520_v8  ;;  %v5370_v6 = vpack.c.bf16 %v5317_v3, %v5316_v2  ;;  %v5318_v7 = vld [vmem:[#allocation3 + $0xc0] sm:$0xff]  ;;  %v5319_v8 = vld [vmem:[#allocation3 + $0xc8] sm:$0xff]  ;;  %v5337_v38 = vld [vmem:[#allocation3 + $0x158] sm:$0xff] }
 0x2d4   :  { %v3666_v11 = vsel %vm3600_vm2, %v3587_v9, 0.0  ;;  %v5320_v9 = vld [vmem:[#allocation3 + $0xd0] sm:$0xff]  ;;  %v5350_v61 = vld [vmem:[#allocation3 + $0x1c0] sm:$0xff]  ;;  %v5351_v22 = vld [vmem:[#allocation3 + $0x1c8] sm:$0xff] }
 0x2d5   :  { %3730 = vst.msk [vmem:[#allocation3 + $0x1e8] sm:$0xff] %vm2630_vm1, %v3666_v11  ;;  %v3665_v12 = vsel %vm3593_vm3, %v3586_v10, 0.0  ;;  %v5321_v10 = vld [vmem:[#allocation3 + $0xd8] sm:$0xff]  ;;  %v5371_v11 = vpack.c.bf16 %v5319_v8, %v5318_v7  ;;  %v5348_v55 = vld [vmem:[#allocation3 + $0x1b0] sm:$0xff]  ;;  %v5358_v8 = vld [vmem:[#allocation3 + $0x200] sm:$0xff] }
 0x2d6   :  { %3729 = vst.msk [vmem:[#allocation3 + $0x1e0] sm:$0xff] %vm2630_vm1, %v3665_v12  ;;  %v5372_v12 = vpack.c.bf16 %v5321_v10, %v5320_v9  ;;  %v5352_v62 = vld [vmem:[#allocation3 + $0x1d0] sm:$0xff]  ;;  %v5357_v2 = vld [vmem:[#allocation3 + $0x1f8] sm:$0xff]  ;;  %v5359_v9 = vld [vmem:[#allocation3 + $0x208] sm:$0xff] }
 0x2d7   :  { %v5356_v1 = vld [vmem:[#allocation3 + $0x1f0] sm:$0xff]  ;;  %v5391_v10 = vpack.c.bf16 %v5359_v9, %v5358_v8  ;;  %v5871_v8 = vld [vmem:[#allocation3 + $0x81] sm:$0xff] }
 0x2d8   :  { %v5861_v29 = vld [vmem:[#allocation3 + $0x31] sm:$0xff] }
 0x2dc   :  { %v3902_v16 = vld [vmem:[#allocation3 + $0x1e9] sm:$0xff] }
 0x2dd   :  { %v4796_v17 = vld [vmem:[#allocation3 + $0x1ea] sm:$0xff]  ;;  %v3900_v18 = vld [vmem:[#allocation3 + $0x1d9] sm:$0xff]  ;;  %v3901_v20 = vld [vmem:[#allocation3 + $0x1e1] sm:$0xff] }
 0x2de   :  { %v4794_v19 = vld [vmem:[#allocation3 + $0x1da] sm:$0xff]  ;;  %v12880_v21 = vpack.c.bf16 %v3900_v18, %v3899_v13  ;;  %v12882_v24 = vpack.c.bf16 %v3902_v16, %v3901_v20  ;;  %v4795_v48 = vld [vmem:[#allocation3 + $0x1e2] sm:$0xff]  ;;  %v5324_v13 = vld [vmem:[#allocation3 + $0xf0] sm:$0xff] }
 0x2df   :  { %v4828_v23 = vpack.c.bf16 %v4794_v19, %v4793_v15  ;;  %v4829_v25 = vpack.c.bf16 %v4796_v17, %v4795_v48  ;;  %v5325_v15 = vld [vmem:[#allocation3 + $0xf8] sm:$0xff]  ;;  %v5322_v16 = vld [vmem:[#allocation3 + $0xe0] sm:$0xff]  ;;  %v5323_v17 = vld [vmem:[#allocation3 + $0xe8] sm:$0xff] }
 0x2e0   :  { %10376 = vmatmul.mubr.msk.bf16.gmra.mrb[56].mxu0 %vm2630_vm1, %v12880_v21  ;;  %v5374_v18 = vpack.c.bf16 %v5325_v15, %v5324_v13  ;;  %v5373_v19 = vpack.c.bf16 %v5323_v17, %v5322_v16  ;;  %v5326_v20 = vld [vmem:[#allocation3 + $0x100] sm:$0xff]  ;;  %v5857_v15 = vld [vmem:[#allocation3 + $0x11] sm:$0xff] }
 0x2e1   :  { %10512 = vmatmul.mubr.msk.bf16.gmra.mrb[24].mxu1 %vm2630_vm1, %v4828_v23  ;;  %10379 = vmatprep.mubr.msk.bf16.mxu0 %vm2630_vm1, %v12882_v24  ;;  %v5327_v23 = vld [vmem:[#allocation3 + $0x108] sm:$0xff]  ;;  %v5354_v3 = vld [vmem:[#allocation3 + $0x1e0] sm:$0xff] }
 0x2e2   :  { %10515 = vmatprep.mubr.msk.bf16.mxu1 %vm2630_vm1, %v4829_v25  ;;  %v5375_v48 = vpack.c.bf16 %v5327_v23, %v5326_v20  ;;  %v5328_v25 = vld [vmem:[#allocation3 + $0x110] sm:$0xff]  ;;  %v5858_v13 = vld [vmem:[#allocation3 + $0x19] sm:$0xff] }
 0x2e3   :  { %v5376_v26 = vpack.c.bf16 %v5329_v35, %v5328_v25  ;;  %v5921_v17 = vpack.c.bf16 %v5858_v13, %v5857_v15  ;;  %v4740_v20 = vld [vmem:[#allocation3 + $0x2a] sm:$0xff]  ;;  %v4737_v23 = vld [vmem:[#allocation3 + $0x12] sm:$0xff] }
 0x2e4   :  { %v5862_v25 = vld [vmem:[#allocation3 + $0x39] sm:$0xff] }
 0x2e8   :  { %10380 = vmatmul.mubr.msk.bf16.gmra.mrb[60].mxu0 %vm2630_vm1, %v12890_v30 }
 0x2e9   :  { %10516 = vmatmul.mubr.msk.bf16.gmra.mrb[28].mxu1 %vm2630_vm1, %v4830_v31  ;;  %10387 = vmatprep.mubr.msk.bf16.mxu0 %vm2630_vm1, %v3805_v34  ;;  %v5377_v31 = vpack.c.bf16 %v5331_v4, %v5330_v27  ;;  %v5335_v34 = vld [vmem:[#allocation3 + $0x148] sm:$0xff]  ;;  %v11584_v4 = vld [vmem:[%s13768_s3 + $0x58] sm:$0xff]  }
 0x2ea   :  { %10523 = vmatprep.mubr.msk.bf16.mxu1 %vm2630_vm1, %v5360_v36  ;;  %v5379_v39 = vpack.c.bf16 %v5335_v34, %v5334_v33  ;;  %v4739_v27 = vld [vmem:[#allocation3 + $0x22] sm:$0xff]  ;;  %v4742_v33 = vld [vmem:[#allocation3 + $0x3a] sm:$0xff] }
 0x2eb   :  { %v12980_v28 = vpack.c.bf16 %v4740_v20, %v4739_v27  ;;  %v5864_v34 = vld [vmem:[#allocation3 + $0x49] sm:$0xff]  ;;  %v4753_v20 = vld [vmem:[#allocation3 + $0x92] sm:$0xff] }
 0x2ec   :  { %v5877_v27 = vld [vmem:[#allocation3 + $0xb1] sm:$0xff] }
 0x2f0   :  { %10388 = vmatmul.mubr.msk.bf16.vlgmr.msra.gmra.mrb[0].mxu0 %vm2630_vm1, %v5360_v36  ;;  %v5336_v36 = vld [vmem:[#allocation3 + $0x150] sm:$0xff] }
 0x2f1   :  { %10524 = vmatmul.mubr.msk.bf16.vlgmr.msra.gmra.mrb[32].mxu1 %vm2630_vm1, %v5361_v42  ;;  %10391 = vmatprep.mubr.msk.bf16.mxu0 %vm2630_vm1, %v5361_v42  ;;  %v5380_v40 = vpack.c.bf16 %v5337_v38, %v5336_v36  ;;  %v5339_v42 = vld [vmem:[#allocation3 + $0x168] sm:$0xff]  ;;  %v5866_v38 = vld [vmem:[#allocation3 + $0x59] sm:$0xff] }
 0x2f2   :  { %10588 = vmatpush3.bf16.msra.mxu1 %v12712_v14  ;;  %10527 = vmatprep.mubr.msk.bf16.mxu1 %vm2630_vm1, %v5362_v44  ;;  %v11595_v14 = vld [vmem:[%s13768_s3 + $0x28] sm:$0xff]   ;;  %v5381_v46 = vpack.c.bf16 %v5339_v42, %v5338_v41 }
 0x2f3   :  { %10589 = vmatprep.subr.bf16.mxu1 %v11582_v43  ;;  %10452 = vmatpush3.bf16.msra.mxu0 %v12723_v37  ;;  %v5306_v37 = vld [vmem:[#allocation3 + $0x60] sm:$0xff]  ;;  %v4744_v36 = vld [vmem:[#allocation3 + $0x4a] sm:$0xff] }
 0x2f4   :  { %10453 = vmatprep.subr.bf16.mxu0 %v11595_v14  ;;  %v5365_v56 = vpack.c.bf16 %v5307_v53, %v5306_v37  ;;  %v5346_v53 = vld [vmem:[#allocation3 + $0x1a0] sm:$0xff] }
 0x2f5   :  { %v4743_v42 = vld [vmem:[#allocation3 + $0x42] sm:$0xff] }
 0x2f6   :  { %10590 = vmatpush3.bf16.msra.mxu1 %v11582_v43  ;;  %v5340_v43 = vld [vmem:[#allocation3 + $0x170] sm:$0xff] }
 0x2f7   :  { %10655 = vmatprep.subr.bf16.mxu1 %v12908_v45  ;;  %10454 = vmatpush3.bf16.msra.mxu0 %v11595_v14  ;;  %v5344_v14 = vld [vmem:[#allocation3 + $0x190] sm:$0xff] }
 0x2f8   :  { %10392 = vmatmul.mubr.msk.bf16.gmra.mrb[4].mxu0 %vm2630_vm1, %v5362_v44  ;;  %v5341_v44 = vld [vmem:[#allocation3 + $0x178] sm:$0xff] }
 0x2f9   :  { %10528 = vmatmul.mubr.msk.bf16.gmra.mrb[36].mxu1 %vm2630_vm1, %v5363_v51  ;;  %10395 = vmatprep.mubr.msk.bf16.mxu0 %vm2630_vm1, %v5363_v51  ;;  %v5382_v47 = vpack.c.bf16 %v5341_v44, %v5340_v43  ;;  %v5345_v51 = vld [vmem:[#allocation3 + $0x198] sm:$0xff]  ;;  %v12997_v44 = vpack.c.bf16 %v4744_v36, %v4743_v42  ;;  %v4759_v42 = vld [vmem:[#allocation3 + $0xc2] sm:$0xff] }
 0x2fa   :  { %10531 = vmatprep.mubr.msk.bf16.mxu1 %vm2630_vm1, %v5364_v52  ;;  %v5384_v37 = vpack.c.bf16 %v5345_v51, %v5344_v14  ;;  %v5865_v43 = vld [vmem:[#allocation3 + $0x51] sm:$0xff]  ;;  %v5868_v14 = vld [vmem:[#allocation3 + $0x69] sm:$0xff]  ;;  %v5882_v36 = vld [vmem:[#allocation3 + $0xd9] sm:$0xff] }
 0x300   :  { %10396 = vmatmul.mubr.msk.bf16.gmra.mrb[8].mxu0 %vm2630_vm1, %v5364_v52  ;;  %v5383_v52 = vpack.c.bf16 %v5343_v50, %v5342_v49  ;;  %v4746_v50 = vld [vmem:[#allocation3 + $0x5a] sm:$0xff] }
 0x301   :  { %10532 = vmatmul.mubr.msk.bf16.gmra.mrb[40].mxu1 %vm2630_vm1, %v5365_v56  ;;  %10399 = vmatprep.mubr.msk.bf16.mxu0 %vm2630_vm1, %v5365_v56  ;;  %v5349_v56 = vld [vmem:[#allocation3 + $0x1b8] sm:$0xff] }
 0x302   :  { %10535 = vmatprep.mubr.msk.bf16.mxu1 %vm2630_vm1, %v5366_v58  ;;  %v5386_v60 = vpack.c.bf16 %v5349_v56, %v5348_v55  ;;  %v5867_v55 = vld [vmem:[#allocation3 + $0x61] sm:$0xff] }
 0x308   :  { %10400 = vmatmul.mubr.msk.bf16.gmra.mrb[12].mxu0 %vm2630_vm1, %v5366_v58  ;;  %v5385_v58 = vpack.c.bf16 %v5347_v54, %v5346_v53  ;;  %v4745_v54 = vld [vmem:[#allocation3 + $0x52] sm:$0xff] }
 0x309   :  { %10536 = vmatmul.mubr.msk.bf16.gmra.mrb[44].mxu1 %vm2630_vm1, %v5367_v59  ;;  %10403 = vmatprep.mubr.msk.bf16.mxu0 %vm2630_vm1, %v5367_v59  ;;  %v5353_v59 = vld [vmem:[#allocation3 + $0x1d8] sm:$0xff] }
 0x30a   :  { %10539 = vmatprep.mubr.msk.bf16.mxu1 %vm2630_vm1, %v5368_v0  ;;  %v5388_v57 = vpack.c.bf16 %v5353_v59, %v5352_v62 }
 0x310   :  { %10404 = vmatmul.mubr.msk.bf16.gmra.mrb[16].mxu0 %vm2630_vm1, %v5368_v0  ;;  %v5387_v0 = vpack.c.bf16 %v5351_v22, %v5350_v61  ;;  %v4747_v61 = vld [vmem:[#allocation3 + $0x62] sm:$0xff]  ;;  %v5869_v22 = vld [vmem:[#allocation3 + $0x71] sm:$0xff] }
 0x311   :  { %10540 = vmatmul.mubr.msk.bf16.gmra.mrb[48].mxu1 %vm2630_vm1, %v5369_v5  ;;  %10407 = vmatprep.mubr.msk.bf16.mxu0 %vm2630_vm1, %v5369_v5  ;;  %v5355_v5 = vld [vmem:[#allocation3 + $0x1e8] sm:$0xff] }
 0x312   :  { %10543 = vmatprep.mubr.msk.bf16.mxu1 %vm2630_vm1, %v5370_v6  ;;  %v5389_v7 = vpack.c.bf16 %v5355_v5, %v5354_v3  ;;  %v5872_v3 = vld [vmem:[#allocation3 + $0x89] sm:$0xff] }
 0x313   :  { %v4752_v5 = vld [vmem:[#allocation3 + $0x8a] sm:$0xff] }
 0x318   :  { %10408 = vmatmul.mubr.msk.bf16.gmra.mrb[20].mxu0 %vm2630_vm1, %v5370_v6  ;;  %v5390_v6 = vpack.c.bf16 %v5357_v2, %v5356_v1  ;;  %v4750_v2 = vld [vmem:[#allocation3 + $0x7a] sm:$0xff] }
 0x319   :  { %10544 = vmatmul.mubr.msk.bf16.gmra.mrb[52].mxu1 %vm2630_vm1, %v5371_v11  ;;  %10411 = vmatprep.mubr.msk.bf16.mxu0 %vm2630_vm1, %v5371_v11  ;;  %v4735_v11 = vld [vmem:[#allocation3 + $0x2] sm:$0xff] }
 0x31a   :  { %10547 = vmatprep.mubr.msk.bf16.mxu1 %vm2630_vm1, %v5372_v12 }
 0x320   :  { %10412 = vmatmul.mubr.msk.bf16.gmra.mrb[24].mxu0 %vm2630_vm1, %v5372_v12  ;;  %v4736_v12 = vld [vmem:[#allocation3 + $0xa] sm:$0xff] }
 0x321   :  { %10548 = vmatmul.mubr.msk.bf16.gmra.mrb[56].mxu1 %vm2630_vm1, %v5373_v19  ;;  %10415 = vmatprep.mubr.msk.bf16.mxu0 %vm2630_vm1, %v5373_v19  ;;  %v4799_v16 = vpack.c.bf16 %v4736_v12, %v4735_v11  ;;  %v5860_v19 = vld [vmem:[#allocation3 + $0x29] sm:$0xff]  ;;  %v5873_v12 = vld [vmem:[#allocation3 + $0x91] sm:$0xff] }
 0x322   :  { %10551 = vmatprep.mubr.msk.bf16.mxu1 %vm2630_vm1, %v5374_v18  ;;  %v4751_v11 = vld [vmem:[#allocation3 + $0x82] sm:$0xff] }
 0x323   :  { %v13017_v13 = vpack.c.bf16 %v4752_v5, %v4751_v11 }
 0x328   :  { %10416 = vmatmul.mubr.msk.bf16.gmra.mrb[28].mxu0 %vm2630_vm1, %v5374_v18  ;;  %v4738_v18 = vld [vmem:[#allocation3 + $0x1a] sm:$0xff] }
 0x329   :  { %10552 = vmatmul.mubr.msk.bf16.gmra.mrb[60].mxu1 %vm2630_vm1, %v5375_v48  ;;  %10419 = vmatprep.mubr.msk.bf16.mxu0 %vm2630_vm1, %v5375_v48  ;;  %v5859_v48 = vld [vmem:[#allocation3 + $0x21] sm:$0xff]  ;;  %v12975_v35 = vpack.c.bf16 %v4738_v18, %v4737_v23  ;;  %v4756_v18 = vld [vmem:[#allocation3 + $0xaa] sm:$0xff] }
 0x32a   :  { %10555 = vmatprep.mubr.msk.bf16.mxu1 %vm2630_vm1, %v5376_v26  ;;  %v5875_v23 = vld [vmem:[#allocation3 + $0xa1] sm:$0xff] }
 0x330   :  { %10420 = vmatmul.mubr.msk.bf16.gmra.mrb[32].mxu0 %vm2630_vm1, %v5376_v26  ;;  %v5922_v26 = vpack.c.bf16 %v5860_v19, %v5859_v48  ;;  %v5878_v19 = vld [vmem:[#allocation3 + $0xb9] sm:$0xff] }
 0x331   :  { %10556 = vmatmul.mubr.msk.bf16.gmra.mrb[0].mxu1 %vm2630_vm1, %v5377_v31  ;;  %10423 = vmatprep.mubr.msk.bf16.mxu0 %vm2630_vm1, %v5377_v31  ;;  %v5923_v31 = vpack.c.bf16 %v5862_v25, %v5861_v29  ;;  %v5931_v29 = vpack.c.bf16 %v5878_v19, %v5877_v27  ;;  %v5899_v27 = vld [vmem:[#allocation3 + $0x161] sm:$0xff] }
 0x332   :  { %10559 = vmatprep.mubr.msk.bf16.mxu1 %vm2630_vm1, %v5378_v32 }
 0x338   :  { %10424 = vmatmul.mubr.msk.bf16.gmra.mrb[36].mxu0 %vm2630_vm1, %v5378_v32  ;;  %v12992_v32 = vld [vmem:[%s13768_s3 + $0x60] sm:$0xff]  }
 0x339   :  { %10560 = vmatmul.mubr.msk.bf16.gmra.mrb[4].mxu1 %vm2630_vm1, %v5379_v39  ;;  %10427 = vmatprep.mubr.msk.bf16.mxu0 %vm2630_vm1, %v5379_v39  ;;  %v4741_v39 = vld [vmem:[#allocation3 + $0x32] sm:$0xff] }
 0x33a   :  { %10563 = vmatprep.mubr.msk.bf16.mxu1 %vm2630_vm1, %v5380_v40  ;;  %v12994_v41 = vpack.c.bf16 %v4742_v33, %v4741_v39  ;;  %v5880_v33 = vld [vmem:[#allocation3 + $0xc9] sm:$0xff]  ;;  %v5879_v39 = vld [vmem:[#allocation3 + $0xc1] sm:$0xff] }
 0x340   :  { %10428 = vmatmul.mubr.msk.bf16.gmra.mrb[40].mxu0 %vm2630_vm1, %v5380_v40  ;;  %v5863_v40 = vld [vmem:[#allocation3 + $0x41] sm:$0xff] }
 0x341   :  { %10564 = vmatmul.mubr.msk.bf16.gmra.mrb[8].mxu1 %vm2630_vm1, %v5381_v46  ;;  %10431 = vmatprep.mubr.msk.bf16.mxu0 %vm2630_vm1, %v5381_v46  ;;  %v5925_v46 = vpack.c.bf16 %v5866_v38, %v5865_v43  ;;  %v4757_v38 = vld [vmem:[#allocation3 + $0xb2] sm:$0xff] }
 0x342   :  { %10567 = vmatprep.mubr.msk.bf16.mxu1 %vm2630_vm1, %v5382_v47  ;;  %v5881_v43 = vld [vmem:[#allocation3 + $0xd1] sm:$0xff] }
 0x348   :  { %10432 = vmatmul.mubr.msk.bf16.gmra.mrb[44].mxu0 %vm2630_vm1, %v5382_v47  ;;  %v10309_v47 = vpop.f32.mrb[248].mxu0 }
 0x349   :  { %10568 = vmatmul.mubr.msk.bf16.gmra.mrb[12].mxu1 %vm2630_vm1, %v5383_v52  ;;  %10435 = vmatprep.mubr.msk.bf16.mxu0 %vm2630_vm1, %v5383_v52  ;;  %v2343_v49 = vpop.f32.mrb[249].mxu0  ;;  %v4748_v52 = vld [vmem:[#allocation3 + $0x6a] sm:$0xff]  ;;  %v5933_v47 = vpack.c.bf16 %v5882_v36, %v5881_v43  ;;  %v5906_v36 = vld [vmem:[#allocation3 + $0x199] sm:$0xff] }
 0x34a   :  { %10571 = vmatprep.mubr.msk.bf16.mxu1 %vm2630_vm1, %v5384_v37  ;;  %v10310_v51 = vpop.f32.mrb[250].mxu0  ;;  %v13007_v59 = vpack.c.bf16 %v4748_v52, %v4747_v61  ;;  %v5885_v49 = vld [vmem:[#allocation3 + $0xf1] sm:$0xff]  ;;  %v5884_v52 = vld [vmem:[#allocation3 + $0xe9] sm:$0xff] }
 0x34b   :  { %v2346_v53 = vpop.f32.mrb[251].mxu0  ;;  %v5883_v51 = vld [vmem:[#allocation3 + $0xe1] sm:$0xff]  ;;  %v5908_v43 = vld [vmem:[#allocation3 + $0x1a9] sm:$0xff] }
 0x34c   :  { %v10313_v56 = vpop.f32.mrb[252].mxu0  ;;  %v4764_v53 = vld [vmem:[#allocation3 + $0xea] sm:$0xff] }
 0x34d   :  { %v2359_v62 = vpop.f32.mrb[253].mxu0 }
 0x34e   :  { %v5888_v62 = vld [vmem:[#allocation3 + $0x109] sm:$0xff] }
 0x350   :  { %10436 = vmatmul.mubr.msk.bf16.gmra.mrb[48].mxu0 %vm2630_vm1, %v5384_v37  ;;  %v5870_v37 = vld [vmem:[#allocation3 + $0x79] sm:$0xff] }
 0x351   :  { %10572 = vmatmul.mubr.msk.bf16.gmra.mrb[16].mxu1 %vm2630_vm1, %v5385_v58  ;;  %10439 = vmatprep.mubr.msk.bf16.mxu0 %vm2630_vm1, %v5385_v58  ;;  %v13005_v58 = vpack.c.bf16 %v4746_v50, %v4745_v54  ;;  %v5886_v50 = vld [vmem:[#allocation3 + $0xf9] sm:$0xff] }
 0x352   :  { %10575 = vmatprep.mubr.msk.bf16.mxu1 %vm2630_vm1, %v5386_v60  ;;  %v4761_v54 = vld [vmem:[#allocation3 + $0xd2] sm:$0xff] }
 0x358   :  { %10440 = vmatmul.mubr.msk.bf16.gmra.mrb[52].mxu0 %vm2630_vm1, %v5386_v60  ;;  %v5926_v60 = vpack.c.bf16 %v5868_v14, %v5867_v55  ;;  %v4762_v14 = vld [vmem:[#allocation3 + $0xda] sm:$0xff]  ;;  %v13045_v55 = vpack.c.bf16 %v5886_v50, %v5885_v49 }
 0x359   :  { %10576 = vmatmul.mubr.msk.bf16.gmra.mrb[20].mxu1 %vm2630_vm1, %v5387_v0  ;;  %10443 = vmatprep.mubr.msk.bf16.mxu0 %vm2630_vm1, %v5387_v0  ;;  %v5927_v0 = vpack.c.bf16 %v5870_v37, %v5869_v22  ;;  %v4763_v37 = vld [vmem:[#allocation3 + $0xe2] sm:$0xff]  ;;  %v13047_v56 = vpack.c.bf16 %v4762_v14, %v4761_v54  ;;  %v5909_v14 = vld [vmem:[#allocation3 + $0x1b1] sm:$0xff] }
 0x35a   :  { %10579 = vmatprep.mubr.msk.bf16.mxu1 %vm2630_vm1, %v5388_v57  ;;  %v13051_v61 = vpack.c.bf16 %v4764_v53, %v4763_v37  ;;  %v5887_v22 = vld [vmem:[#allocation3 + $0x101] sm:$0xff]  ;;  %v5920_v37 = vld [vmem:[#allocation3 + $0x209] sm:$0xff] }
 0x35b   :  { %v5907_v49 = vld [vmem:[#allocation3 + $0x1a1] sm:$0xff] }
 0x35c   :  { %v13105_v50 = vpack.c.bf16 %v5908_v43, %v5907_v49 }
 0x360   :  { %10444 = vmatmul.mubr.msk.bf16.gmra.mrb[56].mxu0 %vm2630_vm1, %v5388_v57  ;;  %v10314_v57 = vpop.f32.mrb[254].mxu0 }
 0x361   :  { %10580 = vmatmul.mubr.msk.bf16.gmra.mrb[24].mxu1 %vm2630_vm1, %v5389_v7  ;;  %10447 = vmatprep.mubr.msk.bf16.mxu0 %vm2630_vm1, %v5389_v7  ;;  %v2362_v1 = vpop.f32.mrb[255].mxu0  ;;  %v4749_v7 = vld [vmem:[#allocation3 + $0x72] sm:$0xff]  ;;  %v13061_v57 = vpack.c.bf16 %v5888_v62, %v5887_v22 }
 0x362   :  { %10583 = vmatprep.mubr.msk.bf16.mxu1 %vm2630_vm1, %v5390_v6  ;;  %v13015_v9 = vpack.c.bf16 %v4750_v2, %v4749_v7  ;;  %v5889_v1 = vld [vmem:[#allocation3 + $0x111] sm:$0xff]  ;;  %v5892_v7 = vld [vmem:[#allocation3 + $0x129] sm:$0xff] }
 0x363   :  { %v6446_v2 = vld [vmem:[#allocation3 + $0xf2] sm:$0xff] }
 0x368   :  { %10448 = vmatmul.mubr.msk.bf16.gmra.mrb[60].mxu0 %vm2630_vm1, %v5390_v6  ;;  %v5874_v6 = vld [vmem:[#allocation3 + $0x99] sm:$0xff] }
 0x369   :  { %10584 = vmatmul.mubr.msk.bf16.gmra.mrb[28].mxu1 %vm2630_vm1, %v5391_v10  ;;  %10455 = vmatprep.mubr.msk.bf16.mxu0 %vm2630_vm1, %v4799_v16  ;;  %v5928_v10 = vpack.c.bf16 %v5872_v3, %v5871_v8  ;;  %v5929_v15 = vpack.c.bf16 %v5874_v6, %v5873_v12  ;;  %v4754_v16 = vld [vmem:[#allocation3 + $0x9a] sm:$0xff]  ;;  %v5893_v12 = vld [vmem:[#allocation3 + $0x131] sm:$0xff] }
 0x36a   :  { %10591 = vmatprep.mubr.msk.bf16.mxu1 %vm2630_vm1, %v5921_v17  ;;  %v5876_v17 = vld [vmem:[#allocation3 + $0xa9] sm:$0xff]  ;;  %v13025_v48 = vpack.c.bf16 %v4754_v16, %v4753_v20  ;;  %v6447_v3 = vld [vmem:[#allocation3 + $0xfa] sm:$0xff]  ;;  %v5897_v20 = vld [vmem:[#allocation3 + $0x151] sm:$0xff] }
 0x36b   :  { %v5930_v25 = vpack.c.bf16 %v5876_v17, %v5875_v23  ;;  %v13065_v6 = vpack.c.bf16 %v6447_v3, %v6446_v2  ;;  %v5894_v8 = vld [vmem:[#allocation3 + $0x139] sm:$0xff]  ;;  %v5896_v16 = vld [vmem:[#allocation3 + $0x149] sm:$0xff] }
 0x36c   :  { %v5898_v17 = vld [vmem:[#allocation3 + $0x159] sm:$0xff] }
 0x36d   :  { %v13083_v23 = vpack.c.bf16 %v5898_v17, %v5897_v20  ;;  %v6455_v17 = vld [vmem:[#allocation3 + $0x13a] sm:$0xff]  ;;  %v6452_v20 = vld [vmem:[#allocation3 + $0x122] sm:$0xff] }
 0x370   :  { %10456 = vmatmul.mubr.msk.bf16.vlgmr.msra.gmra.mrb[0].mxu0 %vm2630_vm1, %v12975_v35 }
 0x371   :  { %10592 = vmatmul.mubr.msk.bf16.vlgmr.msra.gmra.mrb[32].mxu1 %vm2630_vm1, %v5922_v26  ;;  %10459 = vmatprep.mubr.msk.bf16.mxu0 %vm2630_vm1, %v12980_v28  ;;  %v4755_v26 = vld [vmem:[#allocation3 + $0xa2] sm:$0xff] }
 0x372   :  { %10656 = vmatpush3.bf16.msra.mxu1 %v12908_v45  ;;  %10595 = vmatprep.mubr.msk.bf16.mxu1 %vm2630_vm1, %v5923_v31  ;;  %v5924_v45 = vpack.c.bf16 %v5864_v34, %v5863_v40  ;;  %v4758_v31 = vld [vmem:[#allocation3 + $0xba] sm:$0xff]  ;;  %v4760_v34 = vld [vmem:[#allocation3 + $0xca] sm:$0xff] }
 0x373   :  { %10657 = vmatprep.subr.bf16.mxu1 %v11584_v4  ;;  %v13035_v40 = vpack.c.bf16 %v4758_v31, %v4757_v38  ;;  %v5901_v31 = vld [vmem:[#allocation3 + $0x171] sm:$0xff]  ;;  %v5903_v38 = vld [vmem:[#allocation3 + $0x181] sm:$0xff] }
 0x376   :  { %10658 = vmatpush3.bf16.msra.mxu1 %v11584_v4  ;;  %v13027_v4 = vpack.c.bf16 %v4756_v18, %v4755_v26  ;;  %v5895_v18 = vld [vmem:[#allocation3 + $0x141] sm:$0xff]  ;;  %v5902_v26 = vld [vmem:[#allocation3 + $0x179] sm:$0xff] }
 0x377   :  { %10723 = vmatprep.subr.bf16.mxu1 %v12992_v32  ;;  %v13081_v19 = vpack.c.bf16 %v5896_v16, %v5895_v18 }
 0x378   :  { %10460 = vmatmul.mubr.msk.bf16.gmra.mrb[4].mxu0 %vm2630_vm1, %v12994_v41 }
 0x379   :  { %10596 = vmatmul.mubr.msk.bf16.gmra.mrb[36].mxu1 %vm2630_vm1, %v5924_v45  ;;  %10463 = vmatprep.mubr.msk.bf16.mxu0 %vm2630_vm1, %v12997_v44  ;;  %v5932_v45 = vpack.c.bf16 %v5880_v33, %v5879_v39  ;;  %v13091_v33 = vpack.c.bf16 %v5902_v26, %v5901_v31 }
 0x37a   :  { %10599 = vmatprep.mubr.msk.bf16.mxu1 %vm2630_vm1, %v5925_v46  ;;  %v13037_v46 = vpack.c.bf16 %v4760_v34, %v4759_v42  ;;  %v5904_v34 = vld [vmem:[#allocation3 + $0x189] sm:$0xff] }
 0x37b   :  { %v13097_v39 = vpack.c.bf16 %v5904_v34, %v5903_v38 }
 0x380   :  { %10464 = vmatmul.mubr.msk.bf16.gmra.mrb[8].mxu0 %vm2630_vm1, %v13005_v58 }
 0x381   :  { %10600 = vmatmul.mubr.msk.bf16.gmra.mrb[40].mxu1 %vm2630_vm1, %v5926_v60  ;;  %10467 = vmatprep.mubr.msk.bf16.mxu0 %vm2630_vm1, %v13007_v59  ;;  %v13049_v60 = vpack.c.bf16 %v5884_v52, %v5883_v51  ;;  %v5919_v52 = vld [vmem:[#allocation3 + $0x201] sm:$0xff] }
 0x382   :  { %10603 = vmatprep.mubr.msk.bf16.mxu1 %vm2630_vm1, %v5927_v0  ;;  %v5890_v0 = vld [vmem:[#allocation3 + $0x119] sm:$0xff]  ;;  %v13121_v53 = vpack.c.bf16 %v5920_v37, %v5919_v52 }
 0x383   :  { %v13063_v5 = vpack.c.bf16 %v5890_v0, %v5889_v1  ;;  %v6449_v0 = vld [vmem:[#allocation3 + $0x10a] sm:$0xff]  ;;  %v6458_v52 = vld [vmem:[#allocation3 + $0x152] sm:$0xff] }
 0x388   :  { %10468 = vmatmul.mubr.msk.bf16.gmra.mrb[12].mxu0 %vm2630_vm1, %v13015_v9 }
 0x389   :  { %10604 = vmatmul.mubr.msk.bf16.gmra.mrb[44].mxu1 %vm2630_vm1, %v5928_v10  ;;  %10471 = vmatprep.mubr.msk.bf16.mxu0 %vm2630_vm1, %v13017_v13  ;;  %v5891_v10 = vld [vmem:[#allocation3 + $0x121] sm:$0xff] }
 0x38a   :  { %10607 = vmatprep.mubr.msk.bf16.mxu1 %vm2630_vm1, %v5929_v15  ;;  %v13073_v11 = vpack.c.bf16 %v5892_v7, %v5891_v10  ;;  %v13075_v15 = vpack.c.bf16 %v5894_v8, %v5893_v12  ;;  %v6450_v8 = vld [vmem:[#allocation3 + $0x112] sm:$0xff]  ;;  %v6453_v12 = vld [vmem:[#allocation3 + $0x12a] sm:$0xff] }
 0x38b   :  { %v13221_v26 = vpack.c.bf16 %v6453_v12, %v6452_v20  ;;  %v6462_v20 = vld [vmem:[#allocation3 + $0x172] sm:$0xff] }
 0x390   :  { %10472 = vmatmul.mubr.msk.bf16.gmra.mrb[16].mxu0 %vm2630_vm1, %v13025_v48 }
 0x391   :  { %10608 = vmatmul.mubr.msk.bf16.gmra.mrb[48].mxu1 %vm2630_vm1, %v5930_v25  ;;  %10475 = vmatprep.mubr.msk.bf16.mxu0 %vm2630_vm1, %v13027_v4  ;;  %v5900_v25 = vld [vmem:[#allocation3 + $0x169] sm:$0xff] }
 0x392   :  { %10611 = vmatprep.mubr.msk.bf16.mxu1 %vm2630_vm1, %v5931_v29  ;;  %v13089_v29 = vpack.c.bf16 %v5900_v25, %v5899_v27  ;;  %v6454_v27 = vld [vmem:[#allocation3 + $0x132] sm:$0xff] }
 0x393   :  { %v13223_v31 = vpack.c.bf16 %v6455_v17, %v6454_v27 }
 0x398   :  { %10476 = vmatmul.mubr.msk.bf16.gmra.mrb[20].mxu0 %vm2630_vm1, %v13035_v40 }
 0x399   :  { %10612 = vmatmul.mubr.msk.bf16.gmra.mrb[52].mxu1 %vm2630_vm1, %v5932_v45  ;;  %10479 = vmatprep.mubr.msk.bf16.mxu0 %vm2630_vm1, %v13037_v46  ;;  %v5905_v45 = vld [vmem:[#allocation3 + $0x191] sm:$0xff] }
 0x39a   :  { %10615 = vmatprep.mubr.msk.bf16.mxu1 %vm2630_vm1, %v5933_v47  ;;  %v13099_v42 = vpack.c.bf16 %v5906_v36, %v5905_v45  ;;  %v5910_v47 = vld [vmem:[#allocation3 + $0x1b9] sm:$0xff]  ;;  %v6457_v36 = vld [vmem:[#allocation3 + $0x14a] sm:$0xff] }
 0x39b   :  { %v13107_v51 = vpack.c.bf16 %v5910_v47, %v5909_v14  ;;  %v6459_v45 = vld [vmem:[#allocation3 + $0x15a] sm:$0xff]  ;;  %v6456_v47 = vld [vmem:[#allocation3 + $0x142] sm:$0xff] }
 0x39c   :  { %v13237_v14 = vpack.c.bf16 %v6457_v36, %v6456_v47  ;;  %v13239_v37 = vpack.c.bf16 %v6459_v45, %v6458_v52  ;;  %v6465_v47 = vld [vmem:[#allocation3 + $0x18a] sm:$0xff] }
 0x3a0   :  { %10480 = vmatmul.mubr.msk.bf16.gmra.mrb[24].mxu0 %vm2630_vm1, %v13047_v56 }
 0x3a1   :  { %10616 = vmatmul.mubr.msk.bf16.gmra.mrb[56].mxu1 %vm2630_vm1, %v13049_v60  ;;  %10483 = vmatprep.mubr.msk.bf16.mxu0 %vm2630_vm1, %v13051_v61 }
 0x3a2   :  { %10619 = vmatprep.mubr.msk.bf16.mxu1 %vm2630_vm1, %v13045_v55 }
 0x3a8   :  { %10484 = vmatmul.mubr.msk.bf16.gmra.mrb[28].mxu0 %vm2630_vm1, %v13065_v6 }
 0x3a9   :  { %10620 = vmatmul.mubr.msk.bf16.gmra.mrb[60].mxu1 %vm2630_vm1, %v13061_v57 }
 0x3aa   :  { %10623 = vmatprep.mubr.msk.bf16.mxu1 %vm2630_vm1, %v13063_v5 }
 0x3b1   :  { %10624 = vmatmul.mubr.msk.bf16.gmra.mrb[0].mxu1 %vm2630_vm1, %v13073_v11 }
 0x3b2   :  { %10627 = vmatprep.mubr.msk.bf16.mxu1 %vm2630_vm1, %v13075_v15 }
 0x3b9   :  { %10628 = vmatmul.mubr.msk.bf16.gmra.mrb[4].mxu1 %vm2630_vm1, %v13081_v19 }
 0x3ba   :  { %10631 = vmatprep.mubr.msk.bf16.mxu1 %vm2630_vm1, %v13083_v23 }
 0x3c1   :  { %10632 = vmatmul.mubr.msk.bf16.gmra.mrb[8].mxu1 %vm2630_vm1, %v13089_v29 }
 0x3c2   :  { %10635 = vmatprep.mubr.msk.bf16.mxu1 %vm2630_vm1, %v13091_v33 }
 0x3c9   :  { %10636 = vmatmul.mubr.msk.bf16.gmra.mrb[12].mxu1 %vm2630_vm1, %v13097_v39 }
 0x3ca   :  { %10639 = vmatprep.mubr.msk.bf16.mxu1 %vm2630_vm1, %v13099_v42 }
 0x3d1   :  { %10640 = vmatmul.mubr.msk.bf16.gmra.mrb[16].mxu1 %vm2630_vm1, %v13105_v50 }
 0x3d2   :  { %10643 = vmatprep.mubr.msk.bf16.mxu1 %vm2630_vm1, %v13107_v51 }
 0x3d9   :  { %10644 = vmatmul.mubr.msk.bf16.gmra.mrb[20].mxu1 %vm2630_vm1, %v12869_v63  ;;  %v11586_v63 = vld [vmem:[%s13768_s3 + $0x68] sm:$0xff]  }
 0x3da   :  { %10647 = vmatprep.mubr.msk.bf16.mxu1 %vm2630_vm1, %v12880_v21  ;;  %v13138_v21 = vld [vmem:[%s13768_s3 + $0x70] sm:$0xff]  }
 0x3e1   :  { %10648 = vmatmul.mubr.msk.bf16.gmra.mrb[24].mxu1 %vm2630_vm1, %v12882_v24 }
 0x3e2   :  { %10651 = vmatprep.mubr.msk.bf16.mxu1 %vm2630_vm1, %v12890_v30 }
 0x3e9   :  { %10652 = vmatmul.mubr.msk.bf16.gmra.mrb[28].mxu1 %vm2630_vm1, %v13121_v53 }
 0x3ea   :  { %10659 = vmatprep.mubr.msk.bf16.mxu1 %vm2630_vm1, %v12975_v35 }
 0x3f1   :  { %10660 = vmatmul.mubr.msk.bf16.vlgmr.msra.gmra.mrb[32].mxu1 %vm2630_vm1, %v12980_v28 }
 0x3f2   :  { %10724 = vmatpush3.bf16.msra.mxu1 %v12992_v32  ;;  %10663 = vmatprep.mubr.msk.bf16.mxu1 %vm2630_vm1, %v12994_v41 }
 0x3f3   :  { %10725 = vmatprep.subr.bf16.mxu1 %v11586_v63 }
 0x3f6   :  { %10726 = vmatpush3.bf16.msra.mxu1 %v11586_v63 }
 0x3f7   :  { %10791 = vmatprep.subr.bf16.mxu1 %v13138_v21 }
 0x3f9   :  { %10664 = vmatmul.mubr.msk.bf16.gmra.mrb[36].mxu1 %vm2630_vm1, %v12997_v44 }
 0x3fa   :  { %10667 = vmatprep.mubr.msk.bf16.mxu1 %vm2630_vm1, %v13005_v58 }
 0x401   :  { %10668 = vmatmul.mubr.msk.bf16.gmra.mrb[40].mxu1 %vm2630_vm1, %v13007_v59 }
 0x402   :  { %10671 = vmatprep.mubr.msk.bf16.mxu1 %vm2630_vm1, %v13015_v9 }
 0x403   :  { %v13149_v24 = vpop.f32.mrb[32].mxu0 }
 0x404   :  { %13771 = vst [vmem:[#allocation5_spill] sm:$0xff] %v13149_v24  ;;  %v13151_v30 = vpop.f32.mrb[33].mxu0 }
 0x405   :  { %13772 = vst [vmem:[#allocation6_spill] sm:$0xff] %v13151_v30  ;;  %v13153_v35 = vpop.f32.mrb[34].mxu0 }
 0x406   :  { %13773 = vst [vmem:[#allocation7_spill] sm:$0xff] %v13153_v35  ;;  %v13155_v28 = vpop.f32.mrb[35].mxu0  ;;  %v6982_v35 = vld [vmem:[#allocation3 + $0x38] sm:$0xff] }
 0x407   :  { %13774 = vst [vmem:[#allocation8_spill] sm:$0xff] %v13155_v28  ;;  %v6981_v28 = vld [vmem:[#allocation3 + $0x30] sm:$0xff] }
 0x409   :  { %10672 = vmatmul.mubr.msk.bf16.gmra.mrb[44].mxu1 %vm2630_vm1, %v13017_v13 }
 0x40a   :  { %10675 = vmatprep.mubr.msk.bf16.mxu1 %vm2630_vm1, %v13025_v48 }
 0x40b   :  { %v13161_v32 = vpop.f32.mrb[36].mxu0 }
 0x40c   :  { %13775 = vst [vmem:[#allocation9_spill] sm:$0xff] %v13161_v32  ;;  %v13163_v41 = vpop.f32.mrb[37].mxu0 }
 0x40d   :  { %13776 = vst [vmem:[#allocation10_spill] sm:$0xff] %v13163_v41  ;;  %v13165_v44 = vpop.f32.mrb[38].mxu0 }
 0x40e   :  { %13777 = vst [vmem:[#allocation11_spill] sm:$0xff] %v13165_v44  ;;  %v13167_v58 = vpop.f32.mrb[39].mxu0 }
 0x40f   :  { %13778 = vst [vmem:[#allocation12_spill] sm:$0xff] %v13167_v58 }
 0x411   :  { %10676 = vmatmul.mubr.msk.bf16.gmra.mrb[48].mxu1 %vm2630_vm1, %v13027_v4 }
 0x412   :  { %10679 = vmatprep.mubr.msk.bf16.mxu1 %vm2630_vm1, %v13035_v40 }
 0x413   :  { %v13173_v59 = vpop.f32.mrb[40].mxu0 }
 0x414   :  { %13779 = vst [vmem:[#allocation13_spill] sm:$0xff] %v13173_v59  ;;  %v13175_v9 = vpop.f32.mrb[41].mxu0 }
 0x415   :  { %13780 = vst [vmem:[#allocation14_spill] sm:$0xff] %v13175_v9  ;;  %v13177_v13 = vpop.f32.mrb[42].mxu0  ;;  %v6481_v9 = vld [vmem:[#allocation3 + $0x20a] sm:$0xff] }
 0x416   :  { %13781 = vst [vmem:[#allocation15_spill] sm:$0xff] %v13177_v13  ;;  %v13179_v48 = vpop.f32.mrb[43].mxu0 }
 0x417   :  { %13782 = vst [vmem:[#allocation16_spill] sm:$0xff] %v13179_v48 }
 0x419   :  { %10680 = vmatmul.mubr.msk.bf16.gmra.mrb[52].mxu1 %vm2630_vm1, %v13037_v46  ;;  %v6448_v46 = vld [vmem:[#allocation3 + $0x102] sm:$0xff] }
 0x41a   :  { %10683 = vmatprep.mubr.msk.bf16.mxu1 %vm2630_vm1, %v13047_v56  ;;  %v6451_v56 = vld [vmem:[#allocation3 + $0x11a] sm:$0xff]  ;;  %v13205_v7 = vpack.c.bf16 %v6449_v0, %v6448_v46  ;;  %v6461_v46 = vld [vmem:[#allocation3 + $0x16a] sm:$0xff] }
 0x41b   :  { %v13185_v54 = vpop.f32.mrb[44].mxu0  ;;  %v13207_v10 = vpack.c.bf16 %v6451_v56, %v6450_v8  ;;  %v6463_v56 = vld [vmem:[#allocation3 + $0x17a] sm:$0xff]  ;;  %v6460_v8 = vld [vmem:[#allocation3 + $0x162] sm:$0xff] }
 0x41c   :  { %13783 = vst [vmem:[#allocation17_spill] sm:$0xff] %v13185_v54  ;;  %v13187_v4 = vpop.f32.mrb[45].mxu0  ;;  %v13251_v17 = vpack.c.bf16 %v6461_v46, %v6460_v8  ;;  %v13255_v36 = vpack.c.bf16 %v6463_v56, %v6462_v20  ;;  %v6464_v46 = vld [vmem:[#allocation3 + $0x182] sm:$0xff]  ;;  %v6466_v56 = vld [vmem:[#allocation3 + $0x192] sm:$0xff]  ;;  %v6477_v54 = vld [vmem:[#allocation3 + $0x1ea] sm:$0xff] }
 0x41d   :  { %13784 = vst [vmem:[#allocation18_spill] sm:$0xff] %v13187_v4  ;;  %v13189_v22 = vpop.f32.mrb[46].mxu0  ;;  %v6476_v4 = vld [vmem:[#allocation3 + $0x1e2] sm:$0xff] }
 0x41e   :  { %13785 = vst [vmem:[#allocation19_spill] sm:$0xff] %v13189_v22  ;;  %v13191_v40 = vpop.f32.mrb[47].mxu0 }
 0x41f   :  { %13786 = vst [vmem:[#allocation20_spill] sm:$0xff] %v13191_v40  ;;  %v6479_v40 = vld [vmem:[#allocation3 + $0x1fa] sm:$0xff] }
 0x421   :  { %10684 = vmatmul.mubr.msk.bf16.gmra.mrb[56].mxu1 %vm2630_vm1, %v13051_v61 }
 0x422   :  { %10687 = vmatprep.mubr.msk.bf16.mxu1 %vm2630_vm1, %v13065_v6 }
 0x423   :  { %v13197_v62 = vpop.f32.mrb[48].mxu0 }
 0x424   :  { %13787 = vst [vmem:[#allocation21_spill] sm:$0xff] %v13197_v62  ;;  %v13199_v1 = vpop.f32.mrb[49].mxu0  ;;  %v6478_v62 = vld [vmem:[#allocation3 + $0x1f2] sm:$0xff] }
 0x425   :  { %13788 = vst [vmem:[#allocation22_spill] sm:$0xff] %v13199_v1  ;;  %v13201_v2 = vpop.f32.mrb[50].mxu0  ;;  %v6472_v1 = vld [vmem:[#allocation3 + $0x1c2] sm:$0xff] }
 0x426   :  { %13789 = vst [vmem:[#allocation23_spill] sm:$0xff] %v13201_v2  ;;  %v13203_v3 = vpop.f32.mrb[51].mxu0 }
 0x427   :  { %13790 = vst [vmem:[#allocation24_spill] sm:$0xff] %v13203_v3  ;;  %v6475_v3 = vld [vmem:[#allocation3 + $0x1da] sm:$0xff] }
 0x429   :  { %10688 = vmatmul.mubr.msk.bf16.gmra.mrb[60].mxu1 %vm2630_vm1, %v13205_v7 }
 0x42a   :  { %10691 = vmatprep.mubr.msk.bf16.mxu1 %vm2630_vm1, %v13207_v10 }
 0x42b   :  { %v13213_v61 = vpop.f32.mrb[52].mxu0 }
 0x42c   :  { %13791 = vst [vmem:[#allocation25_spill] sm:$0xff] %v13213_v61  ;;  %v13215_v16 = vpop.f32.mrb[53].mxu0 }
 0x42d   :  { %13792 = vst [vmem:[#allocation26_spill] sm:$0xff] %v13215_v16  ;;  %v13217_v18 = vpop.f32.mrb[54].mxu0  ;;  %v6473_v16 = vld [vmem:[#allocation3 + $0x1ca] sm:$0xff] }
 0x42e   :  { %13793 = vst [vmem:[#allocation27_spill] sm:$0xff] %v13217_v18  ;;  %v13219_v25 = vpop.f32.mrb[55].mxu0 }
 0x42f   :  { %13794 = vst [vmem:[#allocation28_spill] sm:$0xff] %v13219_v25  ;;  %v6468_v25 = vld [vmem:[#allocation3 + $0x1a2] sm:$0xff] }
 0x431   :  { %10692 = vmatmul.mubr.msk.bf16.gmra.mrb[0].mxu1 %vm2630_vm1, %v13221_v26 }
 0x432   :  { %10695 = vmatprep.mubr.msk.bf16.mxu1 %vm2630_vm1, %v13223_v31 }
 0x433   :  { %v13229_v34 = vpop.f32.mrb[56].mxu0 }
 0x434   :  { %13795 = vst [vmem:[#allocation29_spill] sm:$0xff] %v13229_v34  ;;  %v13231_v38 = vpop.f32.mrb[57].mxu0 }
 0x435   :  { %13796 = vst [vmem:[#allocation30_spill] sm:$0xff] %v13231_v38  ;;  %v13233_v43 = vpop.f32.mrb[58].mxu0  ;;  %v6471_v38 = vld [vmem:[#allocation3 + $0x1ba] sm:$0xff] }
 0x436   :  { %13797 = vst [vmem:[#allocation31_spill] sm:$0xff] %v13233_v43  ;;  %v13235_v49 = vpop.f32.mrb[59].mxu0 }
 0x437   :  { %13798 = vst [vmem:[#allocation32_spill] sm:$0xff] %v13235_v49  ;;  %v6469_v49 = vld [vmem:[#allocation3 + $0x1aa] sm:$0xff] }
 0x439   :  { %10696 = vmatmul.mubr.msk.bf16.gmra.mrb[4].mxu1 %vm2630_vm1, %v13237_v14 }
 0x43a   :  { %10699 = vmatprep.mubr.msk.bf16.mxu1 %vm2630_vm1, %v13239_v37 }
 0x43b   :  { %v13245_v63 = vpop.f32.mrb[60].mxu0 }
 0x43c   :  { %13799 = vst [vmem:[#allocation33_spill] sm:$0xff] %v13245_v63  ;;  %v13247_v0 = vpop.f32.mrb[61].mxu0 }
 0x43d   :  { %13800 = vst [vmem:[#allocation34_spill] sm:$0xff] %v13247_v0  ;;  %v13249_v12 = vpop.f32.mrb[62].mxu0  ;;  %v6467_v0 = vld [vmem:[#allocation3 + $0x19a] sm:$0xff] }
 0x43e   :  { %13801 = vst [vmem:[#allocation35_spill] sm:$0xff] %v13249_v12  ;;  %v13253_v27 = vpop.f32.mrb[63].mxu0  ;;  %v13271_v20 = vpack.c.bf16 %v6467_v0, %v6466_v56  ;;  %v6470_v0 = vld [vmem:[#allocation3 + $0x1b2] sm:$0xff] }
 0x43f   :  { %13802 = vst [vmem:[#allocation36_spill] sm:$0xff] %v13253_v27  ;;  %v13269_v27 = vpack.c.bf16 %v6465_v47, %v6464_v46  ;;  %v13285_v46 = vpack.c.bf16 %v6469_v49, %v6468_v25  ;;  %v13287_v56 = vpack.c.bf16 %v6471_v38, %v6470_v0  ;;  %v13301_v49 = vpack.c.bf16 %v6473_v16, %v6472_v1  ;;  %v6474_v38 = vld [vmem:[#allocation3 + $0x1d2] sm:$0xff] }
 0x440   :  { %v13303_v0 = vpack.c.bf16 %v6475_v3, %v6474_v38  ;;  %v13315_v1 = vpack.c.bf16 %v6479_v40, %v6478_v62  ;;  %v13319_v16 = vpack.c.bf16 %v6477_v54, %v6476_v4  ;;  %v6480_v38 = vld [vmem:[#allocation3 + $0x202] sm:$0xff] }
 0x441   :  { %10700 = vmatmul.mubr.msk.bf16.gmra.mrb[8].mxu1 %vm2630_vm1, %v13251_v17  ;;  %v13329_v44 = vpack.c.bf16 %v6481_v9, %v6480_v38  ;;  %v6979_v40 = vld [vmem:[#allocation3 + $0x20] sm:$0xff]  ;;  %v6980_v62 = vld [vmem:[#allocation3 + $0x28] sm:$0xff] }
 0x442   :  { %10703 = vmatprep.mubr.msk.bf16.mxu1 %vm2630_vm1, %v13255_v36  ;;  %v7043_v4 = vpack.c.bf16 %v6980_v62, %v6979_v40  ;;  %v6983_v9 = vld [vmem:[#allocation3 + $0x40] sm:$0xff]  ;;  %v6984_v38 = vld [vmem:[#allocation3 + $0x48] sm:$0xff]  ;;  %v11588_v40 = vld [vmem:[%s13768_s3 + $0x78] sm:$0xff]  }
 0x443   :  { %v13261_v45 = vpop.f32.mrb[0].mxu0  ;;  %v7045_v62 = vpack.c.bf16 %v6984_v38, %v6983_v9  ;;  %v6988_v9 = vld [vmem:[#allocation3 + $0x68] sm:$0xff] }
 0x444   :  { %v13263_v52 = vpop.f32.mrb[1].mxu0 }
 0x445   :  { %v13265_v12 = vpop.f32.mrb[2].mxu0 }
 0x446   :  { %v13267_v8 = vpop.f32.mrb[3].mxu0 }
 0x449   :  { %10704 = vmatmul.mubr.msk.bf16.gmra.mrb[12].mxu1 %vm2630_vm1, %v13269_v27 }
 0x44a   :  { %10707 = vmatprep.mubr.msk.bf16.mxu1 %vm2630_vm1, %v13271_v20 }
 0x44b   :  { %v13277_v63 = vpop.f32.mrb[4].mxu0 }
 0x44c   :  { %v13279_v43 = vpop.f32.mrb[5].mxu0 }
 0x44d   :  { %v13281_v34 = vpop.f32.mrb[6].mxu0 }
 0x44e   :  { %v13283_v47 = vpop.f32.mrb[7].mxu0 }
 0x451   :  { %10708 = vmatmul.mubr.msk.bf16.gmra.mrb[16].mxu1 %vm2630_vm1, %v13285_v46 }
 0x452   :  { %10711 = vmatprep.mubr.msk.bf16.mxu1 %vm2630_vm1, %v13287_v56 }
 0x453   :  { %v13293_v18 = vpop.f32.mrb[8].mxu0 }
 0x454   :  { %v13295_v61 = vpop.f32.mrb[9].mxu0 }
 0x455   :  { %v13297_v2 = vpop.f32.mrb[10].mxu0 }
 0x456   :  { %v13299_v25 = vpop.f32.mrb[11].mxu0 }
 0x459   :  { %10712 = vmatmul.mubr.msk.bf16.gmra.mrb[20].mxu1 %vm2630_vm1, %v13301_v49 }
 0x45a   :  { %10715 = vmatprep.mubr.msk.bf16.mxu1 %vm2630_vm1, %v13303_v0 }
 0x45b   :  { %v13309_v22 = vpop.f32.mrb[12].mxu0 }
 0x45c   :  { %v13311_v48 = vpop.f32.mrb[13].mxu0 }
 0x45d   :  { %v13313_v13 = vpop.f32.mrb[14].mxu0 }
 0x45e   :  { %13803 = vst [vmem:[#allocation37_spill] sm:$0xff] %v13313_v13  ;;  %v13317_v3 = vpop.f32.mrb[15].mxu0  ;;  %v7000_v13 = vld [vmem:[#allocation3 + $0xc8] sm:$0xff] }
 0x45f   :  { %13804 = vst [vmem:[#allocation38_spill] sm:$0xff] %v13317_v3 }
 0x461   :  { %10716 = vmatmul.mubr.msk.bf16.gmra.mrb[24].mxu1 %vm2630_vm1, %v13319_v16 }
 0x462   :  { %10719 = vmatprep.mubr.msk.bf16.mxu1 %vm2630_vm1, %v13315_v1 }
 0x463   :  { %v13325_v59 = vpop.f32.mrb[16].mxu0 }
 0x464   :  { %13805 = vst [vmem:[#allocation39_spill] sm:$0xff] %v13325_v59  ;;  %v13327_v58 = vpop.f32.mrb[17].mxu0  ;;  %v6992_v59 = vld [vmem:[#allocation3 + $0x88] sm:$0xff] }
 0x465   :  { %13806 = vst [vmem:[#allocation40_spill] sm:$0xff] %v13327_v58  ;;  %v13331_v41 = vpop.f32.mrb[18].mxu0 }
 0x466   :  { %13807 = vst [vmem:[#allocation41_spill] sm:$0xff] %v13331_v41  ;;  %v13333_v54 = vpop.f32.mrb[19].mxu0  ;;  %v7044_v41 = vpack.c.bf16 %v6982_v35, %v6981_v28  ;;  %v6985_v35 = vld [vmem:[#allocation3 + $0x50] sm:$0xff]  ;;  %v6986_v28 = vld [vmem:[#allocation3 + $0x58] sm:$0xff] }
 0x467   :  { %13808 = vst [vmem:[#allocation42_spill] sm:$0xff] %v13333_v54  ;;  %v6991_v54 = vld [vmem:[#allocation3 + $0x80] sm:$0xff] }
 0x468   :  { %v7049_v3 = vpack.c.bf16 %v6992_v59, %v6991_v54  ;;  %v7002_v59 = vld [vmem:[#allocation3 + $0xd8] sm:$0xff]  ;;  %v7004_v54 = vld [vmem:[#allocation3 + $0xe8] sm:$0xff] }
 0x469   :  { %10720 = vmatmul.mubr.msk.bf16.gmra.mrb[28].mxu1 %vm2630_vm1, %v13329_v44 }
 0x46a   :  { %10727 = vmatprep.mubr.msk.bf16.mxu1 %vm2630_vm1, %v7043_v4  ;;  %v13355_v4 = vld [vmem:[%s13768_s3 + $0x80] sm:$0xff]  }
 0x46b   :  { %v13338_v32 = vpop.f32.mrb[20].mxu0 }
 0x46c   :  { %13809 = vst [vmem:[#allocation43_spill] sm:$0xff] %v13338_v32  ;;  %v13340_v30 = vpop.f32.mrb[21].mxu0  ;;  %v6990_v32 = vld [vmem:[#allocation3 + $0x78] sm:$0xff] }
 0x46d   :  { %13810 = vst [vmem:[#allocation44_spill] sm:$0xff] %v13340_v30  ;;  %v13342_v24 = vpop.f32.mrb[22].mxu0  ;;  %v6987_v30 = vld [vmem:[#allocation3 + $0x60] sm:$0xff] }
 0x46e   :  { %13811 = vst [vmem:[#allocation45_spill] sm:$0xff] %v13342_v24  ;;  %v13344_v58 = vpop.f32.mrb[23].mxu0 }
 0x46f   :  { %13812 = vst [vmem:[#allocation46_spill] sm:$0xff] %v13344_v58 }
 0x471   :  { %10728 = vmatmul.mubr.msk.bf16.vlgmr.msra.gmra.mrb[32].mxu1 %vm2630_vm1, %v7044_v41  ;;  %v7046_v41 = vpack.c.bf16 %v6986_v28, %v6985_v35  ;;  %v6995_v35 = vld [vmem:[#allocation3 + $0xa0] sm:$0xff]  ;;  %v6996_v28 = vld [vmem:[#allocation3 + $0xa8] sm:$0xff] }
 0x472   :  { %10792 = vmatpush3.bf16.msra.mxu1 %v13138_v21  ;;  %10731 = vmatprep.mubr.msk.bf16.mxu1 %vm2630_vm1, %v7045_v62  ;;  %v7047_v62 = vpack.c.bf16 %v6988_v9, %v6987_v30  ;;  %v7051_v30 = vpack.c.bf16 %v6996_v28, %v6995_v35  ;;  %v6997_v9 = vld [vmem:[#allocation3 + $0xb0] sm:$0xff]  ;;  %v7006_v35 = vld [vmem:[#allocation3 + $0xf8] sm:$0xff]  ;;  %v7007_v28 = vld [vmem:[#allocation3 + $0x100] sm:$0xff] }
 0x473   :  { %10793 = vmatprep.subr.bf16.mxu1 %v11588_v40  ;;  %v13357_v24 = vpop.f32.mrb[24].mxu0 }
 0x474   :  { %13813 = vst [vmem:[#allocation47_spill] sm:$0xff] %v13357_v24  ;;  %v13359_v58 = vpop.f32.mrb[25].mxu0  ;;  %v6989_v24 = vld [vmem:[#allocation3 + $0x70] sm:$0xff] }
 0x475   :  { %13814 = vst [vmem:[#allocation48_spill] sm:$0xff] %v13359_v58  ;;  %v13361_v38 = vpop.f32.mrb[26].mxu0  ;;  %v7048_v58 = vpack.c.bf16 %v6990_v32, %v6989_v24 }
 0x476   :  { %13815 = vst [vmem:[#allocation49_spill] sm:$0xff] %v13361_v38  ;;  %10794 = vmatpush3.bf16.msra.mxu1 %v11588_v40  ;;  %v13363_v21 = vpop.f32.mrb[27].mxu0  ;;  %v6993_v40 = vld [vmem:[#allocation3 + $0x90] sm:$0xff] }
 0x477   :  { %13816 = vst [vmem:[#allocation50_spill] sm:$0xff] %v13363_v21  ;;  %10859 = vmatprep.subr.bf16.mxu1 %v13355_v4  ;;  %v6994_v21 = vld [vmem:[#allocation3 + $0x98] sm:$0xff] }
 0x478   :  { %v7050_v38 = vpack.c.bf16 %v6994_v21, %v6993_v40 }
 0x479   :  { %10732 = vmatmul.mubr.msk.bf16.gmra.mrb[36].mxu1 %vm2630_vm1, %v7046_v41  ;;  %v6998_v41 = vld [vmem:[#allocation3 + $0xb8] sm:$0xff] }
 0x47a   :  { %10735 = vmatprep.mubr.msk.bf16.mxu1 %vm2630_vm1, %v7047_v62  ;;  %v6999_v62 = vld [vmem:[#allocation3 + $0xc0] sm:$0xff]  ;;  %v7052_v24 = vpack.c.bf16 %v6998_v41, %v6997_v9  ;;  %v7009_v41 = vld [vmem:[#allocation3 + $0x110] sm:$0xff] }
 0x47b   :  { %v7053_v32 = vpack.c.bf16 %v7000_v13, %v6999_v62  ;;  %v7010_v62 = vld [vmem:[#allocation3 + $0x118] sm:$0xff] }
 0x481   :  { %10736 = vmatmul.mubr.msk.bf16.gmra.mrb[40].mxu1 %vm2630_vm1, %v7048_v58  ;;  %v7001_v58 = vld [vmem:[#allocation3 + $0xd0] sm:$0xff] }
 0x482   :  { %10739 = vmatprep.mubr.msk.bf16.mxu1 %vm2630_vm1, %v7049_v3  ;;  %v7003_v3 = vld [vmem:[#allocation3 + $0xe0] sm:$0xff]  ;;  %v7054_v21 = vpack.c.bf16 %v7002_v59, %v7001_v58  ;;  %v7058_v58 = vpack.c.bf16 %v7010_v62, %v7009_v41 }
 0x483   :  { %v7055_v40 = vpack.c.bf16 %v7004_v54, %v7003_v3  ;;  %v7013_v3 = vld [vmem:[#allocation3 + $0x130] sm:$0xff]  ;;  %v7014_v54 = vld [vmem:[#allocation3 + $0x138] sm:$0xff] }
 0x489   :  { %10740 = vmatmul.mubr.msk.bf16.gmra.mrb[44].mxu1 %vm2630_vm1, %v7050_v38  ;;  %v7005_v38 = vld [vmem:[#allocation3 + $0xf0] sm:$0xff] }
 0x48a   :  { %10743 = vmatprep.mubr.msk.bf16.mxu1 %vm2630_vm1, %v7051_v30  ;;  %v7008_v30 = vld [vmem:[#allocation3 + $0x108] sm:$0xff]  ;;  %v7056_v9 = vpack.c.bf16 %v7006_v35, %v7005_v38  ;;  %v7060_v38 = vpack.c.bf16 %v7014_v54, %v7013_v3 }
 0x48b   :  { %v7057_v13 = vpack.c.bf16 %v7008_v30, %v7007_v28  ;;  %v7017_v28 = vld [vmem:[#allocation3 + $0x150] sm:$0xff]  ;;  %v7018_v30 = vld [vmem:[#allocation3 + $0x158] sm:$0xff] }
 0x48c   :  { %v7062_v41 = vpack.c.bf16 %v7018_v30, %v7017_v28 }
 0x491   :  { %10744 = vmatmul.mubr.msk.bf16.gmra.mrb[48].mxu1 %vm2630_vm1, %v7052_v24  ;;  %v7011_v24 = vld [vmem:[#allocation3 + $0x120] sm:$0xff] }
 0x492   :  { %10747 = vmatprep.mubr.msk.bf16.mxu1 %vm2630_vm1, %v7053_v32  ;;  %v7012_v32 = vld [vmem:[#allocation3 + $0x128] sm:$0xff] }
 0x493   :  { %v7059_v59 = vpack.c.bf16 %v7012_v32, %v7011_v24  ;;  %v7021_v24 = vld [vmem:[#allocation3 + $0x170] sm:$0xff]  ;;  %v7022_v32 = vld [vmem:[#allocation3 + $0x178] sm:$0xff] }
 0x494   :  { %v7064_v3 = vpack.c.bf16 %v7022_v32, %v7021_v24 }
 0x499   :  { %10748 = vmatmul.mubr.msk.bf16.gmra.mrb[52].mxu1 %vm2630_vm1, %v7054_v21  ;;  %v7015_v21 = vld [vmem:[#allocation3 + $0x140] sm:$0xff] }
 0x49a   :  { %10751 = vmatprep.mubr.msk.bf16.mxu1 %vm2630_vm1, %v7055_v40  ;;  %v7016_v40 = vld [vmem:[#allocation3 + $0x148] sm:$0xff] }
 0x49b   :  { %v7061_v35 = vpack.c.bf16 %v7016_v40, %v7015_v21  ;;  %v7025_v21 = vld [vmem:[#allocation3 + $0x190] sm:$0xff]  ;;  %v7026_v40 = vld [vmem:[#allocation3 + $0x198] sm:$0xff] }
 0x49c   :  { %v7066_v28 = vpack.c.bf16 %v7026_v40, %v7025_v21 }
 0x4a1   :  { %10752 = vmatmul.mubr.msk.bf16.gmra.mrb[56].mxu1 %vm2630_vm1, %v7056_v9  ;;  %v7019_v9 = vld [vmem:[#allocation3 + $0x160] sm:$0xff] }
 0x4a2   :  { %10755 = vmatprep.mubr.msk.bf16.mxu1 %vm2630_vm1, %v7057_v13  ;;  %v7020_v13 = vld [vmem:[#allocation3 + $0x168] sm:$0xff] }
 0x4a3   :  { %v7063_v62 = vpack.c.bf16 %v7020_v13, %v7019_v9  ;;  %v7029_v9 = vld [vmem:[#allocation3 + $0x1b0] sm:$0xff]  ;;  %v7030_v13 = vld [vmem:[#allocation3 + $0x1b8] sm:$0xff] }
 0x4a4   :  { %v7068_v24 = vpack.c.bf16 %v7030_v13, %v7029_v9 }
 0x4a9   :  { %10756 = vmatmul.mubr.msk.bf16.gmra.mrb[60].mxu1 %vm2630_vm1, %v7058_v58  ;;  %v7023_v58 = vld [vmem:[#allocation3 + $0x180] sm:$0xff] }
 0x4aa   :  { %10759 = vmatprep.mubr.msk.bf16.mxu1 %vm2630_vm1, %v7059_v59  ;;  %v7024_v59 = vld [vmem:[#allocation3 + $0x188] sm:$0xff] }
 0x4ab   :  { %v7065_v54 = vpack.c.bf16 %v7024_v59, %v7023_v58  ;;  %v7033_v58 = vld [vmem:[#allocation3 + $0x1d0] sm:$0xff]  ;;  %v7034_v59 = vld [vmem:[#allocation3 + $0x1d8] sm:$0xff] }
 0x4ac   :  { %v7070_v21 = vpack.c.bf16 %v7034_v59, %v7033_v58  ;;  %v7540_v58 = vld [vmem:[#allocation3 + $0x21] sm:$0xff] }
 0x4b1   :  { %10760 = vmatmul.mubr.msk.bf16.gmra.mrb[0].mxu1 %vm2630_vm1, %v7060_v38  ;;  %v7027_v38 = vld [vmem:[#allocation3 + $0x1a0] sm:$0xff] }
 0x4b2   :  { %10763 = vmatprep.mubr.msk.bf16.mxu1 %vm2630_vm1, %v7061_v35  ;;  %v7028_v35 = vld [vmem:[#allocation3 + $0x1a8] sm:$0xff] }
 0x4b3   :  { %v7067_v30 = vpack.c.bf16 %v7028_v35, %v7027_v38  ;;  %v7037_v38 = vld [vmem:[#allocation3 + $0x1f0] sm:$0xff]  ;;  %v7038_v35 = vld [vmem:[#allocation3 + $0x1f8] sm:$0xff] }
 0x4b4   :  { %v7072_v9 = vpack.c.bf16 %v7038_v35, %v7037_v38  ;;  %v7544_v38 = vld [vmem:[#allocation3 + $0x41] sm:$0xff] }
 0x4b5   :  { %v11590_v35 = vld [vmem:[%s13768_s3 + $0x88] sm:$0xff]  }
 0x4b9   :  { %10764 = vmatmul.mubr.msk.bf16.gmra.mrb[4].mxu1 %vm2630_vm1, %v7062_v41  ;;  %v7031_v41 = vld [vmem:[#allocation3 + $0x1c0] sm:$0xff] }
 0x4ba   :  { %10767 = vmatprep.mubr.msk.bf16.mxu1 %vm2630_vm1, %v7063_v62  ;;  %v7032_v62 = vld [vmem:[#allocation3 + $0x1c8] sm:$0xff] }
 0x4bb   :  { %v7069_v32 = vpack.c.bf16 %v7032_v62, %v7031_v41  ;;  %v7041_v41 = vld [vmem:[#allocation3 + $0x210] sm:$0xff]  ;;  %v7042_v62 = vld [vmem:[#allocation3 + $0x218] sm:$0xff] }
 0x4c1   :  { %10768 = vmatmul.mubr.msk.bf16.gmra.mrb[8].mxu1 %vm2630_vm1, %v7064_v3  ;;  %v7035_v3 = vld [vmem:[#allocation3 + $0x1e0] sm:$0xff] }
 0x4c2   :  { %10771 = vmatprep.mubr.msk.bf16.mxu1 %vm2630_vm1, %v7065_v54  ;;  %v7036_v54 = vld [vmem:[#allocation3 + $0x1e8] sm:$0xff] }
 0x4c3   :  { %v7071_v40 = vpack.c.bf16 %v7036_v54, %v7035_v3  ;;  %v7543_v3 = vld [vmem:[#allocation3 + $0x39] sm:$0xff]  ;;  %v7545_v54 = vld [vmem:[#allocation3 + $0x49] sm:$0xff] }
 0x4c9   :  { %10772 = vmatmul.mubr.msk.bf16.gmra.mrb[12].mxu1 %vm2630_vm1, %v7066_v28  ;;  %v7039_v28 = vld [vmem:[#allocation3 + $0x200] sm:$0xff] }
 0x4ca   :  { %10775 = vmatprep.mubr.msk.bf16.mxu1 %vm2630_vm1, %v7067_v30  ;;  %v7040_v30 = vld [vmem:[#allocation3 + $0x208] sm:$0xff] }
 0x4cb   :  { %v7073_v13 = vpack.c.bf16 %v7040_v30, %v7039_v28  ;;  %v7606_v28 = vpack.c.bf16 %v7545_v54, %v7544_v38  ;;  %v7547_v30 = vld [vmem:[#allocation3 + $0x59] sm:$0xff]  ;;  %v7552_v54 = vld [vmem:[#allocation3 + $0x81] sm:$0xff]  ;;  %v7554_v38 = vld [vmem:[#allocation3 + $0x91] sm:$0xff] }
 0x4d1   :  { %10776 = vmatmul.mubr.msk.bf16.gmra.mrb[16].mxu1 %vm2630_vm1, %v7068_v24  ;;  %v7074_v24 = vpack.c.bf16 %v7042_v62, %v7041_v41  ;;  %v7548_v62 = vld [vmem:[#allocation3 + $0x61] sm:$0xff] }
 0x4d2   :  { %10779 = vmatprep.mubr.msk.bf16.mxu1 %vm2630_vm1, %v7069_v32  ;;  %v7541_v32 = vld [vmem:[#allocation3 + $0x29] sm:$0xff] }
 0x4d3   :  { %v7604_v59 = vpack.c.bf16 %v7541_v32, %v7540_v58  ;;  %v7551_v32 = vld [vmem:[#allocation3 + $0x79] sm:$0xff]  ;;  %v7553_v58 = vld [vmem:[#allocation3 + $0x89] sm:$0xff] }
 0x4d9   :  { %10780 = vmatmul.mubr.msk.bf16.gmra.mrb[20].mxu1 %vm2630_vm1, %v7070_v21  ;;  %v7542_v21 = vld [vmem:[#allocation3 + $0x31] sm:$0xff] }
 0x4da   :  { %10783 = vmatprep.mubr.msk.bf16.mxu1 %vm2630_vm1, %v7071_v40  ;;  %v7605_v40 = vpack.c.bf16 %v7543_v3, %v7542_v21  ;;  %v7555_v21 = vld [vmem:[#allocation3 + $0x99] sm:$0xff] }
 0x4e1   :  { %10784 = vmatmul.mubr.msk.bf16.gmra.mrb[24].mxu1 %vm2630_vm1, %v7072_v9  ;;  %v7549_v9 = vld [vmem:[#allocation3 + $0x69] sm:$0xff] }
 0x4e2   :  { %10787 = vmatprep.mubr.msk.bf16.mxu1 %vm2630_vm1, %v7073_v13  ;;  %v7546_v13 = vld [vmem:[#allocation3 + $0x51] sm:$0xff] }
 0x4e3   :  { %v7607_v41 = vpack.c.bf16 %v7547_v30, %v7546_v13  ;;  %v7561_v13 = vld [vmem:[#allocation3 + $0xc9] sm:$0xff] }
 0x4e9   :  { %10788 = vmatmul.mubr.msk.bf16.gmra.mrb[28].mxu1 %vm2630_vm1, %v7074_v24  ;;  %v7608_v24 = vpack.c.bf16 %v7549_v9, %v7548_v62  ;;  %v7559_v9 = vld [vmem:[#allocation3 + $0xb9] sm:$0xff] }
 0x4ea   :  { %10795 = vmatprep.mubr.msk.bf16.mxu1 %vm2630_vm1, %v7604_v59  ;;  %v7550_v59 = vld [vmem:[#allocation3 + $0x71] sm:$0xff] }
 0x4eb   :  { %v7609_v3 = vpack.c.bf16 %v7551_v32, %v7550_v59  ;;  %v7562_v59 = vld [vmem:[#allocation3 + $0xd1] sm:$0xff] }
 0x4f1   :  { %10796 = vmatmul.mubr.msk.bf16.vlgmr.msra.gmra.mrb[32].mxu1 %vm2630_vm1, %v7605_v40  ;;  %v7557_v40 = vld [vmem:[#allocation3 + $0xa9] sm:$0xff] }
 0x4f2   :  { %10860 = vmatpush3.bf16.msra.mxu1 %v13355_v4  ;;  %10799 = vmatprep.mubr.msk.bf16.mxu1 %vm2630_vm1, %v7606_v28  ;;  %v7610_v4 = vpack.c.bf16 %v7553_v58, %v7552_v54  ;;  %v7556_v28 = vld [vmem:[#allocation3 + $0xa1] sm:$0xff]  ;;  %v7563_v58 = vld [vmem:[#allocation3 + $0xd9] sm:$0xff]  ;;  %v13425_v54 = vpop.f32.mrb[28].mxu0 }
 0x4f3   :  { %10861 = vmatprep.subr.bf16.mxu1 %v11590_v35  ;;  %v7612_v30 = vpack.c.bf16 %v7557_v40, %v7556_v28  ;;  %v7603_v40 = vld [vmem:[#allocation3 + $0x219] sm:$0xff]  ;;  %v8101_v28 = vld [vmem:[#allocation3 + $0x22] sm:$0xff] }
 0x4f6   :  { %10862 = vmatpush3.bf16.msra.mxu1 %v11590_v35  ;;  %v7611_v35 = vpack.c.bf16 %v7555_v21, %v7554_v38 }
 0x4f9   :  { %10800 = vmatmul.mubr.msk.bf16.gmra.mrb[36].mxu1 %vm2630_vm1, %v7607_v41  ;;  %v7558_v41 = vld [vmem:[#allocation3 + $0xb1] sm:$0xff] }
 0x4fa   :  { %10803 = vmatprep.mubr.msk.bf16.mxu1 %vm2630_vm1, %v7608_v24  ;;  %v7613_v62 = vpack.c.bf16 %v7559_v9, %v7558_v41  ;;  %v7560_v24 = vld [vmem:[#allocation3 + $0xc1] sm:$0xff]  ;;  %v8103_v41 = vld [vmem:[#allocation3 + $0x32] sm:$0xff] }
 0x4fb   :  { %v7614_v32 = vpack.c.bf16 %v7561_v13, %v7560_v24  ;;  %v8104_v9 = vld [vmem:[#allocation3 + $0x3a] sm:$0xff]  ;;  %v8106_v13 = vld [vmem:[#allocation3 + $0x4a] sm:$0xff]  ;;  %v8105_v24 = vld [vmem:[#allocation3 + $0x42] sm:$0xff] }
 0x501   :  { %10804 = vmatmul.mubr.msk.bf16.gmra.mrb[40].mxu1 %vm2630_vm1, %v7609_v3  ;;  %v7615_v3 = vpack.c.bf16 %v7563_v58, %v7562_v59  ;;  %v8110_v58 = vld [vmem:[#allocation3 + $0x6a] sm:$0xff]  ;;  %v8107_v59 = vld [vmem:[#allocation3 + $0x52] sm:$0xff] }
 0x502   :  { %10807 = vmatprep.mubr.msk.bf16.mxu1 %vm2630_vm1, %v7610_v4 }
 0x509   :  { %10808 = vmatmul.mubr.msk.bf16.gmra.mrb[44].mxu1 %vm2630_vm1, %v7611_v35  ;;  %v8102_v35 = vld [vmem:[#allocation3 + $0x2a] sm:$0xff] }
 0x50a   :  { %10811 = vmatprep.mubr.msk.bf16.mxu1 %vm2630_vm1, %v7612_v30  ;;  %v8165_v30 = vpack.c.bf16 %v8102_v35, %v8101_v28  ;;  %v8122_v35 = vld [vmem:[#allocation3 + $0xca] sm:$0xff]  ;;  %v8119_v28 = vld [vmem:[#allocation3 + $0xb2] sm:$0xff] }
 0x511   :  { %10812 = vmatmul.mubr.msk.bf16.gmra.mrb[48].mxu1 %vm2630_vm1, %v7613_v62  ;;  %v8166_v62 = vpack.c.bf16 %v8104_v9, %v8103_v41  ;;  %v8121_v9 = vld [vmem:[#allocation3 + $0xc2] sm:$0xff]  ;;  %v8124_v41 = vld [vmem:[#allocation3 + $0xda] sm:$0xff] }
 0x512   :  { %10815 = vmatprep.mubr.msk.bf16.mxu1 %vm2630_vm1, %v7614_v32  ;;  %v8167_v32 = vpack.c.bf16 %v8106_v13, %v8105_v24  ;;  %v8175_v13 = vpack.c.bf16 %v8122_v35, %v8121_v9  ;;  %v8126_v24 = vld [vmem:[#allocation3 + $0xea] sm:$0xff] }
 0x519   :  { %10816 = vmatmul.mubr.msk.bf16.gmra.mrb[52].mxu1 %vm2630_vm1, %v7615_v3 }
 0x51a   :  { %10819 = vmatprep.mubr.msk.bf16.mxu1 %vm2630_vm1, %v13049_v60 }
 0x521   :  { %10820 = vmatmul.mubr.msk.bf16.gmra.mrb[56].mxu1 %vm2630_vm1, %v13045_v55  ;;  %v13429_v55 = vpop.f32.mrb[29].mxu0 }
 0x522   :  { %10823 = vmatprep.mubr.msk.bf16.mxu1 %vm2630_vm1, %v13061_v57  ;;  %v13433_v60 = vpop.f32.mrb[30].mxu0 }
 0x523   :  { %v13435_v57 = vpop.f32.mrb[31].mxu0 }
 0x529   :  { %10824 = vmatmul.mubr.msk.bf16.gmra.mrb[60].mxu1 %vm2630_vm1, %v13063_v5  ;;  %v7593_v5 = vld [vmem:[#allocation3 + $0x1c9] sm:$0xff] }
 0x52a   :  { %10827 = vmatprep.mubr.msk.bf16.mxu1 %vm2630_vm1, %v13073_v11  ;;  %v7592_v11 = vld [vmem:[#allocation3 + $0x1c1] sm:$0xff] }
 0x531   :  { %10828 = vmatmul.mubr.msk.bf16.gmra.mrb[0].mxu1 %vm2630_vm1, %v13075_v15  ;;  %v7630_v15 = vpack.c.bf16 %v7593_v5, %v7592_v11  ;;  %v8109_v5 = vld [vmem:[#allocation3 + $0x62] sm:$0xff] }
 0x532   :  { %10831 = vmatprep.mubr.msk.bf16.mxu1 %vm2630_vm1, %v13081_v19  ;;  %v7595_v19 = vld [vmem:[#allocation3 + $0x1d9] sm:$0xff]  ;;  %v8169_v11 = vpack.c.bf16 %v8110_v58, %v8109_v5 }
 0x539   :  { %10832 = vmatmul.mubr.msk.bf16.gmra.mrb[4].mxu1 %vm2630_vm1, %v13083_v23  ;;  %v7596_v23 = vld [vmem:[#allocation3 + $0x1e1] sm:$0xff] }
 0x53a   :  { %10835 = vmatprep.mubr.msk.bf16.mxu1 %vm2630_vm1, %v13089_v29  ;;  %v7597_v29 = vld [vmem:[#allocation3 + $0x1e9] sm:$0xff] }
 0x541   :  { %10836 = vmatmul.mubr.msk.bf16.gmra.mrb[8].mxu1 %vm2630_vm1, %v13091_v33  ;;  %v7594_v33 = vld [vmem:[#allocation3 + $0x1d1] sm:$0xff] }
 0x542   :  { %10839 = vmatprep.mubr.msk.bf16.mxu1 %vm2630_vm1, %v13097_v39  ;;  %v7631_v4 = vpack.c.bf16 %v7595_v19, %v7594_v33  ;;  %v7632_v39 = vpack.c.bf16 %v7597_v29, %v7596_v23  ;;  %v8114_v19 = vld [vmem:[#allocation3 + $0x8a] sm:$0xff]  ;;  %v8111_v23 = vld [vmem:[#allocation3 + $0x72] sm:$0xff]  ;;  %v8113_v33 = vld [vmem:[#allocation3 + $0x82] sm:$0xff] }
 0x549   :  { %10840 = vmatmul.mubr.msk.bf16.gmra.mrb[12].mxu1 %vm2630_vm1, %v13099_v42  ;;  %v7598_v42 = vld [vmem:[#allocation3 + $0x1f1] sm:$0xff] }
 0x54a   :  { %10843 = vmatprep.mubr.msk.bf16.mxu1 %vm2630_vm1, %v13105_v50  ;;  %v7599_v50 = vld [vmem:[#allocation3 + $0x1f9] sm:$0xff] }
 0x54b   :  { %v7633_v21 = vpack.c.bf16 %v7599_v50, %v7598_v42  ;;  %v8118_v42 = vld [vmem:[#allocation3 + $0xaa] sm:$0xff]  ;;  %v8115_v50 = vld [vmem:[#allocation3 + $0x92] sm:$0xff] }
 0x551   :  { %10844 = vmatmul.mubr.msk.bf16.gmra.mrb[16].mxu1 %vm2630_vm1, %v13107_v51  ;;  %v7602_v51 = vld [vmem:[#allocation3 + $0x211] sm:$0xff] }
 0x552   :  { %10847 = vmatprep.mubr.msk.bf16.mxu1 %vm2630_vm1, %v7630_v15  ;;  %v7635_v38 = vpack.c.bf16 %v7603_v40, %v7602_v51  ;;  %v8112_v15 = vld [vmem:[#allocation3 + $0x7a] sm:$0xff]  ;;  %v8117_v51 = vld [vmem:[#allocation3 + $0xa2] sm:$0xff] }
 0x553   :  { %v8170_v29 = vpack.c.bf16 %v8112_v15, %v8111_v23  ;;  %v8173_v40 = vpack.c.bf16 %v8118_v42, %v8117_v51 }
 0x559   :  { %10848 = vmatmul.mubr.msk.bf16.gmra.mrb[20].mxu1 %vm2630_vm1, %v7631_v4  ;;  %v8171_v4 = vpack.c.bf16 %v8114_v19, %v8113_v33 }
 0x55a   :  { %10851 = vmatprep.mubr.msk.bf16.mxu1 %vm2630_vm1, %v7632_v39  ;;  %v8116_v39 = vld [vmem:[#allocation3 + $0x9a] sm:$0xff] }
 0x561   :  { %10852 = vmatmul.mubr.msk.bf16.gmra.mrb[24].mxu1 %vm2630_vm1, %v7633_v21  ;;  %v8172_v21 = vpack.c.bf16 %v8116_v39, %v8115_v50 }
 0x562   :  { %10855 = vmatprep.mubr.msk.bf16.mxu1 %vm2630_vm1, %v13121_v53  ;;  %v8108_v53 = vld [vmem:[#allocation3 + $0x5a] sm:$0xff] }
 0x563   :  { %v8168_v3 = vpack.c.bf16 %v8108_v53, %v8107_v59 }
 0x569   :  { %10856 = vmatmul.mubr.msk.bf16.gmra.mrb[28].mxu1 %vm2630_vm1, %v7635_v38  ;;  %v8120_v38 = vld [vmem:[#allocation3 + $0xba] sm:$0xff] }
 0x56a   :  { %10863 = vmatprep.mubr.msk.bf16.mxu1 %vm2630_vm1, %v8165_v30  ;;  %v8174_v30 = vpack.c.bf16 %v8120_v38, %v8119_v28 }
 0x571   :  { %10864 = vmatmul.mubr.msk.bf16.vlgmr.msra.gmra.mrb[32].mxu1 %vm2630_vm1, %v8166_v62  ;;  %v8125_v62 = vld [vmem:[#allocation3 + $0xe2] sm:$0xff] }
 0x572   :  { %10867 = vmatprep.mubr.msk.bf16.mxu1 %vm2630_vm1, %v8167_v32  ;;  %v8123_v32 = vld [vmem:[#allocation3 + $0xd2] sm:$0xff]  ;;  %v8177_v58 = vpack.c.bf16 %v8126_v24, %v8125_v62 }
 0x573   :  { %v8176_v53 = vpack.c.bf16 %v8124_v41, %v8123_v32 }
 0x579   :  { %10868 = vmatmul.mubr.msk.bf16.gmra.mrb[36].mxu1 %vm2630_vm1, %v8168_v3 }
 0x57a   :  { %10871 = vmatprep.mubr.msk.bf16.mxu1 %vm2630_vm1, %v8169_v11 }
 0x581   :  { %10872 = vmatmul.mubr.msk.bf16.gmra.mrb[40].mxu1 %vm2630_vm1, %v8170_v29 }
 0x582   :  { %10875 = vmatprep.mubr.msk.bf16.mxu1 %vm2630_vm1, %v8171_v4 }
 0x589   :  { %10876 = vmatmul.mubr.msk.bf16.gmra.mrb[44].mxu1 %vm2630_vm1, %v8172_v21 }
 0x58a   :  { %10879 = vmatprep.mubr.msk.bf16.mxu1 %vm2630_vm1, %v8173_v40 }
 0x591   :  { %10880 = vmatmul.mubr.msk.bf16.gmra.mrb[48].mxu1 %vm2630_vm1, %v8174_v30 }
 0x592   :  { %10883 = vmatprep.mubr.msk.bf16.mxu1 %vm2630_vm1, %v8175_v13 }
 0x599   :  { %10884 = vmatmul.mubr.msk.bf16.gmra.mrb[52].mxu1 %vm2630_vm1, %v8176_v53 }
 0x59a   :  { %10887 = vmatprep.mubr.msk.bf16.mxu1 %vm2630_vm1, %v8177_v58 }
 0x5a1   :  { %10888 = vmatmul.mubr.msk.bf16.gmra.mrb[56].mxu1 %vm2630_vm1, %v13065_v6  ;;  %v8163_v6 = vld [vmem:[#allocation3 + $0x212] sm:$0xff] }
 0x5a2   :  { %10891 = vmatprep.mubr.msk.bf16.mxu1 %vm2630_vm1, %v13205_v7  ;;  %v8164_v7 = vld [vmem:[#allocation3 + $0x21a] sm:$0xff] }
 0x5a9   :  { %10892 = vmatmul.mubr.msk.bf16.gmra.mrb[60].mxu1 %vm2630_vm1, %v13207_v10  ;;  %v8196_v10 = vpack.c.bf16 %v8164_v7, %v8163_v6 }
 0x5aa   :  { %10895 = vmatprep.mubr.msk.bf16.mxu1 %vm2630_vm1, %v13221_v26 }
 0x5b1   :  { %10896 = vmatmul.mubr.msk.bf16.gmra.mrb[0].mxu1 %vm2630_vm1, %v13223_v31  ;;  %v13507_v31 = vld [vmem:[%s13769_s4] ss:$0 sm:$0xff] }
 0x5b2   :  { %10899 = vmatprep.mubr.msk.bf16.mxu1 %vm2630_vm1, %v13237_v14 }
 0x5b9   :  { %10900 = vmatmul.mubr.msk.bf16.gmra.mrb[4].mxu1 %vm2630_vm1, %v13239_v37 }
 0x5ba   :  { %10903 = vmatprep.mubr.msk.bf16.mxu1 %vm2630_vm1, %v13251_v17 }
 0x5c1   :  { %10904 = vmatmul.mubr.msk.bf16.gmra.mrb[8].mxu1 %vm2630_vm1, %v13255_v36 }
 0x5c2   :  { %10907 = vmatprep.mubr.msk.bf16.mxu1 %vm2630_vm1, %v13269_v27 }
 0x5c9   :  { %10908 = vmatmul.mubr.msk.bf16.gmra.mrb[12].mxu1 %vm2630_vm1, %v13271_v20 }
 0x5ca   :  { %10911 = vmatprep.mubr.msk.bf16.mxu1 %vm2630_vm1, %v13285_v46 }
 0x5d1   :  { %10912 = vmatmul.mubr.msk.bf16.gmra.mrb[16].mxu1 %vm2630_vm1, %v13287_v56 }
 0x5d2   :  { %10915 = vmatprep.mubr.msk.bf16.mxu1 %vm2630_vm1, %v13301_v49 }
 0x5d9   :  { %10916 = vmatmul.mubr.msk.bf16.gmra.mrb[20].mxu1 %vm2630_vm1, %v13303_v0 }
 0x5da   :  { %10919 = vmatprep.mubr.msk.bf16.mxu1 %vm2630_vm1, %v13319_v16 }
 0x5e1   :  { %10920 = vmatmul.mubr.msk.bf16.gmra.mrb[24].mxu1 %vm2630_vm1, %v13315_v1 }
 0x5e2   :  { %10923 = vmatprep.mubr.msk.bf16.mxu1 %vm2630_vm1, %v13329_v44 }
 0x5e9   :  { %10924 = vmatmul.mubr.msk.bf16.gmra.mrb[28].mxu1 %vm2630_vm1, %v8196_v10 }
 0x644   :  { %v10865_v26 = vpop.f32.mrb[32].mxu1 }
 0x645   :  { %v10931_v14 = vadd.f32 %v10865_v26, %v13261_v45  ;;  %v8343_v37 = vpop.f32.mrb[33].mxu1 }
 0x646   :  { %v10932_v17 = vadd.f32 %v8343_v37, %v13263_v52  ;;  %v10866_v27 = vpop.f32.mrb[34].mxu1 }
 0x647   :  { %v8671_v36 = vadd.f32 %v10931_v14, %v13507_v31  ;;  %v10933_v44 = vadd.f32 %v10866_v27, %v13265_v12  ;;  %v8346_v20 = vpop.f32.mrb[35].mxu1 }
 0x648   :  { %v8669_v46 = vadd.f32 %v10932_v17, %v13507_v31  ;;  %v10934_v56 = vadd.f32 %v8346_v20, %v13267_v8 }
 0x649   :  { %v8735_v49 = vmax.f32 %v8671_v36, 0.0  ;;  %v8672_v0 = vadd.f32 %v10933_v44, %v13507_v31 }
 0x64a   :  { %v8733_v1 = vmax.f32 %v8669_v46, 0.0  ;;  %v8670_v45 = vadd.f32 %v10934_v56, %v13507_v31 }
 0x64b   :  { %8800 = vst.msk [vmem:[#allocation4 + $0x10] sm:$0xff] %vm8797_vm4, %v8735_v49  ;;  %v8736_v52 = vmax.f32 %v8672_v0, 0.0  ;;  %v13817_v49 = vld [vmem:[#allocation37_spill] sm:$0xff] }
 0x64c   :  { %8798 = vst.msk [vmem:[#allocation4] sm:$0xff] %vm8797_vm4, %v8733_v1  ;;  %v8734_v16 = vmax.f32 %v8670_v45, 0.0  ;;  %v10869_v59 = vpop.f32.mrb[36].mxu1 }
 0x64d   :  { %8801 = vst.msk [vmem:[#allocation4 + $0x18] sm:$0xff] %vm8797_vm4, %v8736_v52  ;;  %v10935_v12 = vadd.f32 %v10869_v59, %v13277_v63  ;;  %v8359_v3 = vpop.f32.mrb[37].mxu1 }
 0x64e   :  { %8799 = vst.msk [vmem:[#allocation4 + $0x8] sm:$0xff] %vm8797_vm4, %v8734_v16  ;;  %v10936_v8 = vadd.f32 %v8359_v3, %v13279_v43  ;;  %v10870_v5 = vpop.f32.mrb[38].mxu1  ;;  %v13818_v16 = vld [vmem:[#allocation38_spill] sm:$0xff] }
 0x64f   :  { %v8675_v11 = vadd.f32 %v10935_v12, %v13507_v31  ;;  %v10937_v15 = vadd.f32 %v10870_v5, %v13281_v34  ;;  %v8362_v19 = vpop.f32.mrb[39].mxu1 }
 0x650   :  { %v8673_v23 = vadd.f32 %v10936_v8, %v13507_v31  ;;  %v10938_v29 = vadd.f32 %v8362_v19, %v13283_v47 }
 0x651   :  { %v8739_v33 = vmax.f32 %v8675_v11, 0.0  ;;  %v8676_v4 = vadd.f32 %v10937_v15, %v13507_v31 }
 0x652   :  { %v8737_v39 = vmax.f32 %v8673_v23, 0.0  ;;  %v8674_v63 = vadd.f32 %v10938_v29, %v13507_v31 }
 0x653   :  { %8804 = vst.msk [vmem:[#allocation4 + $0x30] sm:$0xff] %vm8797_vm4, %v8739_v33  ;;  %v8740_v42 = vmax.f32 %v8676_v4, 0.0  ;;  %v13819_v4 = vld [vmem:[#allocation39_spill] sm:$0xff] }
 0x654   :  { %v8864_v43 = vld [vmem:[#allocation4 + $0x10] ss:$2 sm:$0xff]  ;;  %v8928_v50 = vld [vmem:[#allocation4 + $0x11] ss:$2 sm:$0xff]  ;;  %8802 = vst.msk [vmem:[#allocation4 + $0x20] sm:$0xff] %vm8797_vm4, %v8737_v39  ;;  %v8738_v21 = vmax.f32 %v8674_v63, 0.0 }
 0x655   :  { %v10873_v34 = vpop.f32.mrb[40].mxu1  ;;  %v8990_v51 = vmax.f32 %v8864_v43, %v8928_v50  ;;  %v8862_v40 = vld [vmem:[#allocation4] ss:$2 sm:$0xff]  ;;  %v8926_v38 = vld [vmem:[#allocation4 + $0x1] ss:$2 sm:$0xff]  ;;  %8805 = vst.msk [vmem:[#allocation4 + $0x38] sm:$0xff] %vm8797_vm4, %v8740_v42 }
 0x656   :  { %v10939_v47 = vadd.f32 %v10873_v34, %v13293_v18  ;;  %v8375_v35 = vpop.f32.mrb[41].mxu1  ;;  %v8989_v28 = vmax.f32 %v8862_v40, %v8926_v38  ;;  %8803 = vst.msk [vmem:[#allocation4 + $0x28] sm:$0xff] %vm8797_vm4, %v8738_v21  ;;  %v13820_v43 = vld [vmem:[#allocation40_spill] sm:$0xff] }
 0x657   :  { %v10940_v30 = vadd.f32 %v8375_v35, %v13295_v61  ;;  %v10874_v9 = vpop.f32.mrb[42].mxu1 }
 0x658   :  { %v8679_v13 = vadd.f32 %v10939_v47, %v13507_v31  ;;  %v10941_v41 = vadd.f32 %v10874_v9, %v13297_v2  ;;  %v8378_v62 = vpop.f32.mrb[43].mxu1  ;;  %v9021_v24 = vmax.f32 %v8989_v28, %v8990_v51  ;;  %v13821_v51 = vld [vmem:[#allocation41_spill] sm:$0xff]  ;;  %v13822_v28 = vld [vmem:[#allocation42_spill] sm:$0xff] }
 0x659   :  { %v8677_v32 = vadd.f32 %v10940_v30, %v13507_v31  ;;  %v10942_v53 = vadd.f32 %v8378_v62, %v13299_v25 }
 0x65a   :  { %v8743_v58 = vmax.f32 %v8679_v13, 0.0  ;;  %v8680_v18 = vadd.f32 %v10941_v41, %v13507_v31  ;;  %9037 = vst.msk [vmem:[%s13770_s5] sm:$0xff] %vm8797_vm4, %v9021_v24 }
 0x65b   :  { %v8741_v61 = vmax.f32 %v8677_v32, 0.0  ;;  %v8678_v6 = vadd.f32 %v10942_v53, %v13507_v31 }
 0x65c   :  { %8808 = vst.msk [vmem:[#allocation4 + $0x50] sm:$0xff] %vm8797_vm4, %v8743_v58  ;;  %v8744_v2 = vmax.f32 %v8680_v18, 0.0  ;;  %v8868_v7 = vld [vmem:[#allocation4 + $0x30] ss:$2 sm:$0xff]  ;;  %v8932_v10 = vld [vmem:[#allocation4 + $0x31] ss:$2 sm:$0xff] }
 0x65d   :  { %8806 = vst.msk [vmem:[#allocation4 + $0x40] sm:$0xff] %vm8797_vm4, %v8741_v61  ;;  %v8742_v26 = vmax.f32 %v8678_v6, 0.0  ;;  %v10877_v25 = vpop.f32.mrb[44].mxu1  ;;  %v8992_v14 = vmax.f32 %v8868_v7, %v8932_v10  ;;  %v8866_v37 = vld [vmem:[#allocation4 + $0x20] ss:$2 sm:$0xff]  ;;  %v13823_v7 = vld [vmem:[#allocation43_spill] sm:$0xff] }
 0x65e   :  { %v8930_v17 = vld [vmem:[#allocation4 + $0x21] ss:$2 sm:$0xff]  ;;  %8809 = vst.msk [vmem:[#allocation4 + $0x58] sm:$0xff] %vm8797_vm4, %v8744_v2  ;;  %v10943_v27 = vadd.f32 %v10877_v25, %v13309_v22  ;;  %v8391_v36 = vpop.f32.mrb[45].mxu1 }
 0x65f   :  { %v8991_v44 = vmax.f32 %v8866_v37, %v8930_v17  ;;  %8807 = vst.msk [vmem:[#allocation4 + $0x48] sm:$0xff] %vm8797_vm4, %v8742_v26  ;;  %v10944_v20 = vadd.f32 %v8391_v36, %v13311_v48  ;;  %v10878_v46 = vpop.f32.mrb[46].mxu1  ;;  %v13825_v36 = vld [vmem:[#allocation45_spill] sm:$0xff] }
 0x660   :  { %v8683_v56 = vadd.f32 %v10943_v27, %v13507_v31  ;;  %v10945_v0 = vadd.f32 %v10878_v46, %v13817_v49  ;;  %v8394_v1 = vpop.f32.mrb[47].mxu1  ;;  %v13826_v49 = vld [vmem:[#allocation46_spill] sm:$0xff] }
 0x661   :  { %v9022_v45 = vmax.f32 %v8991_v44, %v8992_v14  ;;  %v8681_v52 = vadd.f32 %v10944_v20, %v13507_v31  ;;  %v10946_v59 = vadd.f32 %v8394_v1, %v13818_v16  ;;  %v13824_v14 = vld [vmem:[#allocation44_spill] sm:$0xff] }
 0x662   :  { %v8747_v12 = vmax.f32 %v8683_v56, 0.0  ;;  %v8684_v22 = vadd.f32 %v10945_v0, %v13507_v31 }
 0x663   :  { %9038 = vst.msk [vmem:[%s13770_s5 + $0x8] sm:$0xff] %vm8797_vm4, %v9022_v45  ;;  %v8745_v48 = vmax.f32 %v8681_v52, 0.0  ;;  %v8682_v3 = vadd.f32 %v10946_v59, %v13507_v31 }
 0x664   :  { %8812 = vst.msk [vmem:[#allocation4 + $0x70] sm:$0xff] %vm8797_vm4, %v8747_v12  ;;  %v8748_v8 = vmax.f32 %v8684_v22, 0.0  ;;  %v10881_v19 = vpop.f32.mrb[48].mxu1 }
 0x665   :  { %v8872_v5 = vld [vmem:[#allocation4 + $0x50] ss:$2 sm:$0xff]  ;;  %v8936_v11 = vld [vmem:[#allocation4 + $0x51] ss:$2 sm:$0xff]  ;;  %8810 = vst.msk [vmem:[#allocation4 + $0x60] sm:$0xff] %vm8797_vm4, %v8745_v48  ;;  %v8746_v15 = vmax.f32 %v8682_v3, 0.0  ;;  %v10947_v39 = vadd.f32 %v10881_v19, %v13819_v4 }
 0x666   :  { %v8994_v23 = vmax.f32 %v8872_v5, %v8936_v11  ;;  %v8870_v29 = vld [vmem:[#allocation4 + $0x40] ss:$2 sm:$0xff]  ;;  %v8934_v33 = vld [vmem:[#allocation4 + $0x41] ss:$2 sm:$0xff]  ;;  %8813 = vst.msk [vmem:[#allocation4 + $0x78] sm:$0xff] %vm8797_vm4, %v8748_v8  ;;  %v8407_v63 = vpop.f32.mrb[49].mxu1 }
 0x667   :  { %v8993_v42 = vmax.f32 %v8870_v29, %v8934_v33  ;;  %8811 = vst.msk [vmem:[#allocation4 + $0x68] sm:$0xff] %vm8797_vm4, %v8746_v15  ;;  %v10948_v50 = vadd.f32 %v8407_v63, %v13820_v43  ;;  %v10882_v21 = vpop.f32.mrb[50].mxu1  ;;  %v8687_v34 = vadd.f32 %v10947_v39, %v13507_v31  ;;  %v13827_v15 = vld [vmem:[#allocation47_spill] sm:$0xff]  ;;  %v13828_v33 = vld [vmem:[#allocation48_spill] sm:$0xff] }
 0x668   :  { %v10949_v40 = vadd.f32 %v10882_v21, %v13821_v51  ;;  %v8410_v38 = vpop.f32.mrb[51].mxu1  ;;  %v13830_v51 = vld [vmem:[#allocation50_spill] sm:$0xff] }
 0x669   :  { %v9023_v47 = vmax.f32 %v8993_v42, %v8994_v23  ;;  %v8685_v35 = vadd.f32 %v10948_v50, %v13507_v31  ;;  %v10950_v30 = vadd.f32 %v8410_v38, %v13822_v28  ;;  %v8751_v9 = vmax.f32 %v8687_v34, 0.0  ;;  %v13829_v42 = vld [vmem:[#allocation49_spill] sm:$0xff] }
 0x66a   :  { %v8688_v13 = vadd.f32 %v10949_v40, %v13507_v31 }
 0x66b   :  { %9039 = vst.msk [vmem:[%s13770_s5 + $0x10] sm:$0xff] %vm8797_vm4, %v9023_v47  ;;  %v8749_v41 = vmax.f32 %v8685_v35, 0.0  ;;  %v8686_v62 = vadd.f32 %v10950_v30, %v13507_v31  ;;  %8816 = vst.msk [vmem:[#allocation4 + $0x90] sm:$0xff] %vm8797_vm4, %v8751_v9 }
 0x66c   :  { %v8752_v24 = vmax.f32 %v8688_v13, 0.0  ;;  %v10885_v18 = vpop.f32.mrb[52].mxu1 }
 0x66d   :  { %v8876_v32 = vld [vmem:[#allocation4 + $0x70] ss:$2 sm:$0xff]  ;;  %v8940_v53 = vld [vmem:[#allocation4 + $0x71] ss:$2 sm:$0xff]  ;;  %8814 = vst.msk [vmem:[#allocation4 + $0x80] sm:$0xff] %vm8797_vm4, %v8749_v41  ;;  %v8750_v58 = vmax.f32 %v8686_v62, 0.0  ;;  %v10951_v10 = vadd.f32 %v10885_v18, %v13823_v7 }
 0x66e   :  { %v8996_v61 = vmax.f32 %v8876_v32, %v8940_v53  ;;  %v8874_v6 = vld [vmem:[#allocation4 + $0x60] ss:$2 sm:$0xff]  ;;  %v8938_v2 = vld [vmem:[#allocation4 + $0x61] ss:$2 sm:$0xff]  ;;  %8817 = vst.msk [vmem:[#allocation4 + $0x98] sm:$0xff] %vm8797_vm4, %v8752_v24  ;;  %v8423_v26 = vpop.f32.mrb[53].mxu1 }
 0x66f   :  { %v8995_v25 = vmax.f32 %v8874_v6, %v8938_v2  ;;  %8815 = vst.msk [vmem:[#allocation4 + $0x88] sm:$0xff] %vm8797_vm4, %v8750_v58  ;;  %v10952_v37 = vadd.f32 %v8423_v26, %v13824_v14  ;;  %v10886_v17 = vpop.f32.mrb[54].mxu1  ;;  %v8691_v27 = vadd.f32 %v10951_v10, %v13507_v31 }
 0x670   :  { %v10953_v44 = vadd.f32 %v10886_v17, %v13825_v36  ;;  %v8426_v20 = vpop.f32.mrb[55].mxu1 }
 0x671   :  { %v9024_v46 = vmax.f32 %v8995_v25, %v8996_v61  ;;  %v8689_v56 = vadd.f32 %v10952_v37, %v13507_v31  ;;  %v10954_v0 = vadd.f32 %v8426_v20, %v13826_v49  ;;  %v8755_v1 = vmax.f32 %v8691_v27, 0.0 }
 0x672   :  { %v8692_v45 = vadd.f32 %v10953_v44, %v13507_v31 }
 0x673   :  { %9040 = vst.msk [vmem:[%s13770_s5 + $0x18] sm:$0xff] %vm8797_vm4, %v9024_v46  ;;  %v8753_v52 = vmax.f32 %v8689_v56, 0.0  ;;  %v8690_v16 = vadd.f32 %v10954_v0, %v13507_v31  ;;  %8820 = vst.msk [vmem:[#allocation4 + $0xb0] sm:$0xff] %vm8797_vm4, %v8755_v1  ;;  %v13831_v0 = vld [vmem:[#allocation5_spill] sm:$0xff] }
 0x674   :  { %v8756_v59 = vmax.f32 %v8692_v45, 0.0  ;;  %v10889_v3 = vpop.f32.mrb[56].mxu1 }
 0x675   :  { %v8880_v12 = vld [vmem:[#allocation4 + $0x90] ss:$2 sm:$0xff]  ;;  %v8944_v22 = vld [vmem:[#allocation4 + $0x91] ss:$2 sm:$0xff]  ;;  %8818 = vst.msk [vmem:[#allocation4 + $0xa0] sm:$0xff] %vm8797_vm4, %v8753_v52  ;;  %v8754_v48 = vmax.f32 %v8690_v16, 0.0  ;;  %v10955_v19 = vadd.f32 %v10889_v3, %v13827_v15 }
 0x676   :  { %v8998_v8 = vmax.f32 %v8880_v12, %v8944_v22  ;;  %v8878_v5 = vld [vmem:[#allocation4 + $0x80] ss:$2 sm:$0xff]  ;;  %v8942_v11 = vld [vmem:[#allocation4 + $0x81] ss:$2 sm:$0xff]  ;;  %8821 = vst.msk [vmem:[#allocation4 + $0xb8] sm:$0xff] %vm8797_vm4, %v8756_v59  ;;  %v8439_v23 = vpop.f32.mrb[57].mxu1 }
 0x677   :  { %v8997_v29 = vmax.f32 %v8878_v5, %v8942_v11  ;;  %8819 = vst.msk [vmem:[#allocation4 + $0xa8] sm:$0xff] %vm8797_vm4, %v8754_v48  ;;  %v10956_v4 = vadd.f32 %v8439_v23, %v13828_v33  ;;  %v10890_v39 = vpop.f32.mrb[58].mxu1  ;;  %v8695_v63 = vadd.f32 %v10955_v19, %v13507_v31  ;;  %v13832_v16 = vld [vmem:[#allocation6_spill] sm:$0xff]  ;;  %v13833_v48 = vld [vmem:[#allocation7_spill] sm:$0xff]  ;;  %v13834_v15 = vld [vmem:[#allocation8_spill] sm:$0xff] }
 0x678   :  { %v10957_v43 = vadd.f32 %v10890_v39, %v13829_v42  ;;  %v8442_v50 = vpop.f32.mrb[59].mxu1 }
 0x679   :  { %v9025_v21 = vmax.f32 %v8997_v29, %v8998_v8  ;;  %v8693_v34 = vadd.f32 %v10956_v4, %v13507_v31  ;;  %v10958_v40 = vadd.f32 %v8442_v50, %v13830_v51  ;;  %v8759_v38 = vmax.f32 %v8695_v63, 0.0 }
 0x67a   :  { %v8696_v47 = vadd.f32 %v10957_v43, %v13507_v31 }
 0x67b   :  { %9041 = vst.msk [vmem:[%s13770_s5 + $0x20] sm:$0xff] %vm8797_vm4, %v9025_v21  ;;  %v8757_v35 = vmax.f32 %v8693_v34, 0.0  ;;  %v8694_v28 = vadd.f32 %v10958_v40, %v13507_v31  ;;  %8824 = vst.msk [vmem:[#allocation4 + $0xd0] sm:$0xff] %vm8797_vm4, %v8759_v38  ;;  %v13835_v40 = vld [vmem:[#allocation9_spill] sm:$0xff] }
 0x67c   :  { %v8760_v30 = vmax.f32 %v8696_v47, 0.0  ;;  %v10893_v62 = vpop.f32.mrb[60].mxu1 }
 0x67d   :  { %v8884_v9 = vld [vmem:[#allocation4 + $0xb0] ss:$2 sm:$0xff]  ;;  %v8948_v13 = vld [vmem:[#allocation4 + $0xb1] ss:$2 sm:$0xff]  ;;  %8822 = vst.msk [vmem:[#allocation4 + $0xc0] sm:$0xff] %vm8797_vm4, %v8757_v35  ;;  %v8758_v41 = vmax.f32 %v8694_v28, 0.0  ;;  %v10959_v58 = vadd.f32 %v10893_v62, %v13425_v54 }
 0x67e   :  { %v9000_v24 = vmax.f32 %v8884_v9, %v8948_v13  ;;  %v8882_v32 = vld [vmem:[#allocation4 + $0xa0] ss:$2 sm:$0xff]  ;;  %v8946_v53 = vld [vmem:[#allocation4 + $0xa1] ss:$2 sm:$0xff]  ;;  %8825 = vst.msk [vmem:[#allocation4 + $0xd8] sm:$0xff] %vm8797_vm4, %v8760_v30  ;;  %v8455_v18 = vpop.f32.mrb[61].mxu1 }
 0x67f   :  { %v8999_v61 = vmax.f32 %v8882_v32, %v8946_v53  ;;  %8823 = vst.msk [vmem:[#allocation4 + $0xc8] sm:$0xff] %vm8797_vm4, %v8758_v41  ;;  %v10960_v6 = vadd.f32 %v8455_v18, %v13429_v55  ;;  %v10894_v2 = vpop.f32.mrb[62].mxu1  ;;  %v8699_v7 = vadd.f32 %v10959_v58, %v13507_v31  ;;  %v13836_v28 = vld [vmem:[#allocation10_spill] sm:$0xff]  ;;  %v13837_v41 = vld [vmem:[#allocation11_spill] sm:$0xff]  ;;  %v13838_v58 = vld [vmem:[#allocation12_spill] sm:$0xff] }
 0x680   :  { %v10961_v10 = vadd.f32 %v10894_v2, %v13433_v60  ;;  %v8458_v26 = vpop.f32.mrb[63].mxu1 }
 0x681   :  { %v9026_v25 = vmax.f32 %v8999_v61, %v9000_v24  ;;  %v8697_v14 = vadd.f32 %v10960_v6, %v13507_v31  ;;  %v10962_v37 = vadd.f32 %v8458_v26, %v13435_v57  ;;  %v8763_v17 = vmax.f32 %v8699_v7, 0.0 }
 0x682   :  { %v8700_v54 = vadd.f32 %v10961_v10, %v13507_v31 }
 0x683   :  { %9042 = vst.msk [vmem:[%s13770_s5 + $0x28] sm:$0xff] %vm8797_vm4, %v9026_v25  ;;  %v8761_v55 = vmax.f32 %v8697_v14, 0.0  ;;  %v8698_v27 = vadd.f32 %v10962_v37, %v13507_v31  ;;  %8828 = vst.msk [vmem:[#allocation4 + $0xf0] sm:$0xff] %vm8797_vm4, %v8763_v17 }
 0x684   :  { %v8764_v60 = vmax.f32 %v8700_v54, 0.0  ;;  %v10897_v57 = vpop.f32.mrb[0].mxu1 }
 0x685   :  { %v8888_v36 = vld [vmem:[#allocation4 + $0xd0] ss:$2 sm:$0xff]  ;;  %v8952_v44 = vld [vmem:[#allocation4 + $0xd1] ss:$2 sm:$0xff]  ;;  %8826 = vst.msk [vmem:[#allocation4 + $0xe0] sm:$0xff] %vm8797_vm4, %v8761_v55  ;;  %v8762_v20 = vmax.f32 %v8698_v27, 0.0  ;;  %v10963_v1 = vadd.f32 %v10897_v57, %v13831_v0 }
 0x686   :  { %v9002_v46 = vmax.f32 %v8888_v36, %v8952_v44  ;;  %v8886_v56 = vld [vmem:[#allocation4 + $0xc0] ss:$2 sm:$0xff]  ;;  %v8950_v49 = vld [vmem:[#allocation4 + $0xc1] ss:$2 sm:$0xff]  ;;  %8829 = vst.msk [vmem:[#allocation4 + $0xf8] sm:$0xff] %vm8797_vm4, %v8764_v60  ;;  %v8471_v45 = vpop.f32.mrb[1].mxu1 }
 0x687   :  { %v9001_v52 = vmax.f32 %v8886_v56, %v8950_v49  ;;  %8827 = vst.msk [vmem:[#allocation4 + $0xe8] sm:$0xff] %vm8797_vm4, %v8762_v20  ;;  %v10964_v59 = vadd.f32 %v8471_v45, %v13832_v16  ;;  %v10898_v12 = vpop.f32.mrb[2].mxu1  ;;  %v8703_v22 = vadd.f32 %v10963_v1, %v13507_v31  ;;  %v13839_v27 = vld [vmem:[#allocation13_spill] sm:$0xff]  ;;  %v13840_v20 = vld [vmem:[#allocation14_spill] sm:$0xff]  ;;  %v13841_v49 = vld [vmem:[#allocation15_spill] sm:$0xff] }
 0x688   :  { %v10965_v3 = vadd.f32 %v10898_v12, %v13833_v48  ;;  %v8474_v8 = vpop.f32.mrb[3].mxu1  ;;  %v13842_v16 = vld [vmem:[#allocation16_spill] sm:$0xff] }
 0x689   :  { %v9027_v5 = vmax.f32 %v9001_v52, %v9002_v46  ;;  %v8701_v11 = vadd.f32 %v10964_v59, %v13507_v31  ;;  %v10966_v19 = vadd.f32 %v8474_v8, %v13834_v15  ;;  %v8767_v23 = vmax.f32 %v8703_v22, 0.0 }
 0x68a   :  { %v8704_v29 = vadd.f32 %v10965_v3, %v13507_v31 }
 0x68b   :  { %9043 = vst.msk [vmem:[%s13770_s5 + $0x30] sm:$0xff] %vm8797_vm4, %v9027_v5  ;;  %v8765_v33 = vmax.f32 %v8701_v11, 0.0  ;;  %v8702_v4 = vadd.f32 %v10966_v19, %v13507_v31  ;;  %8832 = vst.msk [vmem:[#allocation4 + $0x110] sm:$0xff] %vm8797_vm4, %v8767_v23 }
 0x68c   :  { %v8768_v39 = vmax.f32 %v8704_v29, 0.0  ;;  %v10901_v50 = vpop.f32.mrb[4].mxu1 }
 0x68d   :  { %v8892_v63 = vld [vmem:[#allocation4 + $0xf0] ss:$2 sm:$0xff]  ;;  %v8956_v42 = vld [vmem:[#allocation4 + $0xf1] ss:$2 sm:$0xff]  ;;  %8830 = vst.msk [vmem:[#allocation4 + $0x100] sm:$0xff] %vm8797_vm4, %v8765_v33  ;;  %v8766_v43 = vmax.f32 %v8702_v4, 0.0  ;;  %v10967_v38 = vadd.f32 %v10901_v50, %v13835_v40 }
 0x68e   :  { %v9004_v21 = vmax.f32 %v8892_v63, %v8956_v42  ;;  %v8890_v34 = vld [vmem:[#allocation4 + $0xe0] ss:$2 sm:$0xff]  ;;  %v8954_v51 = vld [vmem:[#allocation4 + $0xe1] ss:$2 sm:$0xff]  ;;  %8833 = vst.msk [vmem:[#allocation4 + $0x118] sm:$0xff] %vm8797_vm4, %v8768_v39  ;;  %v8487_v47 = vpop.f32.mrb[5].mxu1 }
 0x68f   :  { %v9003_v35 = vmax.f32 %v8890_v34, %v8954_v51  ;;  %8831 = vst.msk [vmem:[#allocation4 + $0x108] sm:$0xff] %vm8797_vm4, %v8766_v43  ;;  %v10968_v30 = vadd.f32 %v8487_v47, %v13836_v28  ;;  %v10902_v9 = vpop.f32.mrb[6].mxu1  ;;  %v8707_v13 = vadd.f32 %v10967_v38, %v13507_v31  ;;  %v13843_v4 = vld [vmem:[#allocation17_spill] sm:$0xff]  ;;  %v13844_v43 = vld [vmem:[#allocation18_spill] sm:$0xff]  ;;  %v13845_v51 = vld [vmem:[#allocation19_spill] sm:$0xff] }
 0x690   :  { %v10969_v62 = vadd.f32 %v10902_v9, %v13837_v41  ;;  %v8490_v24 = vpop.f32.mrb[7].mxu1  ;;  %v13846_v28 = vld [vmem:[#allocation20_spill] sm:$0xff] }
 0x691   :  { %v9028_v32 = vmax.f32 %v9003_v35, %v9004_v21  ;;  %v8705_v53 = vadd.f32 %v10968_v30, %v13507_v31  ;;  %v10970_v18 = vadd.f32 %v8490_v24, %v13838_v58  ;;  %v8771_v61 = vmax.f32 %v8707_v13, 0.0 }
 0x692   :  { %v8708_v6 = vadd.f32 %v10969_v62, %v13507_v31 }
 0x693   :  { %9044 = vst.msk [vmem:[%s13770_s5 + $0x38] sm:$0xff] %vm8797_vm4, %v9028_v32  ;;  %v8769_v2 = vmax.f32 %v8705_v53, 0.0  ;;  %v8706_v7 = vadd.f32 %v10970_v18, %v13507_v31  ;;  %8836 = vst.msk [vmem:[#allocation4 + $0x130] sm:$0xff] %vm8797_vm4, %v8771_v61 }
 0x694   :  { %v8772_v10 = vmax.f32 %v8708_v6, 0.0  ;;  %v10905_v37 = vpop.f32.mrb[8].mxu1 }
 0x695   :  { %v8896_v26 = vld [vmem:[#allocation4 + $0x110] ss:$2 sm:$0xff]  ;;  %v8960_v25 = vld [vmem:[#allocation4 + $0x111] ss:$2 sm:$0xff]  ;;  %8834 = vst.msk [vmem:[#allocation4 + $0x120] sm:$0xff] %vm8797_vm4, %v8769_v2  ;;  %v8770_v14 = vmax.f32 %v8706_v7, 0.0  ;;  %v10971_v60 = vadd.f32 %v10905_v37, %v13839_v27 }
 0x696   :  { %v9006_v17 = vmax.f32 %v8896_v26, %v8960_v25  ;;  %v8894_v54 = vld [vmem:[#allocation4 + $0x100] ss:$2 sm:$0xff]  ;;  %v8958_v55 = vld [vmem:[#allocation4 + $0x101] ss:$2 sm:$0xff]  ;;  %8837 = vst.msk [vmem:[#allocation4 + $0x138] sm:$0xff] %vm8797_vm4, %v8772_v10  ;;  %v8503_v36 = vpop.f32.mrb[9].mxu1 }
 0x697   :  { %v9005_v44 = vmax.f32 %v8894_v54, %v8958_v55  ;;  %8835 = vst.msk [vmem:[#allocation4 + $0x128] sm:$0xff] %vm8797_vm4, %v8770_v14  ;;  %v10972_v57 = vadd.f32 %v8503_v36, %v13840_v20  ;;  %v10906_v46 = vpop.f32.mrb[10].mxu1  ;;  %v8711_v56 = vadd.f32 %v10971_v60, %v13507_v31  ;;  %v13847_v7 = vld [vmem:[#allocation21_spill] sm:$0xff]  ;;  %v13848_v14 = vld [vmem:[#allocation22_spill] sm:$0xff]  ;;  %v13849_v55 = vld [vmem:[#allocation23_spill] sm:$0xff] }
 0x698   :  { %v10973_v0 = vadd.f32 %v10906_v46, %v13841_v49  ;;  %v8506_v1 = vpop.f32.mrb[11].mxu1  ;;  %v13850_v20 = vld [vmem:[#allocation24_spill] sm:$0xff] }
 0x699   :  { %v9029_v45 = vmax.f32 %v9005_v44, %v9006_v17  ;;  %v8709_v52 = vadd.f32 %v10972_v57, %v13507_v31  ;;  %v10974_v59 = vadd.f32 %v8506_v1, %v13842_v16  ;;  %v8775_v12 = vmax.f32 %v8711_v56, 0.0 }
 0x69a   :  { %v8712_v22 = vadd.f32 %v10973_v0, %v13507_v31 }
 0x69b   :  { %9045 = vst.msk [vmem:[%s13770_s5 + $0x40] sm:$0xff] %vm8797_vm4, %v9029_v45  ;;  %v8773_v48 = vmax.f32 %v8709_v52, 0.0  ;;  %v8710_v3 = vadd.f32 %v10974_v59, %v13507_v31  ;;  %8840 = vst.msk [vmem:[#allocation4 + $0x150] sm:$0xff] %vm8797_vm4, %v8775_v12 }
 0x69c   :  { %v8776_v8 = vmax.f32 %v8712_v22, 0.0  ;;  %v10909_v19 = vpop.f32.mrb[12].mxu1 }
 0x69d   :  { %v8900_v5 = vld [vmem:[#allocation4 + $0x130] ss:$2 sm:$0xff]  ;;  %v8964_v11 = vld [vmem:[#allocation4 + $0x131] ss:$2 sm:$0xff]  ;;  %8838 = vst.msk [vmem:[#allocation4 + $0x140] sm:$0xff] %vm8797_vm4, %v8773_v48  ;;  %v8774_v15 = vmax.f32 %v8710_v3, 0.0  ;;  %v10975_v39 = vadd.f32 %v10909_v19, %v13843_v4 }
 0x69e   :  { %v9008_v23 = vmax.f32 %v8900_v5, %v8964_v11  ;;  %v8898_v29 = vld [vmem:[#allocation4 + $0x120] ss:$2 sm:$0xff]  ;;  %v8962_v33 = vld [vmem:[#allocation4 + $0x121] ss:$2 sm:$0xff]  ;;  %8841 = vst.msk [vmem:[#allocation4 + $0x158] sm:$0xff] %vm8797_vm4, %v8776_v8  ;;  %v8519_v63 = vpop.f32.mrb[13].mxu1 }
 0x69f   :  { %v9007_v42 = vmax.f32 %v8898_v29, %v8962_v33  ;;  %8839 = vst.msk [vmem:[#allocation4 + $0x148] sm:$0xff] %vm8797_vm4, %v8774_v15  ;;  %v10976_v50 = vadd.f32 %v8519_v63, %v13844_v43  ;;  %v10910_v21 = vpop.f32.mrb[14].mxu1  ;;  %v8715_v34 = vadd.f32 %v10975_v39, %v13507_v31  ;;  %v13851_v3 = vld [vmem:[#allocation25_spill] sm:$0xff]  ;;  %v13852_v15 = vld [vmem:[#allocation26_spill] sm:$0xff]  ;;  %v13853_v33 = vld [vmem:[#allocation27_spill] sm:$0xff] }
 0x6a0   :  { %v10977_v40 = vadd.f32 %v10910_v21, %v13845_v51  ;;  %v8522_v38 = vpop.f32.mrb[15].mxu1  ;;  %v13854_v43 = vld [vmem:[#allocation28_spill] sm:$0xff] }
 0x6a1   :  { %v9030_v47 = vmax.f32 %v9007_v42, %v9008_v23  ;;  %v8713_v35 = vadd.f32 %v10976_v50, %v13507_v31  ;;  %v10978_v30 = vadd.f32 %v8522_v38, %v13846_v28  ;;  %v8779_v9 = vmax.f32 %v8715_v34, 0.0 }
 0x6a2   :  { %v8716_v13 = vadd.f32 %v10977_v40, %v13507_v31 }
 0x6a3   :  { %9046 = vst.msk [vmem:[%s13770_s5 + $0x48] sm:$0xff] %vm8797_vm4, %v9030_v47  ;;  %v8777_v41 = vmax.f32 %v8713_v35, 0.0  ;;  %v8714_v62 = vadd.f32 %v10978_v30, %v13507_v31  ;;  %8844 = vst.msk [vmem:[#allocation4 + $0x170] sm:$0xff] %vm8797_vm4, %v8779_v9 }
 0x6a4   :  { %v8780_v24 = vmax.f32 %v8716_v13, 0.0  ;;  %v10913_v18 = vpop.f32.mrb[16].mxu1 }
 0x6a5   :  { %v8904_v32 = vld [vmem:[#allocation4 + $0x150] ss:$2 sm:$0xff]  ;;  %v8968_v53 = vld [vmem:[#allocation4 + $0x151] ss:$2 sm:$0xff]  ;;  %8842 = vst.msk [vmem:[#allocation4 + $0x160] sm:$0xff] %vm8797_vm4, %v8777_v41  ;;  %v8778_v58 = vmax.f32 %v8714_v62, 0.0  ;;  %v10979_v10 = vadd.f32 %v10913_v18, %v13847_v7 }
 0x6a6   :  { %v9010_v61 = vmax.f32 %v8904_v32, %v8968_v53  ;;  %v8902_v6 = vld [vmem:[#allocation4 + $0x140] ss:$2 sm:$0xff]  ;;  %v8966_v2 = vld [vmem:[#allocation4 + $0x141] ss:$2 sm:$0xff]  ;;  %8845 = vst.msk [vmem:[#allocation4 + $0x178] sm:$0xff] %vm8797_vm4, %v8780_v24  ;;  %v8535_v26 = vpop.f32.mrb[17].mxu1 }
 0x6a7   :  { %v9009_v25 = vmax.f32 %v8902_v6, %v8966_v2  ;;  %8843 = vst.msk [vmem:[#allocation4 + $0x168] sm:$0xff] %vm8797_vm4, %v8778_v58  ;;  %v10980_v37 = vadd.f32 %v8535_v26, %v13848_v14  ;;  %v10914_v17 = vpop.f32.mrb[18].mxu1  ;;  %v8719_v54 = vadd.f32 %v10979_v10, %v13507_v31  ;;  %v13855_v62 = vld [vmem:[#allocation29_spill] sm:$0xff]  ;;  %v13856_v58 = vld [vmem:[#allocation30_spill] sm:$0xff]  ;;  %v13857_v2 = vld [vmem:[#allocation31_spill] sm:$0xff] }
 0x6a8   :  { %v10981_v27 = vadd.f32 %v10914_v17, %v13849_v55  ;;  %v8538_v60 = vpop.f32.mrb[19].mxu1  ;;  %v13858_v14 = vld [vmem:[#allocation32_spill] sm:$0xff] }
 0x6a9   :  { %v9031_v36 = vmax.f32 %v9009_v25, %v9010_v61  ;;  %v8717_v44 = vadd.f32 %v10980_v37, %v13507_v31  ;;  %v10982_v57 = vadd.f32 %v8538_v60, %v13850_v20  ;;  %v8783_v46 = vmax.f32 %v8719_v54, 0.0 }
 0x6aa   :  { %v8720_v56 = vadd.f32 %v10981_v27, %v13507_v31 }
 0x6ab   :  { %9047 = vst.msk [vmem:[%s13770_s5 + $0x50] sm:$0xff] %vm8797_vm4, %v9031_v36  ;;  %v8781_v49 = vmax.f32 %v8717_v44, 0.0  ;;  %v8718_v0 = vadd.f32 %v10982_v57, %v13507_v31  ;;  %8848 = vst.msk [vmem:[#allocation4 + $0x190] sm:$0xff] %vm8797_vm4, %v8783_v46 }
 0x6ac   :  { %v8784_v1 = vmax.f32 %v8720_v56, 0.0  ;;  %v10917_v59 = vpop.f32.mrb[20].mxu1 }
 0x6ad   :  { %v8908_v45 = vld [vmem:[#allocation4 + $0x170] ss:$2 sm:$0xff]  ;;  %v8972_v52 = vld [vmem:[#allocation4 + $0x171] ss:$2 sm:$0xff]  ;;  %8846 = vst.msk [vmem:[#allocation4 + $0x180] sm:$0xff] %vm8797_vm4, %v8781_v49  ;;  %v8782_v16 = vmax.f32 %v8718_v0, 0.0  ;;  %v10983_v8 = vadd.f32 %v10917_v59, %v13851_v3 }
 0x6ae   :  { %v9012_v12 = vmax.f32 %v8908_v45, %v8972_v52  ;;  %v8906_v22 = vld [vmem:[#allocation4 + $0x160] ss:$2 sm:$0xff]  ;;  %v8970_v48 = vld [vmem:[#allocation4 + $0x161] ss:$2 sm:$0xff]  ;;  %8849 = vst.msk [vmem:[#allocation4 + $0x198] sm:$0xff] %vm8797_vm4, %v8784_v1  ;;  %v8551_v5 = vpop.f32.mrb[21].mxu1 }
 0x6af   :  { %v9011_v11 = vmax.f32 %v8906_v22, %v8970_v48  ;;  %8847 = vst.msk [vmem:[#allocation4 + $0x188] sm:$0xff] %vm8797_vm4, %v8782_v16  ;;  %v10984_v19 = vadd.f32 %v8551_v5, %v13852_v15  ;;  %v10918_v23 = vpop.f32.mrb[22].mxu1  ;;  %v8723_v29 = vadd.f32 %v10983_v8, %v13507_v31  ;;  %v13859_v0 = vld [vmem:[#allocation33_spill] sm:$0xff]  ;;  %v13860_v16 = vld [vmem:[#allocation34_spill] sm:$0xff]  ;;  %v13861_v48 = vld [vmem:[#allocation35_spill] sm:$0xff] }
 0x6b0   :  { %v10985_v4 = vadd.f32 %v10918_v23, %v13853_v33  ;;  %v8554_v39 = vpop.f32.mrb[23].mxu1  ;;  %v13862_v15 = vld [vmem:[#allocation36_spill] sm:$0xff] }
 0x6b1   :  { %v9032_v63 = vmax.f32 %v9011_v11, %v9012_v12  ;;  %v8721_v42 = vadd.f32 %v10984_v19, %v13507_v31  ;;  %v10986_v50 = vadd.f32 %v8554_v39, %v13854_v43  ;;  %v8787_v21 = vmax.f32 %v8723_v29, 0.0 }
 0x6b2   :  { %v8724_v34 = vadd.f32 %v10985_v4, %v13507_v31 }
 0x6b3   :  { %9048 = vst.msk [vmem:[%s13770_s5 + $0x58] sm:$0xff] %vm8797_vm4, %v9032_v63  ;;  %v8785_v51 = vmax.f32 %v8721_v42, 0.0  ;;  %v8722_v40 = vadd.f32 %v10986_v50, %v13507_v31  ;;  %8852 = vst.msk [vmem:[#allocation4 + $0x1b0] sm:$0xff] %vm8797_vm4, %v8787_v21 }
 0x6b4   :  { %v8788_v38 = vmax.f32 %v8724_v34, 0.0  ;;  %v10921_v30 = vpop.f32.mrb[24].mxu1 }
 0x6b5   :  { %v8912_v47 = vld [vmem:[#allocation4 + $0x190] ss:$2 sm:$0xff]  ;;  %v8976_v35 = vld [vmem:[#allocation4 + $0x191] ss:$2 sm:$0xff]  ;;  %8850 = vst.msk [vmem:[#allocation4 + $0x1a0] sm:$0xff] %vm8797_vm4, %v8785_v51  ;;  %v8786_v28 = vmax.f32 %v8722_v40, 0.0  ;;  %v10987_v24 = vadd.f32 %v10921_v30, %v13855_v62 }
 0x6b6   :  { %v9014_v9 = vmax.f32 %v8912_v47, %v8976_v35  ;;  %v8910_v13 = vld [vmem:[#allocation4 + $0x180] ss:$2 sm:$0xff]  ;;  %v8974_v41 = vld [vmem:[#allocation4 + $0x181] ss:$2 sm:$0xff]  ;;  %8853 = vst.msk [vmem:[#allocation4 + $0x1b8] sm:$0xff] %vm8797_vm4, %v8788_v38  ;;  %v8567_v32 = vpop.f32.mrb[25].mxu1 }
 0x6b7   :  { %v9013_v53 = vmax.f32 %v8910_v13, %v8974_v41  ;;  %8851 = vst.msk [vmem:[#allocation4 + $0x1a8] sm:$0xff] %vm8797_vm4, %v8786_v28  ;;  %v10988_v18 = vadd.f32 %v8567_v32, %v13856_v58  ;;  %v10922_v61 = vpop.f32.mrb[26].mxu1  ;;  %v8727_v6 = vadd.f32 %v10987_v24, %v13507_v31 }
 0x6b8   :  { %v10989_v7 = vadd.f32 %v10922_v61, %v13857_v2  ;;  %v8570_v10 = vpop.f32.mrb[27].mxu1 }
 0x6b9   :  { %v9033_v26 = vmax.f32 %v9013_v53, %v9014_v9  ;;  %v8725_v25 = vadd.f32 %v10988_v18, %v13507_v31  ;;  %v10990_v37 = vadd.f32 %v8570_v10, %v13858_v14  ;;  %v8791_v17 = vmax.f32 %v8727_v6, 0.0 }
 0x6ba   :  { %v8728_v54 = vadd.f32 %v10989_v7, %v13507_v31 }
 0x6bb   :  { %9049 = vst.msk [vmem:[%s13770_s5 + $0x60] sm:$0xff] %vm8797_vm4, %v9033_v26  ;;  %v8789_v55 = vmax.f32 %v8725_v25, 0.0  ;;  %v8726_v27 = vadd.f32 %v10990_v37, %v13507_v31  ;;  %8856 = vst.msk [vmem:[#allocation4 + $0x1d0] sm:$0xff] %vm8797_vm4, %v8791_v17 }
 0x6bc   :  { %v8792_v60 = vmax.f32 %v8728_v54, 0.0  ;;  %v10925_v57 = vpop.f32.mrb[28].mxu1 }
 0x6bd   :  { %v8916_v36 = vld [vmem:[#allocation4 + $0x1b0] ss:$2 sm:$0xff]  ;;  %v8980_v44 = vld [vmem:[#allocation4 + $0x1b1] ss:$2 sm:$0xff]  ;;  %8854 = vst.msk [vmem:[#allocation4 + $0x1c0] sm:$0xff] %vm8797_vm4, %v8789_v55  ;;  %v8790_v20 = vmax.f32 %v8726_v27, 0.0  ;;  %v10991_v1 = vadd.f32 %v10925_v57, %v13859_v0 }
 0x6be   :  { %v9016_v46 = vmax.f32 %v8916_v36, %v8980_v44  ;;  %v8914_v56 = vld [vmem:[#allocation4 + $0x1a0] ss:$2 sm:$0xff]  ;;  %v8978_v49 = vld [vmem:[#allocation4 + $0x1a1] ss:$2 sm:$0xff]  ;;  %8857 = vst.msk [vmem:[#allocation4 + $0x1d8] sm:$0xff] %vm8797_vm4, %v8792_v60  ;;  %v8583_v45 = vpop.f32.mrb[29].mxu1 }
 0x6bf   :  { %v9015_v52 = vmax.f32 %v8914_v56, %v8978_v49  ;;  %8855 = vst.msk [vmem:[#allocation4 + $0x1c8] sm:$0xff] %vm8797_vm4, %v8790_v20  ;;  %v10992_v59 = vadd.f32 %v8583_v45, %v13860_v16  ;;  %v10926_v12 = vpop.f32.mrb[30].mxu1  ;;  %v8731_v22 = vadd.f32 %v10991_v1, %v13507_v31 }
 0x6c0   :  { %v10993_v3 = vadd.f32 %v10926_v12, %v13861_v48  ;;  %v8586_v8 = vpop.f32.mrb[31].mxu1 }
 0x6c1   :  { %v9034_v5 = vmax.f32 %v9015_v52, %v9016_v46  ;;  %v8729_v11 = vadd.f32 %v10992_v59, %v13507_v31  ;;  %v10994_v19 = vadd.f32 %v8586_v8, %v13862_v15  ;;  %v8795_v23 = vmax.f32 %v8731_v22, 0.0 }
 0x6c2   :  { %v8732_v29 = vadd.f32 %v10993_v3, %v13507_v31 }
 0x6c3   :  { %9050 = vst.msk [vmem:[%s13770_s5 + $0x68] sm:$0xff] %vm8797_vm4, %v9034_v5  ;;  %v8793_v33 = vmax.f32 %v8729_v11, 0.0  ;;  %v8730_v4 = vadd.f32 %v10994_v19, %v13507_v31  ;;  %8860 = vst.msk [vmem:[#allocation4 + $0x1f0] sm:$0xff] %vm8797_vm4, %v8795_v23 }
 0x6c4   :  { %v8796_v39 = vmax.f32 %v8732_v29, 0.0 }
 0x6c5   :  { %v8920_v63 = vld [vmem:[#allocation4 + $0x1d0] ss:$2 sm:$0xff]  ;;  %v8984_v42 = vld [vmem:[#allocation4 + $0x1d1] ss:$2 sm:$0xff]  ;;  %8858 = vst.msk [vmem:[#allocation4 + $0x1e0] sm:$0xff] %vm8797_vm4, %v8793_v33  ;;  %v8794_v43 = vmax.f32 %v8730_v4, 0.0 }
 0x6c6   :  { %v9018_v50 = vmax.f32 %v8920_v63, %v8984_v42  ;;  %v8918_v21 = vld [vmem:[#allocation4 + $0x1c0] ss:$2 sm:$0xff]  ;;  %v8982_v34 = vld [vmem:[#allocation4 + $0x1c1] ss:$2 sm:$0xff]  ;;  %8861 = vst.msk [vmem:[#allocation4 + $0x1f8] sm:$0xff] %vm8797_vm4, %v8796_v39 }
 0x6c7   :  { %v9017_v51 = vmax.f32 %v8918_v21, %v8982_v34  ;;  %8859 = vst.msk [vmem:[#allocation4 + $0x1e8] sm:$0xff] %vm8797_vm4, %v8794_v43 }
 0x6c9   :  { %v9035_v40 = vmax.f32 %v9017_v51, %v9018_v50 }
 0x6cb   :  { %9051 = vst.msk [vmem:[%s13770_s5 + $0x70] sm:$0xff] %vm8797_vm4, %v9035_v40 }
 0x6cd   :  { %v8924_v31 = vld [vmem:[#allocation4 + $0x1f0] ss:$2 sm:$0xff]  ;;  %v8988_v38 = vld [vmem:[#allocation4 + $0x1f1] ss:$2 sm:$0xff] }
 0x6ce   :  { %v9020_v47 = vmax.f32 %v8924_v31, %v8988_v38  ;;  %v8922_v35 = vld [vmem:[#allocation4 + $0x1e0] ss:$2 sm:$0xff]  ;;  %v8986_v28 = vld [vmem:[#allocation4 + $0x1e1] ss:$2 sm:$0xff] }
 0x6cf   :  { %v9019_v30 = vmax.f32 %v8922_v35, %v8986_v28 }
 0x6d1   :  { %v9036_v9 = vmax.f32 %v9019_v30, %v9020_v47 }
 0x6d3   :  { %9052 = vst.msk [vmem:[%s13770_s5 + $0x78] sm:$0xff] %vm8797_vm4, %v9036_v9 }

</bundles_post_ra>
